<compile_context>
chip_gen: v7x
topology: tpu7x:2x2x1
jax: 0.10.0
libtpu: 0.0.40
codegen_flags: <defaults>
</compile_context>

<pallas_src>
import jax
import jax.numpy as jnp
from jax.experimental import pallas as pl
from jax.experimental.pallas import tpu as pltpu

COUT_PAD = 128    # conv2 matmul N padded to a full lane width (lane-dense MXU / sigmoid)
COUT_STORE = 8    # channels written back: 3 real + 5 pad (one sublane granule, dense DMA)


def encoder_mask_kernel(xm_ref, w1_ref, b1_ref, w2_ref, b2_ref, o_ref):
    # xm_ref: (B, H+4, W+4, 3)   masked input, NHWC, zero-padded by 2
    # w1_ref: (3, 3, 3, 16)      b1_ref: (1, 16)
    # w2_ref: (3, 3, 16, 128)    b2_ref: (1, 128)   (Cout zero-padded 3->128)
    # o_ref : (B, COUT_STORE, H*W)   channels-major, pixels lane-dense
    B = xm_ref.shape[0]
    H = xm_ref.shape[1] - 4
    W = xm_ref.shape[2] - 4
    Hp, Wp = H + 2, W + 2          # conv2's zero-padded hidden grid
    M1 = B * Hp * Wp               # conv1 output rows (halo grid)
    M2 = B * H * W                 # conv2 / final output rows
    cs = o_ref.shape[1]            # = COUT_STORE

    # ---- conv1: 3x3, pad=1, 3->16, evaluated on the (H+2)x(W+2) halo grid as
    #      9 shifted (M1,3)x(3,16) MXU matmuls, f32 accumulation, bias in init ----
    acc1 = jnp.broadcast_to(b1_ref[...], (M1, 16))
    for kh in range(3):
        for kw in range(3):
            patch = xm_ref[:, kh:kh + Hp, kw:kw + Wp, :].reshape(M1, 3)
            acc1 = acc1 + jnp.dot(patch, w1_ref[kh, kw],
                                  preferred_element_type=jnp.float32)
    h1 = jnp.maximum(acc1, 0.0).reshape(B, Hp, Wp, 16)

    # Zero the 1-pixel halo so it equals conv2's zero padding (the halo rows of h1
    # hold relu(conv1) evaluated outside the image and must not leak in).
    row = jax.lax.broadcasted_iota(jnp.int32, (1, Hp, Wp, 1), 1)
    col = jax.lax.broadcasted_iota(jnp.int32, (1, Hp, Wp, 1), 2)
    interior = (row >= 1) & (row <= H) & (col >= 1) & (col <= W)
    h1 = jnp.where(interior, h1, 0.0)

    # ---- conv2: 3x3, pad=1, 16->3 (Cout padded to 128 lanes), 9 tap matmuls ----
    acc2 = jnp.broadcast_to(b2_ref[...], (M2, COUT_PAD))
    for kh in range(3):
        for kw in range(3):
            patch = h1[:, kh:kh + H, kw:kw + W, :].reshape(M2, 16)
            acc2 = acc2 + jnp.dot(patch, w2_ref[kh, kw],
                                  preferred_element_type=jnp.float32)
    y = jax.nn.sigmoid(acc2)                       # (M2, 128); lanes 3..127 are junk

    # Channels-major store: native (H*W,128)->(128,H*W) granule transpose on the XLU,
    # then keep only the first `cs` channel rows -> lane-dense, junk-free(-ish) output.
    y_t = jnp.swapaxes(y.reshape(B, H * W, COUT_PAD), 1, 2)   # (B, 128, H*W)
    o_ref[...] = y_t[:, :cs, :].astype(o_ref.dtype)


def _pick_batch_block(n, hw):
    """Images per grid step: aim for ~1024 matmul rows per step, keep >=2 evenly
    sized grid steps when n >= 2 (so the parallel axis can be split across a 2-TC
    chip), and always divide n exactly."""
    target = max(1, 1024 // max(hw, 1))
    divisors = [d for d in range(1, n + 1) if n % d == 0]
    cands = [d for d in divisors if n // d >= 2] or divisors
    return min(cands, key=lambda d: (abs(d - target), d))


@jax.jit
def encoder_mask_forward(x_nchw, mask_nchw, params):
    w1, b1, w2, b2 = params
    N, C, H, W = x_nchw.shape
    assert C == 3

    # mask-multiply + NCHW->NHWC + pad-by-2: one XLA fusion, one kernel input stream.
    xm = jnp.transpose((x_nchw * mask_nchw).astype(jnp.float32), (0, 2, 3, 1))
    xm = jnp.pad(xm, ((0, 0), (2, 2), (2, 2), (0, 0)))

    b1r = b1.reshape(1, 16).astype(jnp.float32)
    w2p = jnp.pad(w2.astype(jnp.float32),
                  ((0, 0), (0, 0), (0, 0), (0, COUT_PAD - 3)))
    b2p = jnp.pad(b2.astype(jnp.float32), (0, COUT_PAD - 3)).reshape(1, COUT_PAD)

    b_blk = _pick_batch_block(N, H * W)

    out_cm = pl.pallas_call(
        encoder_mask_kernel,
        out_shape=jax.ShapeDtypeStruct((N, COUT_STORE, H * W), jnp.float32),
        grid_spec=pltpu.PrefetchScalarGridSpec(
            num_scalar_prefetch=0,
            grid=(N // b_blk,),
            in_specs=[
                pl.BlockSpec((b_blk, H + 4, W + 4, 3), lambda n: (n, 0, 0, 0)),
                pl.BlockSpec((3, 3, 3, 16), lambda n: (0, 0, 0, 0)),
                pl.BlockSpec((1, 16), lambda n: (0, 0)),
                pl.BlockSpec((3, 3, 16, COUT_PAD), lambda n: (0, 0, 0, 0)),
                pl.BlockSpec((1, COUT_PAD), lambda n: (0, 0)),
            ],
            out_specs=pl.BlockSpec((b_blk, COUT_STORE, H * W),
                                   lambda n: (n, 0, 0)),
        ),
        compiler_params=pltpu.CompilerParams(
            dimension_semantics=("parallel",),
            vmem_limit_bytes=32 * 1024 * 1024),
    )(xm, w1.astype(jnp.float32), b1r, w2p, b2p)

    # Channels-major kernel output is already NCHW-ordered: slice pad channels, reshape.
    return out_cm[:, :3, :].reshape(N, 3, H, W)


def reference_forward(x_nchw, mask_nchw, params):
    """Plain-JAX reference (correctness check)."""
    w1, b1, w2, b2 = params
    x = jnp.transpose(x_nchw * mask_nchw, (0, 2, 3, 1)).astype(jnp.float32)
    dn = ('NHWC', 'HWIO', 'NHWC')
    h = jax.lax.conv_general_dilated(x, w1, (1, 1), 'SAME',
                                     dimension_numbers=dn) + b1
    h = jax.nn.relu(h)
    y = jax.lax.conv_general_dilated(h, w2, (1, 1), 'SAME',
                                     dimension_numbers=dn) + b2
    y = jax.nn.sigmoid(y)
    return jnp.transpose(y, (0, 3, 1, 2))


def init_params(key):
    k1, k2, k3, k4 = jax.random.split(key, 4)
    # deterministic synthetic init (shapes match nn.Conv2d(3,16,3) / Conv2d(16,3,3))
    w1 = 0.1 * jax.random.normal(k1, (3, 3, 3, 16), jnp.float32)   # HWIO
    b1 = 0.05 * jax.random.normal(k2, (16,), jnp.float32)
    w2 = 0.1 * jax.random.normal(k3, (3, 3, 16, 3), jnp.float32)   # HWIO
    b2 = 0.05 * jax.random.normal(k4, (3,), jnp.float32)
    return (w1, b1, w2, b2)


if __name__ == "__main__":
    key = jax.random.PRNGKey(0)
    kx, km, kp = jax.random.split(key, 3)

    N, C, H, W = 2, 3, 16, 16          # module requires 3 input channels
    x = jax.random.normal(kx, (N, C, H, W), jnp.float32)
    mask = (jax.random.uniform(km, (N, C, H, W)) > 0.5).astype(jnp.float32)
    params = init_params(kp)

    out = jax.block_until_ready(encoder_mask_forward(x, mask, params))
    ref = jax.block_until_ready(reference_forward(x, mask, params))

    assert out.shape == (N, C, H, W)
    assert jnp.allclose(out, ref, atol=1e-5, rtol=1e-5), (
        float(jnp.max(jnp.abs(out - ref))))

    print("KERNEL_OK")
</pallas_src>

<mosaic_0001>
module attributes {stable_mosaic.version = 11 : i64} {
  func.func @encoder_mask_kernel(%arg0: i32, %arg1: memref<1x20x20x3xf32, #tpu.memory_space<vmem>>, %arg2: memref<3x3x3x16xf32, #tpu.memory_space<vmem>>, %arg3: memref<1x16xf32, #tpu.memory_space<vmem>>, %arg4: memref<3x3x16x128xf32, #tpu.memory_space<vmem>>, %arg5: memref<1x128xf32, #tpu.memory_space<vmem>>, %arg6: memref<1x8x256xf32, #tpu.memory_space<vmem>>) attributes {dimension_semantics = [#tpu.dimension_semantics<parallel>], iteration_bounds = array<i64: 2>, scalar_prefetch = 0 : i64, scratch_operands = 0 : i64, tpu.core_type = #tpu.core_type<tc>, window_params = [{transform_indices = @transform_0, window_bounds = array<i64: 1, 20, 20, 3>}, {pipeline_mode = #tpu.pipeline_mode<synchronous>, transform_indices = @transform_1, window_bounds = array<i64: 3, 3, 3, 16>}, {pipeline_mode = #tpu.pipeline_mode<synchronous>, transform_indices = @transform_2, window_bounds = array<i64: 1, 16>}, {pipeline_mode = #tpu.pipeline_mode<synchronous>, transform_indices = @transform_3, window_bounds = array<i64: 3, 3, 16, 128>}, {pipeline_mode = #tpu.pipeline_mode<synchronous>, transform_indices = @transform_4, window_bounds = array<i64: 1, 128>}, {transform_indices = @transform_5, window_bounds = array<i64: 1, 8, 256>}]} {
    %c0 = arith.constant 0 : index
    %c0_0 = arith.constant 0 : index
    %0 = vector.load %arg3[%c0, %c0_0] : memref<1x16xf32, #tpu.memory_space<vmem>>, vector<1x16xf32>
    %1 = vector.shape_cast %0 : vector<1x16xf32> to vector<1x16xf32>
    %2 = vector.broadcast %1 : vector<1x16xf32> to vector<324x16xf32>
    %c0_1 = arith.constant 0 : index
    %c0_2 = arith.constant 0 : index
    %c0_3 = arith.constant 0 : index
    %c0_4 = arith.constant 0 : index
    %3 = vector.load %arg1[%c0_1, %c0_2, %c0_3, %c0_4] : memref<1x20x20x3xf32, #tpu.memory_space<vmem>>, vector<1x18x18x3xf32>
    %4 = vector.shape_cast %3 : vector<1x18x18x3xf32> to vector<324x3xf32>
    %c0_5 = arith.constant 0 : index
    %c0_6 = arith.constant 0 : index
    %c0_7 = arith.constant 0 : index
    %c0_8 = arith.constant 0 : index
    %5 = vector.load %arg2[%c0_5, %c0_6, %c0_7, %c0_8] : memref<3x3x3x16xf32, #tpu.memory_space<vmem>>, vector<1x1x3x16xf32>
    %6 = vector.shape_cast %5 : vector<1x1x3x16xf32> to vector<3x16xf32>
    %cst = arith.constant dense<0.000000e+00> : vector<324x16xf32>
    %7 = tpu.matmul %4, %6, %cst {dimension_numbers = #tpu.dot_dimension_numbers<[1], [0], [0], [1], [0, 0, 1, 1], [], []>} : vector<324x3xf32>, vector<3x16xf32>, vector<324x16xf32> -> vector<324x16xf32>
    %8 = arith.addf %2, %7 : vector<324x16xf32>
    %c0_9 = arith.constant 0 : index
    %c0_10 = arith.constant 0 : index
    %c1 = arith.constant 1 : index
    %c0_11 = arith.constant 0 : index
    %9 = vector.load %arg1[%c0_9, %c0_10, %c1, %c0_11] : memref<1x20x20x3xf32, #tpu.memory_space<vmem>>, vector<1x18x18x3xf32>
    %10 = vector.shape_cast %9 : vector<1x18x18x3xf32> to vector<324x3xf32>
    %c0_12 = arith.constant 0 : index
    %c1_13 = arith.constant 1 : index
    %c0_14 = arith.constant 0 : index
    %c0_15 = arith.constant 0 : index
    %11 = vector.load %arg2[%c0_12, %c1_13, %c0_14, %c0_15] : memref<3x3x3x16xf32, #tpu.memory_space<vmem>>, vector<1x1x3x16xf32>
    %12 = vector.shape_cast %11 : vector<1x1x3x16xf32> to vector<3x16xf32>
    %cst_16 = arith.constant dense<0.000000e+00> : vector<324x16xf32>
    %13 = tpu.matmul %10, %12, %cst_16 {dimension_numbers = #tpu.dot_dimension_numbers<[1], [0], [0], [1], [0, 0, 1, 1], [], []>} : vector<324x3xf32>, vector<3x16xf32>, vector<324x16xf32> -> vector<324x16xf32>
    %14 = arith.addf %8, %13 : vector<324x16xf32>
    %c0_17 = arith.constant 0 : index
    %c0_18 = arith.constant 0 : index
    %c2 = arith.constant 2 : index
    %c0_19 = arith.constant 0 : index
    %15 = vector.load %arg1[%c0_17, %c0_18, %c2, %c0_19] : memref<1x20x20x3xf32, #tpu.memory_space<vmem>>, vector<1x18x18x3xf32>
    %16 = vector.shape_cast %15 : vector<1x18x18x3xf32> to vector<324x3xf32>
    %c0_20 = arith.constant 0 : index
    %c2_21 = arith.constant 2 : index
    %c0_22 = arith.constant 0 : index
    %c0_23 = arith.constant 0 : index
    %17 = vector.load %arg2[%c0_20, %c2_21, %c0_22, %c0_23] : memref<3x3x3x16xf32, #tpu.memory_space<vmem>>, vector<1x1x3x16xf32>
    %18 = vector.shape_cast %17 : vector<1x1x3x16xf32> to vector<3x16xf32>
    %cst_24 = arith.constant dense<0.000000e+00> : vector<324x16xf32>
    %19 = tpu.matmul %16, %18, %cst_24 {dimension_numbers = #tpu.dot_dimension_numbers<[1], [0], [0], [1], [0, 0, 1, 1], [], []>} : vector<324x3xf32>, vector<3x16xf32>, vector<324x16xf32> -> vector<324x16xf32>
    %20 = arith.addf %14, %19 : vector<324x16xf32>
    %c0_25 = arith.constant 0 : index
    %c1_26 = arith.constant 1 : index
    %c0_27 = arith.constant 0 : index
    %c0_28 = arith.constant 0 : index
    %21 = vector.load %arg1[%c0_25, %c1_26, %c0_27, %c0_28] : memref<1x20x20x3xf32, #tpu.memory_space<vmem>>, vector<1x18x18x3xf32>
    %22 = vector.shape_cast %21 : vector<1x18x18x3xf32> to vector<324x3xf32>
    %c1_29 = arith.constant 1 : index
    %c0_30 = arith.constant 0 : index
    %c0_31 = arith.constant 0 : index
    %c0_32 = arith.constant 0 : index
    %23 = vector.load %arg2[%c1_29, %c0_30, %c0_31, %c0_32] : memref<3x3x3x16xf32, #tpu.memory_space<vmem>>, vector<1x1x3x16xf32>
    %24 = vector.shape_cast %23 : vector<1x1x3x16xf32> to vector<3x16xf32>
    %cst_33 = arith.constant dense<0.000000e+00> : vector<324x16xf32>
    %25 = tpu.matmul %22, %24, %cst_33 {dimension_numbers = #tpu.dot_dimension_numbers<[1], [0], [0], [1], [0, 0, 1, 1], [], []>} : vector<324x3xf32>, vector<3x16xf32>, vector<324x16xf32> -> vector<324x16xf32>
    %26 = arith.addf %20, %25 : vector<324x16xf32>
    %c0_34 = arith.constant 0 : index
    %c1_35 = arith.constant 1 : index
    %c1_36 = arith.constant 1 : index
    %c0_37 = arith.constant 0 : index
    %27 = vector.load %arg1[%c0_34, %c1_35, %c1_36, %c0_37] : memref<1x20x20x3xf32, #tpu.memory_space<vmem>>, vector<1x18x18x3xf32>
    %28 = vector.shape_cast %27 : vector<1x18x18x3xf32> to vector<324x3xf32>
    %c1_38 = arith.constant 1 : index
    %c1_39 = arith.constant 1 : index
    %c0_40 = arith.constant 0 : index
    %c0_41 = arith.constant 0 : index
    %29 = vector.load %arg2[%c1_38, %c1_39, %c0_40, %c0_41] : memref<3x3x3x16xf32, #tpu.memory_space<vmem>>, vector<1x1x3x16xf32>
    %30 = vector.shape_cast %29 : vector<1x1x3x16xf32> to vector<3x16xf32>
    %cst_42 = arith.constant dense<0.000000e+00> : vector<324x16xf32>
    %31 = tpu.matmul %28, %30, %cst_42 {dimension_numbers = #tpu.dot_dimension_numbers<[1], [0], [0], [1], [0, 0, 1, 1], [], []>} : vector<324x3xf32>, vector<3x16xf32>, vector<324x16xf32> -> vector<324x16xf32>
    %32 = arith.addf %26, %31 : vector<324x16xf32>
    %c0_43 = arith.constant 0 : index
    %c1_44 = arith.constant 1 : index
    %c2_45 = arith.constant 2 : index
    %c0_46 = arith.constant 0 : index
    %33 = vector.load %arg1[%c0_43, %c1_44, %c2_45, %c0_46] : memref<1x20x20x3xf32, #tpu.memory_space<vmem>>, vector<1x18x18x3xf32>
    %34 = vector.shape_cast %33 : vector<1x18x18x3xf32> to vector<324x3xf32>
    %c1_47 = arith.constant 1 : index
    %c2_48 = arith.constant 2 : index
    %c0_49 = arith.constant 0 : index
    %c0_50 = arith.constant 0 : index
    %35 = vector.load %arg2[%c1_47, %c2_48, %c0_49, %c0_50] : memref<3x3x3x16xf32, #tpu.memory_space<vmem>>, vector<1x1x3x16xf32>
    %36 = vector.shape_cast %35 : vector<1x1x3x16xf32> to vector<3x16xf32>
    %cst_51 = arith.constant dense<0.000000e+00> : vector<324x16xf32>
    %37 = tpu.matmul %34, %36, %cst_51 {dimension_numbers = #tpu.dot_dimension_numbers<[1], [0], [0], [1], [0, 0, 1, 1], [], []>} : vector<324x3xf32>, vector<3x16xf32>, vector<324x16xf32> -> vector<324x16xf32>
    %38 = arith.addf %32, %37 : vector<324x16xf32>
    %c0_52 = arith.constant 0 : index
    %c2_53 = arith.constant 2 : index
    %c0_54 = arith.constant 0 : index
    %c0_55 = arith.constant 0 : index
    %39 = vector.load %arg1[%c0_52, %c2_53, %c0_54, %c0_55] : memref<1x20x20x3xf32, #tpu.memory_space<vmem>>, vector<1x18x18x3xf32>
    %40 = vector.shape_cast %39 : vector<1x18x18x3xf32> to vector<324x3xf32>
    %c2_56 = arith.constant 2 : index
    %c0_57 = arith.constant 0 : index
    %c0_58 = arith.constant 0 : index
    %c0_59 = arith.constant 0 : index
    %41 = vector.load %arg2[%c2_56, %c0_57, %c0_58, %c0_59] : memref<3x3x3x16xf32, #tpu.memory_space<vmem>>, vector<1x1x3x16xf32>
    %42 = vector.shape_cast %41 : vector<1x1x3x16xf32> to vector<3x16xf32>
    %cst_60 = arith.constant dense<0.000000e+00> : vector<324x16xf32>
    %43 = tpu.matmul %40, %42, %cst_60 {dimension_numbers = #tpu.dot_dimension_numbers<[1], [0], [0], [1], [0, 0, 1, 1], [], []>} : vector<324x3xf32>, vector<3x16xf32>, vector<324x16xf32> -> vector<324x16xf32>
    %44 = arith.addf %38, %43 : vector<324x16xf32>
    %c0_61 = arith.constant 0 : index
    %c2_62 = arith.constant 2 : index
    %c1_63 = arith.constant 1 : index
    %c0_64 = arith.constant 0 : index
    %45 = vector.load %arg1[%c0_61, %c2_62, %c1_63, %c0_64] : memref<1x20x20x3xf32, #tpu.memory_space<vmem>>, vector<1x18x18x3xf32>
    %46 = vector.shape_cast %45 : vector<1x18x18x3xf32> to vector<324x3xf32>
    %c2_65 = arith.constant 2 : index
    %c1_66 = arith.constant 1 : index
    %c0_67 = arith.constant 0 : index
    %c0_68 = arith.constant 0 : index
    %47 = vector.load %arg2[%c2_65, %c1_66, %c0_67, %c0_68] : memref<3x3x3x16xf32, #tpu.memory_space<vmem>>, vector<1x1x3x16xf32>
    %48 = vector.shape_cast %47 : vector<1x1x3x16xf32> to vector<3x16xf32>
    %cst_69 = arith.constant dense<0.000000e+00> : vector<324x16xf32>
    %49 = tpu.matmul %46, %48, %cst_69 {dimension_numbers = #tpu.dot_dimension_numbers<[1], [0], [0], [1], [0, 0, 1, 1], [], []>} : vector<324x3xf32>, vector<3x16xf32>, vector<324x16xf32> -> vector<324x16xf32>
    %50 = arith.addf %44, %49 : vector<324x16xf32>
    %c0_70 = arith.constant 0 : index
    %c2_71 = arith.constant 2 : index
    %c2_72 = arith.constant 2 : index
    %c0_73 = arith.constant 0 : index
    %51 = vector.load %arg1[%c0_70, %c2_71, %c2_72, %c0_73] : memref<1x20x20x3xf32, #tpu.memory_space<vmem>>, vector<1x18x18x3xf32>
    %52 = vector.shape_cast %51 : vector<1x18x18x3xf32> to vector<324x3xf32>
    %c2_74 = arith.constant 2 : index
    %c2_75 = arith.constant 2 : index
    %c0_76 = arith.constant 0 : index
    %c0_77 = arith.constant 0 : index
    %53 = vector.load %arg2[%c2_74, %c2_75, %c0_76, %c0_77] : memref<3x3x3x16xf32, #tpu.memory_space<vmem>>, vector<1x1x3x16xf32>
    %54 = vector.shape_cast %53 : vector<1x1x3x16xf32> to vector<3x16xf32>
    %cst_78 = arith.constant dense<0.000000e+00> : vector<324x16xf32>
    %55 = tpu.matmul %52, %54, %cst_78 {dimension_numbers = #tpu.dot_dimension_numbers<[1], [0], [0], [1], [0, 0, 1, 1], [], []>} : vector<324x3xf32>, vector<3x16xf32>, vector<324x16xf32> -> vector<324x16xf32>
    %56 = arith.addf %50, %55 : vector<324x16xf32>
    %cst_79 = arith.constant 0.000000e+00 : f32
    %57 = vector.broadcast %cst_79 : f32 to vector<324x16xf32>
    %58 = arith.maximumf %56, %57 : vector<324x16xf32>
    %59 = vector.shape_cast %58 : vector<324x16xf32> to vector<1x18x18x16xf32>
    %60 = tpu.iota {dimensions = array<i32: 1>} : vector<1x18x18x1xi32>
    %61 = tpu.iota {dimensions = array<i32: 2>} : vector<1x18x18x1xi32>
    %c1_i32 = arith.constant 1 : i32
    %62 = vector.broadcast %c1_i32 : i32 to vector<1x18x18x1xi32>
    %63 = arith.cmpi sge, %60, %62 : vector<1x18x18x1xi32>
    %c16_i32 = arith.constant 16 : i32
    %64 = vector.broadcast %c16_i32 : i32 to vector<1x18x18x1xi32>
    %65 = arith.cmpi sle, %60, %64 : vector<1x18x18x1xi32>
    %66 = arith.andi %63, %65 : vector<1x18x18x1xi1>
    %c1_i32_80 = arith.constant 1 : i32
    %67 = vector.broadcast %c1_i32_80 : i32 to vector<1x18x18x1xi32>
    %68 = arith.cmpi sge, %61, %67 : vector<1x18x18x1xi32>
    %69 = arith.andi %66, %68 : vector<1x18x18x1xi1>
    %c16_i32_81 = arith.constant 16 : i32
    %70 = vector.broadcast %c16_i32_81 : i32 to vector<1x18x18x1xi32>
    %71 = arith.cmpi sle, %61, %70 : vector<1x18x18x1xi32>
    %72 = arith.andi %69, %71 : vector<1x18x18x1xi1>
    %cst_82 = arith.constant 0.000000e+00 : f32
    %73 = vector.shape_cast %72 : vector<1x18x18x1xi1> to vector<1x18x18x1xi1>
    %74 = vector.broadcast %73 : vector<1x18x18x1xi1> to vector<1x18x18x16xi1>
    %75 = vector.broadcast %cst_82 : f32 to vector<1x18x18x16xf32>
    %76 = arith.select %74, %59, %75 : vector<1x18x18x16xi1>, vector<1x18x18x16xf32>
    %c0_83 = arith.constant 0 : index
    %c0_84 = arith.constant 0 : index
    %77 = vector.load %arg5[%c0_83, %c0_84] : memref<1x128xf32, #tpu.memory_space<vmem>>, vector<1x128xf32>
    %78 = vector.shape_cast %77 : vector<1x128xf32> to vector<1x128xf32>
    %79 = vector.broadcast %78 : vector<1x128xf32> to vector<256x128xf32>
    %80 = vector.extract_strided_slice %76 {offsets = [0, 0, 0, 0], sizes = [1, 16, 16, 16], strides = [1, 1, 1, 1]} : vector<1x18x18x16xf32> to vector<1x16x16x16xf32>
    %81 = vector.shape_cast %80 : vector<1x16x16x16xf32> to vector<256x16xf32>
    %c0_85 = arith.constant 0 : index
    %c0_86 = arith.constant 0 : index
    %c0_87 = arith.constant 0 : index
    %c0_88 = arith.constant 0 : index
    %82 = vector.load %arg4[%c0_85, %c0_86, %c0_87, %c0_88] : memref<3x3x16x128xf32, #tpu.memory_space<vmem>>, vector<1x1x16x128xf32>
    %83 = vector.shape_cast %82 : vector<1x1x16x128xf32> to vector<16x128xf32>
    %cst_89 = arith.constant dense<0.000000e+00> : vector<256x128xf32>
    %84 = tpu.matmul %81, %83, %cst_89 {dimension_numbers = #tpu.dot_dimension_numbers<[1], [0], [0], [1], [0, 0, 1, 1], [], []>} : vector<256x16xf32>, vector<16x128xf32>, vector<256x128xf32> -> vector<256x128xf32>
    %85 = arith.addf %79, %84 : vector<256x128xf32>
    %86 = vector.extract_strided_slice %76 {offsets = [0, 0, 1, 0], sizes = [1, 16, 16, 16], strides = [1, 1, 1, 1]} : vector<1x18x18x16xf32> to vector<1x16x16x16xf32>
    %87 = vector.shape_cast %86 : vector<1x16x16x16xf32> to vector<256x16xf32>
    %c0_90 = arith.constant 0 : index
    %c1_91 = arith.constant 1 : index
    %c0_92 = arith.constant 0 : index
    %c0_93 = arith.constant 0 : index
    %88 = vector.load %arg4[%c0_90, %c1_91, %c0_92, %c0_93] : memref<3x3x16x128xf32, #tpu.memory_space<vmem>>, vector<1x1x16x128xf32>
    %89 = vector.shape_cast %88 : vector<1x1x16x128xf32> to vector<16x128xf32>
    %cst_94 = arith.constant dense<0.000000e+00> : vector<256x128xf32>
    %90 = tpu.matmul %87, %89, %cst_94 {dimension_numbers = #tpu.dot_dimension_numbers<[1], [0], [0], [1], [0, 0, 1, 1], [], []>} : vector<256x16xf32>, vector<16x128xf32>, vector<256x128xf32> -> vector<256x128xf32>
    %91 = arith.addf %85, %90 : vector<256x128xf32>
    %92 = vector.extract_strided_slice %76 {offsets = [0, 0, 2, 0], sizes = [1, 16, 16, 16], strides = [1, 1, 1, 1]} : vector<1x18x18x16xf32> to vector<1x16x16x16xf32>
    %93 = vector.shape_cast %92 : vector<1x16x16x16xf32> to vector<256x16xf32>
    %c0_95 = arith.constant 0 : index
    %c2_96 = arith.constant 2 : index
    %c0_97 = arith.constant 0 : index
    %c0_98 = arith.constant 0 : index
    %94 = vector.load %arg4[%c0_95, %c2_96, %c0_97, %c0_98] : memref<3x3x16x128xf32, #tpu.memory_space<vmem>>, vector<1x1x16x128xf32>
    %95 = vector.shape_cast %94 : vector<1x1x16x128xf32> to vector<16x128xf32>
    %cst_99 = arith.constant dense<0.000000e+00> : vector<256x128xf32>
    %96 = tpu.matmul %93, %95, %cst_99 {dimension_numbers = #tpu.dot_dimension_numbers<[1], [0], [0], [1], [0, 0, 1, 1], [], []>} : vector<256x16xf32>, vector<16x128xf32>, vector<256x128xf32> -> vector<256x128xf32>
    %97 = arith.addf %91, %96 : vector<256x128xf32>
    %98 = vector.extract_strided_slice %76 {offsets = [0, 1, 0, 0], sizes = [1, 16, 16, 16], strides = [1, 1, 1, 1]} : vector<1x18x18x16xf32> to vector<1x16x16x16xf32>
    %99 = vector.shape_cast %98 : vector<1x16x16x16xf32> to vector<256x16xf32>
    %c1_100 = arith.constant 1 : index
    %c0_101 = arith.constant 0 : index
    %c0_102 = arith.constant 0 : index
    %c0_103 = arith.constant 0 : index
    %100 = vector.load %arg4[%c1_100, %c0_101, %c0_102, %c0_103] : memref<3x3x16x128xf32, #tpu.memory_space<vmem>>, vector<1x1x16x128xf32>
    %101 = vector.shape_cast %100 : vector<1x1x16x128xf32> to vector<16x128xf32>
    %cst_104 = arith.constant dense<0.000000e+00> : vector<256x128xf32>
    %102 = tpu.matmul %99, %101, %cst_104 {dimension_numbers = #tpu.dot_dimension_numbers<[1], [0], [0], [1], [0, 0, 1, 1], [], []>} : vector<256x16xf32>, vector<16x128xf32>, vector<256x128xf32> -> vector<256x128xf32>
    %103 = arith.addf %97, %102 : vector<256x128xf32>
    %104 = vector.extract_strided_slice %76 {offsets = [0, 1, 1, 0], sizes = [1, 16, 16, 16], strides = [1, 1, 1, 1]} : vector<1x18x18x16xf32> to vector<1x16x16x16xf32>
    %105 = vector.shape_cast %104 : vector<1x16x16x16xf32> to vector<256x16xf32>
    %c1_105 = arith.constant 1 : index
    %c1_106 = arith.constant 1 : index
    %c0_107 = arith.constant 0 : index
    %c0_108 = arith.constant 0 : index
    %106 = vector.load %arg4[%c1_105, %c1_106, %c0_107, %c0_108] : memref<3x3x16x128xf32, #tpu.memory_space<vmem>>, vector<1x1x16x128xf32>
    %107 = vector.shape_cast %106 : vector<1x1x16x128xf32> to vector<16x128xf32>
    %cst_109 = arith.constant dense<0.000000e+00> : vector<256x128xf32>
    %108 = tpu.matmul %105, %107, %cst_109 {dimension_numbers = #tpu.dot_dimension_numbers<[1], [0], [0], [1], [0, 0, 1, 1], [], []>} : vector<256x16xf32>, vector<16x128xf32>, vector<256x128xf32> -> vector<256x128xf32>
    %109 = arith.addf %103, %108 : vector<256x128xf32>
    %110 = vector.extract_strided_slice %76 {offsets = [0, 1, 2, 0], sizes = [1, 16, 16, 16], strides = [1, 1, 1, 1]} : vector<1x18x18x16xf32> to vector<1x16x16x16xf32>
    %111 = vector.shape_cast %110 : vector<1x16x16x16xf32> to vector<256x16xf32>
    %c1_110 = arith.constant 1 : index
    %c2_111 = arith.constant 2 : index
    %c0_112 = arith.constant 0 : index
    %c0_113 = arith.constant 0 : index
    %112 = vector.load %arg4[%c1_110, %c2_111, %c0_112, %c0_113] : memref<3x3x16x128xf32, #tpu.memory_space<vmem>>, vector<1x1x16x128xf32>
    %113 = vector.shape_cast %112 : vector<1x1x16x128xf32> to vector<16x128xf32>
    %cst_114 = arith.constant dense<0.000000e+00> : vector<256x128xf32>
    %114 = tpu.matmul %111, %113, %cst_114 {dimension_numbers = #tpu.dot_dimension_numbers<[1], [0], [0], [1], [0, 0, 1, 1], [], []>} : vector<256x16xf32>, vector<16x128xf32>, vector<256x128xf32> -> vector<256x128xf32>
    %115 = arith.addf %109, %114 : vector<256x128xf32>
    %116 = vector.extract_strided_slice %76 {offsets = [0, 2, 0, 0], sizes = [1, 16, 16, 16], strides = [1, 1, 1, 1]} : vector<1x18x18x16xf32> to vector<1x16x16x16xf32>
    %117 = vector.shape_cast %116 : vector<1x16x16x16xf32> to vector<256x16xf32>
    %c2_115 = arith.constant 2 : index
    %c0_116 = arith.constant 0 : index
    %c0_117 = arith.constant 0 : index
    %c0_118 = arith.constant 0 : index
    %118 = vector.load %arg4[%c2_115, %c0_116, %c0_117, %c0_118] : memref<3x3x16x128xf32, #tpu.memory_space<vmem>>, vector<1x1x16x128xf32>
    %119 = vector.shape_cast %118 : vector<1x1x16x128xf32> to vector<16x128xf32>
    %cst_119 = arith.constant dense<0.000000e+00> : vector<256x128xf32>
    %120 = tpu.matmul %117, %119, %cst_119 {dimension_numbers = #tpu.dot_dimension_numbers<[1], [0], [0], [1], [0, 0, 1, 1], [], []>} : vector<256x16xf32>, vector<16x128xf32>, vector<256x128xf32> -> vector<256x128xf32>
    %121 = arith.addf %115, %120 : vector<256x128xf32>
    %122 = vector.extract_strided_slice %76 {offsets = [0, 2, 1, 0], sizes = [1, 16, 16, 16], strides = [1, 1, 1, 1]} : vector<1x18x18x16xf32> to vector<1x16x16x16xf32>
    %123 = vector.shape_cast %122 : vector<1x16x16x16xf32> to vector<256x16xf32>
    %c2_120 = arith.constant 2 : index
    %c1_121 = arith.constant 1 : index
    %c0_122 = arith.constant 0 : index
    %c0_123 = arith.constant 0 : index
    %124 = vector.load %arg4[%c2_120, %c1_121, %c0_122, %c0_123] : memref<3x3x16x128xf32, #tpu.memory_space<vmem>>, vector<1x1x16x128xf32>
    %125 = vector.shape_cast %124 : vector<1x1x16x128xf32> to vector<16x128xf32>
    %cst_124 = arith.constant dense<0.000000e+00> : vector<256x128xf32>
    %126 = tpu.matmul %123, %125, %cst_124 {dimension_numbers = #tpu.dot_dimension_numbers<[1], [0], [0], [1], [0, 0, 1, 1], [], []>} : vector<256x16xf32>, vector<16x128xf32>, vector<256x128xf32> -> vector<256x128xf32>
    %127 = arith.addf %121, %126 : vector<256x128xf32>
    %128 = vector.extract_strided_slice %76 {offsets = [0, 2, 2, 0], sizes = [1, 16, 16, 16], strides = [1, 1, 1, 1]} : vector<1x18x18x16xf32> to vector<1x16x16x16xf32>
    %129 = vector.shape_cast %128 : vector<1x16x16x16xf32> to vector<256x16xf32>
    %c2_125 = arith.constant 2 : index
    %c2_126 = arith.constant 2 : index
    %c0_127 = arith.constant 0 : index
    %c0_128 = arith.constant 0 : index
    %130 = vector.load %arg4[%c2_125, %c2_126, %c0_127, %c0_128] : memref<3x3x16x128xf32, #tpu.memory_space<vmem>>, vector<1x1x16x128xf32>
    %131 = vector.shape_cast %130 : vector<1x1x16x128xf32> to vector<16x128xf32>
    %cst_129 = arith.constant dense<0.000000e+00> : vector<256x128xf32>
    %132 = tpu.matmul %129, %131, %cst_129 {dimension_numbers = #tpu.dot_dimension_numbers<[1], [0], [0], [1], [0, 0, 1, 1], [], []>} : vector<256x16xf32>, vector<16x128xf32>, vector<256x128xf32> -> vector<256x128xf32>
    %133 = arith.addf %127, %132 : vector<256x128xf32>
    %134 = arith.negf %133 : vector<256x128xf32>
    %135 = math.exp %134 : vector<256x128xf32>
    %cst_130 = arith.constant 1.000000e+00 : f32
    %136 = vector.broadcast %cst_130 : f32 to vector<256x128xf32>
    %137 = arith.addf %136, %135 : vector<256x128xf32>
    %138 = arith.divf %136, %137 : vector<256x128xf32>
    %139 = vector.shape_cast %138 : vector<256x128xf32> to vector<1x256x128xf32>
    %140 = tpu.transpose %139, [0, 2, 1] : vector<1x256x128xf32> -> vector<1x128x256xf32>
    %141 = vector.extract_strided_slice %140 {offsets = [0, 0, 0], sizes = [1, 8, 256], strides = [1, 1, 1]} : vector<1x128x256xf32> to vector<1x8x256xf32>
    %c0_131 = arith.constant 0 : index
    %c0_132 = arith.constant 0 : index
    %c0_133 = arith.constant 0 : index
    %142 = vector.load %arg6[%c0_131, %c0_132, %c0_133] : memref<1x8x256xf32, #tpu.memory_space<vmem>>, vector<1x8x256xf32>
    tpu.vector_store %arg6[%c0_131, %c0_132, %c0_133], %141 {strides = array<i32>} : memref<1x8x256xf32, #tpu.memory_space<vmem>>, vector<1x8x256xf32>,
    return
  }
  func.func @transform_0(%arg0: i32) -> (i32, i32, i32, i32) {
    %c0_i32 = arith.constant 0 : i32
    %c0_i32_0 = arith.constant 0 : i32
    %c0_i32_1 = arith.constant 0 : i32
    %c0_i32_2 = arith.constant 0 : i32
    return %arg0, %c0_i32, %c0_i32_0, %c0_i32_1 : i32, i32, i32, i32
  }
  func.func @transform_1(%arg0: i32) -> (i32, i32, i32, i32) {
    %c0_i32 = arith.constant 0 : i32
    %c0_i32_0 = arith.constant 0 : i32
    %c0_i32_1 = arith.constant 0 : i32
    %c0_i32_2 = arith.constant 0 : i32
    %c0_i32_3 = arith.constant 0 : i32
    return %c0_i32, %c0_i32_0, %c0_i32_1, %c0_i32_2 : i32, i32, i32, i32
  }
  func.func @transform_2(%arg0: i32) -> (i32, i32) {
    %c0_i32 = arith.constant 0 : i32
    %c0_i32_0 = arith.constant 0 : i32
    %c0_i32_1 = arith.constant 0 : i32
    return %c0_i32, %c0_i32_0 : i32, i32
  }
  func.func @transform_3(%arg0: i32) -> (i32, i32, i32, i32) {
    %c0_i32 = arith.constant 0 : i32
    %c0_i32_0 = arith.constant 0 : i32
    %c0_i32_1 = arith.constant 0 : i32
    %c0_i32_2 = arith.constant 0 : i32
    %c0_i32_3 = arith.constant 0 : i32
    return %c0_i32, %c0_i32_0, %c0_i32_1, %c0_i32_2 : i32, i32, i32, i32
  }
  func.func @transform_4(%arg0: i32) -> (i32, i32) {
    %c0_i32 = arith.constant 0 : i32
    %c0_i32_0 = arith.constant 0 : i32
    %c0_i32_1 = arith.constant 0 : i32
    return %c0_i32, %c0_i32_0 : i32, i32
  }
  func.func @transform_5(%arg0: i32) -> (i32, i32, i32) {
    %c0_i32 = arith.constant 0 : i32
    %c0_i32_0 = arith.constant 0 : i32
    %c0_i32_1 = arith.constant 0 : i32
    return %arg0, %c0_i32, %c0_i32_0 : i32, i32, i32
  }
}

</mosaic_0001>

<bundles_post_ra>
// kernel: mul.1
= control target key start
LH: loop header
LB: loop body
LE: loop exit
PB: predicated region body
PF: predicated region fallthrough
CT: control target
= control target key end

     0   :  { %3 = vsyncpa [#allocation1], 0  ;;  %s288_s0 = inlined_call_operand.hbm [shape: f32[2,3,16,16], index: 0, kind: input, shape index: {}]   ;;  %s289_s1 = inlined_call_operand.hbm [shape: f32[2,3,16,16], index: 1, kind: input, shape index: {}]   ;;  %s290_s2 = inlined_call_operand.vmem [shape: f32[2,3,16,16], index: 2, kind: output, shape index: {}]  }
   0x1   :  { %4 = vsyncpa [#allocation3], 0  ;;  %s209_s9 = smov [#allocation0]   ;;  %s161_s13 = scalar_lea.hbm %s288_s0, 1536 }
   0x2   :  { %s8_s10 = sshll.u32 %s209_s9, 4  ;;  %p162_p0 = scmp.ne.s32.totalorder %s288_s0, %s161_s13  ;;  %s9_s10 = int_to_ptr.vmem [resolvable:$true] %s8_s10 }
   0x3   :  { %p165_p1 = scmp.lt.u32.totalorder %s161_s13, %s288_s0 }
   0x5   :  { %p167_p2 = pnand %p165_p1, %p162_p0 }
   0x7   :  { %170 = shalt.err (!%p167_p2)
}
   0x8   :  { %s171_s18 = scalar_lea.vmem %s9_s10, 1536  ;;  %p176_p4 = scmp.lt.s32.totalorder %s9_s10, %s9_s10 }
   0x9   :  { %p172_p3 = scmp.ne.s32.totalorder %s9_s10, %s171_s18  ;;  %p177_p5 = scmp.lt.s32.totalorder %s171_s18, %s171_s18 }
   0xb   :  { %p178_p6 = por %p177_p5, %p176_p4 }
   0xd   :  { %p179_p7 = pnand %p178_p6, %p172_p3 }
   0xf   :  { %182 = shalt.err (!%p179_p7)
}
  0x10   :  { %s210_s19 = smov 128   ;;  %s211_s20 = smov 8  }
  0x11   :  { %14 = dma.hbm_to_vmem [thread:$0]  %s288_s0, 1536, %s9_s10, [#allocation1], %s210_s19, %s210_s19, %s211_s20  }
  0x12   :  { %s212_s0 = smov [#allocation2]   ;;  %s183_s26 = scalar_lea.hbm %s289_s1, 1536 }
  0x13   :  { %s18_s23 = sshll.u32 %s212_s0, 4  ;;  %p184_p8 = scmp.ne.s32.totalorder %s289_s1, %s183_s26  ;;  %s19_s23 = int_to_ptr.vmem [resolvable:$true] %s18_s23 }
  0x14   :  { %p187_p9 = scmp.lt.u32.totalorder %s183_s26, %s289_s1 }
  0x16   :  { %p189_p10 = pnand %p187_p9, %p184_p8 }
  0x18   :  { %192 = shalt.err (!%p189_p10)
}
  0x19   :  { %s193_s3 = scalar_lea.vmem %s19_s23, 1536  ;;  %p198_p12 = scmp.lt.s32.totalorder %s19_s23, %s19_s23 }
  0x1a   :  { %p194_p11 = scmp.ne.s32.totalorder %s19_s23, %s193_s3  ;;  %p199_p13 = scmp.lt.s32.totalorder %s193_s3, %s193_s3 }
  0x1c   :  { %p200_p0 = por %p199_p13, %p198_p12 }
  0x1e   :  { %p201_p1 = pnand %p200_p0, %p194_p11 }
  0x20   :  { %204 = shalt.err (!%p201_p1)
}
  0x21   :  { %24 = dma.hbm_to_vmem [thread:$0]  %s289_s1, 1536, %s19_s23, [#allocation3], %s210_s19, %s210_s19, %s211_s20  }
  0x22   :  { %205 = dma.done.wait [#allocation1], 1536  }
  0x23   :  { %206 = vsyncadd [#allocation1], 4294965760 }
  0x24   :  { %207 = dma.done.wait [#allocation3], 1536  }
  0x25   :  { %208 = vsyncadd [#allocation3], 4294965760  ;;  %v27_v0 = vld [vmem:[#allocation0] sm:$0xff]  ;;  %v35_v2 = vld [vmem:[#allocation0 + $0x30] sm:$0xff] }
  0x26   :  { %v28_v1 = vld [vmem:[#allocation2] sm:$0xff]  ;;  %v37_v4 = vld [vmem:[#allocation2 + $0x30] sm:$0xff]  ;;  %v85_v18 = vld [vmem:[#allocation0 + $0x8] sm:$0xff] }
  0x27   :  { %v31_v3 = vmul.f32 %v28_v1, %v27_v0  ;;  %v45_v5 = vld [vmem:[#allocation0 + $0x10] sm:$0xff]  ;;  %v40_v7 = vmul.f32 %v37_v4, %v35_v2  ;;  %v55_v9 = vld [vmem:[#allocation0 + $0x40] sm:$0xff]  ;;  %v87_v19 = vld [vmem:[#allocation2 + $0x8] sm:$0xff] }
  0x28   :  { %v47_v6 = vld [vmem:[#allocation2 + $0x10] sm:$0xff]  ;;  %v57_v10 = vld [vmem:[#allocation2 + $0x40] sm:$0xff]  ;;  %v95_v20 = vld [vmem:[#allocation0 + $0x38] sm:$0xff]  ;;  %v90_v21 = vmul.f32 %v87_v19, %v85_v18 }
  0x29   :  { %v50_v8 = vmul.f32 %v47_v6, %v45_v5  ;;  %v65_v11 = vld [vmem:[#allocation0 + $0x20] sm:$0xff]  ;;  %33 = vst [vmem:[%s290_s2] sm:$0xff] %v31_v3  ;;  %v60_v12 = vmul.f32 %v57_v10, %v55_v9  ;;  %v75_v14 = vld [vmem:[#allocation0 + $0x50] sm:$0xff]  ;;  %146 = vst [vmem:[%s290_s2 + $0x30] sm:$0xff] %v40_v7 }
  0x2a   :  { %v67_v13 = vld [vmem:[#allocation2 + $0x20] sm:$0xff]  ;;  %v77_v15 = vld [vmem:[#allocation2 + $0x50] sm:$0xff]  ;;  %v97_v22 = vld [vmem:[#allocation2 + $0x38] sm:$0xff]  ;;  %151 = vst [vmem:[%s290_s2 + $0x8] sm:$0xff] %v90_v21 }
  0x2b   :  { %147 = vst [vmem:[%s290_s2 + $0x10] sm:$0xff] %v50_v8  ;;  %v70_v16 = vmul.f32 %v67_v13, %v65_v11  ;;  %v80_v17 = vmul.f32 %v77_v15, %v75_v14  ;;  %148 = vst [vmem:[%s290_s2 + $0x40] sm:$0xff] %v60_v12  ;;  %v105_v23 = vld [vmem:[#allocation0 + $0x18] sm:$0xff]  ;;  %v100_v25 = vmul.f32 %v97_v22, %v95_v20  ;;  %v115_v27 = vld [vmem:[#allocation0 + $0x48] sm:$0xff] }
  0x2c   :  { %v107_v24 = vld [vmem:[#allocation2 + $0x18] sm:$0xff]  ;;  %v117_v28 = vld [vmem:[#allocation2 + $0x48] sm:$0xff] }
  0x2d   :  { %149 = vst [vmem:[%s290_s2 + $0x20] sm:$0xff] %v70_v16  ;;  %150 = vst [vmem:[%s290_s2 + $0x50] sm:$0xff] %v80_v17  ;;  %v110_v26 = vmul.f32 %v107_v24, %v105_v23  ;;  %v125_v29 = vld [vmem:[#allocation0 + $0x28] sm:$0xff]  ;;  %v120_v30 = vmul.f32 %v117_v28, %v115_v27  ;;  %v135_v32 = vld [vmem:[#allocation0 + $0x58] sm:$0xff] }
  0x2e   :  { %v127_v31 = vld [vmem:[#allocation2 + $0x28] sm:$0xff]  ;;  %v137_v33 = vld [vmem:[#allocation2 + $0x58] sm:$0xff]  ;;  %152 = vst [vmem:[%s290_s2 + $0x38] sm:$0xff] %v100_v25 }
  0x2f   :  { %153 = vst [vmem:[%s290_s2 + $0x18] sm:$0xff] %v110_v26  ;;  %v130_v34 = vmul.f32 %v127_v31, %v125_v29  ;;  %v140_v35 = vmul.f32 %v137_v33, %v135_v32  ;;  %154 = vst [vmem:[%s290_s2 + $0x48] sm:$0xff] %v120_v30 }
  0x31   :  { %155 = vst [vmem:[%s290_s2 + $0x28] sm:$0xff] %v130_v34  ;;  %156 = vst [vmem:[%s290_s2 + $0x58] sm:$0xff] %v140_v35 }
  0x32   :  { %144 = vsyncpa [#allocation1], 1 }
  0x33   :  { %145 = vsyncpa [#allocation3], 1 }

// kernel: encoder_mask_forward.1
= control target key start
LH: loop header
LB: loop body
LE: loop exit
PB: predicated region body
PF: predicated region fallthrough
CT: control target
= control target key end

     0   :  { %s27303_s18 = smov 0   ;;  %s32787_s0 = inlined_call_operand.vmem [shape: f32[2,20,20,3], index: 0, kind: input, shape index: {}]   ;;  %s32788_s1 = inlined_call_operand.vmem [shape: f32[3,3,3,16], index: 1, kind: input, shape index: {}]   ;;  %s32789_s2 = inlined_call_operand.vmem [shape: f32[1,16], index: 2, kind: input, shape index: {}]   ;;  %s32790_s3 = inlined_call_operand.vmem [shape: f32[3,3,16,128], index: 3, kind: input, shape index: {}]   ;;  %s32791_s4 = inlined_call_operand.vmem [shape: f32[1,128], index: 4, kind: input, shape index: {}]   ;;  %s32792_s5 = inlined_call_operand.vmem [shape: f32[2,8,256], index: 5, kind: output, shape index: {}]  }
   0x1 LB: > { %s22385_s19 = sadd.s32 4294967295, %s27268_s18   ;;  %p22389_p0 = scmp.ge.s32.totalorder %s27268_s18, 1  ;;  %s27268_s18 = sphi %s27303_s18, %s15_s18  }
   0x2   : > { %p187_p1 = scmp.lt.s32.totalorder %s27268_s18, 3 }
   0x4   : > { %p188_p2 = pnand %p22389_p0, %p187_p1 }
   0x6   : > { %191 = sbr.rel (%p188_p2) target bundleno = 2117 (0x845), region = 40 }
   0xd   : > { %vm1850_vm0 = vcmask 1042432   ;;  %v22533_v0 = vld [vmem:[%s32788_s1 + $0x8] sm:$0x7]  ;;  %p215_p3 = scmp.lt.s32.totalorder %s22385_s19, 1  ;;  %v344_v1 = vlaneseq  ;;  %v32793_v2 = vmov 0.0   ;;  %vm27271_vm1 = vmmov 0  }
   0xe   : > { %24536 = vmatprep.subr.mxu0 %v32793_v2  ;;  %24538 = vmatprep.mubr.msk.f32.mxu0 %vm27271_vm1, %v32793_v2  ;;  %v27272_v3 = vmov 1983009808   ;;  %vm1767_vm2 = vcmask 23552   ;;  %v22648_v47 = vld [vmem:[%s32788_s1 + $0xc] sm:$0x7]  ;;  %vm19282_vm4 = vcmask 130048  }
   0xf   : > { %24537 = vmatpush3.msk.msra.mxu0 %vm1850_vm0, %v22533_v0  ;;  %s33046_s19 = smov (!%p215_p3, %s22385_s19), 1  ;;  %v342_v4 = vunpack.c.l.s4 %v27272_v3  ;;  %v27320_v5 = vshrl.u32 %v344_v1, 7  ;;  %24286 = vmatprep.subr.mxu1 %v32793_v2  ;;  %vm19652_vm6 = vcmask 1046528   ;;  %vm20057_vm7 = vcmask 1045504  }
  0x10   : > { %24661 = vmatprep.subr.mxu0 %v32793_v2  ;;  %24288 = vmatprep.mubr.msk.f32.mxu1 %vm27271_vm1, %v32793_v2  ;;  %s26797_s22 = smul.u32 480, %s33046_s19  ;;  %s23601_s16 = sshll.u32 %s33046_s19, 4 }
  0x11   : > { %v343_v6 = vunpack.c.0.s8 %v342_v4  ;;  %vm18397_vm3 = vcmp.ge.s32.totalorder %v27320_v5, 1  ;;  %s224_s21 = scalar_lea.vmem %s32792_s5, %s23601_s16 }
  0x12   : > { %s27330_s25 = scalar_lea.vmem %s32787_s0, %s26797_s22 }
  0x13   : > { %v27333_v7 = vsub.s32 %v343_v6, %v27320_v5  ;;  %v4097_v8 = vld [vmem:[%s27330_s25 + $0x2] sm:$0xff]  ;;  %v4098_v9 = vld [vmem:[%s27330_s25 + $0xa] sm:$0xff]  ;;  %v4100_v14 = vld [vmem:[%s27330_s25 + $0x1a] sm:$0xff] }
  0x14   : > { %v4205_v10 = vcombine.high %v4097_v8, %v4097_v8  ;;  %v4222_v12 = vcombine.high %v4098_v9, %v4098_v9  ;;  %v4101_v15 = vld [vmem:[%s27330_s25 + $0x22] sm:$0xff]  ;;  %v4246_v16 = vcombine.high %v4100_v14, %v4100_v14  ;;  %v22515_v22 = vld.sshfl [vmem:[%s27330_s25 + $0x12] sm:$0x3 pattern:$0x76325410]  ;;  %v4104_v45 = vld [vmem:[%s27330_s25 + $0x3a] sm:$0xff] }
  0x15   : > { %v4212_v11 = vrot.slane %v4097_v8, %v27333_v7  ;;  %v4229_v13 = vrot.slane %v4098_v9, %v27333_v7  ;;  %v4253_v17 = vrot.slane %v4100_v14, %v27333_v7  ;;  %v4263_v25 = vcombine.high %v4101_v15, %v4101_v15  ;;  %v4103_v32 = vld [vmem:[%s27330_s25 + $0x32] sm:$0xff]  ;;  %v22516_v55 = vld.sshfl [vmem:[%s27330_s25 + $0x2a] sm:$0x3 pattern:$0x76325410] }
  0x16   : > { %v4219_v18 = vrot.slane %v4205_v10, %v27333_v7  ;;  %v4236_v20 = vrot.slane %v4222_v12, %v27333_v7  ;;  %v4260_v23 = vrot.slane %v4246_v16, %v27333_v7  ;;  %v4270_v26 = vrot.slane %v4101_v15, %v27333_v7  ;;  %v4106_v59 = vld [vmem:[%s27330_s25 + $0x4a] sm:$0xff]  ;;  %v4107_v6 = vld [vmem:[%s27330_s25 + $0x52] sm:$0xff]  ;;  %v22517_v10 = vld.sshfl [vmem:[%s27330_s25 + $0x42] sm:$0x3 pattern:$0x76325410] }
  0x17   : > { %v4220_v19 = vcombine.high %v4212_v11, %v4212_v11  ;;  %v4237_v21 = vcombine.high %v4229_v13, %v4229_v13  ;;  %v4261_v24 = vcombine.high %v4253_v17, %v4253_v17  ;;  %v4979_v31 = vcombine.low %v22515_v22, %v4253_v17 }
  0x18   : > { %v4221_v27 = vcombine.high %v4219_v18, %v4219_v18  ;;  %v4238_v29 = vcombine.high %v4236_v20, %v4236_v20  ;;  %v4262_v38 = vcombine.high %v4260_v23, %v4260_v23  ;;  %v4277_v39 = vrot.slane %v4263_v25, %v27333_v7 }
  0x19   : > { %v4945_v28 = vcombine.low %v4212_v11, %v4220_v19  ;;  %v4962_v30 = vcombine.low %v4229_v13, %v4237_v21  ;;  %v4980_v36 = vcombine.low %v4261_v24, %v4260_v23  ;;  %v4278_v40 = vcombine.high %v4270_v26, %v4270_v26  ;;  %v4109_v19 = vld [vmem:[%s27330_s25 + $0x62] sm:$0xff] }
  0x1a   : > { %v4946_v33 = vcombine.low %v4219_v18, %v4221_v27  ;;  %v4963_v35 = vcombine.low %v4236_v20, %v4238_v29  ;;  %v4294_v43 = vrot.slane %v4103_v32, %v27333_v7  ;;  %v4287_v44 = vcombine.high %v4103_v32, %v4103_v32  ;;  %v4110_v20 = vld [vmem:[%s27330_s25 + $0x6a] sm:$0xff] }
  0x1b   : > { %v4953_v34 = vrot.slane %v4945_v28, %v27333_v7  ;;  %v4970_v37 = vrot.slane %v4962_v30, %v27333_v7  ;;  %v4987_v48 = vrot.slane %v4979_v31, %v27333_v7  ;;  %v4994_v49 = vrot.slane %v4980_v36, %v27333_v7  ;;  %v22576_v28 = vld [vmem:[%s27330_s25 + $0x18] sm:$0xff] }
  0x1c   : > { %v4960_v41 = vrot.slane %v4946_v33, %v27333_v7  ;;  %v4977_v42 = vrot.slane %v4963_v35, %v27333_v7  ;;  %v4996_v50 = vcombine.low %v4262_v38, %v4270_v26  ;;  %v4997_v51 = vcombine.low %v4278_v40, %v4277_v39  ;;  %v22577_v38 = vld [vmem:[%s27330_s25 + $0x20] sm:$0xff] }
  0x1d   : > { %v4279_v52 = vcombine.high %v4277_v39, %v4277_v39  ;;  %v4302_v53 = vcombine.high %v4294_v43, %v4294_v43  ;;  %v4301_v56 = vrot.slane %v4287_v44, %v27333_v7  ;;  %v4311_v57 = vrot.slane %v4104_v45, %v27333_v7 }
  0x1e   : > { %v4961_v46 = vcombine.low %v4953_v34, %v4960_v41  ;;  %v4978_v54 = vcombine.low %v4970_v37, %v4977_v42  ;;  %v4304_v58 = vcombine.high %v4104_v45, %v4104_v45  ;;  %v4995_v60 = vcombine.low %v4987_v48, %v4994_v49 }
  0x1f   : > { %v5004_v61 = vrot.slane %v4996_v50, %v27333_v7  ;;  %v5011_v62 = vrot.slane %v4997_v51, %v27333_v7  ;;  %v5013_v63 = vcombine.low %v4279_v52, %v22516_v55  ;;  %v5014_v0 = vcombine.low %v4294_v43, %v4302_v53 }
  0x20   : > { %24539 = vmatmul.mubr.msk.f32.vlgmr.msra.gmra.mrb[0].mxu0 %vm1767_vm2, %v4961_v46  ;;  %v4303_v1 = vcombine.high %v4301_v56, %v4301_v56  ;;  %v4319_v3 = vcombine.high %v4311_v57, %v4311_v57  ;;  %v4318_v4 = vrot.slane %v4304_v58, %v27333_v7  ;;  %v4328_v8 = vcombine.high %v4106_v59, %v4106_v59  ;;  %v22518_v46 = vld.sshfl [vmem:[%s27330_s25 + $0x5a] sm:$0x3 pattern:$0x76325410] }
  0x21   : > { %24662 = vmatpush3.msk.msra.mxu0 %vm1850_vm0, %v22648_v47  ;;  %24541 = vmatprep.mubr.msk.f32.mxu0 %vm27271_vm1, %v32793_v2  ;;  %v4335_v9 = vrot.slane %v4106_v59, %v27333_v7  ;;  %v5012_v11 = vcombine.low %v5004_v61, %v5011_v62  ;;  %v5021_v12 = vrot.slane %v5013_v63, %v27333_v7  ;;  %v22579_v62 = vld [vmem:[%s27330_s25 + $0x30] sm:$0xff] }
  0x22   : > { %24786 = vmatprep.subr.mxu0 %v32793_v2  ;;  %v5028_v13 = vrot.slane %v5014_v0, %v27333_v7  ;;  %v4345_v14 = vcombine.high %v4107_v6, %v4107_v6  ;;  %v5030_v15 = vcombine.low %v4301_v56, %v4303_v1  ;;  %v5031_v16 = vcombine.low %v4311_v57, %v4319_v3 }
  0x23   : > { %v4320_v17 = vcombine.high %v4318_v4, %v4318_v4  ;;  %v4342_v18 = vrot.slane %v4328_v8, %v27333_v7  ;;  %v5048_v21 = vcombine.low %v22517_v10, %v4335_v9  ;;  %v4343_v22 = vcombine.high %v4335_v9, %v4335_v9 }
  0x24   : > { %24542 = vmatmul.mubr.msk.f32.gmra.mrb[2].mxu0 %vm1767_vm2, %v4978_v54  ;;  %v4352_v23 = vrot.slane %v4107_v6, %v27333_v7  ;;  %v5029_v24 = vcombine.low %v5021_v12, %v5028_v13  ;;  %v4359_v25 = vrot.slane %v4345_v14, %v27333_v7  ;;  %v4369_v26 = vcombine.high %v4109_v19, %v4109_v19 }
  0x25   : > { %24544 = vmatprep.mubr.msk.f32.mxu0 %vm27271_vm1, %v32793_v2  ;;  %v4386_v27 = vcombine.high %v4110_v20, %v4110_v20  ;;  %v5038_v29 = vrot.slane %v5030_v15, %v27333_v7  ;;  %v5045_v30 = vrot.slane %v5031_v16, %v27333_v7  ;;  %v5047_v31 = vcombine.low %v4318_v4, %v4320_v17  ;;  %v22580_v17 = vld [vmem:[%s27330_s25 + $0x38] sm:$0xff] }
  0x26   : > { %v4344_v32 = vcombine.high %v4342_v18, %v4342_v18  ;;  %v5062_v33 = vrot.slane %v5048_v21, %v27333_v7  ;;  %v5064_v34 = vcombine.low %v4343_v22, %v4342_v18  ;;  %v4360_v35 = vcombine.high %v4352_v23, %v4352_v23  ;;  %v22585_v18 = vld [vmem:[%s27330_s25 + $0x60] sm:$0xff] }
  0x27   : > { %v4376_v36 = vrot.slane %v4109_v19, %v27333_v7  ;;  %v6138_v37 = vcombine.high %v22576_v28, %v22576_v28  ;;  %v4361_v39 = vcombine.high %v4359_v25, %v4359_v25  ;;  %v4383_v40 = vrot.slane %v4369_v26, %v27333_v7 }
  0x28   : > { %24545 = vmatmul.mubr.msk.f32.gmra.mrb[4].mxu0 %vm1767_vm2, %v4995_v60  ;;  %v4393_v41 = vrot.slane %v4110_v20, %v27333_v7  ;;  %v4400_v42 = vrot.slane %v4386_v27, %v27333_v7  ;;  %v5046_v43 = vcombine.low %v5038_v29, %v5045_v30  ;;  %v5055_v44 = vrot.slane %v5047_v31, %v27333_v7 }
  0x29   : > { %24547 = vmatprep.mubr.msk.f32.mxu0 %vm27271_vm1, %v32793_v2  ;;  %v5065_v45 = vcombine.low %v4344_v32, %v4352_v23  ;;  %v6145_v47 = vrot.slane %v22576_v28, %v27333_v7  ;;  %v6155_v48 = vcombine.high %v22577_v38, %v22577_v38  ;;  %v5072_v49 = vrot.slane %v5064_v34, %v27333_v7  ;;  %v22630_v23 = vld.sshfl [vmem:[%s27330_s25 + $0x28] sm:$0x3 pattern:$0x76325410]  ;;  %v22583_v28 = vld [vmem:[%s27330_s25 + $0x50] sm:$0xff] }
  0x2a   : > { %v5081_v50 = vcombine.low %v4360_v35, %v4359_v25  ;;  %v4384_v51 = vcombine.high %v4376_v36, %v4376_v36  ;;  %v6152_v52 = vrot.slane %v6138_v37, %v27333_v7  ;;  %v5082_v53 = vcombine.low %v4361_v39, %v22518_v46 }
  0x2b   : > { %v4385_v54 = vcombine.high %v4383_v40, %v4383_v40  ;;  %v4401_v55 = vcombine.high %v4393_v41, %v4393_v41  ;;  %v4402_v56 = vcombine.high %v4400_v42, %v4400_v42  ;;  %v5063_v57 = vcombine.low %v5055_v44, %v5062_v33 }
  0x2c   : > { %24548 = vmatmul.mubr.msk.f32.gmra.mrb[6].mxu0 %vm1767_vm2, %v5012_v11  ;;  %v5079_v58 = vrot.slane %v5065_v45, %v27333_v7  ;;  %v6153_v59 = vcombine.high %v6145_v47, %v6145_v47  ;;  %v6162_v60 = vrot.slane %v22577_v38, %v27333_v7  ;;  %v6169_v61 = vrot.slane %v6155_v48, %v27333_v7  ;;  %v22586_v48 = vld [vmem:[%s27330_s25 + $0x68] sm:$0xff] }
  0x2d   : > { %24550 = vmatprep.mubr.msk.f32.mxu0 %vm27271_vm1, %v32793_v2  ;;  %v5089_v63 = vrot.slane %v5081_v50, %v27333_v7  ;;  %v5098_v0 = vcombine.low %v4376_v36, %v4384_v51  ;;  %v6154_v1 = vcombine.high %v6152_v52, %v6152_v52  ;;  %v5096_v3 = vrot.slane %v5082_v53, %v27333_v7  ;;  %v22588_v50 = vld [vmem:[%s27330_s25 + $0x78] sm:$0xff] }
  0x2e   : > { %v5099_v4 = vcombine.low %v4383_v40, %v4385_v54  ;;  %v5115_v6 = vcombine.low %v4393_v41, %v4401_v55  ;;  %v5116_v8 = vcombine.low %v4400_v42, %v4402_v56  ;;  %v5080_v9 = vcombine.low %v5072_v49, %v5079_v58 }
  0x2f   : > { %v6878_v10 = vcombine.low %v6145_v47, %v6153_v59  ;;  %v6170_v11 = vcombine.high %v6162_v60, %v6162_v60  ;;  %v6179_v12 = vcombine.high %v22579_v62, %v22579_v62  ;;  %v6171_v13 = vcombine.high %v6169_v61, %v6169_v61  ;;  %v22589_v59 = vld [vmem:[%s27330_s25 + $0x80] sm:$0xff] }
  0x30   : > { %24551 = vmatmul.mubr.msk.f32.gmra.mrb[8].mxu0 %vm1767_vm2, %v5029_v24  ;;  %v5106_v14 = vrot.slane %v5098_v0, %v27333_v7  ;;  %v6879_v15 = vcombine.low %v6152_v52, %v6154_v1  ;;  %v6186_v16 = vrot.slane %v22579_v62, %v27333_v7  ;;  %v5097_v19 = vcombine.low %v5089_v63, %v5096_v3  ;;  %v22582_v24 = vld [vmem:[%s27330_s25 + $0x48] sm:$0xff]  ;;  %v22632_v1 = vld.sshfl [vmem:[%s27330_s25 + $0x58] sm:$0x3 pattern:$0x76325410] }
  0x31   : > { %24553 = vmatprep.mubr.msk.f32.mxu0 %vm27271_vm1, %v32793_v2  ;;  %v5113_v20 = vrot.slane %v5099_v4, %v27333_v7  ;;  %v5123_v21 = vrot.slane %v5115_v6, %v27333_v7  ;;  %v5130_v22 = vrot.slane %v5116_v8, %v27333_v7  ;;  %v6886_v25 = vrot.slane %v6878_v10, %v27333_v7 }
  0x32   : > { %v6895_v26 = vcombine.low %v6162_v60, %v6170_v11  ;;  %v6193_v27 = vrot.slane %v6179_v12, %v27333_v7  ;;  %v6220_v29 = vcombine.high %v22582_v24, %v22582_v24  ;;  %v6896_v30 = vcombine.low %v6169_v61, %v6171_v13  ;;  %v22631_v61 = vld.sshfl [vmem:[%s27330_s25 + $0x40] sm:$0x3 pattern:$0x76325410] }
  0x33   : > { %v6196_v31 = vcombine.high %v22580_v17, %v22580_v17  ;;  %v6237_v32 = vcombine.high %v22583_v28, %v22583_v28  ;;  %v6261_v33 = vcombine.high %v22585_v18, %v22585_v18  ;;  %v6893_v34 = vrot.slane %v6879_v15, %v27333_v7 }
  0x34   : > { %24554 = vmatmul.mubr.msk.f32.gmra.mrb[10].mxu0 %vm1767_vm2, %v5046_v43  ;;  %v6194_v35 = vcombine.high %v6186_v16, %v6186_v16  ;;  %v6912_v36 = vcombine.low %v22630_v23, %v6186_v16  ;;  %v6203_v37 = vrot.slane %v22580_v17, %v27333_v7  ;;  %v5114_v38 = vcombine.low %v5106_v14, %v5113_v20 }
  0x35   : > { %24556 = vmatprep.mubr.msk.f32.mxu0 %vm27271_vm1, %v32793_v2  ;;  %v6227_v39 = vrot.slane %v22582_v24, %v27333_v7  ;;  %v6244_v40 = vrot.slane %v22583_v28, %v27333_v7  ;;  %v5131_v41 = vcombine.low %v5123_v21, %v5130_v22  ;;  %v6903_v42 = vrot.slane %v6895_v26, %v27333_v7 }
  0x36   : > { %v6195_v43 = vcombine.high %v6193_v27, %v6193_v27  ;;  %v6234_v44 = vrot.slane %v6220_v29, %v27333_v7  ;;  %v6910_v45 = vrot.slane %v6896_v30, %v27333_v7  ;;  %v6210_v46 = vrot.slane %v6196_v31, %v27333_v7 }
  0x37   : > { %v6251_v47 = vrot.slane %v6237_v32, %v27333_v7  ;;  %v6275_v49 = vrot.slane %v6261_v33, %v27333_v7  ;;  %v6894_v51 = vcombine.low %v6886_v25, %v6893_v34  ;;  %v6913_v52 = vcombine.low %v6194_v35, %v6193_v27  ;;  %v22763_v25 = vld [vmem:[%s32788_s1 + $0x10] sm:$0x7] }
  0x38   : > { %24557 = vmatmul.mubr.msk.f32.gmra.mrb[12].mxu0 %vm1767_vm2, %v5063_v57  ;;  %v6920_v53 = vrot.slane %v6912_v36, %v27333_v7  ;;  %v6211_v54 = vcombine.high %v6203_v37, %v6203_v37  ;;  %v6212_v55 = vcombine.high %v6210_v46, %v6210_v46  ;;  %v6235_v56 = vcombine.high %v6227_v39, %v6227_v39 }
  0x39   : > { %24559 = vmatprep.mubr.msk.f32.mxu0 %vm27271_vm1, %v32793_v2  ;;  %v6252_v57 = vcombine.high %v6244_v40, %v6244_v40  ;;  %v6268_v58 = vrot.slane %v22585_v18, %v27333_v7  ;;  %v6929_v60 = vcombine.low %v6195_v43, %v6203_v37  ;;  %v6236_v62 = vcombine.high %v6234_v44, %v6234_v44  ;;  %v22592_v43 = vld [vmem:[%s27330_s25 + $0x98] sm:$0xff] }
  0x3a   : > { %v6278_v63 = vcombine.high %v22586_v48, %v22586_v48  ;;  %v6302_v0 = vcombine.high %v22588_v50, %v22588_v50  ;;  %v6253_v3 = vcombine.high %v6251_v47, %v6251_v47  ;;  %v6277_v6 = vcombine.high %v6275_v49, %v6275_v49 }
  0x3b   : > { %v6276_v4 = vcombine.high %v6268_v58, %v6268_v58  ;;  %v6285_v8 = vrot.slane %v22586_v48, %v27333_v7  ;;  %v6927_v10 = vrot.slane %v6913_v52, %v27333_v7  ;;  %v6930_v11 = vcombine.low %v6211_v54, %v6210_v46 }
  0x3c   : > { %24560 = vmatmul.mubr.msk.f32.gmra.mrb[14].mxu0 %vm1767_vm2, %v5080_v9  ;;  %v6911_v9 = vcombine.low %v6903_v42, %v6910_v45  ;;  %v6319_v12 = vcombine.high %v22589_v59, %v22589_v59  ;;  %v6946_v13 = vcombine.low %v6212_v55, %v22631_v61  ;;  %v6947_v14 = vcombine.low %v6227_v39, %v6235_v56  ;;  %v22633_v42 = vld.sshfl [vmem:[%s27330_s25 + $0x70] sm:$0x3 pattern:$0x76325410] }
  0x3d   : > { %24562 = vmatprep.mubr.msk.f32.mxu0 %vm27271_vm1, %v32793_v2  ;;  %v6964_v15 = vcombine.low %v6244_v40, %v6252_v57  ;;  %v6309_v16 = vrot.slane %v22588_v50, %v27333_v7  ;;  %v6963_v17 = vcombine.low %v6234_v44, %v6236_v62  ;;  %v6981_v18 = vcombine.low %v22632_v1, %v6268_v58  ;;  %v22594_v57 = vld [vmem:[%s27330_s25 + $0xa8] sm:$0xff] }
  0x3e   : > { %v6316_v20 = vrot.slane %v6302_v0, %v27333_v7  ;;  %v6937_v21 = vrot.slane %v6929_v60, %v27333_v7  ;;  %v6980_v22 = vcombine.low %v6251_v47, %v6253_v3  ;;  %v6997_v23 = vcombine.low %v6276_v4, %v6275_v49  ;;  %v22595_v60 = vld [vmem:[%s27330_s25 + $0xb0] sm:$0xff]  ;;  %v22634_v1 = vld.sshfl [vmem:[%s27330_s25 + $0x88] sm:$0x3 pattern:$0x76325410] }
  0x3f   : > { %v6998_v24 = vcombine.low %v6277_v6, %v6285_v8  ;;  %v6944_v26 = vrot.slane %v6930_v11, %v27333_v7  ;;  %v6293_v27 = vcombine.high %v6285_v8, %v6285_v8  ;;  %v6326_v28 = vrot.slane %v22589_v59, %v27333_v7 }
  0x40   : > { %24563 = vmatmul.mubr.msk.f32.gmra.mrb[16].mxu0 %vm1767_vm2, %v5097_v19  ;;  %v6292_v19 = vrot.slane %v6278_v63, %v27333_v7  ;;  %v6333_v29 = vrot.slane %v6319_v12, %v27333_v7  ;;  %v6954_v30 = vrot.slane %v6946_v13, %v27333_v7  ;;  %v6961_v31 = vrot.slane %v6947_v14, %v27333_v7  ;;  %v22597_v14 = vld [vmem:[%s27330_s25 + $0xc0] sm:$0xff] }
  0x41   : > { %24565 = vmatprep.mubr.msk.f32.mxu0 %vm27271_vm1, %v32793_v2  ;;  %v6978_v32 = vrot.slane %v6964_v15, %v27333_v7  ;;  %v6317_v33 = vcombine.high %v6309_v16, %v6309_v16  ;;  %v6971_v34 = vrot.slane %v6963_v17, %v27333_v7  ;;  %v6995_v35 = vrot.slane %v6981_v18, %v27333_v7  ;;  %v22598_v15 = vld [vmem:[%s27330_s25 + $0xc8] sm:$0xff] }
  0x42   : > { %v6294_v36 = vcombine.high %v6292_v19, %v6292_v19  ;;  %v6318_v37 = vcombine.high %v6316_v20, %v6316_v20  ;;  %v6988_v39 = vrot.slane %v6980_v22, %v27333_v7  ;;  %v7005_v40 = vrot.slane %v6997_v23, %v27333_v7 }
  0x43   : > { %v6928_v44 = vcombine.low %v6920_v53, %v6927_v10  ;;  %v7014_v45 = vcombine.low %v6293_v27, %v6292_v19  ;;  %v6334_v46 = vcombine.high %v6326_v28, %v6326_v28  ;;  %v6335_v47 = vcombine.high %v6333_v29, %v6333_v29 }
  0x44   : > { %24566 = vmatmul.mubr.msk.f32.gmra.mrb[18].mxu0 %vm1767_vm2, %v5114_v38  ;;  %v22591_v38 = vld [vmem:[%s27330_s25 + $0x90] sm:$0xff]  ;;  %v6945_v48 = vcombine.low %v6937_v21, %v6944_v26  ;;  %v7031_v49 = vcombine.low %v6309_v16, %v6317_v33  ;;  %v6962_v52 = vcombine.low %v6954_v30, %v6961_v31  ;;  %v7015_v54 = vcombine.low %v6294_v36, %v22633_v42  ;;  %v22635_v26 = vld.sshfl [vmem:[%s27330_s25 + $0xa0] sm:$0x3 pattern:$0x76325410] }
  0x45   : > { %24568 = vmatprep.mubr.msk.f32.mxu0 %vm27271_vm1, %v32793_v2  ;;  %v6343_v50 = vcombine.high %v22591_v38, %v22591_v38  ;;  %v7032_v55 = vcombine.low %v6316_v20, %v6318_v37  ;;  %v6360_v56 = vcombine.high %v22592_v43, %v22592_v43  ;;  %v27494_v53 = vcombine.low %v6971_v34, %v6978_v32  ;;  %v22600_v20 = vld [vmem:[%s27330_s25 + $0xd8] sm:$0xff] }
  0x46   : > { %v27496_v58 = vcombine.low %v6988_v39, %v6995_v35  ;;  %v6384_v61 = vcombine.high %v22594_v57, %v22594_v57  ;;  %v7022_v62 = vrot.slane %v7014_v45, %v27333_v7  ;;  %v7048_v63 = vcombine.low %v6326_v28, %v6334_v46  ;;  %v22636_v45 = vld.sshfl [vmem:[%s27330_s25 + $0xb8] sm:$0x3 pattern:$0x76325410] }
  0x47   : > { %v7049_v0 = vcombine.low %v6333_v29, %v6335_v47  ;;  %v6367_v3 = vrot.slane %v22592_v43, %v27333_v7  ;;  %v7039_v4 = vrot.slane %v7031_v49, %v27333_v7  ;;  %v6357_v6 = vrot.slane %v6343_v50, %v27333_v7 }
  0x48   : > { %24569 = vmatmul.mubr.msk.f32.gmra.mrb[20].mxu0 %vm1767_vm2, %v5131_v41  ;;  %v7012_v41 = vrot.slane %v6998_v24, %v27333_v7  ;;  %v7029_v10 = vrot.slane %v7015_v54, %v27333_v7  ;;  %v7046_v11 = vrot.slane %v7032_v55, %v27333_v7  ;;  %v6374_v12 = vrot.slane %v6360_v56, %v27333_v7 }
  0x49   : > { %24663 = vmatprep.mubr.msk.f32.mxu0 %vm27271_vm1, %v32793_v2  ;;  %v6408_v13 = vrot.slane %v22595_v60, %v27333_v7  ;;  %v6359_v17 = vcombine.high %v6357_v6, %v6357_v6  ;;  %v6398_v18 = vrot.slane %v6384_v61, %v27333_v7  ;;  %v6401_v19 = vcombine.high %v22595_v60, %v22595_v60 }
  0x4a   : > { %v27498_v59 = vcombine.low %v7005_v40, %v7012_v41  ;;  %v7056_v21 = vrot.slane %v7048_v63, %v27333_v7  ;;  %v7063_v22 = vrot.slane %v7049_v0, %v27333_v7  ;;  %v6375_v23 = vcombine.high %v6367_v3, %v6367_v3 }
  0x4b   : > { %v6376_v24 = vcombine.high %v6374_v12, %v6374_v12  ;;  %v6425_v28 = vcombine.high %v22597_v14, %v22597_v14  ;;  %v6442_v29 = vcombine.high %v22598_v15, %v22598_v15  ;;  %v27522_v30 = vcombine.low %v7022_v62, %v7029_v10 }
  0x4c   : > { %24664 = vmatmul.mubr.msk.f32.vlgmr.msra.gmra.mrb[22].mxu0 %vm1767_vm2, %v6894_v51  ;;  %v6350_v51 = vrot.slane %v22591_v38, %v27333_v7  ;;  %v27524_v31 = vcombine.low %v7039_v4, %v7046_v11  ;;  %v6416_v32 = vcombine.high %v6408_v13, %v6408_v13  ;;  %v6466_v33 = vcombine.high %v22600_v20, %v22600_v20  ;;  %v22601_v38 = vld [vmem:[%s27330_s25 + $0xe0] sm:$0xff]  ;;  %v22603_v4 = vld [vmem:[%s27330_s25 + $0xf0] sm:$0xff] }
  0x4d   : > { %24787 = vmatpush3.msk.msra.mxu0 %vm1850_vm0, %v22763_v25  ;;  %24666 = vmatprep.mubr.msk.f32.mxu0 %vm27271_vm1, %v32793_v2  ;;  %v7082_v35 = vcombine.low %v6359_v17, %v6367_v3  ;;  %v6400_v36 = vcombine.high %v6398_v18, %v6398_v18  ;;  %v6415_v37 = vrot.slane %v6401_v19, %v27333_v7 }
  0x4e   : > { %24911 = vmatprep.subr.mxu0 %v32793_v2  ;;  %v6358_v8 = vcombine.high %v6350_v51, %v6350_v51  ;;  %v7065_v16 = vcombine.low %v22634_v1, %v6350_v51  ;;  %v27531_v39 = vcombine.low %v7056_v21, %v7063_v22  ;;  %v7083_v40 = vcombine.low %v6375_v23, %v6374_v12  ;;  %v22604_v23 = vld [vmem:[%s27330_s25 + $0xf8] sm:$0xff] }
  0x4f   : > { %v7099_v41 = vcombine.low %v6376_v24, %v22635_v26  ;;  %v6432_v42 = vrot.slane %v22597_v14, %v27333_v7  ;;  %v6439_v46 = vrot.slane %v6425_v28, %v27333_v7  ;;  %v6456_v47 = vrot.slane %v6442_v29, %v27333_v7 }
  0x50   : > { %24667 = vmatmul.mubr.msk.f32.gmra.mrb[24].mxu0 %vm1767_vm2, %v6911_v9  ;;  %v6391_v9 = vrot.slane %v22594_v57, %v27333_v7  ;;  %v7066_v25 = vcombine.low %v6358_v8, %v6357_v6  ;;  %v7073_v34 = vrot.slane %v7065_v16, %v27333_v7  ;;  %v6473_v49 = vrot.slane %v22600_v20, %v27333_v7  ;;  %v22637_v6 = vld.sshfl [vmem:[%s27330_s25 + $0xd0] sm:$0x3 pattern:$0x76325410] }
  0x51   : > { %24669 = vmatprep.mubr.msk.f32.mxu0 %vm27271_vm1, %v32793_v2  ;;  %v6480_v50 = vrot.slane %v6466_v33, %v27333_v7  ;;  %v6483_v51 = vcombine.high %v22601_v38, %v22601_v38  ;;  %v7116_v54 = vcombine.low %v6398_v18, %v6400_v36  ;;  %v6417_v55 = vcombine.high %v6415_v37, %v6415_v37 }
  0x52   : > { %v6399_v27 = vcombine.high %v6391_v9, %v6391_v9  ;;  %v7080_v43 = vrot.slane %v7066_v25, %v27333_v7  ;;  %v6440_v56 = vcombine.high %v6432_v42, %v6432_v42  ;;  %v6449_v57 = vrot.slane %v22598_v15, %v27333_v7 }
  0x53   : > { %v7090_v60 = vrot.slane %v7082_v35, %v27333_v7  ;;  %v7107_v61 = vrot.slane %v7099_v41, %v27333_v7  ;;  %v7134_v62 = vcombine.low %v22636_v45, %v6432_v42  ;;  %v6441_v0 = vcombine.high %v6439_v46, %v6439_v46 }
  0x54   : > { %24670 = vmatmul.mubr.msk.f32.gmra.mrb[4].mxu0 %vm1767_vm2, %v6928_v44  ;;  %v7100_v44 = vcombine.low %v6391_v9, %v6399_v27  ;;  %v6457_v1 = vcombine.high %v6449_v57, %v6449_v57  ;;  %v6458_v3 = vcombine.high %v6456_v47, %v6456_v47  ;;  %v6481_v8 = vcombine.high %v6473_v49, %v6473_v49 }
  0x55   : > { %24672 = vmatprep.mubr.msk.f32.mxu0 %vm27271_vm1, %v32793_v2  ;;  %v6482_v9 = vcombine.high %v6480_v50, %v6480_v50  ;;  %v6490_v10 = vrot.slane %v22601_v38, %v27333_v7  ;;  %v6497_v11 = vrot.slane %v6483_v51, %v27333_v7  ;;  %v7124_v12 = vrot.slane %v7116_v54, %v27333_v7  ;;  %v22606_v38 = vld [vmem:[%s27330_s25 + $0x108] sm:$0xff] }
  0x56   : > { %v7114_v63 = vrot.slane %v7100_v44, %v27333_v7  ;;  %v7133_v14 = vcombine.low %v6415_v37, %v6417_v55  ;;  %v7150_v15 = vcombine.low %v6440_v56, %v6439_v46  ;;  %v27558_v16 = vcombine.low %v7073_v34, %v7080_v43  ;;  %v22638_v34 = vld.sshfl [vmem:[%s27330_s25 + $0xe8] sm:$0x3 pattern:$0x76325410] }
  0x57   : > { %v6507_v17 = vcombine.high %v22603_v4, %v22603_v4  ;;  %v6514_v18 = vrot.slane %v22603_v4, %v27333_v7  ;;  %v7148_v19 = vrot.slane %v7134_v62, %v27333_v7  ;;  %v7151_v20 = vcombine.low %v6441_v0, %v6449_v57 }
  0x58   : > { %24673 = vmatmul.mubr.msk.f32.gmra.mrb[6].mxu0 %vm1767_vm2, %v6945_v48  ;;  %v7117_v48 = vcombine.low %v6408_v13, %v6416_v32  ;;  %v7167_v21 = vcombine.low %v6457_v1, %v6456_v47  ;;  %v7168_v22 = vcombine.low %v6458_v3, %v22637_v6  ;;  %v7184_v24 = vcombine.low %v6473_v49, %v6481_v8  ;;  %v22607_v49 = vld [vmem:[%s27330_s25 + $0x110] sm:$0xff]  ;;  %v22610_v6 = vld [vmem:[%s27330_s25 + $0x128] sm:$0xff] }
  0x59   : > { %24675 = vmatprep.mubr.msk.f32.mxu0 %vm27271_vm1, %v32793_v2  ;;  %v7185_v25 = vcombine.low %v6480_v50, %v6482_v9  ;;  %v6498_v26 = vcombine.high %v6490_v10, %v6490_v10  ;;  %v6499_v27 = vcombine.high %v6497_v11, %v6497_v11  ;;  %v27569_v28 = vcombine.low %v7107_v61, %v7114_v63 }
  0x5a   : > { %v7131_v13 = vrot.slane %v7117_v48, %v27333_v7  ;;  %v7141_v32 = vrot.slane %v7133_v14, %v27333_v7  ;;  %v7158_v33 = vrot.slane %v7150_v15, %v27333_v7  ;;  %v6522_v35 = vcombine.high %v6514_v18, %v6514_v18 }
  0x5b   : > { %v6524_v36 = vcombine.high %v22604_v23, %v22604_v23  ;;  %v6531_v37 = vrot.slane %v22604_v23, %v27333_v7  ;;  %v7165_v41 = vrot.slane %v7151_v20, %v27333_v7  ;;  %v7175_v42 = vrot.slane %v7167_v21, %v27333_v7 }
  0x5c   : > { %24676 = vmatmul.mubr.msk.f32.gmra.mrb[8].mxu0 %vm1767_vm2, %v6962_v52  ;;  %v7097_v52 = vrot.slane %v7083_v40, %v27333_v7  ;;  %v27571_v29 = vcombine.low %v7124_v12, %v7131_v13  ;;  %v22609_v40 = vld [vmem:[%s27330_s25 + $0x120] sm:$0xff]  ;;  %v7182_v43 = vrot.slane %v7168_v22, %v27333_v7  ;;  %v6548_v44 = vcombine.high %v22606_v38, %v22606_v38  ;;  %v22612_v12 = vld [vmem:[%s27330_s25 + $0x138] sm:$0xff] }
  0x5d   : > { %24678 = vmatprep.mubr.msk.f32.mxu0 %vm27271_vm1, %v32793_v2  ;;  %v7192_v45 = vrot.slane %v7184_v24, %v27333_v7  ;;  %v7199_v46 = vrot.slane %v7185_v25, %v27333_v7  ;;  %v7201_v47 = vcombine.low %v6490_v10, %v6498_v26  ;;  %v7202_v48 = vcombine.low %v6497_v11, %v6499_v27  ;;  %v22639_v10 = vld.sshfl [vmem:[%s27330_s25 + $0x100] sm:$0x3 pattern:$0x76325410] }
  0x5e   : > { %v7218_v50 = vcombine.low %v22638_v34, %v6514_v18  ;;  %v6565_v54 = vcombine.high %v22607_v49, %v22607_v49  ;;  %v6589_v55 = vcombine.high %v22609_v40, %v22609_v40  ;;  %v6538_v57 = vrot.slane %v6524_v36, %v27333_v7  ;;  %v22613_v13 = vld [vmem:[%s27330_s25 + $0x140] sm:$0xff]  ;;  %v22640_v36 = vld.sshfl [vmem:[%s27330_s25 + $0x118] sm:$0x3 pattern:$0x76325410] }
  0x5f   : > { %v27594_v61 = vcombine.low %v7158_v33, %v7165_v41  ;;  %v6562_v62 = vrot.slane %v6548_v44, %v27333_v7  ;;  %v6572_v63 = vrot.slane %v22607_v49, %v27333_v7  ;;  %v27600_v0 = vcombine.low %v7175_v42, %v7182_v43  ;;  %v22615_v43 = vld [vmem:[%s27330_s25 + $0x150] sm:$0xff] }
  0x60   : > { %24679 = vmatmul.mubr.msk.f32.gmra.mrb[10].mxu0 %vm1767_vm2, %v27494_v53  ;;  %v27560_v53 = vcombine.low %v7090_v60, %v7097_v52  ;;  %v6555_v60 = vrot.slane %v22606_v38, %v27333_v7  ;;  %v27592_v52 = vcombine.low %v7141_v32, %v7148_v19  ;;  %v7209_v1 = vrot.slane %v7201_v47, %v27333_v7 }
  0x61   : > { %24681 = vmatprep.mubr.msk.f32.mxu0 %vm27271_vm1, %v32793_v2  ;;  %v7216_v3 = vrot.slane %v7202_v48, %v27333_v7  ;;  %v6540_v4 = vcombine.high %v6538_v57, %v6538_v57  ;;  %v27607_v8 = vcombine.low %v7192_v45, %v7199_v46  ;;  %v7226_v9 = vrot.slane %v7218_v50, %v27333_v7 }
  0x62   : > { %v6579_v11 = vrot.slane %v6565_v54, %v27333_v7  ;;  %v6563_v18 = vcombine.high %v6555_v60, %v6555_v60  ;;  %v6564_v19 = vcombine.high %v6562_v62, %v6562_v62  ;;  %v6580_v20 = vcombine.high %v6572_v63, %v6572_v63 }
  0x63   : > { %v6596_v21 = vrot.slane %v22609_v40, %v27333_v7  ;;  %v6606_v22 = vcombine.high %v22610_v6, %v22610_v6  ;;  %v27619_v23 = vcombine.low %v7209_v1, %v7216_v3  ;;  %v7252_v24 = vcombine.low %v6540_v4, %v22639_v10  ;;  %v22641_v1 = vld.sshfl [vmem:[%s27330_s25 + $0x130] sm:$0x3 pattern:$0x76325410] }
  0x64   : > { %24682 = vmatmul.mubr.msk.f32.gmra.mrb[12].mxu0 %vm1767_vm2, %v27496_v58  ;;  %v6521_v58 = vrot.slane %v6507_v17, %v27333_v7  ;;  %v6630_v25 = vcombine.high %v22612_v12, %v22612_v12  ;;  %v6647_v26 = vcombine.high %v22613_v13, %v22613_v13  ;;  %v6581_v27 = vcombine.high %v6579_v11, %v6579_v11 }
  0x65   : > { %24684 = vmatprep.mubr.msk.f32.mxu0 %vm27271_vm1, %v32793_v2  ;;  %v6604_v32 = vcombine.high %v6596_v21, %v6596_v21  ;;  %v6613_v34 = vrot.slane %v22610_v6, %v27333_v7  ;;  %v7253_v38 = vcombine.low %v6555_v60, %v6563_v18  ;;  %v7269_v40 = vcombine.low %v6562_v62, %v6564_v19 }
  0x66   : > { %v6523_v51 = vcombine.high %v6521_v58, %v6521_v58  ;;  %v7219_v56 = vcombine.low %v6522_v35, %v6521_v58  ;;  %v7270_v41 = vcombine.low %v6572_v63, %v6580_v20  ;;  %v6620_v42 = vrot.slane %v6606_v22, %v27333_v7 }
  0x67   : > { %v7260_v44 = vrot.slane %v7252_v24, %v27333_v7  ;;  %v6644_v45 = vrot.slane %v6630_v25, %v27333_v7  ;;  %v6654_v46 = vrot.slane %v22613_v13, %v27333_v7  ;;  %v6661_v47 = vrot.slane %v6647_v26, %v27333_v7 }
  0x68   : > { %24685 = vmatmul.mubr.msk.f32.gmra.mrb[14].mxu0 %vm1767_vm2, %v27498_v59  ;;  %v6539_v59 = vcombine.high %v6531_v37, %v6531_v37  ;;  %v7233_v14 = vrot.slane %v7219_v56, %v27333_v7  ;;  %v7235_v15 = vcombine.low %v6523_v51, %v6531_v37  ;;  %v6637_v37 = vrot.slane %v22612_v12, %v27333_v7 }
  0x69   : > { %24687 = vmatprep.mubr.msk.f32.mxu0 %vm27271_vm1, %v32793_v2  ;;  %v7286_v48 = vcombine.low %v6579_v11, %v6581_v27  ;;  %v7287_v49 = vcombine.low %v22640_v36, %v6596_v21  ;;  %v6621_v54 = vcombine.high %v6613_v34, %v6613_v34  ;;  %v6678_v56 = vrot.slane %v22615_v43, %v27333_v7  ;;  %v22642_v21 = vld.sshfl [vmem:[%s27330_s25 + $0x148] sm:$0x3 pattern:$0x76325410] }
  0x6a   : > { %v7236_v17 = vcombine.low %v6539_v59, %v6538_v57  ;;  %v27624_v58 = vcombine.low %v7226_v9, %v7233_v14  ;;  %v7243_v35 = vrot.slane %v7235_v15, %v27333_v7  ;;  %v7267_v57 = vrot.slane %v7253_v38, %v27333_v7  ;;  %v22616_v9 = vld [vmem:[%s27330_s25 + $0x158] sm:$0xff]  ;;  %v22619_v38 = vld [vmem:[%s27330_s25 + $0x170] sm:$0xff] }
  0x6b   : > { %v7277_v59 = vrot.slane %v7269_v40, %v27333_v7  ;;  %v7284_v60 = vrot.slane %v7270_v41, %v27333_v7  ;;  %v6622_v62 = vcombine.high %v6620_v42, %v6620_v42  ;;  %v6646_v3 = vcombine.high %v6644_v45, %v6644_v45 }
  0x6c   : > { %24688 = vmatmul.mubr.msk.f32.gmra.mrb[16].mxu0 %vm1767_vm2, %v27522_v30  ;;  %v6603_v30 = vrot.slane %v6589_v55, %v27333_v7  ;;  %v6645_v55 = vcombine.high %v6637_v37, %v6637_v37  ;;  %v6662_v4 = vcombine.high %v6654_v46, %v6654_v46  ;;  %v6663_v6 = vcombine.high %v6661_v47, %v6661_v47 }
  0x6d   : > { %24690 = vmatprep.mubr.msk.f32.mxu0 %vm27271_vm1, %v32793_v2  ;;  %v7294_v10 = vrot.slane %v7286_v48, %v27333_v7  ;;  %v7301_v11 = vrot.slane %v7287_v49, %v27333_v7  ;;  %v7320_v12 = vcombine.low %v6621_v54, %v6620_v42  ;;  %v6686_v15 = vcombine.high %v6678_v56, %v6678_v56 }
  0x6e   : > { %v6605_v33 = vcombine.high %v6603_v30, %v6603_v30  ;;  %v7303_v50 = vcombine.low %v6604_v32, %v6603_v30  ;;  %v7337_v13 = vcombine.low %v6637_v37, %v6645_v55  ;;  %v27658_v18 = vcombine.low %v7260_v44, %v7267_v57 }
  0x6f   : > { %v27660_v19 = vcombine.low %v7277_v59, %v7284_v60  ;;  %v7321_v20 = vcombine.low %v6622_v62, %v22641_v1  ;;  %v6688_v22 = vcombine.high %v22616_v9, %v22616_v9  ;;  %v7338_v24 = vcombine.low %v6644_v45, %v6646_v3  ;;  %v22622_v45 = vld [vmem:[%s27330_s25 + $0x188] sm:$0xff]  ;;  %v22643_v59 = vld.sshfl [vmem:[%s27330_s25 + $0x160] sm:$0x3 pattern:$0x76325410] }
  0x70   : > { %24691 = vmatmul.mubr.msk.f32.gmra.mrb[18].mxu0 %vm1767_vm2, %v27524_v31  ;;  %v7250_v31 = vrot.slane %v7236_v17, %v27333_v7  ;;  %v7304_v51 = vcombine.low %v6605_v33, %v6613_v34  ;;  %v7311_v30 = vrot.slane %v7303_v50, %v27333_v7  ;;  %v22618_v17 = vld [vmem:[%s27330_s25 + $0x168] sm:$0xff]  ;;  %v7354_v25 = vcombine.low %v6654_v46, %v6662_v4  ;;  %v22624_v50 = vld [vmem:[%s27330_s25 + $0x198] sm:$0xff] }
  0x71   : > { %24693 = vmatprep.mubr.msk.f32.mxu0 %vm27271_vm1, %v32793_v2  ;;  %v7355_v26 = vcombine.low %v6661_v47, %v6663_v6  ;;  %v6695_v27 = vrot.slane %v22616_v9, %v27333_v7  ;;  %v27668_v32 = vcombine.low %v7294_v10, %v7301_v11  ;;  %v7371_v36 = vcombine.low %v22642_v21, %v6678_v56  ;;  %v22625_v56 = vld [vmem:[%s27330_s25 + $0x1a0] sm:$0xff] }
  0x72   : > { %v27646_v63 = vcombine.low %v7243_v35, %v7250_v31  ;;  %v6719_v35 = vrot.slane %v22618_v17, %v27333_v7  ;;  %v7328_v31 = vrot.slane %v7320_v12, %v27333_v7  ;;  %v7335_v40 = vrot.slane %v7321_v20, %v27333_v7 }
  0x73   : > { %v6702_v41 = vrot.slane %v6688_v22, %v27333_v7  ;;  %v6712_v42 = vcombine.high %v22618_v17, %v22618_v17  ;;  %v6729_v44 = vcombine.high %v22619_v38, %v22619_v38  ;;  %v7352_v46 = vrot.slane %v7338_v24, %v27333_v7  ;;  %v22644_v22 = vld.sshfl [vmem:[%s27330_s25 + $0x178] sm:$0x3 pattern:$0x76325410] }
  0x74   : > { %24694 = vmatmul.mubr.msk.f32.gmra.mrb[20].mxu0 %vm1767_vm2, %v27531_v39  ;;  %v6671_v39 = vcombine.high %v22615_v43, %v22615_v43  ;;  %v22621_v43 = vld [vmem:[%s27330_s25 + $0x180] sm:$0xff]  ;;  %v7362_v47 = vrot.slane %v7354_v25, %v27333_v7  ;;  %v7369_v48 = vrot.slane %v7355_v26, %v27333_v7  ;;  %v6703_v49 = vcombine.high %v6695_v27, %v6695_v27 }
  0x75   : > { %24696 = vmatprep.mubr.msk.f32.mxu0 %vm27271_vm1, %v32793_v2  ;;  %v6704_v54 = vcombine.high %v6702_v41, %v6702_v41  ;;  %v6727_v55 = vcombine.high %v6719_v35, %v6719_v35  ;;  %v7379_v57 = vrot.slane %v7371_v36, %v27333_v7  ;;  %v6753_v60 = vcombine.high %v22621_v43, %v22621_v43 }
  0x76   : > { %v6685_v14 = vrot.slane %v6671_v39, %v27333_v7  ;;  %v6736_v39 = vrot.slane %v22619_v38, %v27333_v7  ;;  %v6770_v62 = vcombine.high %v22622_v45, %v22622_v45  ;;  %v27693_v1 = vcombine.low %v7328_v31, %v7335_v40 }
  0x77   : > { %v6726_v3 = vrot.slane %v6712_v42, %v27333_v7  ;;  %v6743_v4 = vrot.slane %v6729_v44, %v27333_v7  ;;  %v6794_v6 = vcombine.high %v22624_v50, %v22624_v50  ;;  %v27701_v10 = vcombine.low %v7362_v47, %v7369_v48 }
  0x78   : > { %24697 = vmatmul.mubr.msk.f32.gmra.mrb[26].mxu0 %vm1767_vm2, %v27558_v16  ;;  %v7318_v16 = vrot.slane %v7304_v51, %v27333_v7  ;;  %v6687_v34 = vcombine.high %v6685_v14, %v6685_v14  ;;  %v7372_v37 = vcombine.low %v6686_v15, %v6685_v14  ;;  %v7389_v11 = vcombine.low %v6703_v49, %v6702_v41 }
  0x79   : > { %24699 = vmatprep.mubr.msk.f32.mxu0 %vm27271_vm1, %v32793_v2  ;;  %v7405_v12 = vcombine.low %v6704_v54, %v22643_v59  ;;  %v6744_v14 = vcombine.high %v6736_v39, %v6736_v39  ;;  %v6760_v17 = vrot.slane %v22621_v43, %v27333_v7  ;;  %v6784_v20 = vrot.slane %v6770_v62, %v27333_v7  ;;  %v22628_v62 = vld [vmem:[%s27330_s25 + $0x1b8] sm:$0xff] }
  0x7a   : > { %v27670_v33 = vcombine.low %v7311_v30, %v7318_v16  ;;  %v7388_v51 = vcombine.low %v6687_v34, %v6695_v27  ;;  %v6811_v30 = vcombine.high %v22625_v56, %v22625_v56  ;;  %v6728_v21 = vcombine.high %v6726_v3, %v6726_v3 }
  0x7b   : > { %v6745_v24 = vcombine.high %v6743_v4, %v6743_v4  ;;  %v6801_v25 = vrot.slane %v22624_v50, %v27333_v7  ;;  %v6808_v26 = vrot.slane %v6794_v6, %v27333_v7  ;;  %v6768_v27 = vcombine.high %v6760_v17, %v6760_v17 }
  0x7c   : > { %24700 = vmatmul.mubr.msk.f32.gmra.mrb[28].mxu0 %vm1767_vm2, %v27560_v53  ;;  %v7345_v53 = vrot.slane %v7337_v13, %v27333_v7  ;;  %v7396_v16 = vrot.slane %v7388_v51, %v27333_v7  ;;  %v7406_v13 = vcombine.low %v6719_v35, %v6727_v55  ;;  %v6777_v34 = vrot.slane %v22622_v45, %v27333_v7  ;;  %v22645_v45 = vld.sshfl [vmem:[%s27330_s25 + $0x190] sm:$0x3 pattern:$0x76325410] }
  0x7d   : > { %24702 = vmatprep.mubr.msk.f32.mxu0 %vm27271_vm1, %v32793_v2  ;;  %v6818_v35 = vrot.slane %v22625_v56, %v27333_v7  ;;  %v6825_v31 = vrot.slane %v6811_v30, %v27333_v7  ;;  %v7403_v36 = vrot.slane %v7389_v11, %v27333_v7  ;;  %v7423_v40 = vcombine.low %v6736_v39, %v6744_v14  ;;  %v22691_v30 = vld [vmem:[%s27330_s25 + $0x19] sm:$0xff] }
  0x7e   : > { %v27699_v9 = vcombine.low %v7345_v53, %v7352_v46  ;;  %v22627_v53 = vld [vmem:[%s27330_s25 + $0x1b0] sm:$0xff]  ;;  %v7420_v38 = vrot.slane %v7406_v13, %v27333_v7  ;;  %v6785_v42 = vcombine.high %v6777_v34, %v6777_v34  ;;  %v6786_v43 = vcombine.high %v6784_v20, %v6784_v20 }
  0x7f   : > { %v7422_v44 = vcombine.low %v6726_v3, %v6728_v21  ;;  %v6809_v46 = vcombine.high %v6801_v25, %v6801_v25  ;;  %v6810_v47 = vcombine.high %v6808_v26, %v6808_v26  ;;  %v6835_v48 = vcombine.high %v22627_v53, %v22627_v53 }
  0x80   : > { %24703 = vmatmul.mubr.msk.f32.gmra.mrb[30].mxu0 %vm1767_vm2, %v27569_v28  ;;  %v7386_v28 = vrot.slane %v7372_v37, %v27333_v7  ;;  %v7413_v37 = vrot.slane %v7405_v12, %v27333_v7  ;;  %v7439_v49 = vcombine.low %v6743_v4, %v6745_v24  ;;  %v6826_v51 = vcombine.high %v6818_v35, %v6818_v35  ;;  %v22692_v24 = vld [vmem:[%s27330_s25 + $0x21] sm:$0xff] }
  0x81   : > { %24705 = vmatprep.mubr.msk.f32.mxu0 %vm27271_vm1, %v32793_v2  ;;  %v6827_v54 = vcombine.high %v6825_v31, %v6825_v31  ;;  %v27730_v55 = vcombine.low %v7396_v16, %v7403_v36  ;;  %v7437_v56 = vrot.slane %v7423_v40, %v27333_v7  ;;  %v7473_v59 = vcombine.low %v6785_v42, %v6784_v20 }
  0x82   : > { %v27706_v15 = vcombine.low %v7379_v57, %v7386_v28  ;;  %v27732_v39 = vcombine.low %v7413_v37, %v7420_v38  ;;  %v6842_v57 = vrot.slane %v22627_v53, %v27333_v7  ;;  %v7430_v3 = vrot.slane %v7422_v44, %v27333_v7 }
  0x83   : > { %v7490_v4 = vcombine.low %v6801_v25, %v6809_v46  ;;  %v7491_v6 = vcombine.low %v6808_v26, %v6810_v47  ;;  %v6849_v11 = vrot.slane %v6835_v48, %v27333_v7  ;;  %v7447_v16 = vrot.slane %v7439_v49, %v27333_v7 }
  0x84   : > { %24706 = vmatmul.mubr.msk.f32.gmra.mrb[32].mxu0 %vm1767_vm2, %v27571_v29  ;;  %v6767_v29 = vrot.slane %v6753_v60, %v27333_v7  ;;  %v7474_v60 = vcombine.low %v6786_v43, %v22645_v45  ;;  %v7507_v13 = vcombine.low %v6818_v35, %v6826_v51  ;;  %v7508_v14 = vcombine.low %v6825_v31, %v6827_v54  ;;  %v22695_v45 = vld [vmem:[%s27330_s25 + $0x39] sm:$0xff] }
  0x85   : > { %24708 = vmatprep.mubr.msk.f32.mxu0 %vm27271_vm1, %v32793_v2  ;;  %v6851_v20 = vcombine.high %v6849_v11, %v6849_v11  ;;  %v6852_v21 = vcombine.high %v22628_v62, %v22628_v62  ;;  %v7498_v35 = vrot.slane %v7490_v4, %v27333_v7  ;;  %v7505_v31 = vrot.slane %v7491_v6, %v27333_v7  ;;  %v22698_v6 = vld [vmem:[%s27330_s25 + $0x51] sm:$0xff] }
  0x86   : > { %v6769_v41 = vcombine.high %v6767_v29, %v6767_v29  ;;  %v7456_v50 = vcombine.low %v6768_v27, %v6767_v29  ;;  %v6850_v29 = vcombine.high %v6842_v57, %v6842_v57  ;;  %v7488_v26 = vrot.slane %v7474_v60, %v27333_v7 }
  0x87   : > { %v8070_v27 = vcombine.high %v22691_v30, %v22691_v30  ;;  %v7515_v37 = vrot.slane %v7507_v13, %v27333_v7  ;;  %v7522_v38 = vrot.slane %v7508_v14, %v27333_v7  ;;  %v8087_v40 = vcombine.high %v22692_v24, %v22692_v24 }
  0x88   : > { %24709 = vmatmul.mubr.msk.f32.gmra.mrb[34].mxu0 %vm1767_vm2, %v27592_v52  ;;  %v7440_v52 = vcombine.low %v22644_v22, %v6760_v17  ;;  %v7464_v12 = vrot.slane %v7456_v50, %v27333_v7  ;;  %v22646_v17 = vld.sshfl [vmem:[%s27330_s25 + $0x1a8] sm:$0x3 pattern:$0x76325410]  ;;  %v6859_v22 = vrot.slane %v22628_v62, %v27333_v7  ;;  %v6866_v42 = vrot.slane %v6852_v21, %v27333_v7 }
  0x89   : > { %24711 = vmatprep.mubr.msk.f32.mxu0 %vm27271_vm1, %v32793_v2  ;;  %v7524_v53 = vcombine.low %v22646_v17, %v6842_v57  ;;  %v8077_v47 = vrot.slane %v22691_v30, %v27333_v7  ;;  %v8084_v48 = vrot.slane %v8070_v27, %v27333_v7  ;;  %v27774_v49 = vcombine.low %v7498_v35, %v7505_v31  ;;  %v22700_v17 = vld [vmem:[%s27330_s25 + $0x61] sm:$0xff] }
  0x8a   : > { %v7454_v28 = vrot.slane %v7440_v52, %v27333_v7  ;;  %v22694_v52 = vld [vmem:[%s27330_s25 + $0x31] sm:$0xff]  ;;  %v6867_v43 = vcombine.high %v6859_v22, %v6859_v22  ;;  %v7541_v44 = vcombine.low %v6851_v20, %v6859_v22  ;;  %v8094_v51 = vrot.slane %v22692_v24, %v27333_v7  ;;  %v22647_v20 = vld.sshfl [vmem:[%s27330_s25 + $0x1c0] sm:$0x3 pattern:$0x76325410] }
  0x8b   : > { %v7532_v50 = vrot.slane %v7524_v53, %v27333_v7  ;;  %v8111_v54 = vcombine.high %v22694_v52, %v22694_v52  ;;  %v27781_v57 = vcombine.low %v7515_v37, %v7522_v38  ;;  %v8118_v4 = vrot.slane %v22694_v52, %v27333_v7 }
  0x8c   : > { %24712 = vmatmul.mubr.msk.f32.gmra.mrb[36].mxu0 %vm1767_vm2, %v27594_v61  ;;  %v7457_v61 = vcombine.low %v6769_v41, %v6777_v34  ;;  %v27753_v34 = vcombine.low %v7430_v3, %v7437_v56  ;;  %v27759_v36 = vcombine.low %v7447_v16, %v7454_v28  ;;  %v7525_v41 = vcombine.low %v6850_v29, %v6849_v11  ;;  %v22697_v56 = vld [vmem:[%s27330_s25 + $0x49] sm:$0xff] }
  0x8d   : > { %24714 = vmatprep.mubr.msk.f32.mxu0 %vm27271_vm1, %v32793_v2  ;;  %v8101_v28 = vrot.slane %v8087_v40, %v27333_v7  ;;  %v7542_v62 = vcombine.low %v6867_v43, %v6866_v42  ;;  %v7549_v3 = vrot.slane %v7541_v44, %v27333_v7  ;;  %v8085_v11 = vcombine.high %v8077_v47, %v8077_v47 }
  0x8e   : > { %v7471_v25 = vrot.slane %v7457_v61, %v27333_v7  ;;  %v8128_v61 = vcombine.high %v22695_v45, %v22695_v45  ;;  %v7539_v60 = vrot.slane %v7525_v41, %v27333_v7  ;;  %v8086_v30 = vcombine.high %v8084_v48, %v8084_v48  ;;  %v22746_v41 = vld.sshfl [vmem:[%s27330_s25 + $0x41] sm:$0x3 pattern:$0x76325410] }
  0x8f   : > { %v8135_v16 = vrot.slane %v22695_v45, %v27333_v7  ;;  %v8125_v13 = vrot.slane %v8111_v54, %v27333_v7  ;;  %v8159_v14 = vrot.slane %v22697_v56, %v27333_v7  ;;  %v8169_v29 = vcombine.high %v22698_v6, %v22698_v6 }
  0x90   : > { %24715 = vmatmul.mubr.msk.f32.gmra.mrb[38].mxu0 %vm1767_vm2, %v27600_v0  ;;  %v7481_v0 = vrot.slane %v7473_v59, %v27333_v7  ;;  %v27768_v46 = vcombine.low %v7464_v12, %v7471_v25  ;;  %v8152_v59 = vcombine.high %v22697_v56, %v22697_v56  ;;  %v8102_v12 = vcombine.high %v8094_v51, %v8094_v51 }
  0x91   : > { %24717 = vmatprep.mubr.msk.f32.mxu0 %vm27271_vm1, %v32793_v2  ;;  %v8103_v21 = vcombine.high %v8101_v28, %v8101_v28  ;;  %v8142_v22 = vrot.slane %v8128_v61, %v27333_v7  ;;  %v8176_v25 = vrot.slane %v22698_v6, %v27333_v7  ;;  %v8126_v27 = vcombine.high %v8118_v4, %v8118_v4 }
  0x92   : > { %v8166_v24 = vrot.slane %v8152_v59, %v27333_v7  ;;  %v8127_v35 = vcombine.high %v8125_v13, %v8125_v13  ;;  %v8810_v31 = vcombine.low %v8077_v47, %v8085_v11  ;;  %v8143_v53 = vcombine.high %v8135_v16, %v8135_v16  ;;  %v22701_v11 = vld [vmem:[%s27330_s25 + $0x69] sm:$0xff] }
  0x93   : > { %v8144_v37 = vcombine.high %v8142_v22, %v8142_v22  ;;  %v8193_v38 = vcombine.high %v22700_v17, %v22700_v17  ;;  %v8811_v52 = vcombine.low %v8084_v48, %v8086_v30  ;;  %v8183_v43 = vrot.slane %v8169_v29, %v27333_v7 }
  0x94   : > { %24718 = vmatmul.mubr.msk.f32.gmra.mrb[40].mxu0 %vm1767_vm2, %v27607_v8  ;;  %v27770_v8 = vcombine.low %v7481_v0, %v7488_v26  ;;  %v27802_v0 = vcombine.low %v7532_v50, %v7539_v60  ;;  %v7556_v26 = vrot.slane %v7542_v62, %v27333_v7  ;;  %v8827_v44 = vcombine.low %v8094_v51, %v8102_v12  ;;  %v22747_v12 = vld.sshfl [vmem:[%s27330_s25 + $0x59] sm:$0x3 pattern:$0x76325410] }
  0x95   : > { %24720 = vmatprep.mubr.msk.f32.mxu0 %vm27271_vm1, %v32793_v2  ;;  %v8828_v45 = vcombine.low %v8101_v28, %v8103_v21  ;;  %v8168_v50 = vcombine.high %v8166_v24, %v8166_v24  ;;  %v8184_v54 = vcombine.high %v8176_v25, %v8176_v25  ;;  %v8845_v61 = vcombine.low %v8126_v27, %v8125_v13 }
  0x96   : > { %v27814_v47 = vcombine.low %v7549_v3, %v7556_v26  ;;  %v8861_v48 = vcombine.low %v8127_v35, %v8135_v16  ;;  %v8818_v59 = vrot.slane %v8810_v31, %v27333_v7  ;;  %v8862_v60 = vcombine.low %v8143_v53, %v8142_v22  ;;  %v22704_v31 = vld [vmem:[%s27330_s25 + $0x81] sm:$0xff] }
  0x97   : > { %v8878_v62 = vcombine.low %v8144_v37, %v22746_v41  ;;  %v8825_v51 = vrot.slane %v8811_v52, %v27333_v7  ;;  %v8185_v6 = vcombine.high %v8183_v43, %v8183_v43  ;;  %v8835_v3 = vrot.slane %v8827_v44, %v27333_v7 }
  0x98   : > { %24721 = vmatmul.mubr.msk.f32.gmra.mrb[42].mxu0 %vm1767_vm2, %v27619_v23  ;;  %v6868_v23 = vcombine.high %v6866_v42, %v6866_v42  ;;  %v8167_v42 = vcombine.high %v8159_v14, %v8159_v14  ;;  %v8895_v30 = vcombine.low %v8166_v24, %v8168_v50  ;;  %v8896_v16 = vcombine.low %v8176_v25, %v8184_v54  ;;  %v22706_v54 = vld [vmem:[%s27330_s25 + $0x91] sm:$0xff] }
  0x99   : > { %24723 = vmatprep.mubr.msk.f32.mxu0 %vm27271_vm1, %v32793_v2  ;;  %v8886_v21 = vrot.slane %v8878_v62, %v27333_v7  ;;  %v8217_v24 = vrot.slane %v22701_v11, %v27333_v7  ;;  %v8912_v26 = vcombine.low %v8183_v43, %v8185_v6  ;;  %v8210_v35 = vcombine.high %v22701_v11, %v22701_v11  ;;  %v22709_v6 = vld [vmem:[%s27330_s25 + $0xa9] sm:$0xff] }
  0x9a   : > { %v27806_v40 = vcombine.low %v6868_v23, %v22647_v20  ;;  %v8879_v28 = vcombine.low %v8159_v14, %v8167_v42  ;;  %v8200_v23 = vrot.slane %v22700_v17, %v27333_v7  ;;  %v8859_v14 = vrot.slane %v8845_v61, %v27333_v7  ;;  %v22703_v20 = vld [vmem:[%s27330_s25 + $0x79] sm:$0xff] }
  0x9b   : > { %v8869_v17 = vrot.slane %v8861_v48, %v27333_v7  ;;  %v8903_v53 = vrot.slane %v8895_v30, %v27333_v7  ;;  %v8910_v37 = vrot.slane %v8896_v16, %v27333_v7  ;;  %v27845_v52 = vcombine.low %v8818_v59, %v8825_v51 }
  0x9c   : > { %24724 = vmatmul.mubr.msk.f32.gmra.mrb[44].mxu0 %vm1767_vm2, %v27624_v58  ;;  %v22745_v58 = vld.sshfl [vmem:[%s27330_s25 + $0x29] sm:$0x3 pattern:$0x76325410]  ;;  %v8208_v29 = vcombine.high %v8200_v23, %v8200_v23  ;;  %v8893_v25 = vrot.slane %v8879_v28, %v27333_v7  ;;  %v8913_v27 = vcombine.low %v22747_v12, %v8200_v23  ;;  %v8251_v50 = vcombine.high %v22704_v31, %v22704_v31 }
  0x9d   : > { %24726 = vmatprep.mubr.msk.f32.mxu0 %vm27271_vm1, %v32793_v2  ;;  %v8844_v56 = vcombine.low %v22745_v58, %v8118_v4  ;;  %v8842_v4 = vrot.slane %v8828_v45, %v27333_v7  ;;  %v8241_v45 = vrot.slane %v22703_v20, %v27333_v7  ;;  %v8920_v48 = vrot.slane %v8912_v26, %v27333_v7 }
  0x9e   : > { %v27856_v61 = vcombine.low %v8886_v21, %v8893_v25  ;;  %v8927_v59 = vrot.slane %v8913_v27, %v27333_v7  ;;  %v27863_v62 = vcombine.low %v8903_v53, %v8910_v37  ;;  %v8258_v28 = vrot.slane %v22704_v31, %v27333_v7  ;;  %v22748_v25 = vld.sshfl [vmem:[%s27330_s25 + $0x71] sm:$0x3 pattern:$0x76325410] }
  0x9f   : > { %v8852_v13 = vrot.slane %v8844_v56, %v27333_v7  ;;  %v27847_v41 = vcombine.low %v8835_v3, %v8842_v4  ;;  %v22707_v56 = vld [vmem:[%s27330_s25 + $0x99] sm:$0xff]  ;;  %v8275_v11 = vcombine.high %v22706_v54, %v22706_v54  ;;  %v8316_v4 = vcombine.high %v22709_v6, %v22709_v6 }
  0xa0   : > { %24727 = vmatmul.mubr.msk.f32.gmra.mrb[46].mxu0 %vm1767_vm2, %v27646_v63  ;;  %v8207_v63 = vrot.slane %v8193_v38, %v27333_v7  ;;  %v8234_v38 = vcombine.high %v22703_v20, %v22703_v20  ;;  %v8292_v3 = vcombine.high %v22707_v56, %v22707_v56  ;;  %v8265_v16 = vrot.slane %v8251_v50, %v27333_v7 }
  0xa1   : > { %24729 = vmatprep.mubr.msk.f32.mxu0 %vm27271_vm1, %v32793_v2  ;;  %v27849_v42 = vcombine.low %v8852_v13, %v8859_v14  ;;  %v8282_v12 = vrot.slane %v22706_v54, %v27333_v7  ;;  %v22710_v13 = vld [vmem:[%s27330_s25 + $0xb1] sm:$0xff]  ;;  %v27875_v14 = vcombine.low %v8920_v48, %v8927_v59  ;;  %v8323_v20 = vrot.slane %v22709_v6, %v27333_v7 }
  0xa2   : > { %v8209_v22 = vcombine.high %v8207_v63, %v8207_v63  ;;  %v8929_v43 = vcombine.low %v8208_v29, %v8207_v63  ;;  %v8225_v63 = vcombine.high %v8217_v24, %v8217_v24  ;;  %v8248_v51 = vrot.slane %v8234_v38, %v27333_v7 }
  0xa3   : > { %v8299_v29 = vrot.slane %v22707_v56, %v27333_v7  ;;  %v8289_v26 = vrot.slane %v8275_v11, %v27333_v7  ;;  %v8306_v27 = vrot.slane %v8292_v3, %v27333_v7  ;;  %v8340_v31 = vrot.slane %v22710_v13, %v27333_v7 }
  0xa4   : > { %24730 = vmatmul.mubr.msk.f32.gmra.mrb[48].mxu0 %vm1767_vm2, %v27658_v18  ;;  %v8876_v18 = vrot.slane %v8862_v60, %v27333_v7  ;;  %v8930_v44 = vcombine.low %v8209_v22, %v8217_v24  ;;  %v8224_v60 = vrot.slane %v8210_v35, %v27333_v7  ;;  %v8937_v23 = vrot.slane %v8929_v43, %v27333_v7 }
  0xa5   : > { %24732 = vmatprep.mubr.msk.f32.mxu0 %vm27271_vm1, %v32793_v2  ;;  %v8250_v21 = vcombine.high %v8248_v51, %v8248_v51  ;;  %v8266_v22 = vcombine.high %v8258_v28, %v8258_v28  ;;  %v8333_v24 = vcombine.high %v22710_v13, %v22710_v13  ;;  %v8330_v35 = vrot.slane %v8316_v4, %v27333_v7 }
  0xa6   : > { %v8944_v30 = vrot.slane %v8930_v44, %v27333_v7  ;;  %v8267_v38 = vcombine.high %v8265_v16, %v8265_v16  ;;  %v8290_v43 = vcombine.high %v8282_v12, %v8282_v12  ;;  %v22749_v44 = vld.sshfl [vmem:[%s27330_s25 + $0x89] sm:$0x3 pattern:$0x76325410]  ;;  %v8291_v50 = vcombine.high %v8289_v26, %v8289_v26 }
  0xa7   : > { %v8307_v54 = vcombine.high %v8299_v29, %v8299_v29  ;;  %v8308_v56 = vcombine.high %v8306_v27, %v8306_v27  ;;  %v8331_v48 = vcombine.high %v8323_v20, %v8323_v20  ;;  %v8347_v6 = vrot.slane %v8333_v24, %v27333_v7 }
  0xa8   : > { %24733 = vmatmul.mubr.msk.f32.gmra.mrb[50].mxu0 %vm1767_vm2, %v27660_v19  ;;  %v27851_v19 = vcombine.low %v8869_v17, %v8876_v18  ;;  %v8226_v17 = vcombine.high %v8224_v60, %v8224_v60  ;;  %v27881_v18 = vcombine.low %v8225_v63, %v8224_v60  ;;  %v27891_v53 = vcombine.low %v8937_v23, %v8944_v30  ;;  %v22750_v63 = vld.sshfl [vmem:[%s27330_s25 + $0xa1] sm:$0x3 pattern:$0x76325410] }
  0xa9   : > { %24735 = vmatprep.mubr.msk.f32.mxu0 %vm27271_vm1, %v32793_v2  ;;  %v8980_v11 = vcombine.low %v8258_v28, %v8266_v22  ;;  %v8332_v3 = vcombine.high %v8330_v35, %v8330_v35  ;;  %v8348_v4 = vcombine.high %v8340_v31, %v8340_v31  ;;  %v8997_v13 = vcombine.low %v22749_v44, %v8282_v12  ;;  %v22751_v22 = vld.sshfl [vmem:[%s27330_s25 + $0xb9] sm:$0x3 pattern:$0x76325410] }
  0xaa   : > { %v8947_v59 = vcombine.low %v8226_v17, %v22748_v25  ;;  %v8954_v60 = vrot.slane %v27881_v18, %v27333_v7  ;;  %v9014_v17 = vcombine.low %v8291_v50, %v8299_v29  ;;  %v9015_v18 = vcombine.low %v8307_v54, %v8306_v27 }
  0xab   : > { %v9031_v25 = vcombine.low %v8308_v56, %v22750_v63  ;;  %v9032_v58 = vcombine.low %v8323_v20, %v8331_v48  ;;  %v8988_v12 = vrot.slane %v8980_v11, %v27333_v7  ;;  %v9048_v29 = vcombine.low %v8330_v35, %v8332_v3  ;;  %v22715_v35 = vld [vmem:[%s27330_s25 + $0xd9] sm:$0xff] }
  0xac   : > { %24736 = vmatmul.mubr.msk.f32.gmra.mrb[52].mxu0 %vm1767_vm2, %v27668_v32  ;;  %v8249_v32 = vcombine.high %v8241_v45, %v8241_v45  ;;  %v8961_v24 = vrot.slane %v8947_v59, %v27333_v7  ;;  %v9049_v20 = vcombine.low %v8340_v31, %v8348_v4  ;;  %v9005_v27 = vrot.slane %v8997_v13, %v27333_v7 }
  0xad   : > { %24738 = vmatprep.mubr.msk.f32.mxu0 %vm27271_vm1, %v32793_v2  ;;  %v9039_v44 = vrot.slane %v9031_v25, %v27333_v7  ;;  %v9046_v50 = vrot.slane %v9032_v58, %v27333_v7  ;;  %v9056_v63 = vrot.slane %v9048_v29, %v27333_v7  ;;  %v8405_v3 = vrot.slane %v22715_v35, %v27333_v7 }
  0xae   : > { %v8963_v37 = vcombine.low %v8241_v45, %v8249_v32  ;;  %v8964_v45 = vcombine.low %v8248_v51, %v8250_v21  ;;  %v8981_v32 = vcombine.low %v8265_v16, %v8267_v38  ;;  %v8349_v51 = vcombine.high %v8347_v6, %v8347_v6 }
  0xaf   : > { %v9022_v38 = vrot.slane %v9014_v17, %v27333_v7  ;;  %v27927_v59 = vcombine.low %v8954_v60, %v8961_v24  ;;  %v27941_v13 = vcombine.low %v9039_v44, %v9046_v50  ;;  %v233_v24 = vld [vmem:[%s27330_s25 + $0x8] sm:$0xff]  ;;  %v235_v50 = vld [vmem:[%s27330_s25 + $0x18] sm:$0xff] }
  0xb0   : > { %24739 = vmatmul.mubr.msk.f32.gmra.mrb[54].mxu0 %vm1767_vm2, %v27670_v33  ;;  %v22712_v33 = vld [vmem:[%s27330_s25 + $0xc1] sm:$0xff]  ;;  %v8971_v30 = vrot.slane %v8963_v37, %v27333_v7  ;;  %v8978_v16 = vrot.slane %v8964_v45, %v27333_v7  ;;  %v9065_v31 = vcombine.low %v8347_v6, %v8349_v51  ;;  %v8398_v6 = vcombine.high %v22715_v35, %v22715_v35 }
  0xb1   : > { %24741 = vmatprep.mubr.msk.f32.mxu0 %vm27271_vm1, %v32793_v2  ;;  %v8357_v23 = vcombine.high %v22712_v33, %v22712_v33  ;;  %v8364_v28 = vrot.slane %v22712_v33, %v27333_v7  ;;  %v232_v45 = vld [vmem:[%s27330_s25] sm:$0xff]  ;;  %v364_v44 = vrot.slane %v233_v24, %v27333_v7 }
  0xb2   : > { %v27932_v11 = vcombine.low %v8971_v30, %v8978_v16  ;;  %v340_v25 = vcombine.high %v232_v45, %v232_v45  ;;  %v347_v16 = vrot.slane %v232_v45, %v27333_v7  ;;  %v8412_v29 = vrot.slane %v8398_v6, %v27333_v7 }
  0xb3   : > { %v8371_v21 = vrot.slane %v8357_v23, %v27333_v7  ;;  %v8372_v37 = vcombine.high %v8364_v28, %v8364_v28  ;;  %v9066_v54 = vcombine.low %v22751_v22, %v8364_v28  ;;  %v9063_v23 = vrot.slane %v9049_v20, %v27333_v7 }
  0xb4   : > { %24742 = vmatmul.mubr.msk.f32.gmra.mrb[56].mxu0 %vm1767_vm2, %v27693_v1  ;;  %v8998_v1 = vcombine.low %v8290_v43, %v8289_v26  ;;  %v22713_v26 = vld [vmem:[%s27330_s25 + $0xc9] sm:$0xff]  ;;  %v9029_v43 = vrot.slane %v9015_v18, %v27333_v7  ;;  %v22716_v18 = vld [vmem:[%s27330_s25 + $0xe1] sm:$0xff]  ;;  %v8413_v20 = vcombine.high %v8405_v3, %v8405_v3  ;;  %v354_v22 = vrot.slane %v340_v25, %v27333_v7 }
  0xb5   : > { %24744 = vmatprep.mubr.msk.f32.mxu0 %vm27271_vm1, %v32793_v2  ;;  %v8373_v56 = vcombine.high %v8371_v21, %v8371_v21  ;;  %v8381_v48 = vrot.slane %v22713_v26, %v27333_v7  ;;  %v8374_v58 = vcombine.high %v22713_v26, %v22713_v26  ;;  %v9080_v30 = vrot.slane %v9066_v54, %v27333_v7 }
  0xb6   : > { %v9012_v33 = vrot.slane %v8998_v1, %v27333_v7  ;;  %v27939_v60 = vcombine.low %v9022_v38, %v9029_v43  ;;  %v9073_v1 = vrot.slane %v9065_v31, %v27333_v7  ;;  %v27951_v51 = vcombine.low %v9056_v63, %v9063_v23 }
  0xb7   : > { %v9083_v17 = vcombine.low %v8373_v56, %v8381_v48  ;;  %v8388_v28 = vrot.slane %v8374_v58, %v27333_v7  ;;  %v8415_v26 = vcombine.high %v22716_v18, %v22716_v18  ;;  %v356_v43 = vcombine.high %v354_v22, %v354_v22 }
  0xb8   : > { %24745 = vmatmul.mubr.msk.f32.gmra.mrb[58].mxu0 %vm1767_vm2, %v27699_v9  ;;  %v8995_v9 = vrot.slane %v8981_v32, %v27333_v7  ;;  %v27937_v32 = vcombine.low %v9005_v27, %v9012_v33  ;;  %v355_v27 = vcombine.high %v347_v16, %v347_v16  ;;  %v357_v33 = vcombine.high %v233_v24, %v233_v24  ;;  %v22394_v24 = vld.sshfl [vmem:[%s27330_s25 + $0x10] sm:$0x3 pattern:$0x76325410] }
  0xb9   : > { %24747 = vmatprep.mubr.msk.f32.mxu0 %vm27271_vm1, %v32793_v2  ;;  %v9097_v38 = vrot.slane %v9083_v17, %v27333_v7  ;;  %v8390_v35 = vcombine.high %v8388_v28, %v8388_v28  ;;  %v27977_v63 = vcombine.low %v8405_v3, %v8413_v20  ;;  %v1080_v23 = vcombine.low %v354_v22, %v356_v43 }
  0xba   : > { %v27935_v4 = vcombine.low %v8988_v12, %v8995_v9  ;;  %v8422_v9 = vrot.slane %v22716_v18, %v27333_v7  ;;  %v1079_v54 = vcombine.low %v347_v16, %v355_v27  ;;  %v371_v56 = vrot.slane %v357_v33, %v27333_v7  ;;  %v22719_v27 = vld [vmem:[%s27330_s25 + $0xf9] sm:$0xff] }
  0xbb   : > { %v372_v58 = vcombine.high %v364_v44, %v364_v44  ;;  %v8429_v45 = vrot.slane %v8415_v26, %v27333_v7  ;;  %v1094_v25 = vrot.slane %v1080_v23, %v27333_v7  ;;  %v28021_v23 = vld [vmem:[%s27330_s25 + $0x109] sm:$0xff] }
  0xbc   : > { %24748 = vmatmul.mubr.msk.f32.gmra.mrb[60].mxu0 %vm1767_vm2, %v27701_v10  ;;  %v9082_v10 = vcombine.low %v8372_v37, %v8371_v21  ;;  %v8389_v21 = vcombine.high %v8381_v48, %v8381_v48  ;;  %v27966_v37 = vcombine.low %v9073_v1, %v9080_v30  ;;  %v8414_v48 = vcombine.high %v8412_v29, %v8412_v29 }
  0xbd   : > { %24750 = vmatprep.mubr.msk.f32.mxu0 %vm27271_vm1, %v32793_v2  ;;  %v1087_v6 = vrot.slane %v1079_v54, %v27333_v7  ;;  %v373_v1 = vcombine.high %v371_v56, %v371_v56  ;;  %v381_v30 = vcombine.high %v235_v50, %v235_v50  ;;  %v8430_v18 = vcombine.high %v8422_v9, %v8422_v9 }
  0xbe   : > { %v9090_v12 = vrot.slane %v9082_v10, %v27333_v7  ;;  %v27973_v31 = vcombine.low %v8389_v21, %v8388_v28  ;;  %v22718_v10 = vld [vmem:[%s27330_s25 + $0xf1] sm:$0xff]  ;;  %v1096_v3 = vcombine.low %v364_v44, %v372_v58  ;;  %v27997_v26 = vcombine.low %v8412_v29, %v8414_v48 }
  0xbf   : > { %v1097_v21 = vcombine.low %v371_v56, %v373_v1  ;;  %v395_v16 = vrot.slane %v381_v30, %v27333_v7  ;;  %v1095_v20 = vcombine.low %v1087_v6, %v1094_v25  ;;  %v9124_v44 = vrot.slane %v27977_v63, %v27333_v7 }
  0xc0   : > { %24751 = vmatmul.mubr.msk.f32.gmra.mrb[62].mxu0 %vm1767_vm2, %v27706_v15  ;;  %v1078_v15 = vld [vmem:[%s32788_s1] sm:$0x7]  ;;  %v27984_v17 = vcombine.low %v9090_v12, %v9097_v38  ;;  %v8439_v12 = vcombine.high %v22718_v10, %v22718_v10  ;;  %v1104_v22 = vrot.slane %v1096_v3, %v27333_v7  ;;  %v28016_v56 = vrot.slane %v22718_v10, %v27333_v7  ;;  %v238_v3 = vld [vmem:[%s27330_s25 + $0x30] sm:$0xff] }
  0xc1   : > { %24753 = vmatprep.mubr.msk.f32.mxu0 %vm27271_vm1, %v32793_v2  ;;  %24287 = vmatpush3.msk.msra.mxu1 %vm1850_vm0, %v1078_v15  ;;  %v388_v15 = vrot.slane %v235_v50, %v27333_v7  ;;  %v1111_v33 = vrot.slane %v1097_v21, %v27333_v7  ;;  %v8431_v50 = vcombine.high %v8429_v45, %v8429_v45 }
  0xc2   : > { %24411 = vmatprep.subr.mxu1 %v32793_v2  ;;  %24289 = vmatmul.mubr.msk.f32.vlgmr.msra.gmra.mrb[0].mxu1 %vm1767_vm2, %v1095_v20  ;;  %v397_v6 = vcombine.high %v395_v16, %v395_v16  ;;  %v9131_v10 = vrot.slane %v27997_v26, %v27333_v7  ;;  %v8463_v25 = vrot.slane %v22719_v27, %v27333_v7  ;;  %v22753_v20 = vld.sshfl [vmem:[%s27330_s25 + $0xe9] sm:$0x3 pattern:$0x76325410] }
  0xc3   : > { %v396_v38 = vcombine.high %v388_v15, %v388_v15  ;;  %v1113_v43 = vcombine.low %v22394_v24, %v388_v15  ;;  %24291 = vmatprep.mubr.msk.f32.mxu1 %vm27271_vm1, %v32793_v2  ;;  %v1112_v54 = vcombine.low %v1104_v22, %v1111_v33  ;;  %v8487_v15 = vrot.slane %v28021_v23, %v27333_v7 }
  0xc4   : > { %24754 = vmatmul.mubr.msk.f32.gmra.mrb[64].mxu0 %vm1767_vm2, %v27730_v55  ;;  %v22752_v55 = vld.sshfl [vmem:[%s27330_s25 + $0xd1] sm:$0x3 pattern:$0x76325410] }
  0xc5   : > { %24756 = vmatprep.mubr.msk.f32.mxu0 %vm27271_vm1, %v32793_v2  ;;  %v27990_v28 = vcombine.low %v8390_v35, %v22752_v55  ;;  %v28005_v35 = vcombine.low %v8422_v9, %v8430_v18  ;;  %v8453_v9 = vrot.slane %v8439_v12, %v27333_v7  ;;  %v8456_v55 = vcombine.high %v22719_v27, %v22719_v27  ;;  %v22395_v12 = vld.sshfl [vmem:[%s27330_s25 + $0x28] sm:$0x3 pattern:$0x76325410] }
  0xc6   : > { %v1121_v48 = vrot.slane %v1113_v43, %v27333_v7  ;;  %v28029_v18 = vcombine.low %v8429_v45, %v8431_v50  ;;  %24292 = vmatmul.mubr.msk.f32.gmra.mrb[2].mxu1 %vm1767_vm2, %v1112_v54  ;;  %v8454_v45 = vcombine.high %v28016_v56, %v28016_v56  ;;  %v8471_v50 = vcombine.high %v8463_v25, %v8463_v25 }
  0xc7   : > { %v9114_v29 = vrot.slane %v27990_v28, %v27333_v7  ;;  %24294 = vmatprep.mubr.msk.f32.mxu1 %vm27271_vm1, %v32793_v2  ;;  %v8455_v22 = vcombine.high %v8453_v9, %v8453_v9  ;;  %v8470_v43 = vrot.slane %v8456_v55, %v27333_v7  ;;  %v32893_v63 = vrot.slane %v28005_v35, %v27333_v7 }
  0xc8   : > { %24757 = vmatmul.mubr.msk.f32.gmra.mrb[66].mxu0 %vm1767_vm2, %v27732_v39  ;;  %v9107_v39 = vrot.slane %v27973_v31, %v27333_v7  ;;  %v236_v31 = vld [vmem:[%s27330_s25 + $0x20] sm:$0xff] }
  0xc9   : > { %24759 = vmatprep.mubr.msk.f32.mxu0 %vm27271_vm1, %v32793_v2  ;;  %v398_v1 = vcombine.high %v236_v31, %v236_v31  ;;  %v405_v30 = vrot.slane %v236_v31, %v27333_v7  ;;  %v8472_v55 = vcombine.high %v8470_v43, %v8470_v43 }
  0xcb   : > { %v413_v28 = vcombine.high %v405_v30, %v405_v30 }
  0xcc   : > { %24760 = vmatmul.mubr.msk.f32.gmra.mrb[68].mxu0 %vm1767_vm2, %v27753_v34  ;;  %v1114_v34 = vcombine.low %v396_v38, %v395_v16  ;;  %v1130_v16 = vcombine.low %v397_v6, %v405_v30  ;;  %v429_v38 = vrot.slane %v238_v3, %v27333_v7  ;;  %v8495_v6 = vcombine.high %v8487_v15, %v8487_v15  ;;  %v239_v30 = vld [vmem:[%s27330_s25 + $0x38] sm:$0xff] }
  0xcd   : > { %24762 = vmatprep.mubr.msk.f32.mxu0 %vm27271_vm1, %v32793_v2 }
  0xce   : > { %v1128_v58 = vrot.slane %v1114_v34, %v27333_v7  ;;  %v1138_v31 = vrot.slane %v1130_v16, %v27333_v7  ;;  %v437_v34 = vcombine.high %v429_v38, %v429_v38 }
  0xd0   : > { %24763 = vmatmul.mubr.msk.f32.gmra.mrb[70].mxu0 %vm1767_vm2, %v27759_v36  ;;  %v1129_v24 = vcombine.low %v1121_v48, %v1128_v58  ;;  %v412_v36 = vrot.slane %v398_v1, %v27333_v7  ;;  %v28058_v58 = vcombine.low %v9107_v39, %v9114_v29  ;;  %v22722_v1 = vld [vmem:[%s27330_s25 + $0x111] sm:$0xff]  ;;  %v1148_v16 = vcombine.low %v429_v38, %v437_v34 }
  0xd1   : > { %24765 = vmatprep.mubr.msk.f32.mxu0 %vm27271_vm1, %v32793_v2  ;;  %v9167_v39 = vcombine.low %v8455_v22, %v8463_v25  ;;  %v9168_v29 = vcombine.low %v8471_v50, %v8470_v43  ;;  %v241_v43 = vld [vmem:[%s27330_s25 + $0x48] sm:$0xff]  ;;  %v8497_v34 = vcombine.high %v22722_v1, %v22722_v1 }
  0xd2   : > { %v1131_v27 = vcombine.low %v413_v28, %v412_v36  ;;  %v414_v33 = vcombine.high %v412_v36, %v412_v36  ;;  %24295 = vmatmul.mubr.msk.f32.gmra.mrb[4].mxu1 %vm1767_vm2, %v1129_v24  ;;  %v22754_v24 = vld.sshfl [vmem:[%s27330_s25 + $0x101] sm:$0x3 pattern:$0x76325410]  ;;  %v8480_v36 = vcombine.high %v28021_v23, %v28021_v23  ;;  %v1162_v23 = vrot.slane %v1148_v16, %v27333_v7 }
  0xd3   : > { %24297 = vmatprep.mubr.msk.f32.mxu1 %vm27271_vm1, %v32793_v2  ;;  %v9175_v50 = vrot.slane %v9167_v39, %v27333_v7 }
  0xd4   : > { %24766 = vmatmul.mubr.msk.f32.gmra.mrb[72].mxu0 %vm1767_vm2, %v27768_v46  ;;  %v1145_v54 = vrot.slane %v1131_v27, %v27333_v7  ;;  %v1147_v48 = vcombine.low %v414_v33, %v22395_v12  ;;  %v9150_v46 = vcombine.low %v22753_v20, %v28016_v56  ;;  %v9151_v12 = vcombine.low %v8454_v45, %v8453_v9 }
  0xd5   : > { %24768 = vmatprep.mubr.msk.f32.mxu0 %vm27271_vm1, %v32793_v2  ;;  %v422_v56 = vcombine.high %v238_v3, %v238_v3  ;;  %v8504_v20 = vrot.slane %v22722_v1, %v27333_v7  ;;  %v446_v27 = vrot.slane %v239_v30, %v27333_v7  ;;  %v9148_v33 = vrot.slane %v28029_v18, %v27333_v7 }
  0xd6   : > { %v1146_v28 = vcombine.low %v1138_v31, %v1145_v54  ;;  %v1155_v21 = vrot.slane %v1147_v48, %v27333_v7  ;;  %v9184_v9 = vcombine.low %v8472_v55, %v22754_v24  ;;  %v9185_v3 = vcombine.low %v8487_v15, %v8495_v6  ;;  %v22396_v48 = vld.sshfl [vmem:[%s27330_s25 + $0x40] sm:$0x3 pattern:$0x76325410] }
  0xd7   : > { %v436_v25 = vrot.slane %v422_v56, %v27333_v7  ;;  %v8494_v45 = vrot.slane %v8480_v36, %v27333_v7  ;;  %v454_v38 = vcombine.high %v446_v27, %v446_v27  ;;  %v9165_v18 = vrot.slane %v9151_v12, %v27333_v7  ;;  %v242_v56 = vld [vmem:[%s27330_s25 + $0x50] sm:$0xff] }
  0xd8   : > { %24769 = vmatmul.mubr.msk.f32.gmra.mrb[74].mxu0 %vm1767_vm2, %v27770_v8  ;;  %24298 = vmatmul.mubr.msk.f32.gmra.mrb[6].mxu1 %vm1767_vm2, %v1146_v28  ;;  %v9158_v8 = vrot.slane %v9150_v46, %v27333_v7  ;;  %v1163_v22 = vcombine.low %v1155_v21, %v1162_v23  ;;  %v9182_v31 = vrot.slane %v9168_v29, %v27333_v7  ;;  %v22724_v28 = vld [vmem:[%s27330_s25 + $0x121] sm:$0xff] }
  0xd9   : > { %24771 = vmatprep.mubr.msk.f32.mxu0 %vm27271_vm1, %v32793_v2  ;;  %24300 = vmatprep.mubr.msk.f32.mxu1 %vm27271_vm1, %v32793_v2  ;;  %v438_v54 = vcombine.high %v436_v25, %v436_v25  ;;  %v8512_v15 = vcombine.high %v8504_v20, %v8504_v20  ;;  %v1165_v21 = vcombine.low %v446_v27, %v454_v38 }
  0xda   : > { %v439_v55 = vcombine.high %v239_v30, %v239_v30  ;;  %v470_v6 = vrot.slane %v241_v43, %v27333_v7  ;;  %v9192_v1 = vrot.slane %v9184_v9, %v27333_v7  ;;  %v9199_v24 = vrot.slane %v9185_v3, %v27333_v7 }
  0xdb   : > { %v1164_v46 = vcombine.low %v436_v25, %v438_v54  ;;  %v8496_v36 = vcombine.high %v8494_v45, %v8494_v45  ;;  %v1179_v26 = vrot.slane %v1165_v21, %v27333_v7  ;;  %v28118_v12 = vcombine.low %v9158_v8, %v9165_v18  ;;  %v22725_v8 = vld [vmem:[%s27330_s25 + $0x129] sm:$0xff]  ;;  %v22727_v54 = vld [vmem:[%s27330_s25 + $0x139] sm:$0xff] }
  0xdc   : > { %24772 = vmatmul.mubr.msk.f32.gmra.mrb[76].mxu0 %vm1767_vm2, %v27774_v49  ;;  %24301 = vmatmul.mubr.msk.f32.gmra.mrb[8].mxu1 %vm1767_vm2, %v1163_v22  ;;  %v28098_v49 = vcombine.low %v9124_v44, %v9131_v10  ;;  %v28112_v44 = vcombine.low %v32893_v63, %v9148_v33  ;;  %v453_v30 = vrot.slane %v439_v55, %v27333_v7 }
  0xdd   : > { %24774 = vmatprep.mubr.msk.f32.mxu0 %vm27271_vm1, %v32793_v2  ;;  %24303 = vmatprep.mubr.msk.f32.mxu1 %vm27271_vm1, %v32793_v2  ;;  %v1172_v10 = vrot.slane %v1164_v46, %v27333_v7  ;;  %v1182_v16 = vcombine.low %v22396_v48, %v470_v6  ;;  %v28120_v39 = vcombine.low %v9175_v50, %v9182_v31 }
  0xde   : > { %v9202_v29 = vcombine.low %v8504_v20, %v8512_v15  ;;  %v8521_v35 = vcombine.high %v22724_v28, %v22724_v28  ;;  %v455_v27 = vcombine.high %v453_v30, %v453_v30  ;;  %v463_v33 = vcombine.high %v241_v43, %v241_v43 }
  0xdf   : > { %v1180_v23 = vcombine.low %v1172_v10, %v1179_v26  ;;  %v28124_v9 = vcombine.low %v9192_v1, %v9199_v24  ;;  %v9201_v25 = vcombine.low %v8494_v45, %v8496_v36  ;;  %v1196_v3 = vrot.slane %v1182_v16, %v27333_v7  ;;  %v244_v16 = vld [vmem:[%s27330_s25 + $0x60] sm:$0xff] }
  0xe0   : > { %24775 = vmatmul.mubr.msk.f32.gmra.mrb[78].mxu0 %vm1767_vm2, %v27781_v57  ;;  %v8511_v57 = vrot.slane %v8497_v34, %v27333_v7  ;;  %v478_v22 = vcombine.high %v470_v6, %v470_v6  ;;  %v1181_v20 = vcombine.low %v453_v30, %v455_v27  ;;  %v477_v38 = vrot.slane %v463_v33, %v27333_v7 }
  0xe1   : > { %24777 = vmatprep.mubr.msk.f32.mxu0 %vm27271_vm1, %v32793_v2  ;;  %24304 = vmatmul.mubr.msk.f32.gmra.mrb[10].mxu1 %vm1767_vm2, %v1180_v23  ;;  %v487_v18 = vrot.slane %v242_v56, %v27333_v7  ;;  %v9216_v45 = vrot.slane %v9202_v29, %v27333_v7  ;;  %v8528_v50 = vrot.slane %v22724_v28, %v27333_v7  ;;  %v22397_v23 = vld.sshfl [vmem:[%s27330_s25 + $0x58] sm:$0x3 pattern:$0x76325410] }
  0xe2   : > { %v8513_v43 = vcombine.high %v8511_v57, %v8511_v57  ;;  %24306 = vmatprep.mubr.msk.f32.mxu1 %vm27271_vm1, %v32793_v2  ;;  %v8535_v31 = vrot.slane %v8521_v35, %v27333_v7  ;;  %v1189_v15 = vrot.slane %v1181_v20, %v27333_v7  ;;  %v479_v34 = vcombine.high %v477_v38, %v477_v38 }
  0xe3   : > { %v1198_v21 = vcombine.low %v478_v22, %v477_v38  ;;  %v9209_v48 = vrot.slane %v9201_v25, %v27333_v7  ;;  %v8536_v46 = vcombine.high %v8528_v50, %v8528_v50  ;;  %v8538_v55 = vcombine.high %v22725_v8, %v22725_v8 }
  0xe4   : > { %24778 = vmatmul.mubr.msk.f32.gmra.mrb[80].mxu0 %vm1767_vm2, %v27802_v0  ;;  %v22755_v0 = vld.sshfl [vmem:[%s27330_s25 + $0x119] sm:$0x3 pattern:$0x76325410]  ;;  %v480_v6 = vcombine.high %v242_v56, %v242_v56  ;;  %v8545_v1 = vrot.slane %v22725_v8, %v27333_v7  ;;  %v1197_v24 = vcombine.low %v1189_v15, %v1196_v3  ;;  %v1199_v36 = vcombine.low %v479_v34, %v487_v18  ;;  %v22728_v15 = vld [vmem:[%s27330_s25 + $0x141] sm:$0xff] }
  0xe5   : > { %24780 = vmatprep.mubr.msk.f32.mxu0 %vm27271_vm1, %v32793_v2  ;;  %v1206_v28 = vrot.slane %v1198_v21, %v27333_v7  ;;  %v9219_v26 = vcombine.low %v22755_v0, %v8528_v50  ;;  %v8562_v63 = vcombine.high %v22727_v54, %v22727_v54  ;;  %v495_v30 = vcombine.high %v487_v18, %v487_v18 }
  0xe6   : > { %v494_v10 = vrot.slane %v480_v6, %v27333_v7  ;;  %v28152_v29 = vcombine.low %v8511_v57, %v8513_v43  ;;  %v8537_v56 = vcombine.high %v8535_v31, %v8535_v31  ;;  %24307 = vmatmul.mubr.msk.f32.gmra.mrb[12].mxu1 %vm1767_vm2, %v1197_v24  ;;  %v1213_v35 = vrot.slane %v1199_v36, %v27333_v7  ;;  %v22756_v24 = vld.sshfl [vmem:[%s27330_s25 + $0x131] sm:$0x3 pattern:$0x76325410] }
  0xe7   : > { %v8552_v27 = vrot.slane %v8538_v55, %v27333_v7  ;;  %v8569_v33 = vrot.slane %v22727_v54, %v27333_v7  ;;  %24309 = vmatprep.mubr.msk.f32.mxu1 %vm27271_vm1, %v32793_v2  ;;  %v32894_v57 = vrot.slane %v27806_v40, %v27333_v7  ;;  %v28165_v22 = vcombine.low %v9209_v48, %v9216_v45  ;;  %v245_v40 = vld [vmem:[%s27330_s25 + $0x68] sm:$0xff]  ;;  %v22878_v45 = vld [vmem:[%s32788_s1 + $0x14] sm:$0x7] }
  0xe8   : > { %24781 = vmatmul.mubr.msk.f32.gmra.mrb[82].mxu0 %vm1767_vm2, %v27814_v47  ;;  %v8553_v47 = vcombine.high %v8545_v1, %v8545_v1  ;;  %v496_v25 = vcombine.high %v494_v10, %v494_v10  ;;  %v1215_v3 = vcombine.low %v495_v30, %v494_v10  ;;  %v28167_v8 = vcombine.low %v8536_v46, %v8535_v31 }
  0xe9   : > { %24783 = vmatprep.mubr.msk.f32.mxu0 %vm27271_vm1, %v32793_v2  ;;  %v1214_v20 = vcombine.low %v1206_v28, %v1213_v35  ;;  %v504_v38 = vcombine.high %v244_v16, %v244_v16  ;;  %v28172_v18 = vrot.slane %v9219_v26, %v27333_v7  ;;  %v8576_v43 = vrot.slane %v8562_v63, %v27333_v7 }
  0xea   : > { %v1216_v50 = vcombine.low %v496_v25, %v22397_v23  ;;  %v1223_v0 = vrot.slane %v1215_v3, %v27333_v7  ;;  %v9226_v31 = vrot.slane %v28152_v29, %v27333_v7  ;;  %v28182_v54 = vcombine.low %v8537_v56, %v8545_v1 }
  0xeb   : > { %24310 = vmatmul.mubr.msk.f32.gmra.mrb[14].mxu1 %vm1767_vm2, %v1214_v20  ;;  %v511_v34 = vrot.slane %v244_v16, %v27333_v7  ;;  %v518_v21 = vrot.slane %v504_v38, %v27333_v7  ;;  %v8554_v48 = vcombine.high %v8552_v27, %v8552_v27  ;;  %v28188_v46 = vcombine.low %v8553_v47, %v8552_v27  ;;  %v22730_v20 = vld [vmem:[%s27330_s25 + $0x151] sm:$0xff] }
  0xec   : > { %24784 = vmatmul.mubr.msk.f32.gmra.mrb[84].mxu0 %vm1767_vm2, %v32894_v57  ;;  %v8577_v55 = vcombine.high %v8569_v33, %v8569_v33  ;;  %24312 = vmatprep.mubr.msk.f32.mxu1 %vm27271_vm1, %v32793_v2  ;;  %v1230_v6 = vrot.slane %v1216_v50, %v27333_v7  ;;  %v9243_v1 = vrot.slane %v28167_v8, %v27333_v7  ;;  %v247_v57 = vld [vmem:[%s27330_s25 + $0x78] sm:$0xff] }
  0xed   : > { %24788 = vmatprep.mubr.msk.f32.mxu0 %vm27271_vm1, %v32793_v2  ;;  %v519_v36 = vcombine.high %v511_v34, %v511_v34  ;;  %v520_v28 = vcombine.high %v518_v21, %v518_v21  ;;  %v521_v26 = vcombine.high %v245_v40, %v245_v40  ;;  %v8578_v63 = vcombine.high %v8576_v43, %v8576_v43 }
  0xee   : > { %v8579_v10 = vcombine.high %v22728_v15, %v22728_v15  ;;  %v1231_v30 = vcombine.low %v1223_v0, %v1230_v6  ;;  %v528_v47 = vrot.slane %v245_v40, %v27333_v7  ;;  %v9253_v23 = vcombine.low %v8554_v48, %v22756_v24 }
  0xef   : > { %v1232_v16 = vcombine.low %v511_v34, %v519_v36  ;;  %v1233_v56 = vcombine.low %v518_v21, %v520_v28  ;;  %v9260_v27 = vrot.slane %v28188_v46, %v27333_v7  ;;  %v9269_v25 = vcombine.low %v8569_v33, %v8577_v55  ;;  %v22398_v28 = vld.sshfl [vmem:[%s27330_s25 + $0x70] sm:$0x3 pattern:$0x76325410] }
  0xf0   : > { %24789 = vmatmul.mubr.msk.f32.vlgmr.msra.gmra.mrb[86].mxu0 %vm1767_vm2, %v27845_v52  ;;  %v9250_v52 = vrot.slane %v28182_v54, %v27333_v7  ;;  %24313 = vmatmul.mubr.msk.f32.gmra.mrb[16].mxu1 %vm1767_vm2, %v1231_v30  ;;  %v535_v3 = vrot.slane %v521_v26, %v27333_v7  ;;  %v536_v0 = vcombine.high %v528_v47, %v528_v47 }
  0xf1   : > { %24912 = vmatpush3.msk.msra.mxu0 %vm1850_vm0, %v22878_v45  ;;  %24791 = vmatprep.mubr.msk.f32.mxu0 %vm27271_vm1, %v32793_v2  ;;  %v1240_v38 = vrot.slane %v1232_v16, %v27333_v7  ;;  %v1247_v50 = vrot.slane %v1233_v56, %v27333_v7  ;;  %v9270_v33 = vcombine.low %v8576_v43, %v8578_v63 }
  0xf2   : > { %25036 = vmatprep.subr.mxu0 %v32793_v2  ;;  %24315 = vmatprep.mubr.msk.f32.mxu1 %vm27271_vm1, %v32793_v2  ;;  %v8586_v40 = vrot.slane %v22728_v15, %v27333_v7  ;;  %v8593_v45 = vrot.slane %v8579_v10, %v27333_v7  ;;  %v537_v54 = vcombine.high %v535_v3, %v535_v3 }
  0xf3   : > { %v5784_v35 = vpop.f32.mrb[0].mxu0  ;;  %v1249_v34 = vcombine.low %v528_v47, %v536_v0  ;;  %v545_v21 = vcombine.high %v247_v57, %v247_v57  ;;  %v552_v48 = vrot.slane %v247_v57, %v27333_v7  ;;  %v9267_v55 = vrot.slane %v9253_v23, %v27333_v7  ;;  %v248_v23 = vld [vmem:[%s27330_s25 + $0x80] sm:$0xff] }
  0xf4   : > { %v24540_v8 = vpop.f32.mrb[1].mxu0  ;;  %24792 = vmatmul.mubr.msk.f32.gmra.mrb[88].mxu0 %vm1767_vm2, %v27847_v41  ;;  %v1248_v41 = vcombine.low %v1240_v38, %v1247_v50  ;;  %v8603_v6 = vcombine.high %v22730_v20, %v22730_v20  ;;  %v28224_v24 = vrot.slane %v22730_v20, %v27333_v7  ;;  %v1250_v36 = vcombine.low %v535_v3, %v537_v54  ;;  %v22731_v50 = vld [vmem:[%s27330_s25 + $0x159] sm:$0xff] }
  0xf5   : > { %24794 = vmatprep.mubr.msk.f32.mxu0 %vm27271_vm1, %v32793_v2  ;;  %v1257_v15 = vrot.slane %v1249_v34, %v27333_v7  ;;  %v559_v26 = vrot.slane %v545_v21, %v27333_v7  ;;  %v560_v63 = vcombine.high %v552_v48, %v552_v48  ;;  %v9277_v10 = vrot.slane %v9269_v25, %v27333_v7 }
  0xf6   : > { %24316 = vmatmul.mubr.msk.f32.gmra.mrb[18].mxu1 %vm1767_vm2, %v1248_v41  ;;  %v9284_v30 = vrot.slane %v9270_v33, %v27333_v7  ;;  %v8594_v16 = vcombine.high %v8586_v40, %v8586_v40  ;;  %v8595_v56 = vcombine.high %v8593_v45, %v8593_v45  ;;  %v1266_v47 = vcombine.low %v22398_v28, %v552_v48 }
  0xf7   : > { %v5789_v46 = vpop.f32.mrb[2].mxu0  ;;  %24318 = vmatprep.mubr.msk.f32.mxu1 %vm27271_vm1, %v32793_v2  ;;  %v1267_v35 = vcombine.low %v560_v63, %v559_v26  ;;  %v28244_v3 = vcombine.low %v9226_v31, %v28172_v18  ;;  %v28246_v25 = vcombine.low %v9243_v1, %v9250_v52  ;;  %v561_v8 = vcombine.high %v559_v26, %v559_v26  ;;  %v22757_v31 = vld.sshfl [vmem:[%s27330_s25 + $0x149] sm:$0x3 pattern:$0x76325410]  ;;  %v250_v52 = vld [vmem:[%s27330_s25 + $0x90] sm:$0xff] }
  0xf8   : > { %v24543_v43 = vpop.f32.mrb[3].mxu0  ;;  %24795 = vmatmul.mubr.msk.f32.gmra.mrb[4].mxu0 %vm1767_vm2, %v27849_v42  ;;  %v1264_v42 = vrot.slane %v1250_v36, %v27333_v7  ;;  %v8617_v20 = vrot.slane %v8603_v6, %v27333_v7  ;;  %v8618_v38 = vcombine.high %v28224_v24, %v28224_v24  ;;  %v1274_v0 = vrot.slane %v1266_v47, %v27333_v7  ;;  %v22733_v63 = vld [vmem:[%s27330_s25 + $0x169] sm:$0xff]  ;;  %v251_v47 = vld [vmem:[%s27330_s25 + $0x98] sm:$0xff] }
  0xf9   : > { %24797 = vmatprep.mubr.msk.f32.mxu0 %vm27271_vm1, %v32793_v2  ;;  %v1281_v29 = vrot.slane %v1267_v35, %v27333_v7  ;;  %v28258_v18 = vcombine.low %v9260_v27, %v9267_v55  ;;  %v562_v1 = vcombine.high %v248_v23, %v248_v23  ;;  %v28264_v33 = vcombine.low %v9277_v10, %v9284_v30 }
  0xfa   : > { %v1265_v57 = vcombine.low %v1257_v15, %v1264_v42  ;;  %v9286_v54 = vcombine.low %v8586_v40, %v8594_v16  ;;  %v9287_v41 = vcombine.low %v8593_v45, %v8595_v56  ;;  %v8620_v21 = vcombine.high %v22731_v50, %v22731_v50  ;;  %v22399_v40 = vld.sshfl [vmem:[%s27330_s25 + $0x88] sm:$0x3 pattern:$0x76325410] }
  0xfb   : > { %v1282_v34 = vcombine.low %v1274_v0, %v1281_v29  ;;  %v576_v27 = vrot.slane %v562_v1, %v27333_v7  ;;  %v9303_v55 = vcombine.low %v22757_v31, %v28224_v24  ;;  %v9304_v6 = vcombine.low %v8618_v38, %v8617_v20  ;;  %v22734_v38 = vld [vmem:[%s27330_s25 + $0x171] sm:$0xff]  ;;  %v22758_v1 = vld.sshfl [vmem:[%s27330_s25 + $0x161] sm:$0x3 pattern:$0x76325410] }
  0xfc   : > { %24798 = vmatmul.mubr.msk.f32.gmra.mrb[6].mxu0 %vm1767_vm2, %v27851_v19  ;;  %24319 = vmatmul.mubr.msk.f32.gmra.mrb[20].mxu1 %vm1767_vm2, %v1265_v57  ;;  %v569_v19 = vrot.slane %v248_v23, %v27333_v7  ;;  %v8627_v36 = vrot.slane %v22731_v50, %v27333_v7  ;;  %v593_v45 = vrot.slane %v250_v52, %v27333_v7 }
  0xfd   : > { %24800 = vmatprep.mubr.msk.f32.mxu0 %vm27271_vm1, %v32793_v2  ;;  %24321 = vmatprep.mubr.msk.f32.mxu1 %vm27271_vm1, %v32793_v2  ;;  %v578_v15 = vcombine.high %v576_v27, %v576_v27  ;;  %v9301_v24 = vrot.slane %v9287_v41, %v27333_v7  ;;  %v8619_v26 = vcombine.high %v8617_v20, %v8617_v20 }
  0xfe   : > { %v577_v48 = vcombine.high %v569_v19, %v569_v19  ;;  %v1283_v46 = vcombine.low %v561_v8, %v569_v19  ;;  %v601_v10 = vcombine.high %v593_v45, %v593_v45  ;;  %v8634_v30 = vrot.slane %v8620_v21, %v27333_v7 }
  0xff   : > { %v8644_v42 = vcombine.high %v22733_v63, %v22733_v63  ;;  %v1300_v56 = vcombine.low %v578_v15, %v22399_v40  ;;  %v9311_v35 = vrot.slane %v9303_v55, %v27333_v7  ;;  %v9318_v23 = vrot.slane %v9304_v6, %v27333_v7  ;;  %v22400_v15 = vld.sshfl [vmem:[%s27330_s25 + $0xa0] sm:$0x3 pattern:$0x76325410] }
 0x100   : > { %24801 = vmatmul.mubr.msk.f32.gmra.mrb[8].mxu0 %vm1767_vm2, %v27856_v61  ;;  %24322 = vmatmul.mubr.msk.f32.gmra.mrb[22].mxu1 %vm1767_vm2, %v1282_v34  ;;  %v1284_v28 = vcombine.low %v577_v48, %v576_v27  ;;  %v1291_v43 = vrot.slane %v1283_v46, %v27333_v7  ;;  %v9294_v61 = vrot.slane %v9286_v54, %v27333_v7  ;;  %v253_v27 = vld [vmem:[%s27330_s25 + $0xa8] sm:$0xff] }
 0x101   : > { %24803 = vmatprep.mubr.msk.f32.mxu0 %vm27271_vm1, %v32793_v2  ;;  %24324 = vmatprep.mubr.msk.f32.mxu1 %vm27271_vm1, %v32793_v2  ;;  %v8635_v57 = vcombine.high %v8627_v36, %v8627_v36  ;;  %v1301_v8 = vcombine.low %v593_v45, %v601_v10  ;;  %v8636_v20 = vcombine.high %v8634_v30, %v8634_v30 }
 0x102   : > { %v1298_v16 = vrot.slane %v1284_v28, %v27333_v7  ;;  %v1308_v0 = vrot.slane %v1300_v56, %v27333_v7  ;;  %v586_v29 = vcombine.high %v250_v52, %v250_v52  ;;  %v28295_v31 = vcombine.low %v9294_v61, %v9301_v24  ;;  %v22736_v28 = vld [vmem:[%s27330_s25 + $0x181] sm:$0xff] }
 0x103   : > { %v1315_v19 = vrot.slane %v1301_v8, %v27333_v7  ;;  %v610_v54 = vrot.slane %v251_v47, %v27333_v7  ;;  %v28300_v41 = vcombine.low %v8619_v26, %v8627_v36  ;;  %v8651_v34 = vrot.slane %v22733_v63, %v27333_v7 }
 0x104   : > { %24804 = vmatmul.mubr.msk.f32.gmra.mrb[10].mxu0 %vm1767_vm2, %v27863_v62  ;;  %v1299_v50 = vcombine.low %v1291_v43, %v1298_v16  ;;  %v8661_v62 = vcombine.high %v22734_v38, %v22734_v38  ;;  %v8658_v21 = vrot.slane %v8644_v42, %v27333_v7  ;;  %v600_v52 = vrot.slane %v586_v29, %v27333_v7 }
 0x105   : > { %24806 = vmatprep.mubr.msk.f32.mxu0 %vm27271_vm1, %v32793_v2  ;;  %v8668_v48 = vrot.slane %v22734_v38, %v27333_v7  ;;  %v1316_v46 = vcombine.low %v1308_v0, %v1315_v19  ;;  %v618_v55 = vcombine.high %v610_v54, %v610_v54  ;;  %v28314_v6 = vcombine.low %v9311_v35, %v9318_v23 }
 0x106   : > { %24325 = vmatmul.mubr.msk.f32.gmra.mrb[24].mxu1 %vm1767_vm2, %v1299_v50  ;;  %v28316_v36 = vcombine.low %v8635_v57, %v8634_v30  ;;  %v28318_v40 = vcombine.low %v8636_v20, %v22758_v1  ;;  %v602_v45 = vcombine.high %v600_v52, %v600_v52  ;;  %v603_v61 = vcombine.high %v251_v47, %v251_v47  ;;  %v254_v50 = vld [vmem:[%s27330_s25 + $0xb0] sm:$0xff]  ;;  %v22759_v1 = vld.sshfl [vmem:[%s27330_s25 + $0x179] sm:$0x3 pattern:$0x76325410] }
 0x107   : > { %24327 = vmatprep.mubr.msk.f32.mxu1 %vm27271_vm1, %v32793_v2  ;;  %v1318_v43 = vcombine.low %v610_v54, %v618_v55  ;;  %v634_v24 = vrot.slane %v253_v27, %v27333_v7  ;;  %v9328_v26 = vrot.slane %v28300_v41, %v27333_v7  ;;  %v8659_v63 = vcombine.high %v8651_v34, %v8651_v34  ;;  %v22737_v41 = vld [vmem:[%s27330_s25 + $0x189] sm:$0xff] }
 0x108   : > { %24807 = vmatmul.mubr.msk.f32.gmra.mrb[12].mxu0 %vm1767_vm2, %v27875_v14  ;;  %v8675_v14 = vrot.slane %v8661_v62, %v27333_v7  ;;  %v8660_v10 = vcombine.high %v8658_v21, %v8658_v21  ;;  %v1317_v30 = vcombine.low %v600_v52, %v602_v45  ;;  %v8676_v42 = vcombine.high %v8668_v48, %v8668_v48 }
 0x109   : > { %24809 = vmatprep.mubr.msk.f32.mxu0 %vm27271_vm1, %v32793_v2  ;;  %v1332_v16 = vrot.slane %v1318_v43, %v27333_v7  ;;  %v617_v56 = vrot.slane %v603_v61, %v27333_v7  ;;  %v9335_v47 = vrot.slane %v28316_v36, %v27333_v7  ;;  %v8685_v35 = vcombine.high %v22736_v28, %v22736_v28 }
 0x10a   : > { %24328 = vmatmul.mubr.msk.f32.gmra.mrb[26].mxu1 %vm1767_vm2, %v1316_v46  ;;  %v1325_v23 = vrot.slane %v1317_v30, %v27333_v7  ;;  %v9345_v57 = vrot.slane %v28318_v40, %v27333_v7  ;;  %v8677_v8 = vcombine.high %v8675_v14, %v8675_v14  ;;  %v8692_v20 = vrot.slane %v22736_v28, %v27333_v7 }
 0x10b   : > { %24330 = vmatprep.mubr.msk.f32.mxu1 %vm27271_vm1, %v32793_v2  ;;  %v619_v38 = vcombine.high %v617_v56, %v617_v56  ;;  %v9338_v0 = vcombine.low %v8651_v34, %v8659_v63  ;;  %v9354_v29 = vcombine.low %v8658_v21, %v8660_v10  ;;  %v627_v19 = vcombine.high %v253_v27, %v253_v27 }
 0x10c   : > { %24810 = vmatmul.mubr.msk.f32.gmra.mrb[14].mxu0 %vm1767_vm2, %v27891_v53  ;;  %v1335_v53 = vcombine.low %v22400_v15, %v634_v24  ;;  %v1333_v62 = vcombine.low %v1325_v23, %v1332_v16  ;;  %v9355_v54 = vcombine.low %v8668_v48, %v8676_v42  ;;  %v642_v55 = vcombine.high %v634_v24, %v634_v24 }
 0x10d   : > { %24812 = vmatprep.mubr.msk.f32.mxu0 %vm27271_vm1, %v32793_v2  ;;  %v1334_v52 = vcombine.low %v617_v56, %v619_v38  ;;  %v8699_v36 = vrot.slane %v8685_v35, %v27333_v7  ;;  %v641_v34 = vrot.slane %v627_v19, %v27333_v7  ;;  %v651_v21 = vrot.slane %v254_v50, %v27333_v7  ;;  %v256_v56 = vld [vmem:[%s27330_s25 + $0xc0] sm:$0xff] }
 0x10e   : > { %v1349_v46 = vrot.slane %v1335_v53, %v27333_v7  ;;  %24331 = vmatmul.mubr.msk.f32.gmra.mrb[28].mxu1 %vm1767_vm2, %v1333_v62  ;;  %v9371_v27 = vcombine.low %v8675_v14, %v8677_v8  ;;  %v9372_v40 = vcombine.low %v22759_v1, %v8692_v20  ;;  %v8702_v45 = vcombine.high %v22737_v41, %v22737_v41 }
 0x10f   : > { %24333 = vmatprep.mubr.msk.f32.mxu1 %vm27271_vm1, %v32793_v2  ;;  %v1342_v48 = vrot.slane %v1334_v52, %v27333_v7  ;;  %v643_v28 = vcombine.high %v641_v34, %v641_v34  ;;  %v1351_v43 = vcombine.low %v642_v55, %v641_v34  ;;  %v644_v15 = vcombine.high %v254_v50, %v254_v50  ;;  %v257_v34 = vld [vmem:[%s27330_s25 + $0xc8] sm:$0xff] }
 0x110   : > { %24813 = vmatmul.mubr.msk.f32.gmra.mrb[16].mxu0 %vm1767_vm2, %v27927_v59  ;;  %v8700_v59 = vcombine.high %v8692_v20, %v8692_v20  ;;  %v9352_v61 = vrot.slane %v9338_v0, %v27333_v7  ;;  %v9362_v24 = vrot.slane %v9354_v29, %v27333_v7  ;;  %v9369_v14 = vrot.slane %v9355_v54, %v27333_v7  ;;  %v22401_v0 = vld.sshfl [vmem:[%s27330_s25 + $0xb8] sm:$0x3 pattern:$0x76325410] }
 0x111   : > { %24815 = vmatprep.mubr.msk.f32.mxu0 %vm27271_vm1, %v32793_v2  ;;  %v1350_v63 = vcombine.low %v1342_v48, %v1349_v46  ;;  %v8701_v10 = vcombine.high %v8699_v36, %v8699_v36  ;;  %v8709_v30 = vrot.slane %v22737_v41, %v27333_v7  ;;  %v1352_v42 = vcombine.low %v643_v28, %v651_v21  ;;  %v22739_v54 = vld [vmem:[%s27330_s25 + $0x199] sm:$0xff]  ;;  %v22760_v48 = vld.sshfl [vmem:[%s27330_s25 + $0x191] sm:$0x3 pattern:$0x76325410] }
 0x112   : > { %v1359_v16 = vrot.slane %v1351_v43, %v27333_v7  ;;  %v9386_v35 = vrot.slane %v9372_v40, %v27333_v7  ;;  %v658_v23 = vrot.slane %v644_v15, %v27333_v7  ;;  %v659_v53 = vcombine.high %v651_v21, %v651_v21 }
 0x113   : > { %24334 = vmatmul.mubr.msk.f32.gmra.mrb[30].mxu1 %vm1767_vm2, %v1350_v63  ;;  %v28370_v8 = vcombine.low %v9328_v26, %v9335_v47  ;;  %v28372_v20 = vcombine.low %v8700_v59, %v8699_v36  ;;  %v8716_v38 = vrot.slane %v8702_v45, %v27333_v7  ;;  %v1366_v50 = vrot.slane %v1352_v42, %v27333_v7 }
 0x114   : > { %24816 = vmatmul.mubr.msk.f32.gmra.mrb[18].mxu0 %vm1767_vm2, %v27932_v11  ;;  %v9379_v11 = vrot.slane %v9371_v27, %v27333_v7  ;;  %24336 = vmatprep.mubr.msk.f32.mxu1 %vm27271_vm1, %v32793_v2  ;;  %v8717_v29 = vcombine.high %v8709_v30, %v8709_v30  ;;  %v660_v1 = vcombine.high %v658_v23, %v658_v23  ;;  %v22740_v27 = vld [vmem:[%s27330_s25 + $0x1a1] sm:$0xff] }
 0x115   : > { %24818 = vmatprep.mubr.msk.f32.mxu0 %vm27271_vm1, %v32793_v2  ;;  %v1368_v62 = vcombine.low %v659_v53, %v658_v23  ;;  %v668_v26 = vcombine.high %v256_v56, %v256_v56  ;;  %v28383_v47 = vcombine.low %v9345_v57, %v9352_v61  ;;  %v28385_v19 = vcombine.low %v8701_v10, %v8709_v30  ;;  %v259_v23 = vld [vmem:[%s27330_s25 + $0xd8] sm:$0xff] }
 0x116   : > { %v1367_v41 = vcombine.low %v1359_v16, %v1366_v50  ;;  %v675_v52 = vrot.slane %v256_v56, %v27333_v7  ;;  %v28389_v46 = vcombine.low %v9362_v24, %v9369_v14  ;;  %v1369_v55 = vcombine.low %v660_v1, %v22401_v0  ;;  %v22742_v0 = vld [vmem:[%s27330_s25 + $0x1b1] sm:$0xff] }
 0x117   : > { %v1376_v36 = vrot.slane %v1368_v62, %v27333_v7  ;;  %v9396_v21 = vrot.slane %v28372_v20, %v27333_v7  ;;  %v8718_v57 = vcombine.high %v8716_v38, %v8716_v38  ;;  %v682_v40 = vrot.slane %v668_v26, %v27333_v7 }
 0x118   : > { %24819 = vmatmul.mubr.msk.f32.gmra.mrb[20].mxu0 %vm1767_vm2, %v27935_v4  ;;  %v28391_v4 = vcombine.low %v9379_v11, %v9386_v35  ;;  %24337 = vmatmul.mubr.msk.f32.gmra.mrb[32].mxu1 %vm1767_vm2, %v1367_v41  ;;  %v683_v59 = vcombine.high %v675_v52, %v675_v52  ;;  %v28403_v45 = vcombine.low %v8717_v29, %v8716_v38  ;;  %v22402_v41 = vld.sshfl [vmem:[%s27330_s25 + $0xd0] sm:$0x3 pattern:$0x76325410] }
 0x119   : > { %24821 = vmatprep.mubr.msk.f32.mxu0 %vm27271_vm1, %v32793_v2  ;;  %v8726_v28 = vcombine.high %v22739_v54, %v22739_v54  ;;  %24339 = vmatprep.mubr.msk.f32.mxu1 %vm27271_vm1, %v32793_v2  ;;  %v1383_v43 = vrot.slane %v1369_v55, %v27333_v7  ;;  %v9403_v15 = vrot.slane %v28385_v19, %v27333_v7 }
 0x11a   : > { %v684_v61 = vcombine.high %v682_v40, %v682_v40  ;;  %v1385_v24 = vcombine.low %v675_v52, %v683_v59  ;;  %v8733_v14 = vrot.slane %v22739_v54, %v27333_v7  ;;  %v8743_v63 = vcombine.high %v22740_v27, %v22740_v27 }
 0x11b   : > { %v1384_v10 = vcombine.low %v1376_v36, %v1383_v43  ;;  %v692_v30 = vrot.slane %v257_v34, %v27333_v7  ;;  %v28414_v16 = vcombine.low %v8718_v57, %v22760_v48  ;;  %v9413_v38 = vrot.slane %v28403_v45, %v27333_v7 }
 0x11c   : > { %24822 = vmatmul.mubr.msk.f32.gmra.mrb[26].mxu0 %vm1767_vm2, %v27937_v32  ;;  %v685_v32 = vcombine.high %v257_v34, %v257_v34  ;;  %v1386_v56 = vcombine.low %v682_v40, %v684_v61  ;;  %v1393_v11 = vrot.slane %v1385_v24, %v27333_v7  ;;  %v8740_v50 = vrot.slane %v8726_v28, %v27333_v7 }
 0x11d   : > { %24824 = vmatprep.mubr.msk.f32.mxu0 %vm27271_vm1, %v32793_v2  ;;  %24340 = vmatmul.mubr.msk.f32.gmra.mrb[34].mxu1 %vm1767_vm2, %v1384_v10  ;;  %v700_v29 = vcombine.high %v692_v30, %v692_v30  ;;  %v8750_v1 = vrot.slane %v22740_v27, %v27333_v7  ;;  %v8757_v26 = vrot.slane %v8743_v63, %v27333_v7  ;;  %v260_v63 = vld [vmem:[%s27330_s25 + $0xe0] sm:$0xff] }
 0x11e   : > { %v699_v35 = vrot.slane %v685_v32, %v27333_v7  ;;  %24342 = vmatprep.mubr.msk.f32.mxu1 %vm27271_vm1, %v32793_v2  ;;  %v1400_v62 = vrot.slane %v1386_v56, %v27333_v7  ;;  %v709_v52 = vcombine.high %v259_v23, %v259_v23  ;;  %v716_v55 = vrot.slane %v259_v23, %v27333_v7 }
 0x11f   : > { %v7717_v42 = vpop.f32.mrb[22].mxu0  ;;  %v1402_v54 = vcombine.low %v692_v30, %v700_v29  ;;  %v8741_v34 = vcombine.high %v8733_v14, %v8733_v14  ;;  %v8767_v57 = vcombine.high %v22742_v0, %v22742_v0  ;;  %v28438_v48 = vrot.slane %v22742_v0, %v27333_v7 }
 0x120   : > { %v24665_v53 = vpop.f32.mrb[23].mxu0  ;;  %24825 = vmatmul.mubr.msk.f32.gmra.mrb[28].mxu0 %vm1767_vm2, %v27939_v60  ;;  %v701_v60 = vcombine.high %v699_v35, %v699_v35  ;;  %v1401_v40 = vcombine.low %v1393_v11, %v1400_v62  ;;  %v723_v28 = vrot.slane %v709_v52, %v27333_v7  ;;  %v724_v43 = vcombine.high %v716_v55, %v716_v55  ;;  %v22761_v62 = vld.sshfl [vmem:[%s27330_s25 + $0x1a9] sm:$0x3 pattern:$0x76325410] }
 0x121   : > { %24827 = vmatprep.mubr.msk.f32.mxu0 %vm27271_vm1, %v32793_v2  ;;  %v1410_v45 = vrot.slane %v1402_v54, %v27333_v7  ;;  %v8742_v61 = vcombine.high %v8740_v50, %v8740_v50  ;;  %v1419_v32 = vcombine.low %v22402_v41, %v716_v55  ;;  %v8758_v10 = vcombine.high %v8750_v1, %v8750_v1  ;;  %v262_v54 = vld [vmem:[%s27330_s25 + $0xf0] sm:$0xff] }
 0x122   : > { %v1403_v59 = vcombine.low %v699_v35, %v701_v60  ;;  %24343 = vmatmul.mubr.msk.f32.gmra.mrb[36].mxu1 %vm1767_vm2, %v1401_v40  ;;  %v8759_v30 = vcombine.high %v8757_v26, %v8757_v26  ;;  %v1420_v42 = vcombine.low %v724_v43, %v723_v28  ;;  %v9422_v56 = vcombine.low %v8733_v14, %v8741_v34  ;;  %v22743_v34 = vld [vmem:[%s27330_s25 + $0x1b9] sm:$0xff] }
 0x123   : > { %v7722_v36 = vpop.f32.mrb[24].mxu0  ;;  %24345 = vmatprep.mubr.msk.f32.mxu1 %vm27271_vm1, %v32793_v2  ;;  %v1427_v35 = vrot.slane %v1419_v32, %v27333_v7  ;;  %v725_v23 = vcombine.high %v723_v28, %v723_v28  ;;  %v8781_v53 = vrot.slane %v8767_v57, %v27333_v7  ;;  %v726_v29 = vcombine.high %v260_v63, %v260_v63 }
 0x124   : > { %v24668_v27 = vpop.f32.mrb[25].mxu0  ;;  %24828 = vmatmul.mubr.msk.f32.gmra.mrb[30].mxu0 %vm1767_vm2, %v27941_v13  ;;  %v1417_v24 = vrot.slane %v1403_v59, %v27333_v7  ;;  %v9420_v13 = vrot.slane %v28414_v16, %v27333_v7  ;;  %v8782_v16 = vcombine.high %v28438_v48, %v28438_v48  ;;  %v1434_v0 = vrot.slane %v1420_v42, %v27333_v7  ;;  %v22403_v36 = vld.sshfl [vmem:[%s27330_s25 + $0xe8] sm:$0x3 pattern:$0x76325410] }
 0x125   : > { %24830 = vmatprep.mubr.msk.f32.mxu0 %vm27271_vm1, %v32793_v2  ;;  %v28466_v14 = vcombine.low %v9396_v21, %v9403_v15  ;;  %v733_v60 = vrot.slane %v260_v63, %v27333_v7  ;;  %v9439_v41 = vcombine.low %v8750_v1, %v8758_v10  ;;  %v9440_v52 = vcombine.low %v8757_v26, %v8759_v30  ;;  %v22807_v63 = vld [vmem:[%s27330_s25 + $0x22] sm:$0xff]  ;;  %v263_v10 = vld [vmem:[%s27330_s25 + $0xf8] sm:$0xff] }
 0x126   : > { %v1418_v11 = vcombine.low %v1410_v45, %v1417_v24  ;;  %v1435_v19 = vcombine.low %v1427_v35, %v1434_v0  ;;  %v740_v55 = vrot.slane %v726_v29, %v27333_v7  ;;  %v28475_v20 = vcombine.low %v9413_v38, %v9420_v13  ;;  %v22806_v45 = vld [vmem:[%s27330_s25 + $0x1a] sm:$0xff] }
 0x127   : > { %v9430_v21 = vrot.slane %v9422_v56, %v27333_v7  ;;  %v741_v15 = vcombine.high %v733_v60, %v733_v60  ;;  %v9456_v1 = vcombine.low %v22761_v62, %v28438_v48  ;;  %v9457_v26 = vcombine.low %v8782_v16, %v8781_v53 }
 0x128   : > { %24831 = vmatmul.mubr.msk.f32.gmra.mrb[32].mxu0 %vm1767_vm2, %v27951_v51  ;;  %v9423_v51 = vcombine.low %v8740_v50, %v8742_v61  ;;  %24346 = vmatmul.mubr.msk.f32.gmra.mrb[38].mxu1 %vm1767_vm2, %v1418_v11  ;;  %v1436_v50 = vcombine.low %v725_v23, %v733_v60  ;;  %v742_v57 = vcombine.high %v740_v55, %v740_v55 }
 0x129   : > { %24833 = vmatprep.mubr.msk.f32.mxu0 %vm27271_vm1, %v32793_v2  ;;  %24348 = vmatprep.mubr.msk.f32.mxu1 %vm27271_vm1, %v32793_v2  ;;  %v757_v40 = vrot.slane %v262_v54, %v27333_v7  ;;  %v1437_v59 = vcombine.low %v741_v15, %v740_v55  ;;  %v9454_v48 = vrot.slane %v9440_v52, %v27333_v7 }
 0x12a   : > { %v9437_v38 = vrot.slane %v9423_v51, %v27333_v7  ;;  %v1444_v27 = vrot.slane %v1436_v50, %v27333_v7  ;;  %v1453_v43 = vcombine.low %v742_v57, %v22403_v36  ;;  %v8783_v61 = vcombine.high %v8781_v53, %v8781_v53 }
 0x12b   : > { %v765_v28 = vcombine.high %v757_v40, %v757_v40  ;;  %v8784_v24 = vcombine.high %v22743_v34, %v22743_v34  ;;  %v8791_v32 = vrot.slane %v22743_v34, %v27333_v7  ;;  %v1451_v13 = vrot.slane %v1437_v59, %v27333_v7 }
 0x12c   : > { %24834 = vmatmul.mubr.msk.f32.gmra.mrb[34].mxu0 %vm1767_vm2, %v27966_v37  ;;  %24349 = vmatmul.mubr.msk.f32.gmra.mrb[40].mxu1 %vm1767_vm2, %v1435_v19  ;;  %v9447_v37 = vrot.slane %v9439_v41, %v27333_v7  ;;  %v9464_v30 = vrot.slane %v9456_v1, %v27333_v7  ;;  %v9471_v42 = vrot.slane %v9457_v26, %v27333_v7  ;;  %v265_v19 = vld [vmem:[%s27330_s25 + $0x108] sm:$0xff] }
 0x12d   : > { %24836 = vmatprep.mubr.msk.f32.mxu0 %vm27271_vm1, %v32793_v2  ;;  %24351 = vmatprep.mubr.msk.f32.mxu1 %vm27271_vm1, %v32793_v2  ;;  %v1454_v56 = vcombine.low %v757_v40, %v765_v28  ;;  %v1461_v11 = vrot.slane %v1453_v43, %v27333_v7  ;;  %v28505_v35 = vcombine.low %v9430_v21, %v9437_v38  ;;  %v22809_v28 = vld [vmem:[%s27330_s25 + $0x32] sm:$0xff] }
 0x12e   : > { %v10002_v23 = vcombine.high %v22806_v45, %v22806_v45  ;;  %v1452_v53 = vcombine.low %v1444_v27, %v1451_v13  ;;  %v750_v16 = vcombine.high %v262_v54, %v262_v54  ;;  %v28507_v0 = vcombine.low %v9447_v37, %v9454_v48  ;;  %v22762_v27 = vld.sshfl [vmem:[%s27330_s25 + $0x1c1] sm:$0x3 pattern:$0x76325410] }
 0x12f   : > { %v10019_v29 = vcombine.high %v22807_v63, %v22807_v63  ;;  %v774_v51 = vrot.slane %v263_v10, %v27333_v7  ;;  %v8798_v62 = vrot.slane %v8784_v24, %v27333_v7  ;;  %v8799_v60 = vcombine.high %v8791_v32, %v8791_v32 }
 0x130   : > { %24837 = vmatmul.mubr.msk.f32.gmra.mrb[36].mxu0 %vm1767_vm2, %v27984_v17  ;;  %v1468_v17 = vrot.slane %v1454_v56, %v27333_v7  ;;  %v28512_v41 = vcombine.low %v8783_v61, %v8791_v32  ;;  %24352 = vmatmul.mubr.msk.f32.gmra.mrb[42].mxu1 %vm1767_vm2, %v1452_v53  ;;  %v764_v52 = vrot.slane %v750_v16, %v27333_v7 }
 0x131   : > { %24839 = vmatprep.mubr.msk.f32.mxu0 %vm27271_vm1, %v32793_v2  ;;  %v28519_v54 = vcombine.low %v9464_v30, %v9471_v42  ;;  %v10009_v55 = vrot.slane %v22806_v45, %v27333_v7  ;;  %24354 = vmatprep.mubr.msk.f32.mxu1 %vm27271_vm1, %v32793_v2  ;;  %v10016_v15 = vrot.slane %v10002_v23, %v27333_v7 }
 0x132   : > { %v1469_v21 = vcombine.low %v1461_v11, %v1468_v17  ;;  %v10026_v50 = vrot.slane %v22807_v63, %v27333_v7  ;;  %v766_v36 = vcombine.high %v764_v52, %v764_v52  ;;  %v782_v1 = vcombine.high %v774_v51, %v774_v51 }
 0x133   : > { %v8800_v26 = vcombine.high %v8798_v62, %v8798_v62  ;;  %v10033_v34 = vrot.slane %v10019_v29, %v27333_v7  ;;  %v767_v57 = vcombine.high %v263_v10, %v263_v10  ;;  %v798_v40 = vrot.slane %v265_v19, %v27333_v7  ;;  %v266_v10 = vld [vmem:[%s27330_s25 + $0x110] sm:$0xff] }
 0x134   : > { %24840 = vmatmul.mubr.msk.f32.gmra.mrb[38].mxu0 %vm1767_vm2, %v28058_v58  ;;  %v22404_v58 = vld.sshfl [vmem:[%s27330_s25 + $0x100] sm:$0x3 pattern:$0x76325410]  ;;  %v28531_v38 = vcombine.low %v8799_v60, %v8798_v62  ;;  %v9481_v59 = vrot.slane %v28512_v41, %v27333_v7  ;;  %24355 = vmatmul.mubr.msk.f32.gmra.mrb[44].mxu1 %vm1767_vm2, %v1469_v21  ;;  %v1470_v37 = vcombine.low %v764_v52, %v766_v36 }
 0x135   : > { %24842 = vmatprep.mubr.msk.f32.mxu0 %vm27271_vm1, %v32793_v2  ;;  %v1471_v48 = vcombine.low %v774_v51, %v782_v1  ;;  %v10017_v45 = vcombine.high %v10009_v55, %v10009_v55  ;;  %24357 = vmatprep.mubr.msk.f32.mxu1 %vm27271_vm1, %v32793_v2  ;;  %v781_v43 = vrot.slane %v767_v57, %v27333_v7  ;;  %v22810_v57 = vld [vmem:[%s27330_s25 + $0x3a] sm:$0xff] }
 0x136   : > { %v1488_v61 = vcombine.low %v22404_v58, %v798_v40  ;;  %v10018_v24 = vcombine.high %v10016_v15, %v10016_v15  ;;  %v10034_v32 = vcombine.high %v10026_v50, %v10026_v50  ;;  %v1478_v63 = vrot.slane %v1470_v37, %v27333_v7 }
 0x137   : > { %v1485_v13 = vrot.slane %v1471_v48, %v27333_v7  ;;  %v28548_v30 = vcombine.low %v8800_v26, %v22762_v27  ;;  %v783_v42 = vcombine.high %v781_v43, %v781_v43  ;;  %v791_v56 = vcombine.high %v265_v19, %v265_v19  ;;  %v22860_v26 = vld.sshfl [vmem:[%s27330_s25 + $0x2a] sm:$0x3 pattern:$0x76325410] }
 0x138   : > { %24843 = vmatmul.mubr.msk.f32.gmra.mrb[40].mxu0 %vm1767_vm2, %v28098_v49  ;;  %v10035_v49 = vcombine.high %v10033_v34, %v10033_v34  ;;  %v10043_v11 = vcombine.high %v22809_v28, %v22809_v28  ;;  %v28551_v23 = vrot.slane %v22809_v28, %v27333_v7  ;;  %v806_v16 = vcombine.high %v798_v40, %v798_v40 }
 0x139   : > { %24845 = vmatprep.mubr.msk.f32.mxu0 %vm27271_vm1, %v32793_v2  ;;  %v1486_v53 = vcombine.low %v1478_v63, %v1485_v13  ;;  %v1487_v29 = vcombine.low %v781_v43, %v783_v42  ;;  %v1502_v17 = vrot.slane %v1488_v61, %v27333_v7  ;;  %v805_v51 = vrot.slane %v791_v56, %v27333_v7  ;;  %v22405_v63 = vld.sshfl [vmem:[%s27330_s25 + $0x118] sm:$0x3 pattern:$0x76325410] }
 0x13a   : > { %v815_v62 = vrot.slane %v266_v10, %v27333_v7  ;;  %v10742_v60 = vcombine.low %v10009_v55, %v10017_v45  ;;  %v10743_v52 = vcombine.low %v10016_v15, %v10018_v24  ;;  %v10759_v19 = vcombine.low %v10026_v50, %v10034_v32 }
 0x13b   : > { %24358 = vmatmul.mubr.msk.f32.gmra.mrb[46].mxu1 %vm1767_vm2, %v1486_v53  ;;  %v10760_v21 = vcombine.low %v10033_v34, %v10035_v49  ;;  %v807_v36 = vcombine.high %v805_v51, %v805_v51  ;;  %v1504_v1 = vcombine.low %v806_v16, %v805_v51  ;;  %v9488_v58 = vrot.slane %v28531_v38, %v27333_v7 }
 0x13c   : > { %24846 = vmatmul.mubr.msk.f32.gmra.mrb[42].mxu0 %vm1767_vm2, %v28112_v44  ;;  %24360 = vmatprep.mubr.msk.f32.mxu1 %vm27271_vm1, %v32793_v2  ;;  %v1495_v44 = vrot.slane %v1487_v29, %v27333_v7  ;;  %v10057_v55 = vrot.slane %v10043_v11, %v27333_v7  ;;  %v10058_v15 = vcombine.high %v28551_v23, %v28551_v23 }
 0x13d   : > { %24848 = vmatprep.mubr.msk.f32.mxu0 %vm27271_vm1, %v32793_v2  ;;  %v808_v50 = vcombine.high %v266_v10, %v266_v10  ;;  %v9497_v34 = vrot.slane %v28548_v30, %v27333_v7  ;;  %v1505_v27 = vcombine.low %v807_v36, %v815_v62  ;;  %v1512_v38 = vrot.slane %v1504_v1, %v27333_v7 }
 0x13e   : > { %v1503_v40 = vcombine.low %v1495_v44, %v1502_v17  ;;  %v10750_v37 = vrot.slane %v10742_v60, %v27333_v7  ;;  %v10757_v48 = vrot.slane %v10743_v52, %v27333_v7  ;;  %v823_v28 = vcombine.high %v815_v62, %v815_v62  ;;  %v22812_v60 = vld [vmem:[%s27330_s25 + $0x4a] sm:$0xff] }
 0x13f   : > { %v822_v45 = vrot.slane %v808_v50, %v27333_v7  ;;  %v10767_v43 = vrot.slane %v10759_v19, %v27333_v7  ;;  %v10774_v61 = vrot.slane %v10760_v21, %v27333_v7  ;;  %v10776_v24 = vcombine.low %v22860_v26, %v28551_v23  ;;  %v269_v21 = vld [vmem:[%s27330_s25 + $0x128] sm:$0xff]  ;;  %v22813_v26 = vld [vmem:[%s27330_s25 + $0x52] sm:$0xff] }
 0x140   : > { %24849 = vmatmul.mubr.msk.f32.gmra.mrb[44].mxu0 %vm1767_vm2, %v28118_v12  ;;  %v268_v12 = vld [vmem:[%s27330_s25 + $0x120] sm:$0xff]  ;;  %24361 = vmatmul.mubr.msk.f32.gmra.mrb[48].mxu1 %vm1767_vm2, %v1503_v40  ;;  %v1519_v32 = vrot.slane %v1505_v27, %v27333_v7  ;;  %v10777_v13 = vcombine.low %v10058_v15, %v10057_v55  ;;  %v10060_v10 = vcombine.high %v22810_v57, %v22810_v57 }
 0x141   : > { %24851 = vmatprep.mubr.msk.f32.mxu0 %vm27271_vm1, %v32793_v2  ;;  %24363 = vmatprep.mubr.msk.f32.mxu1 %vm27271_vm1, %v32793_v2  ;;  %v824_v49 = vcombine.high %v822_v45, %v822_v45  ;;  %v1521_v42 = vcombine.low %v823_v28, %v822_v45  ;;  %v10067_v56 = vrot.slane %v22810_v57, %v27333_v7 }
 0x142   : > { %v1520_v11 = vcombine.low %v1512_v38, %v1519_v32  ;;  %v832_v23 = vcombine.high %v268_v12, %v268_v12  ;;  %v839_v53 = vrot.slane %v268_v12, %v27333_v7  ;;  %v28599_v16 = vcombine.low %v9481_v59, %v9488_v58 }
 0x143   : > { %v28601_v29 = vcombine.low %v10750_v37, %v10757_v48  ;;  %v1522_v17 = vcombine.low %v824_v49, %v22405_v63  ;;  %v28604_v51 = vcombine.low %v10767_v43, %v10774_v61  ;;  %v10059_v62 = vcombine.high %v10057_v55, %v10057_v55  ;;  %v22861_v37 = vld.sshfl [vmem:[%s27330_s25 + $0x42] sm:$0x3 pattern:$0x76325410] }
 0x144   : > { %24852 = vmatmul.mubr.msk.f32.gmra.mrb[46].mxu0 %vm1767_vm2, %v28120_v39  ;;  %v1529_v39 = vrot.slane %v1521_v42, %v27333_v7  ;;  %24364 = vmatmul.mubr.msk.f32.gmra.mrb[50].mxu1 %vm1767_vm2, %v1520_v11  ;;  %v846_v52 = vrot.slane %v832_v23, %v27333_v7  ;;  %v847_v19 = vcombine.high %v839_v53, %v839_v53 }
 0x145   : > { %24854 = vmatprep.mubr.msk.f32.mxu0 %vm27271_vm1, %v32793_v2  ;;  %v10784_v41 = vrot.slane %v10776_v24, %v27333_v7  ;;  %v10074_v59 = vrot.slane %v10060_v10, %v27333_v7  ;;  %v10084_v44 = vcombine.high %v22812_v60, %v22812_v60  ;;  %24366 = vmatprep.mubr.msk.f32.mxu1 %vm27271_vm1, %v32793_v2  ;;  %v271_v24 = vld [vmem:[%s27330_s25 + $0x138] sm:$0xff] }
 0x146   : > { %v1536_v36 = vrot.slane %v1522_v17, %v27333_v7  ;;  %v10791_v1 = vrot.slane %v10777_v13, %v27333_v7  ;;  %v10075_v58 = vcombine.high %v10067_v56, %v10067_v56  ;;  %v848_v55 = vcombine.high %v846_v52, %v846_v52 }
 0x147   : > { %v1538_v15 = vcombine.low %v839_v53, %v847_v19  ;;  %v10076_v50 = vcombine.high %v10074_v59, %v10074_v59  ;;  %v10091_v57 = vrot.slane %v22812_v60, %v27333_v7  ;;  %v849_v27 = vcombine.high %v269_v21, %v269_v21  ;;  %v22406_v19 = vld.sshfl [vmem:[%s27330_s25 + $0x130] sm:$0x3 pattern:$0x76325410] }
 0x148   : > { %24855 = vmatmul.mubr.msk.f32.gmra.mrb[48].mxu0 %vm1767_vm2, %v28124_v9  ;;  %v1537_v40 = vcombine.low %v1529_v39, %v1536_v36  ;;  %v28622_v38 = vcombine.low %v10059_v62, %v10067_v56  ;;  %v1539_v48 = vcombine.low %v846_v52, %v848_v55  ;;  %v856_v45 = vrot.slane %v269_v21, %v27333_v7  ;;  %v22815_v62 = vld [vmem:[%s27330_s25 + $0x62] sm:$0xff] }
 0x149   : > { %24857 = vmatprep.mubr.msk.f32.mxu0 %vm27271_vm1, %v32793_v2  ;;  %v1546_v9 = vrot.slane %v1538_v15, %v27333_v7  ;;  %v10098_v28 = vrot.slane %v10084_v44, %v27333_v7  ;;  %v10108_v12 = vrot.slane %v22813_v26, %v27333_v7  ;;  %v10101_v43 = vcombine.high %v22813_v26, %v22813_v26  ;;  %v272_v15 = vld [vmem:[%s27330_s25 + $0x140] sm:$0xff] }
 0x14a   : > { %24367 = vmatmul.mubr.msk.f32.gmra.mrb[52].mxu1 %vm1767_vm2, %v1537_v40  ;;  %v863_v61 = vrot.slane %v849_v27, %v27333_v7  ;;  %v28634_v32 = vcombine.low %v10784_v41, %v10791_v1  ;;  %v1553_v63 = vrot.slane %v1539_v48, %v27333_v7  ;;  %v864_v13 = vcombine.high %v856_v45, %v856_v45  ;;  %v22862_v27 = vld.sshfl [vmem:[%s27330_s25 + $0x5a] sm:$0x3 pattern:$0x76325410] }
 0x14b   : > { %24369 = vmatprep.mubr.msk.f32.mxu1 %vm27271_vm1, %v32793_v2  ;;  %v10794_v10 = vcombine.low %v10075_v58, %v10074_v59  ;;  %v10099_v49 = vcombine.high %v10091_v57, %v10091_v57  ;;  %v28641_v42 = vcombine.low %v10076_v50, %v22861_v37  ;;  %v873_v23 = vcombine.high %v271_v24, %v271_v24 }
 0x14c   : > { %24858 = vmatmul.mubr.msk.f32.gmra.mrb[50].mxu0 %vm1767_vm2, %v28165_v22  ;;  %v865_v56 = vcombine.high %v863_v61, %v863_v61  ;;  %v1554_v11 = vcombine.low %v1546_v9, %v1553_v63  ;;  %v1555_v22 = vcombine.low %v856_v45, %v864_v13  ;;  %v880_v53 = vrot.slane %v271_v24, %v27333_v7  ;;  %v274_v63 = vld [vmem:[%s27330_s25 + $0x150] sm:$0xff] }
 0x14d   : > { %24860 = vmatprep.mubr.msk.f32.mxu0 %vm27271_vm1, %v32793_v2  ;;  %v10100_v17 = vcombine.high %v10098_v28, %v10098_v28  ;;  %v10116_v39 = vcombine.high %v10108_v12, %v10108_v12  ;;  %v10115_v60 = vrot.slane %v10101_v43, %v27333_v7  ;;  %v887_v41 = vrot.slane %v873_v23, %v27333_v7 }
 0x14e   : > { %v1556_v52 = vcombine.low %v863_v61, %v865_v56  ;;  %24370 = vmatmul.mubr.msk.f32.gmra.mrb[54].mxu1 %vm1767_vm2, %v1554_v11  ;;  %v1563_v21 = vrot.slane %v1555_v22, %v27333_v7  ;;  %v888_v59 = vcombine.high %v880_v53, %v880_v53  ;;  %v10801_v44 = vrot.slane %v28622_v38, %v27333_v7 }
 0x14f   : > { %v10808_v36 = vrot.slane %v10794_v10, %v27333_v7  ;;  %24372 = vmatprep.mubr.msk.f32.mxu1 %vm27271_vm1, %v32793_v2  ;;  %v10811_v1 = vcombine.low %v10091_v57, %v10099_v49  ;;  %v28661_v58 = vrot.slane %v22815_v62, %v27333_v7  ;;  %v1572_v26 = vcombine.low %v22406_v19, %v880_v53  ;;  %v22816_v57 = vld [vmem:[%s27330_s25 + $0x6a] sm:$0xff] }
 0x150   : > { %24861 = vmatmul.mubr.msk.f32.gmra.mrb[52].mxu0 %vm1767_vm2, %v28244_v3  ;;  %v1570_v3 = vrot.slane %v1556_v52, %v27333_v7  ;;  %v1573_v55 = vcombine.low %v888_v59, %v887_v41  ;;  %v10818_v50 = vrot.slane %v28641_v42, %v27333_v7  ;;  %v10827_v40 = vcombine.low %v10098_v28, %v10100_v17 }
 0x151   : > { %24863 = vmatprep.mubr.msk.f32.mxu0 %vm27271_vm1, %v32793_v2  ;;  %v889_v37 = vcombine.high %v887_v41, %v887_v41  ;;  %v10828_v48 = vcombine.low %v10108_v12, %v10116_v39  ;;  %v10117_v9 = vcombine.high %v10115_v60, %v10115_v60  ;;  %v1580_v45 = vrot.slane %v1572_v26, %v27333_v7  ;;  %v275_v26 = vld [vmem:[%s27330_s25 + $0x158] sm:$0xff] }
 0x152   : > { %v1571_v38 = vcombine.low %v1563_v21, %v1570_v3  ;;  %v1587_v43 = vrot.slane %v1573_v55, %v27333_v7  ;;  %v10125_v61 = vcombine.high %v22815_v62, %v22815_v62  ;;  %v890_v28 = vcombine.high %v272_v15, %v272_v15  ;;  %v22818_v21 = vld [vmem:[%s27330_s25 + $0x7a] sm:$0xff] }
 0x153   : > { %v897_v24 = vrot.slane %v272_v15, %v27333_v7  ;;  %v28677_v13 = vcombine.low %v10801_v44, %v10808_v36  ;;  %v10845_v12 = vcombine.low %v22862_v27, %v28661_v58  ;;  %v10142_v49 = vcombine.high %v22816_v57, %v22816_v57 }
 0x154   : > { %24864 = vmatmul.mubr.msk.f32.gmra.mrb[54].mxu0 %vm1767_vm2, %v28246_v25  ;;  %24373 = vmatmul.mubr.msk.f32.gmra.mrb[56].mxu1 %vm1767_vm2, %v1571_v38  ;;  %v10825_v25 = vrot.slane %v10811_v1, %v27333_v7  ;;  %v1588_v10 = vcombine.low %v1580_v45, %v1587_v43  ;;  %v904_v42 = vrot.slane %v890_v28, %v27333_v7 }
 0x155   : > { %24866 = vmatprep.mubr.msk.f32.mxu0 %vm27271_vm1, %v32793_v2  ;;  %24375 = vmatprep.mubr.msk.f32.mxu1 %vm27271_vm1, %v32793_v2  ;;  %v905_v56 = vcombine.high %v897_v24, %v897_v24  ;;  %v1589_v11 = vcombine.low %v889_v37, %v897_v24  ;;  %v10835_v22 = vrot.slane %v10827_v40, %v27333_v7 }
 0x156   : > { %v10842_v23 = vrot.slane %v10828_v48, %v27333_v7  ;;  %v28688_v53 = vcombine.low %v10115_v60, %v10117_v9  ;;  %v921_v17 = vrot.slane %v274_v63, %v27333_v7  ;;  %v10139_v39 = vrot.slane %v10125_v61, %v27333_v7 }
 0x157   : > { %v1590_v62 = vcombine.low %v905_v56, %v904_v42  ;;  %v1597_v52 = vrot.slane %v1589_v11, %v27333_v7  ;;  %v28697_v19 = vcombine.low %v10818_v50, %v10825_v25  ;;  %v28700_v60 = vrot.slane %v10845_v12, %v27333_v7  ;;  %v22819_v50 = vld [vmem:[%s27330_s25 + $0x82] sm:$0xff]  ;;  %v22863_v12 = vld.sshfl [vmem:[%s27330_s25 + $0x72] sm:$0x3 pattern:$0x76325410] }
 0x158   : > { %24867 = vmatmul.mubr.msk.f32.gmra.mrb[56].mxu0 %vm1767_vm2, %v28258_v18  ;;  %24376 = vmatmul.mubr.msk.f32.gmra.mrb[58].mxu1 %vm1767_vm2, %v1588_v10  ;;  %v22407_v18 = vld.sshfl [vmem:[%s27330_s25 + $0x148] sm:$0x3 pattern:$0x76325410]  ;;  %v906_v41 = vcombine.high %v904_v42, %v904_v42  ;;  %v929_v59 = vcombine.high %v921_v17, %v921_v17  ;;  %v10140_v44 = vcombine.high %v28661_v58, %v28661_v58 }
 0x159   : > { %24869 = vmatprep.mubr.msk.f32.mxu0 %vm27271_vm1, %v32793_v2  ;;  %24378 = vmatprep.mubr.msk.f32.mxu1 %vm27271_vm1, %v32793_v2  ;;  %v10149_v36 = vrot.slane %v22816_v57, %v27333_v7  ;;  %v10156_v3 = vrot.slane %v10142_v49, %v27333_v7  ;;  %v1604_v1 = vrot.slane %v1590_v62, %v27333_v7  ;;  %v277_v25 = vld [vmem:[%s27330_s25 + $0x168] sm:$0xff] }
 0x15a   : > { %v28713_v55 = vcombine.low %v10835_v22, %v10842_v23  ;;  %v10852_v15 = vrot.slane %v28688_v53, %v27333_v7  ;;  %v1606_v40 = vcombine.low %v906_v41, %v22407_v18  ;;  %v1607_v27 = vcombine.low %v921_v17, %v929_v59 }
 0x15b   : > { %v10141_v58 = vcombine.high %v10139_v39, %v10139_v39  ;;  %v10157_v38 = vcombine.high %v10149_v36, %v10149_v36  ;;  %v10166_v37 = vcombine.high %v22818_v21, %v22818_v21  ;;  %v1605_v48 = vcombine.low %v1597_v52, %v1604_v1 }
 0x15c   : > { %24870 = vmatmul.mubr.msk.f32.gmra.mrb[58].mxu0 %vm1767_vm2, %v28264_v33  ;;  %v1614_v9 = vrot.slane %v1606_v40, %v27333_v7  ;;  %v1621_v33 = vrot.slane %v1607_v27, %v27333_v7  ;;  %v914_v57 = vcombine.high %v274_v63, %v274_v63  ;;  %v938_v45 = vrot.slane %v275_v26, %v27333_v7  ;;  %v22821_v27 = vld [vmem:[%s27330_s25 + $0x92] sm:$0xff] }
 0x15d   : > { %24872 = vmatprep.mubr.msk.f32.mxu0 %vm27271_vm1, %v32793_v2  ;;  %v28723_v43 = vcombine.low %v10140_v44, %v10139_v39  ;;  %v10158_v61 = vcombine.high %v10156_v3, %v10156_v3  ;;  %v10173_v28 = vrot.slane %v22818_v21, %v27333_v7  ;;  %v10183_v24 = vcombine.high %v22819_v50, %v22819_v50 }
 0x15e   : > { %24379 = vmatmul.mubr.msk.f32.gmra.mrb[60].mxu1 %vm1767_vm2, %v1605_v48  ;;  %v1622_v63 = vcombine.low %v1614_v9, %v1621_v33  ;;  %v928_v10 = vrot.slane %v914_v57, %v27333_v7  ;;  %v946_v49 = vcombine.high %v938_v45, %v938_v45  ;;  %v10862_v42 = vcombine.low %v10141_v58, %v10149_v36 }
 0x15f   : > { %24381 = vmatprep.mubr.msk.f32.mxu1 %vm27271_vm1, %v32793_v2  ;;  %v10878_v56 = vcombine.low %v10157_v38, %v10156_v3  ;;  %v10180_v11 = vrot.slane %v10166_v37, %v27333_v7  ;;  %v10190_v22 = vrot.slane %v22819_v50, %v27333_v7  ;;  %v931_v39 = vcombine.high %v275_v26, %v275_v26  ;;  %v278_v37 = vld [vmem:[%s27330_s25 + $0x170] sm:$0xff] }
 0x160   : > { %24873 = vmatmul.mubr.msk.f32.gmra.mrb[60].mxu0 %vm1767_vm2, %v28295_v31  ;;  %v930_v23 = vcombine.high %v928_v10, %v928_v10  ;;  %v1624_v17 = vcombine.low %v938_v45, %v946_v49  ;;  %v22408_v31 = vld.sshfl [vmem:[%s27330_s25 + $0x160] sm:$0x3 pattern:$0x76325410]  ;;  %v962_v62 = vrot.slane %v277_v25, %v27333_v7  ;;  %v10869_v52 = vrot.slane %v28723_v43, %v27333_v7 }
 0x161   : > { %24875 = vmatprep.mubr.msk.f32.mxu0 %vm27271_vm1, %v32793_v2  ;;  %v10879_v18 = vcombine.low %v10158_v61, %v22863_v12  ;;  %v10181_v21 = vcombine.high %v10173_v28, %v10173_v28  ;;  %v10197_v41 = vrot.slane %v10183_v24, %v27333_v7  ;;  %v945_v36 = vrot.slane %v931_v39, %v27333_v7  ;;  %v22822_v39 = vld [vmem:[%s27330_s25 + $0x9a] sm:$0xff] }
 0x162   : > { %24382 = vmatmul.mubr.msk.f32.gmra.mrb[62].mxu1 %vm1767_vm2, %v1622_v63  ;;  %v1623_v59 = vcombine.low %v928_v10, %v930_v23  ;;  %v1638_v44 = vrot.slane %v1624_v17, %v27333_v7  ;;  %v10876_v3 = vrot.slane %v10862_v42, %v27333_v7  ;;  %v10182_v1 = vcombine.high %v10180_v11, %v10180_v11 }
 0x163   : > { %24384 = vmatprep.mubr.msk.f32.mxu1 %vm27271_vm1, %v32793_v2  ;;  %v10198_v26 = vcombine.high %v10190_v22, %v10190_v22  ;;  %v1641_v50 = vcombine.low %v22408_v31, %v962_v62  ;;  %v10886_v40 = vrot.slane %v10878_v56, %v27333_v7  ;;  %v947_v38 = vcombine.high %v945_v36, %v945_v36 }
 0x164   : > { %24876 = vmatmul.mubr.msk.f32.gmra.mrb[62].mxu0 %vm1767_vm2, %v28314_v6  ;;  %v22472_v6 = vld [vmem:[%s32788_s1 + $0x4] sm:$0x7]  ;;  %v1631_v58 = vrot.slane %v1623_v59, %v27333_v7  ;;  %v955_v48 = vcombine.high %v277_v25, %v277_v25  ;;  %v10893_v9 = vrot.slane %v10879_v18, %v27333_v7  ;;  %v10895_v33 = vcombine.low %v10173_v28, %v10181_v21 }
 0x165   : > { %24878 = vmatprep.mubr.msk.f32.mxu0 %vm27271_vm1, %v32793_v2  ;;  %24412 = vmatpush3.msk.msra.mxu1 %vm1850_vm0, %v22472_v6  ;;  %v10199_v57 = vcombine.high %v10197_v41, %v10197_v41  ;;  %v970_v45 = vcombine.high %v962_v62, %v962_v62  ;;  %v1640_v61 = vcombine.low %v945_v36, %v947_v38  ;;  %v280_v21 = vld [vmem:[%s27330_s25 + $0x180] sm:$0xff]  ;;  %v22824_v6 = vld [vmem:[%s27330_s25 + $0xaa] sm:$0xff] }
 0x166   : > { %25915 = vmatprep.subr.mxu1 %v32793_v2  ;;  %v1639_v43 = vcombine.low %v1631_v58, %v1638_v44  ;;  %v1655_v24 = vrot.slane %v1641_v50, %v27333_v7  ;;  %v969_v12 = vrot.slane %v955_v48, %v27333_v7  ;;  %v10896_v25 = vcombine.low %v10180_v11, %v10182_v1 }
 0x167   : > { %v10912_v63 = vcombine.low %v10190_v22, %v10198_v26  ;;  %v10207_v28 = vcombine.high %v22821_v27, %v22821_v27  ;;  %v979_v10 = vrot.slane %v278_v37, %v27333_v7  ;;  %v28771_v49 = vrot.slane %v22821_v27, %v27333_v7  ;;  %v22864_v26 = vld.sshfl [vmem:[%s27330_s25 + $0x8a] sm:$0x3 pattern:$0x76325410] }
 0x168   : > { %24879 = vmatmul.mubr.msk.f32.gmra.mrb[64].mxu0 %vm1767_vm2, %v28370_v8  ;;  %24385 = vmatmul.mubr.msk.f32.gmra.mrb[64].mxu1 %vm1767_vm2, %v1639_v43  ;;  %v1648_v8 = vrot.slane %v1640_v61, %v27333_v7  ;;  %v971_v42 = vcombine.high %v969_v12, %v969_v12  ;;  %v1657_v56 = vcombine.low %v970_v45, %v969_v12  ;;  %v281_v12 = vld [vmem:[%s27330_s25 + $0x188] sm:$0xff] }
 0x169   : > { %24881 = vmatprep.mubr.msk.f32.mxu0 %vm27271_vm1, %v32793_v2  ;;  %v28779_v23 = vcombine.low %v10852_v15, %v28700_v60  ;;  %v28781_v11 = vcombine.low %v10869_v52, %v10876_v3  ;;  %v10913_v22 = vcombine.low %v10197_v41, %v10199_v57  ;;  %24387 = vmatprep.mubr.msk.f32.mxu1 %vm27271_vm1, %v32793_v2  ;;  %v22409_v3 = vld.sshfl [vmem:[%s27330_s25 + $0x178] sm:$0x3 pattern:$0x76325410] }
 0x16a   : > { %v972_v17 = vcombine.high %v278_v37, %v278_v37  ;;  %v28787_v31 = vcombine.low %v10886_v40, %v10893_v9  ;;  %v1656_v62 = vcombine.low %v1648_v8, %v1655_v24  ;;  %v1658_v53 = vcombine.low %v971_v42, %v979_v10 }
 0x16b   : > { %v1665_v60 = vrot.slane %v1657_v56, %v27333_v7  ;;  %v10903_v15 = vrot.slane %v10895_v33, %v27333_v7  ;;  %v10910_v52 = vrot.slane %v10896_v25, %v27333_v7  ;;  %v10920_v41 = vrot.slane %v10912_v63, %v27333_v7 }
 0x16c   : > { %24882 = vmatmul.mubr.msk.f32.gmra.mrb[66].mxu0 %vm1767_vm2, %v28383_v47  ;;  %v986_v18 = vrot.slane %v972_v17, %v27333_v7  ;;  %v987_v47 = vcombine.high %v979_v10, %v979_v10  ;;  %v10221_v59 = vrot.slane %v10207_v28, %v27333_v7  ;;  %v10222_v44 = vcombine.high %v28771_v49, %v28771_v49  ;;  %v28828_v28 = vld [vmem:[%s27330_s25 + $0xb2] sm:$0xff] }
 0x16d   : > { %24884 = vmatprep.mubr.msk.f32.mxu0 %vm27271_vm1, %v32793_v2  ;;  %24388 = vmatmul.mubr.msk.f32.gmra.mrb[66].mxu1 %vm1767_vm2, %v1656_v62  ;;  %v1672_v36 = vrot.slane %v1658_v53, %v27333_v7  ;;  %v10927_v1 = vrot.slane %v10913_v22, %v27333_v7  ;;  %v10224_v50 = vcombine.high %v22822_v39, %v22822_v39 }
 0x16e   : > { %24390 = vmatprep.mubr.msk.f32.mxu1 %vm27271_vm1, %v32793_v2  ;;  %v988_v40 = vcombine.high %v986_v18, %v986_v18  ;;  %v1674_v27 = vcombine.low %v987_v47, %v986_v18  ;;  %v10231_v58 = vrot.slane %v22822_v39, %v27333_v7  ;;  %v10248_v38 = vcombine.high %v22824_v6, %v22824_v6  ;;  %v22865_v18 = vld.sshfl [vmem:[%s27330_s25 + $0xa2] sm:$0x3 pattern:$0x76325410] }
 0x16f   : > { %v1673_v37 = vcombine.low %v1665_v60, %v1672_v36  ;;  %v996_v48 = vcombine.high %v280_v21, %v280_v21  ;;  %v28814_v9 = vcombine.low %v10903_v15, %v10910_v52  ;;  %v1003_v45 = vrot.slane %v280_v21, %v27333_v7 }
 0x170   : > { %24885 = vmatmul.mubr.msk.f32.gmra.mrb[68].mxu0 %vm1767_vm2, %v28389_v46  ;;  %v1675_v33 = vcombine.low %v988_v40, %v22409_v3  ;;  %v1682_v57 = vrot.slane %v1674_v27, %v27333_v7  ;;  %v10929_v43 = vcombine.low %v22864_v26, %v28771_v49  ;;  %v28819_v61 = vcombine.low %v10222_v44, %v10221_v59  ;;  %v283_v44 = vld [vmem:[%s27330_s25 + $0x198] sm:$0xff] }
 0x171   : > { %24887 = vmatprep.mubr.msk.f32.mxu0 %vm27271_vm1, %v32793_v2  ;;  %v10223_v46 = vcombine.high %v10221_v59, %v10221_v59  ;;  %24391 = vmatmul.mubr.msk.f32.gmra.mrb[68].mxu1 %vm1767_vm2, %v1673_v37  ;;  %v1010_v24 = vrot.slane %v996_v48, %v27333_v7  ;;  %v28824_v25 = vcombine.low %v10920_v41, %v10927_v1 }
 0x172   : > { %v10255_v63 = vrot.slane %v22824_v6, %v27333_v7  ;;  %24393 = vmatprep.mubr.msk.f32.mxu1 %vm27271_vm1, %v32793_v2  ;;  %v1689_v10 = vrot.slane %v1675_v33, %v27333_v7  ;;  %v1011_v49 = vcombine.high %v1003_v45, %v1003_v45  ;;  %v10238_v8 = vrot.slane %v10224_v50, %v27333_v7  ;;  %v22827_v33 = vld [vmem:[%s27330_s25 + $0xc2] sm:$0xff] }
 0x173   : > { %v10239_v42 = vcombine.high %v10231_v58, %v10231_v58  ;;  %v10262_v56 = vrot.slane %v10248_v38, %v27333_v7  ;;  %v1012_v22 = vcombine.high %v1010_v24, %v1010_v24  ;;  %v1013_v62 = vcombine.high %v281_v12, %v281_v12 }
 0x174   : > { %24888 = vmatmul.mubr.msk.f32.gmra.mrb[70].mxu0 %vm1767_vm2, %v28391_v4  ;;  %v1690_v17 = vcombine.low %v1682_v57, %v1689_v10  ;;  %v1691_v39 = vcombine.low %v1003_v45, %v1011_v49  ;;  %v1020_v53 = vrot.slane %v281_v12, %v27333_v7  ;;  %v28841_v60 = vrot.slane %v10929_v43, %v27333_v7  ;;  %v22410_v43 = vld.sshfl [vmem:[%s27330_s25 + $0x190] sm:$0x3 pattern:$0x76325410] }
 0x175   : > { %24890 = vmatprep.mubr.msk.f32.mxu0 %vm27271_vm1, %v32793_v2  ;;  %v10240_v15 = vcombine.high %v10238_v8, %v10238_v8  ;;  %v10272_v4 = vrot.slane %v28828_v28, %v27333_v7  ;;  %v1692_v52 = vcombine.low %v1010_v24, %v1012_v22  ;;  %v10263_v47 = vcombine.high %v10255_v63, %v10255_v63 }
 0x176   : > { %24394 = vmatmul.mubr.msk.f32.gmra.mrb[70].mxu1 %vm1767_vm2, %v1690_v17  ;;  %v1699_v21 = vrot.slane %v1691_v39, %v27333_v7  ;;  %v1027_v41 = vrot.slane %v1013_v62, %v27333_v7  ;;  %v1028_v59 = vcombine.high %v1020_v53, %v1020_v53  ;;  %v10944_v36 = vrot.slane %v28819_v61, %v27333_v7  ;;  %v22828_v17 = vld [vmem:[%s27330_s25 + $0xca] sm:$0xff] }
 0x177   : > { %v10264_v3 = vcombine.high %v10262_v56, %v10262_v56  ;;  %24396 = vmatprep.mubr.msk.f32.mxu1 %vm27271_vm1, %v32793_v2  ;;  %v1706_v1 = vrot.slane %v1692_v52, %v27333_v7  ;;  %v28859_v26 = vcombine.low %v10223_v46, %v10231_v58  ;;  %v28861_v50 = vcombine.low %v10239_v42, %v10238_v8 }
 0x178   : > { %24891 = vmatmul.mubr.msk.f32.gmra.mrb[72].mxu0 %vm1767_vm2, %v28466_v14  ;;  %v1029_v6 = vcombine.high %v1027_v41, %v1027_v41  ;;  %v1708_v40 = vcombine.low %v1020_v53, %v1028_v59  ;;  %v28863_v14 = vcombine.low %v10240_v15, %v22865_v18  ;;  %v10280_v27 = vcombine.high %v10272_v4, %v10272_v4 }
 0x179   : > { %24893 = vmatprep.mubr.msk.f32.mxu0 %vm27271_vm1, %v32793_v2  ;;  %v1707_v38 = vcombine.low %v1699_v21, %v1706_v1  ;;  %v1037_v37 = vcombine.high %v283_v44, %v283_v44  ;;  %v28865_v48 = vcombine.low %v10255_v63, %v10263_v47  ;;  %v1044_v58 = vrot.slane %v283_v44, %v27333_v7  ;;  %v22830_v47 = vld [vmem:[%s27330_s25 + $0xda] sm:$0xff] }
 0x17a   : > { %v1709_v57 = vcombine.low %v1027_v41, %v1029_v6  ;;  %v1716_v45 = vrot.slane %v1708_v40, %v27333_v7  ;;  %v28873_v46 = vcombine.low %v10262_v56, %v10264_v3  ;;  %v10265_v24 = vcombine.high %v28828_v28, %v28828_v28  ;;  %v284_v56 = vld [vmem:[%s27330_s25 + $0x1a0] sm:$0xff] }
 0x17b   : > { %24397 = vmatmul.mubr.msk.f32.gmra.mrb[72].mxu1 %vm1767_vm2, %v1707_v38  ;;  %v1051_v12 = vrot.slane %v1037_v37, %v27333_v7  ;;  %v10954_v63 = vrot.slane %v28859_v26, %v27333_v7  ;;  %v1052_v10 = vcombine.high %v1044_v58, %v1044_v58  ;;  %v10961_v49 = vrot.slane %v28861_v50, %v27333_v7 }
 0x17c   : > { %24894 = vmatmul.mubr.msk.f32.gmra.mrb[74].mxu0 %vm1767_vm2, %v28475_v20  ;;  %24399 = vmatprep.mubr.msk.f32.mxu1 %vm27271_vm1, %v32793_v2  ;;  %v1723_v20 = vrot.slane %v1709_v57, %v27333_v7  ;;  %v10981_v28 = vcombine.low %v10272_v4, %v10280_v27  ;;  %v10289_v8 = vcombine.high %v22827_v33, %v22827_v33 }
 0x17d   : > { %24896 = vmatprep.mubr.msk.f32.mxu0 %vm27271_vm1, %v32793_v2  ;;  %v1725_v42 = vcombine.low %v22410_v43, %v1044_v58  ;;  %v10971_v22 = vrot.slane %v28863_v14, %v27333_v7  ;;  %v1726_v62 = vcombine.low %v1052_v10, %v1051_v12  ;;  %v1053_v53 = vcombine.high %v1051_v12, %v1051_v12  ;;  %v2165_v58 = vld [vmem:[%s27330_s25 + $0x1] sm:$0xff] }
 0x17e   : > { %v1724_v39 = vcombine.low %v1716_v45, %v1723_v20  ;;  %v10978_v15 = vrot.slane %v28865_v48, %v27333_v7  ;;  %v10988_v4 = vrot.slane %v28873_v46, %v27333_v7  ;;  %v10279_v52 = vrot.slane %v10265_v24, %v27333_v7  ;;  %v22411_v48 = vld.sshfl [vmem:[%s27330_s25 + $0x1a8] sm:$0x3 pattern:$0x76325410] }
 0x17f   : > { %v1733_v18 = vrot.slane %v1725_v42, %v27333_v7  ;;  %v1740_v21 = vrot.slane %v1726_v62, %v27333_v7  ;;  %v1054_v41 = vcombine.high %v284_v56, %v284_v56  ;;  %v10995_v59 = vrot.slane %v10981_v28, %v27333_v7 }
 0x180   : > { %24897 = vmatmul.mubr.msk.f32.gmra.mrb[76].mxu0 %vm1767_vm2, %v28505_v35  ;;  %24400 = vmatmul.mubr.msk.f32.gmra.mrb[74].mxu1 %vm1767_vm2, %v1724_v39  ;;  %v1061_v35 = vrot.slane %v284_v56, %v27333_v7  ;;  %v10296_v44 = vrot.slane %v22827_v33, %v27333_v7  ;;  %v10303_v3 = vrot.slane %v10289_v8, %v27333_v7  ;;  %v22866_v33 = vld.sshfl [vmem:[%s27330_s25 + $0xba] sm:$0x3 pattern:$0x76325410] }
 0x181   : > { %24899 = vmatprep.mubr.msk.f32.mxu0 %vm27271_vm1, %v32793_v2  ;;  %v10306_v1 = vcombine.high %v22828_v17, %v22828_v17  ;;  %24402 = vmatprep.mubr.msk.f32.mxu1 %vm27271_vm1, %v32793_v2  ;;  %v1741_v26 = vcombine.low %v1733_v18, %v1740_v21  ;;  %v1068_v50 = vrot.slane %v1054_v41, %v27333_v7 }
 0x182   : > { %v1069_v6 = vcombine.high %v1061_v35, %v1061_v35  ;;  %v1742_v40 = vcombine.low %v1053_v53, %v1061_v35  ;;  %v10281_v14 = vcombine.high %v10279_v52, %v10279_v52  ;;  %v10304_v27 = vcombine.high %v10296_v44, %v10296_v44  ;;  %v22867_v35 = vld.sshfl [vmem:[%s27330_s25 + $0xd2] sm:$0x3 pattern:$0x76325410] }
 0x183   : > { %v10313_v38 = vrot.slane %v22828_v17, %v27333_v7  ;;  %v10330_v37 = vcombine.high %v22830_v47, %v22830_v47  ;;  %v1070_v43 = vcombine.high %v1068_v50, %v1068_v50  ;;  %v28928_v46 = vcombine.low %v10954_v63, %v10961_v49  ;;  %v2166_v49 = vld [vmem:[%s27330_s25 + $0x9] sm:$0xff] }
 0x184   : > { %24900 = vmatmul.mubr.msk.f32.gmra.mrb[78].mxu0 %vm1767_vm2, %v28507_v0  ;;  %24403 = vmatmul.mubr.msk.f32.gmra.mrb[76].mxu1 %vm1767_vm2, %v1741_v26  ;;  %v1743_v57 = vcombine.low %v1069_v6, %v1068_v50  ;;  %v1750_v45 = vrot.slane %v1742_v40, %v27333_v7  ;;  %v28926_v0 = vcombine.low %v28841_v60, %v10944_v36 }
 0x185   : > { %24902 = vmatprep.mubr.msk.f32.mxu0 %vm27271_vm1, %v32793_v2  ;;  %v10305_v24 = vcombine.high %v10303_v3, %v10303_v3  ;;  %v10320_v12 = vrot.slane %v10306_v1, %v27333_v7  ;;  %24405 = vmatprep.mubr.msk.f32.mxu1 %vm27271_vm1, %v32793_v2  ;;  %v10321_v20 = vcombine.high %v10313_v38, %v10313_v38 }
 0x186   : > { %v10337_v10 = vrot.slane %v22830_v47, %v27333_v7  ;;  %v1757_v28 = vrot.slane %v1743_v57, %v27333_v7  ;;  %v1759_v8 = vcombine.low %v1070_v43, %v22411_v48  ;;  %v28937_v61 = vcombine.low %v10971_v22, %v10978_v15  ;;  %v22831_v22 = vld [vmem:[%s27330_s25 + $0xe2] sm:$0xff]  ;;  %v2168_v48 = vld [vmem:[%s27330_s25 + $0x19] sm:$0xff] }
 0x187   : > { %v28939_v60 = vcombine.low %v10279_v52, %v10281_v14  ;;  %v10998_v36 = vcombine.low %v22866_v33, %v10296_v44  ;;  %v2273_v63 = vcombine.high %v2165_v58, %v2165_v58  ;;  %v28944_v42 = vcombine.low %v10988_v4, %v10995_v59  ;;  %v22833_v33 = vld [vmem:[%s27330_s25 + $0xf2] sm:$0xff] }
 0x188   : > { %24903 = vmatmul.mubr.msk.f32.gmra.mrb[80].mxu0 %vm1767_vm2, %v28519_v54  ;;  %v28946_v56 = vcombine.low %v10304_v27, %v10303_v3  ;;  %v10344_v17 = vrot.slane %v10330_v37, %v27333_v7  ;;  %v1758_v39 = vcombine.low %v1750_v45, %v1757_v28  ;;  %v28949_v62 = vcombine.low %v10305_v24, %v10313_v38  ;;  %v22454_v28 = vld.sshfl [vmem:[%s27330_s25 + $0x11] sm:$0x3 pattern:$0x76325410] }
 0x189   : > { %24905 = vmatprep.mubr.msk.f32.mxu0 %vm27271_vm1, %v32793_v2  ;;  %v10322_v54 = vcombine.high %v10320_v12, %v10320_v12  ;;  %v2280_v53 = vrot.slane %v2165_v58, %v27333_v7  ;;  %v2287_v15 = vrot.slane %v2273_v63, %v27333_v7  ;;  %v28954_v52 = vcombine.low %v10321_v20, %v10320_v12 }
 0x18a   : > { %v10345_v18 = vcombine.high %v10337_v10, %v10337_v10  ;;  %24406 = vmatmul.mubr.msk.f32.gmra.mrb[78].mxu1 %vm1767_vm2, %v1758_v39  ;;  %v1766_v4 = vrot.slane %v1759_v8, %v27333_v7  ;;  %v2290_v47 = vcombine.high %v2166_v49, %v2166_v49  ;;  %v11005_v21 = vrot.slane %v28939_v60, %v27333_v7 }
 0x18b   : > { %v11012_v41 = vrot.slane %v10998_v36, %v27333_v7  ;;  %24408 = vmatprep.mubr.msk.f32.mxu1 %vm27271_vm1, %v32793_v2  ;;  %v2288_v59 = vcombine.high %v2280_v53, %v2280_v53  ;;  %v11022_v44 = vrot.slane %v28946_v56, %v27333_v7  ;;  %v10346_v3 = vcombine.high %v10344_v17, %v10344_v17 }
 0x18c   : > { %24906 = vmatmul.mubr.msk.f32.gmra.mrb[90].mxu0 %vm1767_vm2, %v28599_v16  ;;  %v10347_v16 = vcombine.high %v22831_v22, %v22831_v22  ;;  %v2289_v1 = vcombine.high %v2287_v15, %v2287_v15  ;;  %v11029_v26 = vrot.slane %v28949_v62, %v27333_v7  ;;  %v2297_v6 = vrot.slane %v2166_v49, %v27333_v7 }
 0x18d   : > { %24908 = vmatprep.mubr.msk.f32.mxu0 %vm27271_vm1, %v32793_v2  ;;  %v3013_v50 = vcombine.low %v2280_v53, %v2288_v59  ;;  %v2304_v40 = vrot.slane %v2290_v47, %v27333_v7  ;;  %v11032_v14 = vcombine.low %v10322_v54, %v22867_v35  ;;  %v11039_v27 = vrot.slane %v28954_v52, %v27333_v7  ;;  %v22834_v52 = vld [vmem:[%s27330_s25 + $0xfa] sm:$0xff] }
 0x18e   : > { %v11048_v38 = vcombine.low %v10337_v10, %v10345_v18  ;;  %24409 = vmatmul.mubr.msk.f32.gmra.mrb[80].mxu1 %vm1767_vm2, %v1766_v4  ;;  %v3014_v37 = vcombine.low %v2287_v15, %v2289_v1  ;;  %v2305_v45 = vcombine.high %v2297_v6, %v2297_v6  ;;  %v11049_v58 = vcombine.low %v10344_v17, %v10346_v3 }
 0x18f   : > { %24413 = vmatprep.mubr.msk.f32.mxu1 %vm27271_vm1, %v32793_v2  ;;  %v3021_v57 = vrot.slane %v3013_v50, %v27333_v7  ;;  %v2306_v43 = vcombine.high %v2304_v40, %v2304_v40  ;;  %v10354_v24 = vrot.slane %v22831_v22, %v27333_v7  ;;  %v10361_v12 = vrot.slane %v10347_v16, %v27333_v7 }
 0x190   : > { %24909 = vmatmul.mubr.msk.f32.gmra.mrb[92].mxu0 %vm1767_vm2, %v9497_v34  ;;  %v3028_v30 = vrot.slane %v3014_v37, %v27333_v7  ;;  %v22993_v34 = vld [vmem:[%s32788_s1 + $0x18] sm:$0x7]  ;;  %v3030_v20 = vcombine.low %v2297_v6, %v2305_v45  ;;  %v2314_v8 = vcombine.high %v2168_v48, %v2168_v48  ;;  %v2321_v60 = vrot.slane %v2168_v48, %v27333_v7  ;;  %v22868_v6 = vld.sshfl [vmem:[%s27330_s25 + $0xea] sm:$0x3 pattern:$0x76325410] }
 0x191   : > { %24913 = vmatprep.mubr.msk.f32.mxu0 %vm27271_vm1, %v32793_v2  ;;  %v3031_v10 = vcombine.low %v2304_v40, %v2306_v43  ;;  %v11046_v36 = vrot.slane %v11032_v14, %v27333_v7  ;;  %v10371_v63 = vcombine.high %v22833_v33, %v22833_v33  ;;  %v28998_v49 = vrot.slane %v22833_v33, %v27333_v7  ;;  %v2171_v33 = vld [vmem:[%s27330_s25 + $0x31] sm:$0xff] }
 0x192   : > { %v3029_v17 = vcombine.low %v3021_v57, %v3028_v30  ;;  %v3038_v39 = vrot.slane %v3030_v20, %v27333_v7  ;;  %v2328_v54 = vrot.slane %v2314_v8, %v27333_v7  ;;  %v2329_v22 = vcombine.high %v2321_v60, %v2321_v60  ;;  %v22836_v43 = vld [vmem:[%s27330_s25 + $0x10a] sm:$0xff] }
 0x193   : > { %v3045_v62 = vrot.slane %v3031_v10, %v27333_v7  ;;  %v11056_v53 = vrot.slane %v11048_v38, %v27333_v7  ;;  %v11063_v15 = vrot.slane %v11049_v58, %v27333_v7  ;;  %v3047_v18 = vcombine.low %v22454_v28, %v2321_v60 }
 0x194   : > { %24914 = vmatmul.mubr.msk.f32.vlgmr.msra.gmra.mrb[94].mxu0 %vm1767_vm2, %v28601_v29  ;;  %v2169_v29 = vld [vmem:[%s27330_s25 + $0x21] sm:$0xff]  ;;  %v10362_v4 = vcombine.high %v10354_v24, %v10354_v24  ;;  %v10363_v47 = vcombine.high %v10361_v12, %v10361_v12  ;;  %24414 = vmatmul.mubr.msk.f32.vlgmr.msra.gmra.mrb[82].mxu1 %vm1767_vm2, %v3029_v17  ;;  %v3048_v59 = vcombine.low %v2329_v22, %v2328_v54  ;;  %v29063_v22 = vld [vmem:[%s27330_s25 + $0x112] sm:$0xff] }
 0x195   : > { %25037 = vmatpush3.msk.msra.mxu0 %vm1850_vm0, %v22993_v34  ;;  %24916 = vmatprep.mubr.msk.f32.mxu0 %vm27271_vm1, %v32793_v2  ;;  %v3046_v35 = vcombine.low %v3038_v39, %v3045_v62  ;;  %v29013_v3 = vcombine.low %v11005_v21, %v11012_v41  ;;  %v29016_v16 = vrot.slane %v10371_v63, %v27333_v7  ;;  %v22455_v34 = vld.sshfl [vmem:[%s27330_s25 + $0x29] sm:$0x3 pattern:$0x76325410] }
 0x196   : > { %24416 = vmatprep.mubr.msk.f32.mxu1 %vm27271_vm1, %v32793_v2  ;;  %v3055_v1 = vrot.slane %v3047_v18, %v27333_v7  ;;  %v2330_v50 = vcombine.high %v2328_v54, %v2328_v54  ;;  %v10386_v40 = vcombine.high %v28998_v49, %v28998_v49  ;;  %v10388_v21 = vcombine.high %v22834_v52, %v22834_v52 }
 0x197   : > { %v3062_v41 = vrot.slane %v3048_v59, %v27333_v7  ;;  %v2331_v14 = vcombine.high %v2169_v29, %v2169_v29  ;;  %v29032_v38 = vcombine.low %v11022_v44, %v11029_v26  ;;  %v29034_v37 = vcombine.low %v11039_v27, %v11046_v36  ;;  %25161 = vmatprep.subr.mxu0 %v32793_v2 }
 0x198   : > { %24917 = vmatmul.mubr.msk.f32.gmra.mrb[96].mxu0 %vm1767_vm2, %v28604_v51  ;;  %v29036_v51 = vcombine.low %v11056_v53, %v11063_v15  ;;  %v2338_v48 = vrot.slane %v2169_v29, %v27333_v7  ;;  %v11065_v57 = vcombine.low %v10354_v24, %v10362_v4  ;;  %v11066_v45 = vcombine.low %v10361_v12, %v10363_v47  ;;  %v2172_v15 = vld [vmem:[%s27330_s25 + $0x39] sm:$0xff]  ;;  %v22869_v4 = vld.sshfl [vmem:[%s27330_s25 + $0x102] sm:$0x3 pattern:$0x76325410] }
 0x199   : > { %24919 = vmatprep.mubr.msk.f32.mxu0 %vm27271_vm1, %v32793_v2  ;;  %24417 = vmatmul.mubr.msk.f32.gmra.mrb[84].mxu1 %vm1767_vm2, %v3046_v35  ;;  %v3063_v58 = vcombine.low %v3055_v1, %v3062_v41  ;;  %v2345_v30 = vrot.slane %v2331_v14, %v27333_v7  ;;  %v11082_v56 = vcombine.low %v22868_v6, %v28998_v49 }
 0x19a   : > { %v10395_v44 = vrot.slane %v22834_v52, %v27333_v7  ;;  %24419 = vmatprep.mubr.msk.f32.mxu1 %vm27271_vm1, %v32793_v2  ;;  %v2346_v26 = vcombine.high %v2338_v48, %v2338_v48  ;;  %v3064_v27 = vcombine.low %v2330_v50, %v2338_v48  ;;  %v11083_v24 = vcombine.low %v10386_v40, %v29016_v16  ;;  %v1920_v52 = vpop.f32.mrb[0].mxu1 }
 0x19b   : > { %v10402_v12 = vrot.slane %v10388_v21, %v27333_v7  ;;  %v2347_v20 = vcombine.high %v2345_v30, %v2345_v30  ;;  %v2362_v10 = vrot.slane %v2171_v33, %v27333_v7  ;;  %v10419_v28 = vrot.slane %v22836_v43, %v27333_v7  ;;  %v24290_v59 = vpop.f32.mrb[1].mxu1  ;;  %v2175_v52 = vld [vmem:[%s27330_s25 + $0x51] sm:$0xff] }
 0x19c   : > { %24920 = vmatmul.mubr.msk.f32.gmra.mrb[4].mxu0 %vm1767_vm2, %v28634_v32  ;;  %v10412_v8 = vcombine.high %v22836_v43, %v22836_v43  ;;  %v3065_v60 = vcombine.low %v2346_v26, %v2345_v30  ;;  %v3072_v36 = vrot.slane %v3064_v27, %v27333_v7  ;;  %v11073_v32 = vrot.slane %v11065_v57, %v27333_v7  ;;  %v1925_v43 = vpop.f32.mrb[2].mxu1 }
 0x19d   : > { %24922 = vmatprep.mubr.msk.f32.mxu0 %vm27271_vm1, %v32793_v2  ;;  %v10387_v63 = vcombine.high %v29016_v16, %v29016_v16  ;;  %24420 = vmatmul.mubr.msk.f32.gmra.mrb[4].mxu1 %vm1767_vm2, %v3063_v58  ;;  %v2370_v49 = vcombine.high %v2362_v10, %v2362_v10  ;;  %v3081_v17 = vcombine.low %v2347_v20, %v22455_v34 }
 0x19e   : > { %v11080_v39 = vrot.slane %v11066_v45, %v27333_v7  ;;  %v10403_v62 = vcombine.high %v10395_v44, %v10395_v44  ;;  %v10404_v54 = vcombine.high %v10402_v12, %v10402_v12  ;;  %24422 = vmatprep.mubr.msk.f32.mxu1 %vm27271_vm1, %v32793_v2  ;;  %v3079_v53 = vrot.slane %v3065_v60, %v27333_v7  ;;  %v27260_v60 = vld [vmem:[%s32788_s1 + $0x8] sm:$0x7] }
 0x19f   : > { %v11090_v18 = vrot.slane %v11082_v56, %v27333_v7  ;;  %v11097_v29 = vrot.slane %v11083_v24, %v27333_v7  ;;  %v3082_v47 = vcombine.low %v2362_v10, %v2370_v49  ;;  %v3089_v35 = vrot.slane %v3081_v17, %v27333_v7  ;;  %v22456_v24 = vld.sshfl [vmem:[%s27330_s25 + $0x41] sm:$0x3 pattern:$0x76325410]  ;;  %25916 = vmatpush3.msk.msra.mxu1 %vm1850_vm0, %v27260_v60 }
 0x1a0   : > { %24923 = vmatmul.mubr.msk.f32.gmra.mrb[6].mxu0 %vm1767_vm2, %v28677_v13  ;;  %v10427_v16 = vcombine.high %v10419_v28, %v10419_v28  ;;  %v10426_v1 = vrot.slane %v10412_v8, %v27333_v7  ;;  %v3080_v50 = vcombine.low %v3072_v36, %v3079_v53  ;;  %v2355_v6 = vcombine.high %v2171_v33, %v2171_v33  ;;  %v2174_v33 = vld [vmem:[%s27330_s25 + $0x49] sm:$0xff]  ;;  %v2177_v60 = vld [vmem:[%s27330_s25 + $0x61] sm:$0xff] }
 0x1a1   : > { %24925 = vmatprep.mubr.msk.f32.mxu0 %vm27271_vm1, %v32793_v2  ;;  %v11099_v40 = vcombine.low %v10387_v63, %v10395_v44  ;;  %v10436_v13 = vrot.slane %v29063_v22, %v27333_v7  ;;  %v3096_v21 = vrot.slane %v3082_v47, %v27333_v7  ;;  %v2379_v41 = vrot.slane %v2172_v15, %v27333_v7  ;;  %v24293_v44 = vpop.f32.mrb[3].mxu1 }
 0x1a2   : > { %v29083_v14 = vcombine.low %v11073_v32, %v11080_v39  ;;  %v11100_v48 = vcombine.low %v10403_v62, %v10402_v12  ;;  %v11116_v57 = vcombine.low %v10404_v54, %v22869_v4  ;;  %24423 = vmatmul.mubr.msk.f32.gmra.mrb[6].mxu1 %vm1767_vm2, %v3080_v50  ;;  %v2369_v45 = vrot.slane %v2355_v6, %v27333_v7  ;;  %v22839_v32 = vld [vmem:[%s27330_s25 + $0x122] sm:$0xff]  ;;  %v22870_v50 = vld.sshfl [vmem:[%s27330_s25 + $0x11a] sm:$0x3 pattern:$0x76325410] }
 0x1a3   : > { %v29090_v58 = vcombine.low %v11090_v18, %v11097_v29  ;;  %24425 = vmatprep.mubr.msk.f32.mxu1 %vm27271_vm1, %v32793_v2  ;;  %v3097_v30 = vcombine.low %v3089_v35, %v3096_v21  ;;  %v2387_v56 = vcombine.high %v2379_v41, %v2379_v41  ;;  %v11117_v26 = vcombine.low %v10419_v28, %v10427_v16 }
 0x1a4   : > { %24926 = vmatmul.mubr.msk.f32.gmra.mrb[8].mxu0 %vm1767_vm2, %v28697_v19  ;;  %v10428_v27 = vcombine.high %v10426_v1, %v10426_v1  ;;  %v2371_v34 = vcombine.high %v2369_v45, %v2369_v45  ;;  %v2372_v12 = vcombine.high %v2172_v15, %v2172_v15  ;;  %v11107_v20 = vrot.slane %v11099_v40, %v27333_v7  ;;  %v22840_v40 = vld [vmem:[%s27330_s25 + $0x12a] sm:$0xff] }
 0x1a5   : > { %24928 = vmatprep.mubr.msk.f32.mxu0 %vm27271_vm1, %v32793_v2  ;;  %v10444_v19 = vcombine.high %v10436_v13, %v10436_v13  ;;  %v3099_v10 = vcombine.low %v2379_v41, %v2387_v56  ;;  %v2403_v8 = vrot.slane %v2174_v33, %v27333_v7  ;;  %v11114_v36 = vrot.slane %v11100_v48, %v27333_v7 }
 0x1a6   : > { %v11124_v28 = vrot.slane %v11116_v57, %v27333_v7  ;;  %24426 = vmatmul.mubr.msk.f32.gmra.mrb[8].mxu1 %vm1767_vm2, %v3097_v30  ;;  %v3098_v63 = vcombine.low %v2369_v45, %v2371_v34  ;;  %v2386_v49 = vrot.slane %v2372_v12, %v27333_v7  ;;  %v10429_v17 = vcombine.high %v29063_v22, %v29063_v22 }
 0x1a7   : > { %24428 = vmatprep.mubr.msk.f32.mxu1 %vm27271_vm1, %v32793_v2  ;;  %v3113_v39 = vrot.slane %v3099_v10, %v27333_v7  ;;  %v3116_v62 = vcombine.low %v22456_v24, %v2403_v8  ;;  %v11131_v54 = vrot.slane %v11117_v26, %v27333_v7  ;;  %v11133_v53 = vcombine.low %v10426_v1, %v10428_v27 }
 0x1a8   : > { %24929 = vmatmul.mubr.msk.f32.gmra.mrb[10].mxu0 %vm1767_vm2, %v28713_v55  ;;  %v3106_v15 = vrot.slane %v3098_v63, %v27333_v7  ;;  %v2388_v55 = vcombine.high %v2386_v49, %v2386_v49  ;;  %v11134_v18 = vcombine.low %v10436_v13, %v10444_v19  ;;  %v29121_v22 = vrot.slane %v22839_v32, %v27333_v7  ;;  %v22457_v63 = vld.sshfl [vmem:[%s27330_s25 + $0x59] sm:$0x3 pattern:$0x76325410] }
 0x1a9   : > { %24931 = vmatprep.mubr.msk.f32.mxu0 %vm27271_vm1, %v32793_v2  ;;  %v10453_v29 = vcombine.high %v22839_v32, %v22839_v32  ;;  %v2396_v4 = vcombine.high %v2174_v33, %v2174_v33  ;;  %v3130_v59 = vrot.slane %v3116_v62, %v27333_v7  ;;  %v2411_v16 = vcombine.high %v2403_v8, %v2403_v8  ;;  %v22842_v33 = vld [vmem:[%s27330_s25 + $0x13a] sm:$0xff] }
 0x1aa   : > { %v3114_v47 = vcombine.low %v3106_v15, %v3113_v39  ;;  %v3115_v35 = vcombine.low %v2386_v49, %v2388_v55  ;;  %v29126_v1 = vcombine.low %v11107_v20, %v11114_v36  ;;  %v10443_v6 = vrot.slane %v10429_v17, %v27333_v7 }
 0x1ab   : > { %v2410_v13 = vrot.slane %v2396_v4, %v27333_v7  ;;  %v2420_v21 = vrot.slane %v2175_v52, %v27333_v7  ;;  %v29135_v41 = vcombine.low %v11124_v28, %v11131_v54  ;;  %v11141_v48 = vrot.slane %v11133_v53, %v27333_v7 }
 0x1ac   : > { %24932 = vmatmul.mubr.msk.f32.gmra.mrb[12].mxu0 %vm1767_vm2, %v28779_v23  ;;  %24429 = vmatmul.mubr.msk.f32.gmra.mrb[10].mxu1 %vm1767_vm2, %v3114_v47  ;;  %v3123_v23 = vrot.slane %v3115_v35, %v27333_v7  ;;  %v11148_v57 = vrot.slane %v11134_v18, %v27333_v7  ;;  %v10467_v45 = vrot.slane %v10453_v29, %v27333_v7  ;;  %v22843_v18 = vld [vmem:[%s27330_s25 + $0x142] sm:$0xff] }
 0x1ad   : > { %24934 = vmatprep.mubr.msk.f32.mxu0 %vm27271_vm1, %v32793_v2  ;;  %24431 = vmatprep.mubr.msk.f32.mxu1 %vm27271_vm1, %v32793_v2  ;;  %v2412_v43 = vcombine.high %v2410_v13, %v2410_v13  ;;  %v3132_v30 = vcombine.low %v2411_v16, %v2410_v13  ;;  %v11151_v56 = vcombine.low %v22870_v50, %v29121_v22  ;;  %v2178_v16 = vld [vmem:[%s27330_s25 + $0x69] sm:$0xff] }
 0x1ae   : > { %v10470_v44 = vcombine.high %v22840_v40, %v22840_v40  ;;  %v3131_v26 = vcombine.low %v3123_v23, %v3130_v59  ;;  %v2413_v27 = vcombine.high %v2175_v52, %v2175_v52  ;;  %v10445_v34 = vcombine.high %v10443_v6, %v10443_v6 }
 0x1af   : > { %v3133_v24 = vcombine.low %v2412_v43, %v2420_v21  ;;  %v3140_v12 = vrot.slane %v3132_v30, %v27333_v7  ;;  %v2428_v20 = vcombine.high %v2420_v21, %v2420_v21  ;;  %v10477_v19 = vrot.slane %v22840_v40, %v27333_v7 }
 0x1b0   : > { %24935 = vmatmul.mubr.msk.f32.gmra.mrb[14].mxu0 %vm1767_vm2, %v28781_v11  ;;  %v10494_v10 = vcombine.high %v22842_v33, %v22842_v33  ;;  %24432 = vmatmul.mubr.msk.f32.gmra.mrb[12].mxu1 %vm1767_vm2, %v3131_v26  ;;  %v2427_v8 = vrot.slane %v2413_v27, %v27333_v7  ;;  %v29155_v36 = vcombine.low %v11141_v48, %v11148_v57  ;;  %v22871_v48 = vld.sshfl [vmem:[%s27330_s25 + $0x132] sm:$0x3 pattern:$0x76325410] }
 0x1b1   : > { %24937 = vmatprep.mubr.msk.f32.mxu0 %vm27271_vm1, %v32793_v2  ;;  %v10468_v11 = vcombine.high %v29121_v22, %v29121_v22  ;;  %v10469_v28 = vcombine.high %v10467_v45, %v10467_v45  ;;  %24434 = vmatprep.mubr.msk.f32.mxu1 %vm27271_vm1, %v32793_v2  ;;  %v3147_v32 = vrot.slane %v3133_v24, %v27333_v7 }
 0x1b2   : > { %v10484_v49 = vrot.slane %v10470_v44, %v27333_v7  ;;  %v10485_v17 = vcombine.high %v10477_v19, %v10477_v19  ;;  %v2429_v39 = vcombine.high %v2427_v8, %v2427_v8  ;;  %v3149_v62 = vcombine.low %v2428_v20, %v2427_v8 }
 0x1b3   : > { %v29166_v54 = vcombine.low %v10443_v6, %v10445_v34  ;;  %v10501_v53 = vrot.slane %v22842_v33, %v27333_v7  ;;  %v3148_v15 = vcombine.low %v3140_v12, %v3147_v32  ;;  %v2437_v55 = vcombine.high %v2177_v60, %v2177_v60 }
 0x1b4   : > { %24938 = vmatmul.mubr.msk.f32.gmra.mrb[16].mxu0 %vm1767_vm2, %v28787_v31  ;;  %v10508_v52 = vrot.slane %v10494_v10, %v27333_v7  ;;  %v3150_v22 = vcombine.low %v2429_v39, %v22457_v63  ;;  %v3157_v29 = vrot.slane %v3149_v62, %v27333_v7  ;;  %v2444_v4 = vrot.slane %v2177_v60, %v27333_v7  ;;  %v2180_v10 = vld [vmem:[%s27330_s25 + $0x79] sm:$0xff] }
 0x1b5   : > { %24940 = vmatprep.mubr.msk.f32.mxu0 %vm27271_vm1, %v32793_v2  ;;  %v29176_v31 = vrot.slane %v11151_v56, %v27333_v7  ;;  %v29178_v47 = vcombine.low %v10468_v11, %v10467_v45  ;;  %v29180_v35 = vcombine.low %v10469_v28, %v10477_v19  ;;  %24435 = vmatmul.mubr.msk.f32.gmra.mrb[14].mxu1 %vm1767_vm2, %v3148_v15  ;;  %v22845_v11 = vld [vmem:[%s27330_s25 + $0x152] sm:$0xff] }
 0x1b6   : > { %v2451_v59 = vrot.slane %v2437_v55, %v27333_v7  ;;  %v10486_v50 = vcombine.high %v10484_v49, %v10484_v49  ;;  %v29185_v6 = vcombine.low %v10485_v17, %v10484_v49  ;;  %24437 = vmatprep.mubr.msk.f32.mxu1 %vm27271_vm1, %v32793_v2  ;;  %v3164_v40 = vrot.slane %v3150_v22, %v27333_v7 }
 0x1b7   : > { %v2452_v13 = vcombine.high %v2444_v4, %v2444_v4  ;;  %v11158_v21 = vrot.slane %v29166_v54, %v27333_v7  ;;  %v10509_v23 = vcombine.high %v10501_v53, %v10501_v53  ;;  %v10511_v57 = vcombine.high %v22843_v18, %v22843_v18 }
 0x1b8   : > { %24941 = vmatmul.mubr.msk.f32.gmra.mrb[18].mxu0 %vm1767_vm2, %v28814_v9  ;;  %v2453_v45 = vcombine.high %v2451_v59, %v2451_v59  ;;  %v10510_v33 = vcombine.high %v10508_v52, %v10508_v52  ;;  %v3165_v43 = vcombine.low %v3157_v29, %v3164_v40  ;;  %v2454_v56 = vcombine.high %v2178_v16, %v2178_v16 }
 0x1b9   : > { %24943 = vmatprep.mubr.msk.f32.mxu0 %vm27271_vm1, %v32793_v2  ;;  %v3166_v30 = vcombine.low %v2444_v4, %v2452_v13  ;;  %v11175_v44 = vrot.slane %v29178_v47, %v27333_v7  ;;  %v11182_v9 = vrot.slane %v29180_v35, %v27333_v7  ;;  %v2461_v27 = vrot.slane %v2178_v16, %v27333_v7  ;;  %v22458_v47 = vld.sshfl [vmem:[%s27330_s25 + $0x71] sm:$0x3 pattern:$0x76325410] }
 0x1ba   : > { %v3167_v26 = vcombine.low %v2451_v59, %v2453_v45  ;;  %v11185_v24 = vcombine.low %v10486_v50, %v22871_v48  ;;  %v11192_v12 = vrot.slane %v29185_v6, %v27333_v7  ;;  %24438 = vmatmul.mubr.msk.f32.gmra.mrb[16].mxu1 %vm1767_vm2, %v3165_v43  ;;  %v2468_v19 = vrot.slane %v2454_v56, %v27333_v7 }
 0x1bb   : > { %v7912_v34 = vpop.f32.mrb[82].mxu0  ;;  %v3174_v20 = vrot.slane %v3166_v30, %v27333_v7  ;;  %v11201_v60 = vcombine.low %v10501_v53, %v10509_v23  ;;  %24440 = vmatprep.mubr.msk.f32.mxu1 %vm27271_vm1, %v32793_v2  ;;  %v2469_v32 = vcombine.high %v2461_v27, %v2461_v27  ;;  %v11202_v63 = vcombine.low %v10508_v52, %v10510_v33  ;;  %v2181_v23 = vld [vmem:[%s27330_s25 + $0x81] sm:$0xff] }
 0x1bc   : > { %v24782_v8 = vpop.f32.mrb[83].mxu0  ;;  %24944 = vmatmul.mubr.msk.f32.gmra.mrb[20].mxu0 %vm1767_vm2, %v28824_v25  ;;  %v3181_v28 = vrot.slane %v3167_v26, %v27333_v7  ;;  %v10518_v49 = vrot.slane %v22843_v18, %v27333_v7  ;;  %v10525_v17 = vrot.slane %v10511_v57, %v27333_v7  ;;  %v2470_v39 = vcombine.high %v2468_v19, %v2468_v19  ;;  %v22846_v34 = vld [vmem:[%s27330_s25 + $0x15a] sm:$0xff] }
 0x1bd   : > { %24946 = vmatprep.mubr.msk.f32.mxu0 %vm27271_vm1, %v32793_v2  ;;  %v3183_v25 = vcombine.low %v2461_v27, %v2469_v32  ;;  %v2478_v54 = vcombine.high %v2180_v10, %v2180_v10  ;;  %v2485_v53 = vrot.slane %v2180_v10, %v27333_v7  ;;  %v11199_v55 = vrot.slane %v11185_v24, %v27333_v7 }
 0x1be   : > { %v3182_v62 = vcombine.low %v3174_v20, %v3181_v28  ;;  %v10535_v22 = vcombine.high %v22845_v11, %v22845_v11  ;;  %v29221_v29 = vrot.slane %v22845_v11, %v27333_v7  ;;  %v3184_v4 = vcombine.low %v2468_v19, %v2470_v39  ;;  %v2183_v20 = vld [vmem:[%s27330_s25 + $0x91] sm:$0xff] }
 0x1bf   : > { %v7917_v15 = vpop.f32.mrb[84].mxu0  ;;  %v3191_v18 = vrot.slane %v3183_v25, %v27333_v7  ;;  %v2492_v35 = vrot.slane %v2478_v54, %v27333_v7  ;;  %v2493_v59 = vcombine.high %v2485_v53, %v2485_v53  ;;  %v11209_v16 = vrot.slane %v11201_v60, %v27333_v7 }
 0x1c0   : > { %v24785_v52 = vpop.f32.mrb[85].mxu0  ;;  %24947 = vmatmul.mubr.msk.f32.gmra.mrb[26].mxu0 %vm1767_vm2, %v28926_v0  ;;  %24441 = vmatmul.mubr.msk.f32.gmra.mrb[18].mxu1 %vm1767_vm2, %v3182_v62  ;;  %v10526_v50 = vcombine.high %v10518_v49, %v10518_v49  ;;  %v3198_v6 = vrot.slane %v3184_v4, %v27333_v7  ;;  %v11216_v0 = vrot.slane %v11202_v63, %v27333_v7  ;;  %v22848_v4 = vld [vmem:[%s27330_s25 + $0x16a] sm:$0xff] }
 0x1c1   : > { %24949 = vmatprep.mubr.msk.f32.mxu0 %vm27271_vm1, %v32793_v2  ;;  %24443 = vmatprep.mubr.msk.f32.mxu1 %vm27271_vm1, %v32793_v2  ;;  %v10527_v40 = vcombine.high %v10525_v17, %v10525_v17  ;;  %v3200_v13 = vcombine.low %v22458_v47, %v2485_v53  ;;  %v3201_v48 = vcombine.low %v2493_v59, %v2492_v35 }
 0x1c2   : > { %v29238_v45 = vcombine.low %v11158_v21, %v29176_v31  ;;  %v29240_v33 = vcombine.low %v11175_v44, %v11182_v9  ;;  %v3199_v43 = vcombine.low %v3191_v18, %v3198_v6  ;;  %v2494_v30 = vcombine.high %v2492_v35, %v2492_v35  ;;  %v22872_v44 = vld.sshfl [vmem:[%s27330_s25 + $0x14a] sm:$0x3 pattern:$0x76325410] }
 0x1c3   : > { %v9649_v57 = vpop.f32.mrb[86].mxu0  ;;  %v10549_v26 = vrot.slane %v10535_v22, %v27333_v7  ;;  %v10550_v27 = vcombine.high %v29221_v29, %v29221_v29  ;;  %v3208_v24 = vrot.slane %v3200_v13, %v27333_v7  ;;  %v3215_v31 = vrot.slane %v3201_v48, %v27333_v7  ;;  %v22849_v48 = vld [vmem:[%s27330_s25 + $0x172] sm:$0xff] }
 0x1c4   : > { %v24790_v56 = vpop.f32.mrb[87].mxu0  ;;  %24950 = vmatmul.mubr.msk.f32.gmra.mrb[28].mxu0 %vm1767_vm2, %v28928_v46  ;;  %v29252_v21 = vcombine.low %v11192_v12, %v11199_v55  ;;  %24444 = vmatmul.mubr.msk.f32.gmra.mrb[20].mxu1 %vm1767_vm2, %v3199_v43  ;;  %v2495_v9 = vcombine.high %v2181_v23, %v2181_v23  ;;  %v2502_v46 = vrot.slane %v2181_v23, %v27333_v7 }
 0x1c5   : > { %24952 = vmatprep.mubr.msk.f32.mxu0 %vm27271_vm1, %v32793_v2  ;;  %v29258_v19 = vcombine.low %v11209_v16, %v11216_v0  ;;  %v11218_v10 = vcombine.low %v10518_v49, %v10526_v50  ;;  %v11219_v8 = vcombine.low %v10525_v17, %v10527_v40  ;;  %24446 = vmatprep.mubr.msk.f32.mxu1 %vm27271_vm1, %v32793_v2  ;;  %v22459_v17 = vld.sshfl [vmem:[%s27330_s25 + $0x89] sm:$0x3 pattern:$0x76325410]  ;;  %v2184_v16 = vld [vmem:[%s27330_s25 + $0x99] sm:$0xff] }
 0x1c6   : > { %v3216_v60 = vcombine.low %v3208_v24, %v3215_v31  ;;  %v10552_v28 = vcombine.high %v22846_v34, %v22846_v34  ;;  %v2509_v12 = vrot.slane %v2495_v9, %v27333_v7  ;;  %v2510_v32 = vcombine.high %v2502_v46, %v2502_v46  ;;  %v22873_v56 = vld.sshfl [vmem:[%s27330_s25 + $0x162] sm:$0x3 pattern:$0x76325410]  ;;  %v2186_v9 = vld [vmem:[%s27330_s25 + $0xa9] sm:$0xff] }
 0x1c7   : > { %v9654_v11 = vpop.f32.mrb[88].mxu0  ;;  %v3217_v63 = vcombine.low %v2494_v30, %v2502_v46  ;;  %v11235_v62 = vcombine.low %v22872_v44, %v29221_v29  ;;  %v11236_v25 = vcombine.low %v10550_v27, %v10549_v26  ;;  %v10559_v49 = vrot.slane %v22846_v34, %v27333_v7 }
 0x1c8   : > { %v24793_v39 = vpop.f32.mrb[89].mxu0  ;;  %24953 = vmatmul.mubr.msk.f32.gmra.mrb[30].mxu0 %vm1767_vm2, %v28937_v61  ;;  %v2526_v54 = vrot.slane %v2183_v20, %v27333_v7  ;;  %24447 = vmatmul.mubr.msk.f32.gmra.mrb[22].mxu1 %vm1767_vm2, %v3216_v60  ;;  %v3218_v53 = vcombine.low %v2510_v32, %v2509_v12  ;;  %v2511_v55 = vcombine.high %v2509_v12, %v2509_v12  ;;  %v22851_v12 = vld [vmem:[%s27330_s25 + $0x182] sm:$0xff] }
 0x1c9   : > { %24955 = vmatprep.mubr.msk.f32.mxu0 %vm27271_vm1, %v32793_v2  ;;  %v3225_v15 = vrot.slane %v3217_v63, %v27333_v7  ;;  %v11226_v61 = vrot.slane %v11218_v10, %v27333_v7  ;;  %v11233_v22 = vrot.slane %v11219_v8, %v27333_v7  ;;  %v10551_v29 = vcombine.high %v10549_v26, %v10549_v26  ;;  %v22460_v63 = vld.sshfl [vmem:[%s27330_s25 + $0xa1] sm:$0x3 pattern:$0x76325410] }
 0x1ca   : > { %24449 = vmatprep.mubr.msk.f32.mxu1 %vm27271_vm1, %v32793_v2  ;;  %v2534_v47 = vcombine.high %v2526_v54, %v2526_v54  ;;  %v10566_v52 = vrot.slane %v10552_v28, %v27333_v7  ;;  %v10576_v18 = vcombine.high %v22848_v4, %v22848_v4  ;;  %v3232_v35 = vrot.slane %v3218_v53, %v27333_v7 }
 0x1cb   : > { %v3234_v59 = vcombine.low %v2511_v55, %v22459_v17  ;;  %v11243_v50 = vrot.slane %v11235_v62, %v27333_v7  ;;  %v11250_v6 = vrot.slane %v11236_v25, %v27333_v7  ;;  %v10567_v0 = vcombine.high %v10559_v49, %v10559_v49 }
 0x1cc   : > { %24956 = vmatmul.mubr.msk.f32.gmra.mrb[32].mxu0 %vm1767_vm2, %v28944_v42  ;;  %v3235_v40 = vcombine.low %v2526_v54, %v2534_v47  ;;  %v10568_v13 = vcombine.high %v10566_v52, %v10566_v52  ;;  %v3233_v23 = vcombine.low %v3225_v15, %v3232_v35  ;;  %v2519_v43 = vcombine.high %v2183_v20, %v2183_v20  ;;  %v2187_v35 = vld [vmem:[%s27330_s25 + $0xb1] sm:$0xff] }
 0x1cd   : > { %24958 = vmatprep.mubr.msk.f32.mxu0 %vm27271_vm1, %v32793_v2  ;;  %v3242_v57 = vrot.slane %v3234_v59, %v27333_v7  ;;  %v29289_v30 = vcombine.low %v11226_v61, %v11233_v22  ;;  %v10593_v42 = vcombine.high %v22849_v48, %v22849_v48  ;;  %v2543_v27 = vrot.slane %v2184_v16, %v27333_v7 }
 0x1ce   : > { %v3249_v26 = vrot.slane %v3235_v40, %v27333_v7  ;;  %v29294_v34 = vcombine.low %v10551_v29, %v10559_v49  ;;  %v10583_v24 = vrot.slane %v22848_v4, %v27333_v7  ;;  %v10590_v31 = vrot.slane %v10576_v18, %v27333_v7  ;;  %24450 = vmatmul.mubr.msk.f32.gmra.mrb[24].mxu1 %vm1767_vm2, %v3233_v23 }
 0x1cf   : > { %v2533_v44 = vrot.slane %v2519_v43, %v27333_v7  ;;  %v10600_v46 = vrot.slane %v22849_v48, %v27333_v7  ;;  %24452 = vmatprep.mubr.msk.f32.mxu1 %vm27271_vm1, %v32793_v2  ;;  %v2551_v10 = vcombine.high %v2543_v27, %v2543_v27  ;;  %v29308_v8 = vcombine.low %v11243_v50, %v11250_v6  ;;  %v22874_v50 = vld.sshfl [vmem:[%s27330_s25 + $0x17a] sm:$0x3 pattern:$0x76325410] }
 0x1d0   : > { %24959 = vmatmul.mubr.msk.f32.gmra.mrb[34].mxu0 %vm1767_vm2, %v29013_v3  ;;  %v3250_v20 = vcombine.low %v3242_v57, %v3249_v26  ;;  %v29310_v60 = vcombine.low %v10567_v0, %v10566_v52  ;;  %v29312_v11 = vcombine.low %v10568_v13, %v22873_v56  ;;  %v10607_v3 = vrot.slane %v10593_v42, %v27333_v7  ;;  %v22852_v13 = vld [vmem:[%s27330_s25 + $0x18a] sm:$0xff] }
 0x1d1   : > { %24961 = vmatprep.mubr.msk.f32.mxu0 %vm27271_vm1, %v32793_v2  ;;  %v2535_v28 = vcombine.high %v2533_v44, %v2533_v44  ;;  %v3252_v32 = vcombine.low %v2543_v27, %v2551_v10  ;;  %v2536_v39 = vcombine.high %v2184_v16, %v2184_v16  ;;  %v2567_v62 = vrot.slane %v2186_v9, %v27333_v7 }
 0x1d2   : > { %v11260_v25 = vrot.slane %v29294_v34, %v27333_v7  ;;  %v10591_v49 = vcombine.high %v10583_v24, %v10583_v24  ;;  %v10592_v17 = vcombine.high %v10590_v31, %v10590_v31  ;;  %24453 = vmatmul.mubr.msk.f32.gmra.mrb[26].mxu1 %vm1767_vm2, %v3250_v20  ;;  %v10608_v53 = vcombine.high %v10600_v46, %v10600_v46 }
 0x1d3   : > { %v3251_v54 = vcombine.low %v2533_v44, %v2535_v28  ;;  %24455 = vmatprep.mubr.msk.f32.mxu1 %vm27271_vm1, %v32793_v2  ;;  %v3266_v15 = vrot.slane %v3252_v32, %v27333_v7  ;;  %v2550_v55 = vrot.slane %v2536_v39, %v27333_v7  ;;  %v11267_v61 = vrot.slane %v29310_v60, %v27333_v7  ;;  %v2189_v32 = vld [vmem:[%s27330_s25 + $0xc1] sm:$0xff] }
 0x1d4   : > { %24962 = vmatmul.mubr.msk.f32.gmra.mrb[36].mxu0 %vm1767_vm2, %v29032_v38  ;;  %v10617_v22 = vcombine.high %v22851_v12, %v22851_v12  ;;  %v3269_v38 = vcombine.low %v22460_v63, %v2567_v62  ;;  %v11277_v4 = vrot.slane %v29312_v11, %v27333_v7  ;;  %v10609_v47 = vcombine.high %v10607_v3, %v10607_v3 }
 0x1d5   : > { %24964 = vmatprep.mubr.msk.f32.mxu0 %vm27271_vm1, %v32793_v2  ;;  %v3259_v29 = vrot.slane %v3251_v54, %v27333_v7  ;;  %v10624_v52 = vrot.slane %v22851_v12, %v27333_v7  ;;  %v2552_v18 = vcombine.high %v2550_v55, %v2550_v55  ;;  %v11270_v59 = vcombine.low %v10583_v24, %v10591_v49 }
 0x1d6   : > { %v11286_v16 = vcombine.low %v10590_v31, %v10592_v17  ;;  %v2560_v0 = vcombine.high %v2186_v9, %v2186_v9  ;;  %v11287_v40 = vcombine.low %v10600_v46, %v10608_v53  ;;  %v3283_v23 = vrot.slane %v3269_v38, %v27333_v7 }
 0x1d7   : > { %v3267_v6 = vcombine.low %v3259_v29, %v3266_v15  ;;  %v3268_v48 = vcombine.low %v2550_v55, %v2552_v18  ;;  %v2575_v57 = vcombine.high %v2567_v62, %v2567_v62  ;;  %v10631_v43 = vrot.slane %v10617_v22, %v27333_v7  ;;  %v22461_v15 = vld.sshfl [vmem:[%s27330_s25 + $0xb9] sm:$0x3 pattern:$0x76325410] }
 0x1d8   : > { %24965 = vmatmul.mubr.msk.f32.gmra.mrb[38].mxu0 %vm1767_vm2, %v29034_v37  ;;  %v2574_v56 = vrot.slane %v2560_v0, %v27333_v7  ;;  %v2584_v42 = vrot.slane %v2187_v35, %v27333_v7  ;;  %v11303_v26 = vcombine.low %v10607_v3, %v10609_v47  ;;  %v11304_v27 = vcombine.low %v22874_v50, %v10624_v52  ;;  %v22854_v47 = vld [vmem:[%s27330_s25 + $0x19a] sm:$0xff]  ;;  %v2190_v50 = vld [vmem:[%s27330_s25 + $0xc9] sm:$0xff] }
 0x1d9   : > { %24967 = vmatprep.mubr.msk.f32.mxu0 %vm27271_vm1, %v32793_v2  ;;  %24456 = vmatmul.mubr.msk.f32.gmra.mrb[28].mxu1 %vm1767_vm2, %v3267_v6  ;;  %v10632_v37 = vcombine.high %v10624_v52, %v10624_v52  ;;  %v3276_v34 = vrot.slane %v3268_v48, %v27333_v7  ;;  %v10634_v24 = vcombine.high %v22852_v13, %v22852_v13  ;;  %v22855_v0 = vld [vmem:[%s27330_s25 + $0x1a2] sm:$0xff]  ;;  %v22875_v48 = vld.sshfl [vmem:[%s27330_s25 + $0x192] sm:$0x3 pattern:$0x76325410] }
 0x1da   : > { %24458 = vmatprep.mubr.msk.f32.mxu1 %vm27271_vm1, %v32793_v2  ;;  %v2576_v31 = vcombine.high %v2574_v56, %v2574_v56  ;;  %v3285_v44 = vcombine.low %v2575_v57, %v2574_v56  ;;  %v2577_v9 = vcombine.high %v2187_v35, %v2187_v35  ;;  %v11284_v46 = vrot.slane %v11270_v59, %v27333_v7 }
 0x1db   : > { %v11294_v20 = vrot.slane %v11286_v16, %v27333_v7  ;;  %v11301_v10 = vrot.slane %v11287_v40, %v27333_v7  ;;  %v3284_v60 = vcombine.low %v3276_v34, %v3283_v23  ;;  %v10633_v11 = vcombine.high %v10631_v43, %v10631_v43 }
 0x1dc   : > { %24968 = vmatmul.mubr.msk.f32.gmra.mrb[40].mxu0 %vm1767_vm2, %v29036_v51  ;;  %v10641_v28 = vrot.slane %v22852_v13, %v27333_v7  ;;  %v3286_v12 = vcombine.low %v2576_v31, %v2584_v42  ;;  %v3293_v3 = vrot.slane %v3285_v44, %v27333_v7  ;;  %v11311_v51 = vrot.slane %v11303_v26, %v27333_v7 }
 0x1dd   : > { %24970 = vmatprep.mubr.msk.f32.mxu0 %vm27271_vm1, %v32793_v2  ;;  %v11318_v63 = vrot.slane %v11304_v27, %v27333_v7  ;;  %24459 = vmatmul.mubr.msk.f32.gmra.mrb[30].mxu1 %vm1767_vm2, %v3284_v60  ;;  %v2591_v39 = vrot.slane %v2577_v9, %v27333_v7  ;;  %v2592_v62 = vcombine.high %v2584_v42, %v2584_v42 }
 0x1de   : > { %v29364_v49 = vcombine.low %v11260_v25, %v11267_v61  ;;  %v29366_v17 = vcombine.low %v10632_v37, %v10631_v43  ;;  %v10648_v54 = vrot.slane %v10634_v24, %v27333_v7  ;;  %24461 = vmatprep.mubr.msk.f32.mxu1 %vm27271_vm1, %v32793_v2  ;;  %v3300_v53 = vrot.slane %v3286_v12, %v27333_v7 }
 0x1df   : > { %v10649_v55 = vcombine.high %v10641_v28, %v10641_v28  ;;  %v2593_v22 = vcombine.high %v2591_v39, %v2591_v39  ;;  %v3302_v29 = vcombine.low %v2592_v62, %v2591_v39  ;;  %v2601_v25 = vcombine.high %v2189_v32, %v2189_v32 }
 0x1e0   : > { %24971 = vmatmul.mubr.msk.f32.gmra.mrb[42].mxu0 %vm1767_vm2, %v29083_v14  ;;  %v29377_v61 = vcombine.low %v11277_v4, %v11284_v46  ;;  %v29379_v38 = vcombine.low %v10633_v11, %v10641_v28  ;;  %v3301_v52 = vcombine.low %v3293_v3, %v3300_v53  ;;  %v2608_v18 = vrot.slane %v2189_v32, %v27333_v7  ;;  %v22857_v11 = vld [vmem:[%s27330_s25 + $0x1b2] sm:$0xff] }
 0x1e1   : > { %24973 = vmatprep.mubr.msk.f32.mxu0 %vm27271_vm1, %v32793_v2  ;;  %v29383_v35 = vcombine.low %v11294_v20, %v11301_v10  ;;  %v29385_v14 = vcombine.low %v11311_v51, %v11318_v63  ;;  %v3303_v59 = vcombine.low %v2593_v22, %v22461_v15  ;;  %v3310_v16 = vrot.slane %v3302_v29, %v27333_v7  ;;  %v2192_v20 = vld [vmem:[%s27330_s25 + $0xd9] sm:$0xff]  ;;  %v22462_v63 = vld.sshfl [vmem:[%s27330_s25 + $0xd1] sm:$0x3 pattern:$0x76325410] }
 0x1e2   : > { %v11328_v6 = vrot.slane %v29366_v17, %v27333_v7  ;;  %v10650_v4 = vcombine.high %v10648_v54, %v10648_v54  ;;  %24462 = vmatmul.mubr.msk.f32.gmra.mrb[32].mxu1 %vm1767_vm2, %v3301_v52  ;;  %v2615_v40 = vrot.slane %v2601_v25, %v27333_v7  ;;  %v2616_v13 = vcombine.high %v2608_v18, %v2608_v18 }
 0x1e3   : > { %v29397_v23 = vcombine.low %v10649_v55, %v10648_v54  ;;  %v10658_v57 = vcombine.high %v22854_v47, %v22854_v47  ;;  %24464 = vmatprep.mubr.msk.f32.mxu1 %vm27271_vm1, %v32793_v2  ;;  %v3317_v43 = vrot.slane %v3303_v59, %v27333_v7  ;;  %v11335_v56 = vrot.slane %v29379_v38, %v27333_v7  ;;  %v2193_v59 = vld [vmem:[%s27330_s25 + $0xe1] sm:$0xff] }
 0x1e4   : > { %24974 = vmatmul.mubr.msk.f32.gmra.mrb[44].mxu0 %vm1767_vm2, %v29090_v58  ;;  %v2617_v42 = vcombine.high %v2615_v40, %v2615_v40  ;;  %v3319_v26 = vcombine.low %v2608_v18, %v2616_v13  ;;  %v2618_v58 = vcombine.high %v2190_v50, %v2190_v50  ;;  %v10665_v27 = vrot.slane %v22854_v47, %v27333_v7 }
 0x1e5   : > { %24976 = vmatprep.mubr.msk.f32.mxu0 %vm27271_vm1, %v32793_v2  ;;  %v10675_v37 = vcombine.high %v22855_v0, %v22855_v0  ;;  %v3318_v34 = vcombine.low %v3310_v16, %v3317_v43  ;;  %v2625_v24 = vrot.slane %v2190_v50, %v27333_v7  ;;  %v29408_v31 = vcombine.low %v10650_v4, %v22875_v48 }
 0x1e6   : > { %v3320_v44 = vcombine.low %v2615_v40, %v2617_v42  ;;  %v3327_v9 = vrot.slane %v3319_v26, %v27333_v7  ;;  %v2632_v46 = vrot.slane %v2618_v58, %v27333_v7  ;;  %v11345_v10 = vrot.slane %v29397_v23, %v27333_v7 }
 0x1e7   : > { %v10672_v60 = vrot.slane %v10658_v57, %v27333_v7  ;;  %24465 = vmatmul.mubr.msk.f32.gmra.mrb[34].mxu1 %vm1767_vm2, %v3318_v34  ;;  %v2633_v28 = vcombine.high %v2625_v24, %v2625_v24  ;;  %v10682_v12 = vrot.slane %v22855_v0, %v27333_v7  ;;  %v10689_v32 = vrot.slane %v10675_v37, %v27333_v7  ;;  %v2195_v37 = vld [vmem:[%s27330_s25 + $0xf1] sm:$0xff] }
 0x1e8   : > { %24977 = vmatmul.mubr.msk.f32.gmra.mrb[46].mxu0 %vm1767_vm2, %v29126_v1  ;;  %24467 = vmatprep.mubr.msk.f32.mxu1 %vm27271_vm1, %v32793_v2  ;;  %v3334_v3 = vrot.slane %v3320_v44, %v27333_v7  ;;  %v2634_v1 = vcombine.high %v2632_v46, %v2632_v46  ;;  %v2642_v39 = vcombine.high %v2192_v20, %v2192_v20 }
 0x1e9   : > { %24979 = vmatprep.mubr.msk.f32.mxu0 %vm27271_vm1, %v32793_v2  ;;  %v3336_v51 = vcombine.low %v2625_v24, %v2633_v28  ;;  %v2649_v62 = vrot.slane %v2192_v20, %v27333_v7  ;;  %v10673_v54 = vcombine.high %v10665_v27, %v10665_v27  ;;  %v10699_v53 = vcombine.high %v22857_v11, %v22857_v11 }
 0x1ea   : > { %v3335_v15 = vcombine.low %v3327_v9, %v3334_v3  ;;  %v3337_v55 = vcombine.low %v2632_v46, %v2634_v1  ;;  %v29432_v22 = vrot.slane %v22857_v11, %v27333_v7  ;;  %v2656_v25 = vrot.slane %v2642_v39, %v27333_v7  ;;  %v22463_v46 = vld.sshfl [vmem:[%s27330_s25 + $0xe9] sm:$0x3 pattern:$0x76325410]  ;;  %v22858_v11 = vld [vmem:[%s27330_s25 + $0x1ba] sm:$0xff] }
 0x1eb   : > { %v3344_v29 = vrot.slane %v3336_v51, %v27333_v7  ;;  %v2657_v38 = vcombine.high %v2649_v62, %v2649_v62  ;;  %v10674_v47 = vcombine.high %v10672_v60, %v10672_v60  ;;  %v3353_v18 = vcombine.low %v22462_v63, %v2649_v62  ;;  %v22921_v51 = vld [vmem:[%s27330_s25 + $0x30] sm:$0xff] }
 0x1ec   : > { %24980 = vmatmul.mubr.msk.f32.gmra.mrb[48].mxu0 %vm1767_vm2, %v29135_v41  ;;  %24468 = vmatmul.mubr.msk.f32.gmra.mrb[36].mxu1 %vm1767_vm2, %v3335_v15  ;;  %v3351_v52 = vrot.slane %v3337_v55, %v27333_v7  ;;  %v11352_v41 = vrot.slane %v29408_v31, %v27333_v7  ;;  %v10690_v16 = vcombine.high %v10682_v12, %v10682_v12  ;;  %v22922_v15 = vld [vmem:[%s27330_s25 + $0x38] sm:$0xff] }
 0x1ed   : > { %24982 = vmatprep.mubr.msk.f32.mxu0 %vm27271_vm1, %v32793_v2  ;;  %v10691_v50 = vcombine.high %v10689_v32, %v10689_v32  ;;  %24470 = vmatprep.mubr.msk.f32.mxu1 %vm27271_vm1, %v32793_v2  ;;  %v3354_v4 = vcombine.low %v2657_v38, %v2656_v25  ;;  %v11354_v0 = vcombine.low %v10665_v27, %v10673_v54 }
 0x1ee   : > { %v3352_v40 = vcombine.low %v3344_v29, %v3351_v52  ;;  %v3361_v13 = vrot.slane %v3353_v18, %v27333_v7  ;;  %v2658_v48 = vcombine.high %v2656_v25, %v2656_v25  ;;  %v29449_v23 = vrot.slane %v10699_v53, %v27333_v7 }
 0x1ef   : > { %v10714_v57 = vcombine.high %v29432_v22, %v29432_v22  ;;  %v3368_v43 = vrot.slane %v3354_v4, %v27333_v7  ;;  %v2659_v42 = vcombine.high %v2193_v59, %v2193_v59  ;;  %v29459_v26 = vcombine.low %v11328_v6, %v11335_v56 }
 0x1f0   : > { %24983 = vmatmul.mubr.msk.f32.gmra.mrb[50].mxu0 %vm1767_vm2, %v29155_v36  ;;  %v11355_v58 = vcombine.low %v10672_v60, %v10674_v47  ;;  %v22876_v36 = vld.sshfl [vmem:[%s27330_s25 + $0x1aa] sm:$0x3 pattern:$0x76325410]  ;;  %24471 = vmatmul.mubr.msk.f32.gmra.mrb[38].mxu1 %vm1767_vm2, %v3352_v40  ;;  %v2666_v27 = vrot.slane %v2193_v59, %v27333_v7  ;;  %v11371_v34 = vcombine.low %v10682_v12, %v10690_v16 }
 0x1f1   : > { %24985 = vmatprep.mubr.msk.f32.mxu0 %vm27271_vm1, %v32793_v2  ;;  %v11372_v24 = vcombine.low %v10689_v32, %v10691_v50  ;;  %24473 = vmatprep.mubr.msk.f32.mxu1 %vm27271_vm1, %v32793_v2  ;;  %v3369_v31 = vcombine.low %v3361_v13, %v3368_v43  ;;  %v2673_v44 = vrot.slane %v2659_v42, %v27333_v7 }
 0x1f2   : > { %v29468_v17 = vcombine.low %v11345_v10, %v11352_v41  ;;  %v11362_v6 = vrot.slane %v11354_v0, %v27333_v7  ;;  %v2674_v56 = vcombine.high %v2666_v27, %v2666_v27  ;;  %v3370_v9 = vcombine.low %v2658_v48, %v2666_v27 }
 0x1f3   : > { %v11388_v20 = vcombine.low %v22876_v36, %v29432_v22  ;;  %v11389_v60 = vcombine.low %v10714_v57, %v29449_v23  ;;  %v2675_v28 = vcombine.high %v2673_v44, %v2673_v44  ;;  %v2690_v12 = vrot.slane %v2195_v37, %v27333_v7  ;;  %v2196_v22 = vld [vmem:[%s27330_s25 + $0xf9] sm:$0xff] }
 0x1f4   : > { %24986 = vmatmul.mubr.msk.f32.gmra.mrb[52].mxu0 %vm1767_vm2, %v29238_v45  ;;  %v11369_v10 = vrot.slane %v11355_v58, %v27333_v7  ;;  %24474 = vmatmul.mubr.msk.f32.gmra.mrb[40].mxu1 %vm1767_vm2, %v3369_v31  ;;  %v3371_v3 = vcombine.low %v2674_v56, %v2673_v44  ;;  %v3378_v45 = vrot.slane %v3370_v9, %v27333_v7  ;;  %v22877_v56 = vld.sshfl [vmem:[%s27330_s25 + $0x1c2] sm:$0x3 pattern:$0x76325410] }
 0x1f5   : > { %24988 = vmatprep.mubr.msk.f32.mxu0 %vm27271_vm1, %v32793_v2  ;;  %v11379_v1 = vrot.slane %v11371_v34, %v27333_v7  ;;  %v11386_v32 = vrot.slane %v11372_v24, %v27333_v7  ;;  %24476 = vmatprep.mubr.msk.f32.mxu1 %vm27271_vm1, %v32793_v2  ;;  %v2698_v63 = vcombine.high %v2690_v12, %v2690_v12  ;;  %v22464_v34 = vld.sshfl [vmem:[%s27330_s25 + $0x101] sm:$0x3 pattern:$0x76325410] }
 0x1f6   : > { %v3387_v39 = vcombine.low %v2675_v28, %v22463_v46  ;;  %v10715_v62 = vcombine.high %v29449_v23, %v29449_v23  ;;  %v10716_v54 = vcombine.high %v22858_v11, %v22858_v11  ;;  %v10723_v53 = vrot.slane %v22858_v11, %v27333_v7  ;;  %v2198_v23 = vld [vmem:[%s27330_s25 + $0x109] sm:$0xff] }
 0x1f7   : > { %v3385_v55 = vrot.slane %v3371_v3, %v27333_v7  ;;  %v11396_v29 = vrot.slane %v11388_v20, %v27333_v7  ;;  %v11403_v25 = vrot.slane %v11389_v60, %v27333_v7  ;;  %v3388_v38 = vcombine.low %v2690_v12, %v2698_v63 }
 0x1f8   : > { %24989 = vmatmul.mubr.msk.f32.gmra.mrb[54].mxu0 %vm1767_vm2, %v29240_v33  ;;  %v3395_v47 = vrot.slane %v3387_v39, %v27333_v7  ;;  %v29501_v52 = vcombine.low %v11362_v6, %v11369_v10  ;;  %v11935_v18 = vcombine.high %v22921_v51, %v22921_v51  ;;  %v2683_v41 = vcombine.high %v2195_v37, %v2195_v37 }
 0x1f9   : > { %24991 = vmatprep.mubr.msk.f32.mxu0 %vm27271_vm1, %v32793_v2  ;;  %v3386_v59 = vcombine.low %v3378_v45, %v3385_v55  ;;  %v29503_v16 = vcombine.low %v11379_v1, %v11386_v32  ;;  %v11952_v50 = vcombine.high %v22922_v15, %v22922_v15  ;;  %v3402_v33 = vrot.slane %v3388_v38, %v27333_v7  ;;  %v2199_v1 = vld [vmem:[%s27330_s25 + $0x111] sm:$0xff] }
 0x1fa   : > { %v2707_v4 = vrot.slane %v2196_v22, %v27333_v7  ;;  %v10730_v0 = vrot.slane %v10716_v54, %v27333_v7  ;;  %v10731_v40 = vcombine.high %v10723_v53, %v10723_v53  ;;  %v11942_v13 = vrot.slane %v22921_v51, %v27333_v7  ;;  %v22924_v51 = vld [vmem:[%s27330_s25 + $0x48] sm:$0xff] }
 0x1fb   : > { %24477 = vmatmul.mubr.msk.f32.gmra.mrb[42].mxu1 %vm1767_vm2, %v3386_v59  ;;  %v2697_v48 = vrot.slane %v2683_v41, %v27333_v7  ;;  %v29514_v57 = vcombine.low %v11396_v29, %v11403_v25  ;;  %v11405_v43 = vcombine.low %v10715_v62, %v10723_v53  ;;  %v3403_v42 = vcombine.low %v3395_v47, %v3402_v33  ;;  %v22925_v41 = vld [vmem:[%s27330_s25 + $0x50] sm:$0xff] }
 0x1fc   : > { %24992 = vmatmul.mubr.msk.f32.gmra.mrb[56].mxu0 %vm1767_vm2, %v29252_v21  ;;  %24479 = vmatprep.mubr.msk.f32.mxu1 %vm27271_vm1, %v32793_v2  ;;  %v11949_v58 = vrot.slane %v11935_v18, %v27333_v7  ;;  %v11959_v36 = vrot.slane %v22922_v15, %v27333_v7  ;;  %v2715_v37 = vcombine.high %v2707_v4, %v2707_v4 }
 0x1fd   : > { %24994 = vmatprep.mubr.msk.f32.mxu0 %vm27271_vm1, %v32793_v2  ;;  %v2699_v27 = vcombine.high %v2697_v48, %v2697_v48  ;;  %v10732_v24 = vcombine.high %v10730_v0, %v10730_v0  ;;  %v11966_v21 = vrot.slane %v11952_v50, %v27333_v7  ;;  %v2700_v31 = vcombine.high %v2196_v22, %v2196_v22 }
 0x1fe   : > { %v2731_v44 = vrot.slane %v2198_v23, %v27333_v7  ;;  %v11406_v6 = vcombine.low %v10731_v40, %v10730_v0  ;;  %v11950_v9 = vcombine.high %v11942_v13, %v11942_v13  ;;  %v3405_v20 = vcombine.low %v2707_v4, %v2715_v37 }
 0x1ff   : > { %24480 = vmatmul.mubr.msk.f32.gmra.mrb[44].mxu1 %vm1767_vm2, %v3403_v42  ;;  %v3404_v46 = vcombine.low %v2697_v48, %v2699_v27  ;;  %v11413_v60 = vrot.slane %v11405_v43, %v27333_v7  ;;  %v2714_v11 = vrot.slane %v2700_v31, %v27333_v7  ;;  %v11951_v12 = vcombine.high %v11949_v58, %v11949_v58  ;;  %v22927_v31 = vld [vmem:[%s27330_s25 + $0x60] sm:$0xff] }
 0x200   : > { %24995 = vmatmul.mubr.msk.f32.gmra.mrb[58].mxu0 %vm1767_vm2, %v29258_v19  ;;  %24482 = vmatprep.mubr.msk.f32.mxu1 %vm27271_vm1, %v32793_v2  ;;  %v3422_v28 = vcombine.low %v22464_v34, %v2731_v44  ;;  %v11967_v10 = vcombine.high %v11959_v36, %v11959_v36  ;;  %v3419_v45 = vrot.slane %v3405_v20, %v27333_v7  ;;  %v2201_v34 = vld [vmem:[%s27330_s25 + $0x121] sm:$0xff] }
 0x201   : > { %24997 = vmatprep.mubr.msk.f32.mxu0 %vm27271_vm1, %v32793_v2  ;;  %v3412_v3 = vrot.slane %v3404_v46, %v27333_v7  ;;  %v29538_v32 = vcombine.low %v10732_v24, %v22877_v56  ;;  %v11968_v19 = vcombine.high %v11966_v21, %v11966_v21  ;;  %v2716_v63 = vcombine.high %v2714_v11, %v2714_v11  ;;  %v22975_v56 = vld.sshfl [vmem:[%s27330_s25 + $0x40] sm:$0x3 pattern:$0x76325410] }
 0x202   : > { %v2724_v39 = vcombine.high %v2198_v23, %v2198_v23  ;;  %v11420_v62 = vrot.slane %v11406_v6, %v27333_v7  ;;  %v12675_v54 = vcombine.low %v11942_v13, %v11950_v9  ;;  %v2739_v15 = vcombine.high %v2731_v44, %v2731_v44  ;;  %v22465_v6 = vld.sshfl [vmem:[%s27330_s25 + $0x119] sm:$0x3 pattern:$0x76325410] }
 0x203   : > { %v3420_v53 = vcombine.low %v3412_v3, %v3419_v45  ;;  %v3421_v55 = vcombine.low %v2714_v11, %v2716_v63  ;;  %v3436_v22 = vrot.slane %v3422_v28, %v27333_v7  ;;  %v2748_v25 = vrot.slane %v2199_v1, %v27333_v7 }
 0x204   : > { %24998 = vmatmul.mubr.msk.f32.gmra.mrb[60].mxu0 %vm1767_vm2, %v29289_v30  ;;  %v2738_v29 = vrot.slane %v2724_v39, %v27333_v7  ;;  %v12676_v38 = vcombine.low %v11949_v58, %v11951_v12  ;;  %v12692_v47 = vcombine.low %v11959_v36, %v11967_v10  ;;  %v11976_v18 = vcombine.high %v22924_v51, %v22924_v51 }
 0x205   : > { %25000 = vmatprep.mubr.msk.f32.mxu0 %vm27271_vm1, %v32793_v2  ;;  %24483 = vmatmul.mubr.msk.f32.gmra.mrb[46].mxu1 %vm1767_vm2, %v3420_v53  ;;  %v12693_v59 = vcombine.low %v11966_v21, %v11968_v19  ;;  %v3429_v30 = vrot.slane %v3421_v55, %v27333_v7  ;;  %v29554_v4 = vcombine.low %v11413_v60, %v11420_v62  ;;  %v2202_v62 = vld [vmem:[%s27330_s25 + $0x129] sm:$0xff] }
 0x206   : > { %24485 = vmatprep.mubr.msk.f32.mxu1 %vm27271_vm1, %v32793_v2  ;;  %v2740_v50 = vcombine.high %v2738_v29, %v2738_v29  ;;  %v3438_v33 = vcombine.low %v2739_v15, %v2738_v29  ;;  %v11429_v0 = vrot.slane %v29538_v32, %v27333_v7  ;;  %v11983_v40 = vrot.slane %v22924_v51, %v27333_v7 }
 0x207   : > { %v2741_v13 = vcombine.high %v2199_v1, %v2199_v1  ;;  %v12683_v48 = vrot.slane %v12675_v54, %v27333_v7  ;;  %v3437_v23 = vcombine.low %v3429_v30, %v3436_v22  ;;  %v12690_v58 = vrot.slane %v12676_v38, %v27333_v7 }
 0x208   : > { %25001 = vmatmul.mubr.msk.f32.gmra.mrb[62].mxu0 %vm1767_vm2, %v29308_v8  ;;  %v3439_v43 = vcombine.low %v2740_v50, %v2748_v25  ;;  %v3446_v42 = vrot.slane %v3438_v33, %v27333_v7  ;;  %v11993_v36 = vcombine.high %v22925_v41, %v22925_v41  ;;  %v2756_v37 = vcombine.high %v2748_v25, %v2748_v25  ;;  %v22976_v25 = vld.sshfl [vmem:[%s27330_s25 + $0x58] sm:$0x3 pattern:$0x76325410]  ;;  %v22928_v33 = vld [vmem:[%s27330_s25 + $0x68] sm:$0xff] }
 0x209   : > { %25003 = vmatprep.mubr.msk.f32.mxu0 %vm27271_vm1, %v32793_v2  ;;  %v2755_v27 = vrot.slane %v2741_v13, %v27333_v7  ;;  %v12700_v8 = vrot.slane %v12692_v47, %v27333_v7  ;;  %v12707_v24 = vrot.slane %v12693_v59, %v27333_v7  ;;  %v11990_v21 = vrot.slane %v11976_v18, %v27333_v7 }
 0x20a   : > { %24486 = vmatmul.mubr.msk.f32.gmra.mrb[48].mxu1 %vm1767_vm2, %v3437_v23  ;;  %v3453_v44 = vrot.slane %v3439_v43, %v27333_v7  ;;  %v11991_v9 = vcombine.high %v11983_v40, %v11983_v40  ;;  %v12000_v46 = vrot.slane %v22925_v41, %v27333_v7  ;;  %v2765_v12 = vcombine.high %v2201_v34, %v2201_v34 }
 0x20b   : > { %24488 = vmatprep.mubr.msk.f32.mxu1 %vm27271_vm1, %v32793_v2  ;;  %v2757_v20 = vcombine.high %v2755_v27, %v2755_v27  ;;  %v3455_v60 = vcombine.low %v2756_v37, %v2755_v27  ;;  %v11992_v11 = vcombine.high %v11990_v21, %v11990_v21  ;;  %v2772_v10 = vrot.slane %v2201_v34, %v27333_v7 }
 0x20c   : > { %25004 = vmatmul.mubr.msk.f32.gmra.mrb[64].mxu0 %vm1767_vm2, %v29364_v49  ;;  %v3454_v28 = vcombine.low %v3446_v42, %v3453_v44  ;;  %v12007_v3 = vrot.slane %v11993_v36, %v27333_v7  ;;  %v12024_v45 = vrot.slane %v22927_v31, %v27333_v7  ;;  %v29587_v51 = vcombine.low %v12683_v48, %v12690_v58  ;;  %v2204_v58 = vld [vmem:[%s27330_s25 + $0x139] sm:$0xff] }
 0x20d   : > { %25006 = vmatprep.mubr.msk.f32.mxu0 %vm27271_vm1, %v32793_v2  ;;  %v3456_v1 = vcombine.low %v2757_v20, %v22465_v6  ;;  %v3463_v19 = vrot.slane %v3455_v60, %v27333_v7  ;;  %v12709_v63 = vcombine.low %v22975_v56, %v11983_v40  ;;  %v2779_v49 = vrot.slane %v2765_v12, %v27333_v7 }
 0x20e   : > { %24489 = vmatmul.mubr.msk.f32.gmra.mrb[50].mxu1 %vm1767_vm2, %v3454_v28  ;;  %v2780_v39 = vcombine.high %v2772_v10, %v2772_v10  ;;  %v29592_v54 = vcombine.low %v11991_v9, %v11990_v21  ;;  %v12008_v53 = vcombine.high %v12000_v46, %v12000_v46  ;;  %v12009_v15 = vcombine.high %v12007_v3, %v12007_v3 }
 0x20f   : > { %24491 = vmatprep.mubr.msk.f32.mxu1 %vm27271_vm1, %v32793_v2  ;;  %v3470_v55 = vrot.slane %v3456_v1, %v27333_v7  ;;  %v29599_v22 = vcombine.low %v12700_v8, %v12707_v24  ;;  %v12726_v29 = vcombine.low %v11992_v11, %v12000_v46  ;;  %v2781_v38 = vcombine.high %v2779_v49, %v2779_v49  ;;  %v22930_v46 = vld [vmem:[%s27330_s25 + $0x78] sm:$0xff]  ;;  %v22466_v11 = vld.sshfl [vmem:[%s27330_s25 + $0x131] sm:$0x3 pattern:$0x76325410] }
 0x210   : > { %25007 = vmatmul.mubr.msk.f32.gmra.mrb[66].mxu0 %vm1767_vm2, %v29377_v61  ;;  %v3472_v47 = vcombine.low %v2772_v10, %v2780_v39  ;;  %v12032_v18 = vcombine.high %v12024_v45, %v12024_v45  ;;  %v12017_v59 = vcombine.high %v22927_v31, %v22927_v31  ;;  %v2782_v30 = vcombine.high %v2202_v62, %v2202_v62  ;;  %v2205_v39 = vld [vmem:[%s27330_s25 + $0x141] sm:$0xff] }
 0x211   : > { %25009 = vmatprep.mubr.msk.f32.mxu0 %vm27271_vm1, %v32793_v2  ;;  %v3471_v41 = vcombine.low %v3463_v19, %v3470_v55  ;;  %v12717_v50 = vrot.slane %v12709_v63, %v27333_v7  ;;  %v3473_v40 = vcombine.low %v2779_v49, %v2781_v38  ;;  %v2789_v13 = vrot.slane %v2202_v62, %v27333_v7 }
 0x212   : > { %v3480_v61 = vrot.slane %v3472_v47, %v27333_v7  ;;  %v12724_v48 = vrot.slane %v29592_v54, %v27333_v7  ;;  %v12727_v23 = vcombine.low %v12008_v53, %v12007_v3  ;;  %v12743_v43 = vcombine.low %v12009_v15, %v22976_v25  ;;  %v22931_v25 = vld [vmem:[%s27330_s25 + $0x80] sm:$0xff] }
 0x213   : > { %24492 = vmatmul.mubr.msk.f32.gmra.mrb[52].mxu1 %vm1767_vm2, %v3471_v41  ;;  %v2796_v42 = vrot.slane %v2782_v30, %v27333_v7  ;;  %v12734_v36 = vrot.slane %v12726_v29, %v27333_v7  ;;  %v3487_v27 = vrot.slane %v3473_v40, %v27333_v7  ;;  %v2797_v37 = vcombine.high %v2789_v13, %v2789_v13  ;;  %v2207_v30 = vld [vmem:[%s27330_s25 + $0x151] sm:$0xff] }
 0x214   : > { %25010 = vmatmul.mubr.msk.f32.gmra.mrb[68].mxu0 %vm1767_vm2, %v29383_v35  ;;  %24494 = vmatprep.mubr.msk.f32.mxu1 %vm27271_vm1, %v32793_v2  ;;  %v12744_v34 = vcombine.low %v12024_v45, %v12032_v18  ;;  %v12031_v8 = vrot.slane %v12017_v59, %v27333_v7  ;;  %v12041_v24 = vrot.slane %v22928_v33, %v27333_v7  ;;  %v22977_v59 = vld.sshfl [vmem:[%s27330_s25 + $0x70] sm:$0x3 pattern:$0x76325410] }
 0x215   : > { %25012 = vmatprep.mubr.msk.f32.mxu0 %vm27271_vm1, %v32793_v2  ;;  %v2798_v21 = vcombine.high %v2796_v42, %v2796_v42  ;;  %v3488_v35 = vcombine.low %v3480_v61, %v3487_v27  ;;  %v3489_v31 = vcombine.low %v2789_v13, %v2797_v37  ;;  %v2806_v44 = vcombine.high %v2204_v58, %v2204_v58  ;;  %v22933_v61 = vld [vmem:[%s27330_s25 + $0x90] sm:$0xff] }
 0x216   : > { %v2813_v6 = vrot.slane %v2204_v58, %v27333_v7  ;;  %v12741_v56 = vrot.slane %v12727_v23, %v27333_v7  ;;  %v12751_v9 = vrot.slane %v12743_v43, %v27333_v7  ;;  %v12034_v20 = vcombine.high %v22928_v33, %v22928_v33 }
 0x217   : > { %v3490_v60 = vcombine.low %v2796_v42, %v2798_v21  ;;  %24495 = vmatmul.mubr.msk.f32.gmra.mrb[54].mxu1 %vm1767_vm2, %v3488_v35  ;;  %v3497_v28 = vrot.slane %v3489_v31, %v27333_v7  ;;  %v2820_v12 = vrot.slane %v2806_v44, %v27333_v7  ;;  %v12758_v3 = vrot.slane %v12744_v34, %v27333_v7  ;;  %v22467_v21 = vld.sshfl [vmem:[%s27330_s25 + $0x149] sm:$0x3 pattern:$0x76325410] }
 0x218   : > { %25013 = vmatmul.mubr.msk.f32.gmra.mrb[70].mxu0 %vm1767_vm2, %v29385_v14  ;;  %v2821_v10 = vcombine.high %v2813_v6, %v2813_v6  ;;  %v12033_v45 = vcombine.high %v12031_v8, %v12031_v8  ;;  %24497 = vmatprep.mubr.msk.f32.mxu1 %vm27271_vm1, %v32793_v2  ;;  %v12049_v14 = vcombine.high %v12041_v24, %v12041_v24 }
 0x219   : > { %25015 = vmatprep.mubr.msk.f32.mxu0 %vm27271_vm1, %v32793_v2  ;;  %v3504_v1 = vrot.slane %v3490_v60, %v27333_v7  ;;  %v12058_v19 = vcombine.high %v22930_v46, %v22930_v46  ;;  %v3506_v63 = vcombine.low %v22466_v11, %v2813_v6  ;;  %v29640_v62 = vcombine.low %v12717_v50, %v12724_v48 }
 0x21a   : > { %v3507_v49 = vcombine.low %v2821_v10, %v2820_v12  ;;  %v29642_v54 = vcombine.low %v12734_v36, %v12741_v56  ;;  %v2822_v15 = vcombine.high %v2820_v12, %v2820_v12  ;;  %v12048_v55 = vrot.slane %v12034_v20, %v27333_v7  ;;  %v2208_v20 = vld [vmem:[%s27330_s25 + $0x159] sm:$0xff] }
 0x21b   : > { %v3505_v53 = vcombine.low %v3497_v28, %v3504_v1  ;;  %v12065_v29 = vrot.slane %v22930_v46, %v27333_v7  ;;  %v3514_v38 = vrot.slane %v3506_v63, %v27333_v7  ;;  %v29653_v18 = vcombine.low %v12751_v9, %v12758_v3  ;;  %v22934_v1 = vld [vmem:[%s27330_s25 + $0x98] sm:$0xff] }
 0x21c   : > { %25016 = vmatmul.mubr.msk.f32.gmra.mrb[72].mxu0 %vm1767_vm2, %v29459_v26  ;;  %v3521_v47 = vrot.slane %v3507_v49, %v27333_v7  ;;  %v2823_v41 = vcombine.high %v2205_v39, %v2205_v39  ;;  %v2830_v26 = vrot.slane %v2205_v39, %v27333_v7  ;;  %v29659_v50 = vcombine.low %v12031_v8, %v12033_v45 }
 0x21d   : > { %25018 = vmatprep.mubr.msk.f32.mxu0 %vm27271_vm1, %v32793_v2  ;;  %24498 = vmatmul.mubr.msk.f32.gmra.mrb[56].mxu1 %vm1767_vm2, %v3505_v53  ;;  %v29661_v33 = vcombine.low %v12041_v24, %v12049_v14  ;;  %v12072_v40 = vrot.slane %v12058_v19, %v27333_v7  ;;  %v12075_v48 = vcombine.high %v22931_v25, %v22931_v25 }
 0x21e   : > { %24500 = vmatprep.mubr.msk.f32.mxu1 %vm27271_vm1, %v32793_v2  ;;  %v3522_v13 = vcombine.low %v3514_v38, %v3521_v47  ;;  %v2837_v23 = vrot.slane %v2823_v41, %v27333_v7  ;;  %v2838_v43 = vcombine.high %v2830_v26, %v2830_v26  ;;  %v3523_v42 = vcombine.low %v2822_v15, %v2830_v26 }
 0x21f   : > { %v12050_v58 = vcombine.high %v12048_v55, %v12048_v55  ;;  %v12778_v36 = vcombine.low %v22977_v59, %v12065_v29  ;;  %v12082_v27 = vrot.slane %v22931_v25, %v27333_v7  ;;  %v2854_v37 = vrot.slane %v2207_v30, %v27333_v7  ;;  %v22978_v25 = vld.sshfl [vmem:[%s27330_s25 + $0x88] sm:$0x3 pattern:$0x76325410] }
 0x220   : > { %25019 = vmatmul.mubr.msk.f32.gmra.mrb[74].mxu0 %vm1767_vm2, %v29468_v17  ;;  %v12099_v34 = vcombine.high %v22933_v61, %v22933_v61  ;;  %v3524_v8 = vcombine.low %v2838_v43, %v2837_v23  ;;  %v3531_v24 = vrot.slane %v3523_v42, %v27333_v7  ;;  %v12768_v17 = vrot.slane %v29659_v50, %v27333_v7 }
 0x221   : > { %25021 = vmatprep.mubr.msk.f32.mxu0 %vm27271_vm1, %v32793_v2  ;;  %24501 = vmatmul.mubr.msk.f32.gmra.mrb[58].mxu1 %vm1767_vm2, %v3522_v13  ;;  %v12073_v35 = vcombine.high %v12065_v29, %v12065_v29  ;;  %v2839_v31 = vcombine.high %v2837_v23, %v2837_v23  ;;  %v2862_v44 = vcombine.high %v2854_v37, %v2854_v37  ;;  %v2210_v29 = vld [vmem:[%s27330_s25 + $0x169] sm:$0xff]  ;;  %v22468_v13 = vld.sshfl [vmem:[%s27330_s25 + $0x161] sm:$0x3 pattern:$0x76325410] }
 0x222   : > { %24503 = vmatprep.mubr.msk.f32.mxu1 %vm27271_vm1, %v32793_v2  ;;  %v12074_v6 = vcombine.high %v12072_v40, %v12072_v40  ;;  %v12089_v56 = vrot.slane %v12075_v48, %v27333_v7  ;;  %v12090_v9 = vcombine.high %v12082_v27, %v12082_v27  ;;  %v3538_v46 = vrot.slane %v3524_v8, %v27333_v7 }
 0x223   : > { %v12775_v60 = vrot.slane %v29661_v33, %v27333_v7  ;;  %v29689_v11 = vrot.slane %v12778_v36, %v27333_v7  ;;  %v3540_v28 = vcombine.low %v2839_v31, %v22467_v21  ;;  %v3541_v12 = vcombine.low %v2854_v37, %v2862_v44  ;;  %v22979_v33 = vld.sshfl [vmem:[%s27330_s25 + $0xa0] sm:$0x3 pattern:$0x76325410] }
 0x224   : > { %25022 = vmatmul.mubr.msk.f32.gmra.mrb[76].mxu0 %vm1767_vm2, %v29501_v52  ;;  %v29693_v10 = vcombine.low %v12048_v55, %v12050_v58  ;;  %v12106_v3 = vrot.slane %v22933_v61, %v27333_v7  ;;  %v12113_v45 = vrot.slane %v12099_v34, %v27333_v7  ;;  %v3539_v52 = vcombine.low %v3531_v24, %v3538_v46 }
 0x225   : > { %25024 = vmatprep.mubr.msk.f32.mxu0 %vm27271_vm1, %v32793_v2  ;;  %v3548_v14 = vrot.slane %v3540_v28, %v27333_v7  ;;  %v3555_v19 = vrot.slane %v3541_v12, %v27333_v7  ;;  %v2847_v63 = vcombine.high %v2207_v30, %v2207_v30  ;;  %v2871_v49 = vrot.slane %v2208_v20, %v27333_v7 }
 0x226   : > { %v29701_v39 = vcombine.low %v12073_v35, %v12072_v40  ;;  %v29703_v53 = vcombine.low %v12074_v6, %v12082_v27  ;;  %v12091_v15 = vcombine.high %v12089_v56, %v12089_v56  ;;  %v29705_v55 = vcombine.low %v12090_v9, %v12089_v56  ;;  %24504 = vmatmul.mubr.msk.f32.gmra.mrb[60].mxu1 %vm1767_vm2, %v3539_v52  ;;  %v22936_v27 = vld [vmem:[%s27330_s25 + $0xa8] sm:$0xff]  ;;  %v2211_v56 = vld [vmem:[%s27330_s25 + $0x171] sm:$0xff] }
 0x227   : > { %24506 = vmatprep.mubr.msk.f32.mxu1 %vm27271_vm1, %v32793_v2  ;;  %v3556_v38 = vcombine.low %v3548_v14, %v3555_v19  ;;  %v2861_v47 = vrot.slane %v2847_v63, %v27333_v7  ;;  %v2879_v59 = vcombine.high %v2871_v49, %v2871_v49  ;;  %v12785_v41 = vrot.slane %v29693_v10, %v27333_v7 }
 0x228   : > { %25025 = vmatmul.mubr.msk.f32.gmra.mrb[78].mxu0 %vm1767_vm2, %v29503_v16  ;;  %v12114_v26 = vcombine.high %v12106_v3, %v12106_v3  ;;  %v12115_v30 = vcombine.high %v12113_v45, %v12113_v45  ;;  %v12116_v40 = vcombine.high %v22934_v1, %v22934_v1  ;;  %v2864_v48 = vcombine.high %v2208_v20, %v2208_v20 }
 0x229   : > { %25027 = vmatprep.mubr.msk.f32.mxu0 %vm27271_vm1, %v32793_v2  ;;  %v2863_v61 = vcombine.high %v2861_v47, %v2861_v47  ;;  %v3558_v16 = vcombine.low %v2871_v49, %v2879_v59  ;;  %v2895_v23 = vrot.slane %v2210_v29, %v27333_v7  ;;  %v12802_v43 = vrot.slane %v29701_v39, %v27333_v7 }
 0x22a   : > { %v12809_v42 = vrot.slane %v29703_v53, %v27333_v7  ;;  %v12812_v58 = vcombine.low %v12091_v15, %v22978_v25  ;;  %v12819_v36 = vrot.slane %v29705_v55, %v27333_v7  ;;  %24507 = vmatmul.mubr.msk.f32.gmra.mrb[62].mxu1 %vm1767_vm2, %v3556_v38  ;;  %v2878_v8 = vrot.slane %v2864_v48, %v27333_v7 }
 0x22b   : > { %24509 = vmatprep.mubr.msk.f32.mxu1 %vm27271_vm1, %v32793_v2  ;;  %v3557_v37 = vcombine.low %v2861_v47, %v2863_v61  ;;  %v3572_v34 = vrot.slane %v3558_v16, %v27333_v7  ;;  %v12828_v24 = vcombine.low %v12106_v3, %v12114_v26  ;;  %v12829_v21 = vcombine.low %v12113_v45, %v12115_v30  ;;  %v22937_v26 = vld [vmem:[%s27330_s25 + $0xb0] sm:$0xff]  ;;  %v2213_v30 = vld [vmem:[%s27330_s25 + $0x181] sm:$0xff] }
 0x22c   : > { %25028 = vmatmul.mubr.msk.f32.gmra.mrb[80].mxu0 %vm1767_vm2, %v29514_v57  ;;  %v12123_v35 = vrot.slane %v22934_v1, %v27333_v7  ;;  %v3575_v31 = vcombine.low %v22468_v13, %v2895_v23  ;;  %v12130_v44 = vrot.slane %v12116_v40, %v27333_v7  ;;  %v2880_v6 = vcombine.high %v2878_v8, %v2878_v8  ;;  %v22469_v13 = vld.sshfl [vmem:[%s27330_s25 + $0x179] sm:$0x3 pattern:$0x76325410] }
 0x22d   : > { %25030 = vmatprep.mubr.msk.f32.mxu0 %vm27271_vm1, %v32793_v2  ;;  %v3565_v57 = vrot.slane %v3557_v37, %v27333_v7  ;;  %v2888_v9 = vcombine.high %v2210_v29, %v2210_v29  ;;  %v12826_v46 = vrot.slane %v12812_v58, %v27333_v7  ;;  %v12140_v20 = vcombine.high %v22936_v27, %v22936_v27 }
 0x22e   : > { %v29743_v28 = vrot.slane %v22936_v27, %v27333_v7  ;;  %v2903_v12 = vcombine.high %v2895_v23, %v2895_v23  ;;  %v3574_v3 = vcombine.low %v2878_v8, %v2880_v6  ;;  %v3589_v45 = vrot.slane %v3575_v31, %v27333_v7  ;;  %v22939_v8 = vld [vmem:[%s27330_s25 + $0xc0] sm:$0xff] }
 0x22f   : > { %v3573_v10 = vcombine.low %v3565_v57, %v3572_v34  ;;  %v2902_v52 = vrot.slane %v2888_v9, %v27333_v7  ;;  %v12836_v1 = vrot.slane %v12828_v24, %v27333_v7  ;;  %v12843_v14 = vrot.slane %v12829_v21, %v27333_v7  ;;  %v2214_v57 = vld [vmem:[%s27330_s25 + $0x189] sm:$0xff] }
 0x230   : > { %25031 = vmatmul.mubr.msk.f32.gmra.mrb[98].mxu0 %vm1767_vm2, %v29554_v4  ;;  %v12131_v19 = vcombine.high %v12123_v35, %v12123_v35  ;;  %v2912_v63 = vrot.slane %v2211_v56, %v27333_v7  ;;  %v12132_v49 = vcombine.high %v12130_v44, %v12130_v44  ;;  %v3582_v4 = vrot.slane %v3574_v3, %v27333_v7 }
 0x231   : > { %25033 = vmatprep.mubr.msk.f32.mxu0 %vm27271_vm1, %v32793_v2  ;;  %24510 = vmatmul.mubr.msk.f32.gmra.mrb[64].mxu1 %vm1767_vm2, %v3573_v10  ;;  %v2904_v39 = vcombine.high %v2902_v52, %v2902_v52  ;;  %v3591_v53 = vcombine.low %v2903_v12, %v2902_v52  ;;  %v29762_v15 = vcombine.low %v12768_v17, %v12775_v60  ;;  %v22940_v12 = vld [vmem:[%s27330_s25 + $0xc8] sm:$0xff] }
 0x232   : > { %v29765_v55 = vrot.slane %v12140_v20, %v27333_v7  ;;  %v12155_v29 = vcombine.high %v29743_v28, %v29743_v28  ;;  %24512 = vmatprep.mubr.msk.f32.mxu1 %vm27271_vm1, %v32793_v2  ;;  %v2905_v25 = vcombine.high %v2211_v56, %v2211_v56  ;;  %v29776_v50 = vcombine.low %v12785_v41, %v29689_v11  ;;  %v23108_v11 = vld [vmem:[%s32788_s1 + $0x1c] sm:$0x7] }
 0x233   : > { %v3590_v17 = vcombine.low %v3582_v4, %v3589_v45  ;;  %v3592_v60 = vcombine.low %v2904_v39, %v2912_v63  ;;  %v3599_v38 = vrot.slane %v3591_v53, %v27333_v7  ;;  %v29782_v47 = vcombine.low %v12802_v43, %v12809_v42 }
 0x234   : > { %25034 = vmatmul.mubr.msk.f32.gmra.mrb[100].mxu0 %vm1767_vm2, %v11429_v0  ;;  %v29784_v59 = vcombine.low %v12123_v35, %v12131_v19  ;;  %v2919_v32 = vrot.slane %v2905_v25, %v27333_v7  ;;  %v2920_v0 = vcombine.high %v2912_v63, %v2912_v63  ;;  %v29792_v41 = vcombine.low %v12819_v36, %v12826_v46 }
 0x235   : > { %25038 = vmatprep.mubr.msk.f32.mxu0 %vm27271_vm1, %v32793_v2  ;;  %v29794_v40 = vcombine.low %v12836_v1, %v12843_v14  ;;  %v29796_v61 = vcombine.low %v12130_v44, %v12132_v49  ;;  %24513 = vmatmul.mubr.msk.f32.gmra.mrb[66].mxu1 %vm1767_vm2, %v3590_v17  ;;  %v3606_v16 = vrot.slane %v3592_v60, %v27333_v7 }
 0x236   : > { %v12862_v48 = vcombine.low %v22979_v33, %v29743_v28  ;;  %v29803_v23 = vcombine.low %v12155_v29, %v29765_v55  ;;  %24515 = vmatprep.mubr.msk.f32.mxu1 %vm27271_vm1, %v32793_v2  ;;  %v2921_v43 = vcombine.high %v2919_v32, %v2919_v32  ;;  %v3608_v42 = vcombine.low %v2920_v0, %v2919_v32  ;;  %v2216_v29 = vld [vmem:[%s27330_s25 + $0x199] sm:$0xff] }
 0x237   : > { %v12157_v58 = vcombine.high %v22937_v26, %v22937_v26  ;;  %v12164_v36 = vrot.slane %v22937_v26, %v27333_v7  ;;  %v3607_v27 = vcombine.low %v3599_v38, %v3606_v16  ;;  %v2929_v37 = vcombine.high %v2213_v30, %v2213_v30  ;;  %v22942_v38 = vld [vmem:[%s27330_s25 + $0xd8] sm:$0xff] }
 0x238   : > { %25039 = vmatmul.mubr.msk.f32.vlgmr.msra.gmra.mrb[102].mxu0 %vm1767_vm2, %v29587_v51  ;;  %v12853_v34 = vrot.slane %v29784_v59, %v27333_v7  ;;  %v3609_v24 = vcombine.low %v2921_v43, %v22469_v13  ;;  %v3616_v21 = vrot.slane %v3608_v42, %v27333_v7  ;;  %v12860_v51 = vrot.slane %v29796_v61, %v27333_v7 }
 0x239   : > { %25162 = vmatpush3.msk.msra.mxu0 %vm1850_vm0, %v23108_v11  ;;  %25041 = vmatprep.mubr.msk.f32.mxu0 %vm27271_vm1, %v32793_v2  ;;  %v12181_v35 = vcombine.high %v22939_v8, %v22939_v8  ;;  %v2936_v31 = vrot.slane %v2213_v30, %v27333_v7  ;;  %v2943_v44 = vrot.slane %v2929_v37, %v27333_v7 }
 0x23a   : > { %24516 = vmatmul.mubr.msk.f32.gmra.mrb[68].mxu1 %vm1767_vm2, %v3607_v27  ;;  %v29824_v6 = vrot.slane %v12862_v48, %v27333_v7  ;;  %v12877_v56 = vrot.slane %v29803_v23, %v27333_v7  ;;  %v12156_v9 = vcombine.high %v29765_v55, %v29765_v55  ;;  %v3623_v46 = vrot.slane %v3609_v24, %v27333_v7  ;;  %v22981_v24 = vld.sshfl [vmem:[%s27330_s25 + $0xd0] sm:$0x3 pattern:$0x76325410] }
 0x23b   : > { %24518 = vmatprep.mubr.msk.f32.mxu1 %vm27271_vm1, %v32793_v2  ;;  %v12171_v20 = vrot.slane %v12157_v58, %v27333_v7  ;;  %v12172_v28 = vcombine.high %v12164_v36, %v12164_v36  ;;  %v2944_v10 = vcombine.high %v2936_v31, %v2936_v31  ;;  %v2945_v3 = vcombine.high %v2943_v44, %v2943_v44  ;;  %v22470_v58 = vld.sshfl [vmem:[%s27330_s25 + $0x191] sm:$0x3 pattern:$0x76325410] }
 0x23c   : > { %25042 = vmatmul.mubr.msk.f32.gmra.mrb[104].mxu0 %vm1767_vm2, %v29599_v22  ;;  %v12198_v45 = vcombine.high %v22940_v12, %v22940_v12  ;;  %v3624_v52 = vcombine.low %v3616_v21, %v3623_v46  ;;  %v2946_v1 = vcombine.high %v2214_v57, %v2214_v57  ;;  %v2953_v14 = vrot.slane %v2214_v57, %v27333_v7  ;;  %v2217_v46 = vld [vmem:[%s27330_s25 + $0x1a1] sm:$0xff] }
 0x23d   : > { %25044 = vmatprep.mubr.msk.f32.mxu0 %vm27271_vm1, %v32793_v2  ;;  %v12188_v19 = vrot.slane %v22939_v8, %v27333_v7  ;;  %v12195_v63 = vrot.slane %v12181_v35, %v27333_v7  ;;  %v3625_v22 = vcombine.low %v2936_v31, %v2944_v10  ;;  %v3626_v49 = vcombine.low %v2943_v44, %v2945_v3 }
 0x23e   : > { %25286 = vmatprep.subr.mxu0 %v32793_v2  ;;  %v29843_v4 = vcombine.low %v12156_v9, %v12164_v36  ;;  %v12205_v39 = vrot.slane %v22940_v12, %v27333_v7  ;;  %24519 = vmatmul.mubr.msk.f32.gmra.mrb[70].mxu1 %vm1767_vm2, %v3624_v52  ;;  %v2960_v53 = vrot.slane %v2946_v1, %v27333_v7 }
 0x23f   : > { %v2961_v55 = vcombine.high %v2953_v14, %v2953_v14  ;;  %v12173_v25 = vcombine.high %v12171_v20, %v12171_v20  ;;  %24521 = vmatprep.mubr.msk.f32.mxu1 %vm27271_vm1, %v32793_v2  ;;  %v3633_v33 = vrot.slane %v3625_v22, %v27333_v7  ;;  %v3640_v17 = vrot.slane %v3626_v49, %v27333_v7 }
 0x240   : > { %25045 = vmatmul.mubr.msk.f32.gmra.mrb[4].mxu0 %vm1767_vm2, %v29640_v62  ;;  %v29857_v60 = vcombine.low %v12172_v28, %v12171_v20  ;;  %v12212_v26 = vrot.slane %v12198_v45, %v27333_v7  ;;  %v2962_v32 = vcombine.high %v2960_v53, %v2960_v53  ;;  %v22980_v62 = vld.sshfl [vmem:[%s27330_s25 + $0xb8] sm:$0x3 pattern:$0x76325410]  ;;  %v12196_v30 = vcombine.high %v12188_v19, %v12188_v19 }
 0x241   : > { %25047 = vmatprep.mubr.msk.f32.mxu0 %vm27271_vm1, %v32793_v2  ;;  %v3642_v0 = vcombine.low %v2953_v14, %v2961_v55  ;;  %v12197_v11 = vcombine.high %v12195_v63, %v12195_v63  ;;  %v3641_v16 = vcombine.low %v3633_v33, %v3640_v17  ;;  %v2970_v13 = vcombine.high %v2216_v29, %v2216_v29 }
 0x242   : > { %v12213_v48 = vcombine.high %v12205_v39, %v12205_v39  ;;  %v3643_v43 = vcombine.low %v2960_v53, %v2962_v32  ;;  %v2977_v36 = vrot.slane %v2216_v29, %v27333_v7  ;;  %v12887_v27 = vrot.slane %v29843_v4, %v27333_v7 }
 0x243   : > { %v3650_v42 = vrot.slane %v3642_v0, %v27333_v7  ;;  %v12229_v37 = vrot.slane %v22942_v38, %v27333_v7  ;;  %24522 = vmatmul.mubr.msk.f32.gmra.mrb[72].mxu1 %vm1767_vm2, %v3641_v16  ;;  %v2984_v8 = vrot.slane %v2970_v13, %v27333_v7  ;;  %v12214_v21 = vcombine.high %v12212_v26, %v12212_v26  ;;  %v4112_v13 = vld [vmem:[%s27330_s25 + $0x7a] sm:$0xff] }
 0x244   : > { %25048 = vmatmul.mubr.msk.f32.gmra.mrb[6].mxu0 %vm1767_vm2, %v29642_v54  ;;  %24524 = vmatprep.mubr.msk.f32.mxu1 %vm27271_vm1, %v32793_v2  ;;  %v3657_v35 = vrot.slane %v3643_v43, %v27333_v7  ;;  %v2985_v54 = vcombine.high %v2977_v36, %v2977_v36  ;;  %v12896_v31 = vcombine.low %v12173_v25, %v22980_v62  ;;  %v22471_v62 = vld.sshfl [vmem:[%s27330_s25 + $0x1a9] sm:$0x3 pattern:$0x76325410] }
 0x245   : > { %25050 = vmatprep.mubr.msk.f32.mxu0 %vm27271_vm1, %v32793_v2  ;;  %v12897_v44 = vcombine.low %v12188_v19, %v12196_v30  ;;  %v12222_v57 = vcombine.high %v22942_v38, %v22942_v38  ;;  %v3659_v9 = vcombine.low %v22470_v58, %v2977_v36  ;;  %v12913_v20 = vcombine.low %v12195_v63, %v12197_v11  ;;  %v22943_v19 = vld [vmem:[%s27330_s25 + $0xe0] sm:$0xff]  ;;  %v22945_v36 = vld [vmem:[%s27330_s25 + $0xf0] sm:$0xff] }
 0x246   : > { %v12914_v28 = vcombine.low %v12205_v39, %v12213_v48  ;;  %v3658_v12 = vcombine.low %v3650_v42, %v3657_v35  ;;  %v3660_v10 = vcombine.low %v2985_v54, %v2984_v8  ;;  %v12894_v3 = vrot.slane %v29857_v60, %v27333_v7 }
 0x247   : > { %v12931_v45 = vcombine.low %v22981_v24, %v12229_v37  ;;  %v3667_v52 = vrot.slane %v3659_v9, %v27333_v7  ;;  %v2986_v1 = vcombine.high %v2984_v8, %v2984_v8  ;;  %v12930_v14 = vcombine.low %v12212_v26, %v12214_v21  ;;  %v4113_v9 = vld [vmem:[%s27330_s25 + $0x82] sm:$0xff] }
 0x248   : > { %25051 = vmatmul.mubr.msk.f32.gmra.mrb[8].mxu0 %vm1767_vm2, %v29653_v18  ;;  %24525 = vmatmul.mubr.msk.f32.gmra.mrb[74].mxu1 %vm1767_vm2, %v3658_v12  ;;  %v3674_v63 = vrot.slane %v3660_v10, %v27333_v7  ;;  %v2987_v22 = vcombine.high %v2217_v46, %v2217_v46  ;;  %v12904_v49 = vrot.slane %v12896_v31, %v27333_v7  ;;  %v22982_v12 = vld.sshfl [vmem:[%s27330_s25 + $0xe8] sm:$0x3 pattern:$0x76325410] }
 0x249   : > { %25053 = vmatprep.mubr.msk.f32.mxu0 %vm27271_vm1, %v32793_v2  ;;  %v12911_v18 = vrot.slane %v12897_v44, %v27333_v7  ;;  %v12236_v4 = vrot.slane %v12222_v57, %v27333_v7  ;;  %24527 = vmatprep.mubr.msk.f32.mxu1 %vm27271_vm1, %v32793_v2  ;;  %v2994_v39 = vrot.slane %v2217_v46, %v27333_v7 }
 0x24a   : > { %v12921_v53 = vrot.slane %v12913_v20, %v27333_v7  ;;  %v12928_v55 = vrot.slane %v12914_v28, %v27333_v7  ;;  %v3675_v29 = vcombine.low %v3667_v52, %v3674_v63  ;;  %v3001_v25 = vrot.slane %v2987_v22, %v27333_v7 }
 0x24b   : > { %v12237_v33 = vcombine.high %v12229_v37, %v12229_v37  ;;  %v12239_v17 = vcombine.high %v22943_v19, %v22943_v19  ;;  %v3002_v60 = vcombine.high %v2994_v39, %v2994_v39  ;;  %v3676_v38 = vcombine.low %v2986_v1, %v2994_v39  ;;  %v22519_v37 = vld.sshfl [vmem:[%s27330_s25 + $0x72] sm:$0x3 pattern:$0x76325410] }
 0x24c   : > { %25054 = vmatmul.mubr.msk.f32.gmra.mrb[10].mxu0 %vm1767_vm2, %v29762_v15  ;;  %v12938_v26 = vrot.slane %v12930_v14, %v27333_v7  ;;  %v12945_v32 = vrot.slane %v12931_v45, %v27333_v7  ;;  %v12246_v0 = vrot.slane %v22943_v19, %v27333_v7  ;;  %24528 = vmatmul.mubr.msk.f32.gmra.mrb[76].mxu1 %vm1767_vm2, %v3675_v29  ;;  %v22948_v29 = vld [vmem:[%s27330_s25 + $0x108] sm:$0xff] }
 0x24d   : > { %25056 = vmatprep.mubr.msk.f32.mxu0 %vm27271_vm1, %v32793_v2  ;;  %v12238_v15 = vcombine.high %v12236_v4, %v12236_v4  ;;  %24530 = vmatprep.mubr.msk.f32.mxu1 %vm27271_vm1, %v32793_v2  ;;  %v3677_v30 = vcombine.low %v3002_v60, %v3001_v25  ;;  %v3684_v11 = vrot.slane %v3676_v38, %v27333_v7 }
 0x24e   : > { %v3003_v16 = vcombine.high %v3001_v25, %v3001_v25  ;;  %v29917_v48 = vcombine.low %v12853_v34, %v12860_v51  ;;  %v29923_v43 = vcombine.low %v29824_v6, %v12877_v56  ;;  %v29925_v42 = vcombine.low %v12887_v27, %v12894_v3  ;;  %v22946_v34 = vld [vmem:[%s27330_s25 + $0xf8] sm:$0xff] }
 0x24f   : > { %v29927_v58 = vcombine.low %v12904_v49, %v12911_v18  ;;  %v29932_v61 = vcombine.low %v12237_v33, %v12236_v4  ;;  %v12253_v59 = vrot.slane %v12239_v17, %v27333_v7  ;;  %v3691_v51 = vrot.slane %v3677_v30, %v27333_v7 }
 0x250   : > { %25057 = vmatmul.mubr.msk.f32.gmra.mrb[12].mxu0 %vm1767_vm2, %v29776_v50  ;;  %v3693_v23 = vcombine.low %v3003_v16, %v22471_v62  ;;  %v29940_v6 = vcombine.low %v12921_v53, %v12928_v55  ;;  %v29942_v56 = vcombine.low %v12938_v26, %v12945_v32  ;;  %v4410_v27 = vcombine.high %v4112_v13, %v4112_v13  ;;  %v4115_v53 = vld [vmem:[%s27330_s25 + $0x92] sm:$0xff]  ;;  %v22520_v62 = vld.sshfl [vmem:[%s27330_s25 + $0x8a] sm:$0x3 pattern:$0x76325410] }
 0x251   : > { %25059 = vmatprep.mubr.msk.f32.mxu0 %vm27271_vm1, %v32793_v2  ;;  %v4417_v50 = vrot.slane %v4112_v13, %v27333_v7  ;;  %v29945_v8 = vcombine.low %v12238_v15, %v12246_v0  ;;  %v12254_v24 = vcombine.high %v12246_v0, %v12246_v0  ;;  %v12263_v21 = vcombine.high %v22945_v36, %v22945_v36 }
 0x252   : > { %v3692_v35 = vcombine.low %v3684_v11, %v3691_v51  ;;  %v12280_v54 = vcombine.high %v22946_v34, %v22946_v34  ;;  %v4424_v31 = vrot.slane %v4410_v27, %v27333_v7  ;;  %v12955_v46 = vrot.slane %v29932_v61, %v27333_v7 }
 0x253   : > { %v4425_v44 = vcombine.high %v4417_v50, %v4417_v50  ;;  %v5132_v57 = vcombine.low %v22519_v37, %v4417_v50  ;;  %v12255_v20 = vcombine.high %v12253_v59, %v12253_v59  ;;  %v3700_v28 = vrot.slane %v3693_v23, %v27333_v7  ;;  %v22983_v23 = vld.sshfl [vmem:[%s27330_s25 + $0x100] sm:$0x3 pattern:$0x76325410] }
 0x254   : > { %25060 = vmatmul.mubr.msk.f32.gmra.mrb[14].mxu0 %vm1767_vm2, %v29782_v47  ;;  %24531 = vmatmul.mubr.msk.f32.gmra.mrb[86].mxu1 %vm1767_vm2, %v3692_v35  ;;  %v12270_v10 = vrot.slane %v22945_v36, %v27333_v7  ;;  %v12277_v45 = vrot.slane %v12263_v21, %v27333_v7  ;;  %v12287_v52 = vrot.slane %v22946_v34, %v27333_v7  ;;  %v4116_v35 = vld [vmem:[%s27330_s25 + $0x9a] sm:$0xff] }
 0x255   : > { %25062 = vmatprep.mubr.msk.f32.mxu0 %vm27271_vm1, %v32793_v2  ;;  %24533 = vmatprep.mubr.msk.f32.mxu1 %vm27271_vm1, %v32793_v2  ;;  %v5133_v3 = vcombine.low %v4425_v44, %v4424_v31  ;;  %v5140_v47 = vrot.slane %v5132_v57, %v27333_v7  ;;  %v4426_v1 = vcombine.high %v4424_v31, %v4424_v31 }
 0x256   : > { %v4427_v14 = vcombine.high %v4113_v9, %v4113_v9  ;;  %v12964_v19 = vcombine.low %v12254_v24, %v12253_v59  ;;  %v12294_v63 = vrot.slane %v12280_v54, %v27333_v7  ;;  %v4434_v49 = vrot.slane %v4113_v9, %v27333_v7 }
 0x257   : > { %v5147_v22 = vrot.slane %v5133_v3, %v27333_v7  ;;  %v12962_v18 = vrot.slane %v29945_v8, %v27333_v7  ;;  %v12965_v4 = vcombine.low %v12255_v20, %v22982_v12  ;;  %v12278_v55 = vcombine.high %v12270_v10, %v12270_v10 }
 0x258   : > { %25063 = vmatmul.mubr.msk.f32.gmra.mrb[16].mxu0 %vm1767_vm2, %v29792_v41  ;;  %24534 = vmatmul.mubr.msk.f32.gmra.mrb[88].mxu1 %vm1767_vm2, %v3700_v28  ;;  %v4441_v39 = vrot.slane %v4427_v14, %v27333_v7  ;;  %v4442_v41 = vcombine.high %v4434_v49, %v4434_v49  ;;  %v12279_v33 = vcombine.high %v12277_v45, %v12277_v45 }
 0x259   : > { %25065 = vmatprep.mubr.msk.f32.mxu0 %vm27271_vm1, %v32793_v2  ;;  %24571 = vmatprep.mubr.msk.f32.mxu1 %vm27271_vm1, %v32793_v2  ;;  %v5148_v25 = vcombine.low %v5140_v47, %v5147_v22  ;;  %v12295_v17 = vcombine.high %v12287_v52, %v12287_v52  ;;  %v5149_v60 = vcombine.low %v4426_v1, %v4434_v49  ;;  %v22951_v22 = vld [vmem:[%s27330_s25 + $0x120] sm:$0xff] }
 0x25a   : > { %v4443_v38 = vcombine.high %v4441_v39, %v4441_v39  ;;  %v12972_v26 = vrot.slane %v12964_v19, %v27333_v7  ;;  %v12296_v32 = vcombine.high %v12294_v63, %v12294_v63  ;;  %v5150_v0 = vcombine.low %v4442_v41, %v4441_v39  ;;  %v22521_v41 = vld.sshfl [vmem:[%s27330_s25 + $0xa2] sm:$0x3 pattern:$0x76325410] }
 0x25b   : > { %v4458_v15 = vrot.slane %v4115_v53, %v27333_v7  ;;  %v12304_v30 = vcombine.high %v22948_v29, %v22948_v29  ;;  %v12311_v11 = vrot.slane %v22948_v29, %v27333_v7  ;;  %v5157_v16 = vrot.slane %v5149_v60, %v27333_v7 }
 0x25c   : > { %25066 = vmatmul.mubr.msk.f32.gmra.mrb[18].mxu0 %vm1767_vm2, %v29794_v40  ;;  %24572 = vmatmul.mubr.msk.f32.vlgmr.msra.gmra.mrb[22].mxu1 %vm1767_vm2, %v5148_v25  ;;  %v12979_v13 = vrot.slane %v12965_v4, %v27333_v7  ;;  %v5164_v36 = vrot.slane %v5150_v0, %v27333_v7  ;;  %v12981_v40 = vcombine.low %v12270_v10, %v12278_v55  ;;  %v22949_v10 = vld [vmem:[%s27330_s25 + $0x110] sm:$0xff] }
 0x25d   : > { %25068 = vmatprep.mubr.msk.f32.mxu0 %vm27271_vm1, %v32793_v2  ;;  %24574 = vmatprep.mubr.msk.f32.mxu1 %vm27271_vm1, %v32793_v2  ;;  %v4466_v59 = vcombine.high %v4458_v15, %v4458_v15  ;;  %v12982_v34 = vcombine.low %v12277_v45, %v12279_v33  ;;  %v12998_v51 = vcombine.low %v12287_v52, %v12295_v17  ;;  %v2115_v27 = vpop.f32.mrb[78].mxu1  ;;  %v4118_v52 = vld [vmem:[%s27330_s25 + $0xaa] sm:$0xff] }
 0x25e   : > { %v5166_v37 = vcombine.low %v4443_v38, %v22520_v62  ;;  %v12999_v8 = vcombine.low %v12294_v63, %v12296_v32  ;;  %v5165_v24 = vcombine.low %v5157_v16, %v5164_v36  ;;  %v4451_v54 = vcombine.high %v4115_v53, %v4115_v53  ;;  %v24407_v31 = vpop.f32.mrb[79].mxu1 }
 0x25f   : > { %v9844_v50 = vpop.f32.mrb[90].mxu0  ;;  %v5167_v21 = vcombine.low %v4458_v15, %v4466_v59  ;;  %v30000_v57 = vcombine.low %v12955_v46, %v12962_v18  ;;  %v30003_v9 = vrot.slane %v12304_v30, %v27333_v7  ;;  %v12319_v20 = vcombine.high %v12311_v11, %v12311_v11 }
 0x260   : > { %v24907_v44 = vpop.f32.mrb[91].mxu0  ;;  %25069 = vmatmul.mubr.msk.f32.gmra.mrb[20].mxu0 %vm1767_vm2, %v29917_v48  ;;  %v5174_v28 = vrot.slane %v5166_v37, %v27333_v7  ;;  %v30008_v12 = vcombine.low %v12972_v26, %v12979_v13  ;;  %24575 = vmatmul.mubr.msk.f32.gmra.mrb[24].mxu1 %vm1767_vm2, %v5165_v24  ;;  %v4465_v61 = vrot.slane %v4451_v54, %v27333_v7  ;;  %v4119_v37 = vld [vmem:[%s27330_s25 + $0xb2] sm:$0xff]  ;;  %v22952_v24 = vld [vmem:[%s27330_s25 + $0x128] sm:$0xff] }
 0x261   : > { %25071 = vmatprep.mubr.msk.f32.mxu0 %vm27271_vm1, %v32793_v2  ;;  %v5181_v48 = vrot.slane %v5167_v21, %v27333_v7  ;;  %v12989_v46 = vrot.slane %v12981_v40, %v27333_v7  ;;  %v12996_v3 = vrot.slane %v12982_v34, %v27333_v7  ;;  %v13015_v47 = vcombine.low %v22983_v23, %v12311_v11  ;;  %v2120_v1 = vpop.f32.mrb[80].mxu1 }
 0x262   : > { %24577 = vmatprep.mubr.msk.f32.mxu1 %vm27271_vm1, %v32793_v2  ;;  %v4475_v45 = vrot.slane %v4116_v35, %v27333_v7  ;;  %v13006_v19 = vrot.slane %v12998_v51, %v27333_v7  ;;  %v13013_v63 = vrot.slane %v12999_v8, %v27333_v7  ;;  %v4467_v18 = vcombine.high %v4465_v61, %v4465_v61  ;;  %v24410_v4 = vpop.f32.mrb[81].mxu1 }
 0x263   : > { %v9849_v14 = vpop.f32.mrb[92].mxu0  ;;  %v5182_v49 = vcombine.low %v5174_v28, %v5181_v48  ;;  %v30026_v53 = vcombine.low %v12319_v20, %v30003_v9  ;;  %v12321_v55 = vcombine.high %v22949_v10, %v22949_v10  ;;  %v12328_v29 = vrot.slane %v22949_v10, %v27333_v7 }
 0x264   : > { %v24910_v39 = vpop.f32.mrb[93].mxu0  ;;  %25072 = vmatmul.mubr.msk.f32.gmra.mrb[26].mxu0 %vm1767_vm2, %v29923_v43  ;;  %v4483_v25 = vcombine.high %v4475_v45, %v4475_v45  ;;  %v5183_v33 = vcombine.low %v4465_v61, %v4467_v18  ;;  %v4468_v17 = vcombine.high %v4116_v35, %v4116_v35  ;;  %v4499_v60 = vrot.slane %v4118_v52, %v27333_v7  ;;  %v22954_v18 = vld [vmem:[%s27330_s25 + $0x138] sm:$0xff] }
 0x265   : > { %25074 = vmatprep.mubr.msk.f32.mxu0 %vm27271_vm1, %v32793_v2  ;;  %24578 = vmatmul.mubr.msk.f32.gmra.mrb[26].mxu1 %vm1767_vm2, %v5182_v49  ;;  %v30034_v38 = vcombine.low %v12989_v46, %v12996_v3  ;;  %v30037_v43 = vrot.slane %v13015_v47, %v27333_v7  ;;  %v12352_v26 = vrot.slane %v22951_v22, %v27333_v7 }
 0x266   : > { %24580 = vmatprep.mubr.msk.f32.mxu1 %vm27271_vm1, %v32793_v2  ;;  %v5184_v32 = vcombine.low %v4475_v45, %v4483_v25  ;;  %v12320_v62 = vcombine.high %v30003_v9, %v30003_v9  ;;  %v5191_v15 = vrot.slane %v5183_v33, %v27333_v7  ;;  %v4482_v30 = vrot.slane %v4468_v17, %v27333_v7  ;;  %v22984_v9 = vld.sshfl [vmem:[%s27330_s25 + $0x118] sm:$0x3 pattern:$0x76325410]  ;;  %v4121_v17 = vld [vmem:[%s27330_s25 + $0xc2] sm:$0xff] }
 0x267   : > { %v11581_v0 = vpop.f32.mrb[94].mxu0  ;;  %v5201_v11 = vcombine.low %v22521_v41, %v4499_v60  ;;  %v30048_v13 = vcombine.low %v13006_v19, %v13013_v63  ;;  %v12335_v36 = vrot.slane %v12321_v55, %v27333_v7  ;;  %v12345_v59 = vcombine.high %v22951_v22, %v22951_v22  ;;  %v3852_v50 = vpop.f32.mrb[82].mxu1 }
 0x268   : > { %v24915_v16 = vpop.f32.mrb[95].mxu0  ;;  %25075 = vmatmul.mubr.msk.f32.gmra.mrb[28].mxu0 %vm1767_vm2, %v29925_v42  ;;  %v5198_v40 = vrot.slane %v5184_v32, %v27333_v7  ;;  %v13030_v34 = vrot.slane %v30026_v53, %v27333_v7  ;;  %v12336_v51 = vcombine.high %v12328_v29, %v12328_v29  ;;  %v4484_v23 = vcombine.high %v4482_v30, %v4482_v30  ;;  %v24415_v54 = vpop.f32.mrb[83].mxu1 }
 0x269   : > { %25077 = vmatprep.mubr.msk.f32.mxu0 %vm27271_vm1, %v32793_v2  ;;  %v4492_v27 = vcombine.high %v4118_v52, %v4118_v52  ;;  %v12337_v42 = vcombine.high %v12335_v36, %v12335_v36  ;;  %v12360_v8 = vcombine.high %v12352_v26, %v12352_v26  ;;  %v4507_v35 = vcombine.high %v4499_v60, %v4499_v60 }
 0x26a   : > { %v5199_v21 = vcombine.low %v5191_v15, %v5198_v40  ;;  %v13032_v44 = vcombine.low %v12320_v62, %v12328_v29  ;;  %v5200_v20 = vcombine.low %v4482_v30, %v4484_v23  ;;  %v5215_v28 = vrot.slane %v5201_v11, %v27333_v7  ;;  %v22522_v30 = vld.sshfl [vmem:[%s27330_s25 + $0xba] sm:$0x3 pattern:$0x76325410] }
 0x26b   : > { %v11586_v31 = vpop.f32.mrb[96].mxu0  ;;  %v4506_v10 = vrot.slane %v4492_v27, %v27333_v7  ;;  %v12359_v61 = vrot.slane %v12345_v59, %v27333_v7  ;;  %v12362_v46 = vcombine.high %v22952_v24, %v22952_v24  ;;  %v4516_v3 = vrot.slane %v4119_v37, %v27333_v7  ;;  %v22985_v11 = vld.sshfl [vmem:[%s27330_s25 + $0x130] sm:$0x3 pattern:$0x76325410] }
 0x26c   : > { %v24918_v48 = vpop.f32.mrb[97].mxu0  ;;  %25078 = vmatmul.mubr.msk.f32.gmra.mrb[30].mxu0 %vm1767_vm2, %v29927_v58  ;;  %24581 = vmatmul.mubr.msk.f32.gmra.mrb[28].mxu1 %vm1767_vm2, %v5199_v21  ;;  %v13033_v47 = vcombine.low %v12336_v51, %v12335_v36  ;;  %v12369_v45 = vrot.slane %v22952_v24, %v27333_v7  ;;  %v5208_v52 = vrot.slane %v5200_v20, %v27333_v7  ;;  %v3857_v58 = vpop.f32.mrb[84].mxu1  ;;  %v4122_v21 = vld [vmem:[%s27330_s25 + $0xca] sm:$0xff] }
 0x26d   : > { %25080 = vmatprep.mubr.msk.f32.mxu0 %vm27271_vm1, %v32793_v2  ;;  %24583 = vmatprep.mubr.msk.f32.mxu1 %vm27271_vm1, %v32793_v2  ;;  %v13049_v1 = vcombine.low %v12337_v42, %v22984_v9  ;;  %v13050_v14 = vcombine.low %v12352_v26, %v12360_v8  ;;  %v4508_v19 = vcombine.high %v4506_v10, %v4506_v10  ;;  %v24418_v22 = vpop.f32.mrb[85].mxu1 }
 0x26e   : > { %v5217_v63 = vcombine.low %v4507_v35, %v4506_v10  ;;  %v13040_v49 = vrot.slane %v13032_v44, %v27333_v7  ;;  %v5216_v4 = vcombine.low %v5208_v52, %v5215_v28  ;;  %v4509_v39 = vcombine.high %v4119_v37, %v4119_v37  ;;  %v22955_v28 = vld [vmem:[%s27330_s25 + $0x140] sm:$0xff]  ;;  %v22958_v52 = vld [vmem:[%s27330_s25 + $0x158] sm:$0xff] }
 0x26f   : > { %v4524_v55 = vcombine.high %v4516_v3, %v4516_v3  ;;  %v12361_v29 = vcombine.high %v12359_v61, %v12359_v61  ;;  %v12376_v25 = vrot.slane %v12362_v46, %v27333_v7  ;;  %v5218_v41 = vcombine.low %v4508_v19, %v4516_v3 }
 0x270   : > { %25081 = vmatmul.mubr.msk.f32.gmra.mrb[32].mxu0 %vm1767_vm2, %v29940_v6  ;;  %v5225_v33 = vrot.slane %v5217_v63, %v27333_v7  ;;  %v13047_v60 = vrot.slane %v13033_v47, %v27333_v7  ;;  %v12377_v26 = vcombine.high %v12369_v45, %v12369_v45  ;;  %24584 = vmatmul.mubr.msk.f32.gmra.mrb[30].mxu1 %vm1767_vm2, %v5216_v4 }
 0x271   : > { %25083 = vmatprep.mubr.msk.f32.mxu0 %vm27271_vm1, %v32793_v2  ;;  %v4523_v32 = vrot.slane %v4509_v39, %v27333_v7  ;;  %v13057_v6 = vrot.slane %v13049_v1, %v27333_v7  ;;  %v13064_v0 = vrot.slane %v13050_v14, %v27333_v7  ;;  %v12393_v62 = vrot.slane %v22954_v18, %v27333_v7 }
 0x272   : > { %24586 = vmatprep.mubr.msk.f32.mxu1 %vm27271_vm1, %v32793_v2  ;;  %v5232_v15 = vrot.slane %v5218_v41, %v27333_v7  ;;  %v12386_v16 = vcombine.high %v22954_v18, %v22954_v18  ;;  %v4533_v40 = vcombine.high %v4121_v17, %v4121_v17  ;;  %v30094_v51 = vcombine.low %v12359_v61, %v12361_v29  ;;  %v4124_v18 = vld [vmem:[%s27330_s25 + $0xda] sm:$0xff] }
 0x273   : > { %v4525_v36 = vcombine.high %v4523_v32, %v4523_v32  ;;  %v5234_v59 = vcombine.low %v4524_v55, %v4523_v32  ;;  %v12378_v23 = vcombine.high %v12376_v25, %v12376_v25  ;;  %v4540_v27 = vrot.slane %v4121_v17, %v27333_v7 }
 0x274   : > { %25084 = vmatmul.mubr.msk.f32.gmra.mrb[34].mxu0 %vm1767_vm2, %v29942_v56  ;;  %v5233_v37 = vcombine.low %v5225_v33, %v5232_v15  ;;  %v30099_v50 = vcombine.low %v12369_v45, %v12377_v26  ;;  %v4547_v24 = vrot.slane %v4533_v40, %v27333_v7  ;;  %v30108_v56 = vcombine.low %v30037_v43, %v13030_v34  ;;  %v22957_v45 = vld [vmem:[%s27330_s25 + $0x150] sm:$0xff] }
 0x275   : > { %25086 = vmatprep.mubr.msk.f32.mxu0 %vm27271_vm1, %v32793_v2  ;;  %v5235_v42 = vcombine.low %v4525_v36, %v22522_v30  ;;  %v5242_v8 = vrot.slane %v5234_v59, %v27333_v7  ;;  %v30110_v35 = vcombine.low %v13040_v49, %v13047_v60  ;;  %v13084_v54 = vcombine.low %v22985_v11, %v12393_v62  ;;  %v4125_v36 = vld [vmem:[%s27330_s25 + $0xe2] sm:$0xff] }
 0x276   : > { %24587 = vmatmul.mubr.msk.f32.gmra.mrb[32].mxu1 %vm1767_vm2, %v5233_v37  ;;  %v4548_v31 = vcombine.high %v4540_v27, %v4540_v27  ;;  %v30113_v44 = vcombine.low %v13057_v6, %v13064_v0  ;;  %v12400_v9 = vrot.slane %v12386_v16, %v27333_v7  ;;  %v4549_v20 = vcombine.high %v4547_v24, %v4547_v24 }
 0x277   : > { %24589 = vmatprep.mubr.msk.f32.mxu1 %vm27271_vm1, %v32793_v2  ;;  %v5249_v53 = vrot.slane %v5235_v42, %v27333_v7  ;;  %v13074_v43 = vrot.slane %v30094_v51, %v27333_v7  ;;  %v30123_v34 = vcombine.low %v12376_v25, %v12378_v23  ;;  %v4550_v48 = vcombine.high %v4122_v21, %v4122_v21 }
 0x278   : > { %25087 = vmatmul.mubr.msk.f32.gmra.mrb[36].mxu0 %vm1767_vm2, %v30000_v57  ;;  %v5251_v10 = vcombine.low %v4540_v27, %v4548_v31  ;;  %v13081_v61 = vrot.slane %v30099_v50, %v27333_v7  ;;  %v12401_v46 = vcombine.high %v12393_v62, %v12393_v62  ;;  %v5252_v47 = vcombine.low %v4547_v24, %v4549_v20  ;;  %v22960_v20 = vld [vmem:[%s27330_s25 + $0x168] sm:$0xff] }
 0x279   : > { %25089 = vmatprep.mubr.msk.f32.mxu0 %vm27271_vm1, %v32793_v2  ;;  %v5250_v3 = vcombine.low %v5242_v8, %v5249_v53  ;;  %v30131_v57 = vrot.slane %v13084_v54, %v27333_v7  ;;  %v4557_v1 = vrot.slane %v4122_v21, %v27333_v7  ;;  %v4564_v14 = vrot.slane %v4550_v48, %v27333_v7 }
 0x27a   : > { %v5259_v58 = vrot.slane %v5251_v10, %v27333_v7  ;;  %v12402_v19 = vcombine.high %v12400_v9, %v12400_v9  ;;  %v12410_v63 = vrot.slane %v22955_v28, %v27333_v7  ;;  %v12403_v22 = vcombine.high %v22955_v28, %v22955_v28  ;;  %v22986_v10 = vld.sshfl [vmem:[%s27330_s25 + $0x148] sm:$0x3 pattern:$0x76325410] }
 0x27b   : > { %24590 = vmatmul.mubr.msk.f32.gmra.mrb[34].mxu1 %vm1767_vm2, %v5250_v3  ;;  %v5266_v49 = vrot.slane %v5252_v47, %v27333_v7  ;;  %v13091_v4 = vrot.slane %v30123_v34, %v27333_v7  ;;  %v4565_v39 = vcombine.high %v4557_v1, %v4557_v1  ;;  %v4566_v55 = vcombine.high %v4564_v14, %v4564_v14  ;;  %v4127_v3 = vld [vmem:[%s27330_s25 + $0xf2] sm:$0xff] }
 0x27c   : > { %25090 = vmatmul.mubr.msk.f32.gmra.mrb[38].mxu0 %vm1767_vm2, %v30008_v12  ;;  %24592 = vmatprep.mubr.msk.f32.mxu1 %vm27271_vm1, %v32793_v2  ;;  %v30150_v29 = vcombine.low %v12401_v46, %v12400_v9  ;;  %v12427_v25 = vcombine.high %v22957_v45, %v22957_v45  ;;  %v12444_v41 = vcombine.high %v22958_v52, %v22958_v52  ;;  %v22523_v12 = vld.sshfl [vmem:[%s27330_s25 + $0xd2] sm:$0x3 pattern:$0x76325410] }
 0x27d   : > { %25092 = vmatprep.mubr.msk.f32.mxu0 %vm27271_vm1, %v32793_v2  ;;  %v5267_v33 = vcombine.low %v5259_v58, %v5266_v49  ;;  %v5268_v17 = vcombine.low %v4557_v1, %v4565_v39  ;;  %v5269_v60 = vcombine.low %v4564_v14, %v4566_v55  ;;  %v4574_v26 = vcombine.high %v4124_v18, %v4124_v18  ;;  %v22524_v1 = vld.sshfl [vmem:[%s27330_s25 + $0xea] sm:$0x3 pattern:$0x76325410] }
 0x27e   : > { %v4581_v32 = vrot.slane %v4124_v18, %v27333_v7  ;;  %v30154_v6 = vcombine.low %v12402_v19, %v12410_v63  ;;  %v12417_v0 = vrot.slane %v12403_v22, %v27333_v7  ;;  %v12418_v62 = vcombine.high %v12410_v63, %v12410_v63 }
 0x27f   : > { %v12434_v15 = vrot.slane %v22957_v45, %v27333_v7  ;;  %24593 = vmatmul.mubr.msk.f32.gmra.mrb[36].mxu1 %vm1767_vm2, %v5267_v33  ;;  %v5276_v30 = vrot.slane %v5268_v17, %v27333_v7  ;;  %v5283_v11 = vrot.slane %v5269_v60, %v27333_v7  ;;  %v4588_v16 = vrot.slane %v4574_v26, %v27333_v7  ;;  %v4128_v26 = vld [vmem:[%s27330_s25 + $0xfa] sm:$0xff] }
 0x280   : > { %25093 = vmatmul.mubr.msk.f32.gmra.mrb[40].mxu0 %vm1767_vm2, %v30034_v38  ;;  %24595 = vmatprep.mubr.msk.f32.mxu1 %vm27271_vm1, %v32793_v2  ;;  %v13108_v59 = vrot.slane %v30150_v29, %v27333_v7  ;;  %v12441_v40 = vrot.slane %v12427_v25, %v27333_v7  ;;  %v4589_v38 = vcombine.high %v4581_v32, %v4581_v32 }
 0x281   : > { %25095 = vmatprep.mubr.msk.f32.mxu0 %vm27271_vm1, %v32793_v2  ;;  %v5285_v23 = vcombine.low %v22523_v12, %v4581_v32  ;;  %v12451_v37 = vrot.slane %v22958_v52, %v27333_v7  ;;  %v12458_v27 = vrot.slane %v12444_v41, %v27333_v7  ;;  %v5284_v42 = vcombine.low %v5276_v30, %v5283_v11 }
 0x282   : > { %v4590_v8 = vcombine.high %v4588_v16, %v4588_v16  ;;  %v12419_v24 = vcombine.high %v12417_v0, %v12417_v0  ;;  %v5286_v21 = vcombine.low %v4589_v38, %v4588_v16  ;;  %v4591_v31 = vcombine.high %v4125_v36, %v4125_v36 }
 0x283   : > { %v5293_v54 = vrot.slane %v5285_v23, %v27333_v7  ;;  %v30177_v9 = vcombine.low %v12418_v62, %v12417_v0  ;;  %v12442_v53 = vcombine.high %v12434_v15, %v12434_v15  ;;  %24596 = vmatmul.mubr.msk.f32.gmra.mrb[38].mxu1 %vm1767_vm2, %v5284_v42  ;;  %v4598_v28 = vrot.slane %v4125_v36, %v27333_v7  ;;  %v22987_v23 = vld.sshfl [vmem:[%s27330_s25 + $0x160] sm:$0x3 pattern:$0x76325410]  ;;  %v22961_v42 = vld [vmem:[%s27330_s25 + $0x170] sm:$0xff] }
 0x284   : > { %25096 = vmatmul.mubr.msk.f32.gmra.mrb[42].mxu0 %vm1767_vm2, %v30048_v13  ;;  %v12443_v48 = vcombine.high %v12441_v40, %v12441_v40  ;;  %24598 = vmatprep.mubr.msk.f32.mxu1 %vm27271_vm1, %v32793_v2  ;;  %v5300_v46 = vrot.slane %v5286_v21, %v27333_v7  ;;  %v4605_v13 = vrot.slane %v4591_v31, %v27333_v7 }
 0x285   : > { %25098 = vmatprep.mubr.msk.f32.mxu0 %vm27271_vm1, %v32793_v2  ;;  %v12459_v47 = vcombine.high %v12451_v37, %v12451_v37  ;;  %v12460_v45 = vcombine.high %v12458_v27, %v12458_v27  ;;  %v4606_v52 = vcombine.high %v4598_v28, %v4598_v28  ;;  %v5302_v58 = vcombine.low %v4590_v8, %v4598_v28 }
 0x286   : > { %v12468_v14 = vcombine.high %v22960_v20, %v22960_v20  ;;  %v30192_v19 = vrot.slane %v22960_v20, %v27333_v7  ;;  %v5301_v63 = vcombine.low %v5293_v54, %v5300_v46  ;;  %v4607_v22 = vcombine.high %v4605_v13, %v4605_v13 }
 0x287   : > { %v13118_v49 = vcombine.low %v12419_v24, %v22986_v10  ;;  %v5303_v18 = vcombine.low %v4606_v52, %v4605_v13  ;;  %v5310_v39 = vrot.slane %v5302_v58, %v27333_v7  ;;  %v4622_v55 = vrot.slane %v4127_v3, %v27333_v7  ;;  %v22963_v13 = vld [vmem:[%s27330_s25 + $0x180] sm:$0xff]  ;;  %v22964_v52 = vld [vmem:[%s27330_s25 + $0x188] sm:$0xff] }
 0x288   : > { %25099 = vmatmul.mubr.msk.f32.gmra.mrb[44].mxu0 %vm1767_vm2, %v30108_v56  ;;  %v13134_v25 = vcombine.low %v12434_v15, %v12442_v53  ;;  %v13135_v41 = vcombine.low %v12441_v40, %v12443_v48  ;;  %24599 = vmatmul.mubr.msk.f32.gmra.mrb[40].mxu1 %vm1767_vm2, %v5301_v63  ;;  %v5319_v33 = vcombine.low %v4607_v22, %v22524_v1  ;;  %v22525_v48 = vld.sshfl [vmem:[%s27330_s25 + $0x102] sm:$0x3 pattern:$0x76325410] }
 0x289   : > { %25101 = vmatprep.mubr.msk.f32.mxu0 %vm27271_vm1, %v32793_v2  ;;  %v13151_v17 = vcombine.low %v12451_v37, %v12459_v47  ;;  %v13152_v60 = vcombine.low %v12458_v27, %v12460_v45  ;;  %24601 = vmatprep.mubr.msk.f32.mxu1 %vm27271_vm1, %v32793_v2  ;;  %v5317_v56 = vrot.slane %v5303_v18, %v27333_v7 }
 0x28a   : > { %v4630_v12 = vcombine.high %v4622_v55, %v4622_v55  ;;  %v13115_v32 = vrot.slane %v30154_v6, %v27333_v7  ;;  %v13125_v0 = vrot.slane %v30177_v9, %v27333_v7  ;;  %v30210_v62 = vrot.slane %v12468_v14, %v27333_v7 }
 0x28b   : > { %v12483_v15 = vcombine.high %v30192_v19, %v30192_v19  ;;  %v5318_v30 = vcombine.low %v5310_v39, %v5317_v56  ;;  %v5327_v16 = vrot.slane %v5319_v33, %v27333_v7  ;;  %v4615_v36 = vcombine.high %v4127_v3, %v4127_v3 }
 0x28c   : > { %25102 = vmatmul.mubr.msk.f32.gmra.mrb[46].mxu0 %vm1767_vm2, %v30110_v35  ;;  %v5320_v11 = vcombine.low %v4622_v55, %v4630_v12  ;;  %v13132_v6 = vrot.slane %v13118_v49, %v27333_v7  ;;  %v13142_v40 = vrot.slane %v13134_v25, %v27333_v7  ;;  %v13149_v38 = vrot.slane %v13135_v41, %v27333_v7  ;;  %v4131_v49 = vld [vmem:[%s27330_s25 + $0x112] sm:$0xff] }
 0x28d   : > { %25104 = vmatprep.mubr.msk.f32.mxu0 %vm27271_vm1, %v32793_v2  ;;  %v4639_v37 = vrot.slane %v4128_v26, %v27333_v7  ;;  %v13159_v35 = vrot.slane %v13151_v17, %v27333_v7  ;;  %v13166_v27 = vrot.slane %v13152_v60, %v27333_v7  ;;  %24602 = vmatmul.mubr.msk.f32.gmra.mrb[42].mxu1 %vm1767_vm2, %v5318_v30  ;;  %v22966_v30 = vld [vmem:[%s27330_s25 + $0x198] sm:$0xff] }
 0x28e   : > { %v5334_v8 = vrot.slane %v5320_v11, %v27333_v7  ;;  %v4629_v24 = vrot.slane %v4615_v36, %v27333_v7  ;;  %v13082_v21 = vcombine.low %v13074_v43, %v13081_v61  ;;  %v13099_v54 = vcombine.low %v13091_v4, %v30131_v57  ;;  %24604 = vmatprep.mubr.msk.f32.mxu1 %vm27271_vm1, %v32793_v2  ;;  %v4130_v61 = vld [vmem:[%s27330_s25 + $0x10a] sm:$0xff] }
 0x28f   : > { %v4647_v31 = vcombine.high %v4639_v37, %v4639_v37  ;;  %v13168_v9 = vcombine.low %v22987_v23, %v30192_v19  ;;  %v13169_v50 = vcombine.low %v12483_v15, %v30210_v62  ;;  %v13116_v34 = vcombine.low %v13108_v59, %v13115_v32 }
 0x290   : > { %25105 = vmatmul.mubr.msk.f32.gmra.mrb[48].mxu0 %vm1767_vm2, %v30113_v44  ;;  %v5335_v51 = vcombine.low %v5327_v16, %v5334_v8  ;;  %v4631_v43 = vcombine.high %v4629_v24, %v4629_v24  ;;  %v12485_v57 = vcombine.high %v22961_v42, %v22961_v42  ;;  %v4632_v53 = vcombine.high %v4128_v26, %v4128_v26 }
 0x291   : > { %25107 = vmatprep.mubr.msk.f32.mxu0 %vm27271_vm1, %v32793_v2  ;;  %v5337_v4 = vcombine.low %v4639_v37, %v4647_v31  ;;  %v30252_v44 = vcombine.low %v13125_v0, %v13132_v6  ;;  %v30254_v20 = vcombine.low %v13142_v40, %v13149_v38  ;;  %v30256_v28 = vcombine.low %v13159_v35, %v13166_v27  ;;  %v22988_v6 = vld.sshfl [vmem:[%s27330_s25 + $0x178] sm:$0x3 pattern:$0x76325410] }
 0x292   : > { %24605 = vmatmul.mubr.msk.f32.gmra.mrb[44].mxu1 %vm1767_vm2, %v5335_v51  ;;  %v5336_v10 = vcombine.low %v4629_v24, %v4631_v43  ;;  %v12484_v46 = vcombine.high %v30210_v62, %v30210_v62  ;;  %v4646_v59 = vrot.slane %v4632_v53, %v27333_v7  ;;  %v4663_v3 = vrot.slane %v4130_v61, %v27333_v7  ;;  %v4133_v24 = vld [vmem:[%s27330_s25 + $0x122] sm:$0xff] }
 0x293   : > { %24607 = vmatprep.mubr.msk.f32.mxu1 %vm27271_vm1, %v32793_v2  ;;  %v5351_v29 = vrot.slane %v5337_v4, %v27333_v7  ;;  %v13176_v47 = vrot.slane %v13168_v9, %v27333_v7  ;;  %v13183_v45 = vrot.slane %v13169_v50, %v27333_v7  ;;  %v12509_v58 = vcombine.high %v22963_v13, %v22963_v13 }
 0x294   : > { %25108 = vmatmul.mubr.msk.f32.gmra.mrb[50].mxu0 %vm1767_vm2, %v13082_v21  ;;  %v5344_v1 = vrot.slane %v5336_v10, %v27333_v7  ;;  %v12492_v14 = vrot.slane %v22961_v42, %v27333_v7  ;;  %v12499_v19 = vrot.slane %v12485_v57, %v27333_v7  ;;  %v4648_v63 = vcombine.high %v4646_v59, %v4646_v59 }
 0x295   : > { %25110 = vmatprep.mubr.msk.f32.mxu0 %vm27271_vm1, %v32793_v2  ;;  %v5354_v22 = vcombine.low %v22525_v48, %v4663_v3  ;;  %v12526_v18 = vcombine.high %v22964_v52, %v22964_v52  ;;  %v4656_v55 = vcombine.high %v4130_v61, %v4130_v61  ;;  %v4671_v25 = vcombine.high %v4663_v3, %v4663_v3 }
 0x296   : > { %v5352_v39 = vcombine.low %v5344_v1, %v5351_v29  ;;  %v12516_v41 = vrot.slane %v22963_v13, %v27333_v7  ;;  %v12533_v33 = vrot.slane %v22964_v52, %v27333_v7  ;;  %v5353_v17 = vcombine.low %v4646_v59, %v4648_v63 }
 0x297   : > { %v5368_v60 = vrot.slane %v5354_v22, %v27333_v7  ;;  %v12523_v56 = vrot.slane %v12509_v58, %v27333_v7  ;;  %v4670_v12 = vrot.slane %v4656_v55, %v27333_v7  ;;  %v4680_v26 = vrot.slane %v4131_v49, %v27333_v7 }
 0x298   : > { %25111 = vmatmul.mubr.msk.f32.gmra.mrb[52].mxu0 %vm1767_vm2, %v13099_v54  ;;  %24608 = vmatmul.mubr.msk.f32.gmra.mrb[46].mxu1 %vm1767_vm2, %v5352_v39  ;;  %v30288_v32 = vcombine.low %v13176_v47, %v13183_v45  ;;  %v12500_v0 = vcombine.high %v12492_v14, %v12492_v14  ;;  %v5361_v62 = vrot.slane %v5353_v17, %v27333_v7  ;;  %v22989_v54 = vld.sshfl [vmem:[%s27330_s25 + $0x190] sm:$0x3 pattern:$0x76325410] }
 0x299   : > { %25113 = vmatprep.mubr.msk.f32.mxu0 %vm27271_vm1, %v32793_v2  ;;  %24610 = vmatprep.mubr.msk.f32.mxu1 %vm27271_vm1, %v32793_v2  ;;  %v12501_v15 = vcombine.high %v12499_v19, %v12499_v19  ;;  %v12540_v11 = vrot.slane %v12526_v18, %v27333_v7  ;;  %v4672_v16 = vcombine.high %v4670_v12, %v4670_v12  ;;  %v4134_v18 = vld [vmem:[%s27330_s25 + $0x12a] sm:$0xff] }
 0x29a   : > { %v5370_v36 = vcombine.low %v4671_v25, %v4670_v12  ;;  %v12524_v40 = vcombine.high %v12516_v41, %v12516_v41  ;;  %v5369_v38 = vcombine.low %v5361_v62, %v5368_v60  ;;  %v4673_v23 = vcombine.high %v4131_v49, %v4131_v49 }
 0x29b   : > { %v4688_v37 = vcombine.high %v4680_v26, %v4680_v26  ;;  %v12525_v35 = vcombine.high %v12523_v56, %v12523_v56  ;;  %v12541_v27 = vcombine.high %v12533_v33, %v12533_v33  ;;  %v5371_v42 = vcombine.low %v4672_v16, %v4680_v26  ;;  %v4136_v16 = vld [vmem:[%s27330_s25 + $0x13a] sm:$0xff] }
 0x29c   : > { %25114 = vmatmul.mubr.msk.f32.gmra.mrb[54].mxu0 %vm1767_vm2, %v13116_v34  ;;  %v5378_v8 = vrot.slane %v5370_v36, %v27333_v7  ;;  %v13185_v21 = vcombine.low %v12484_v46, %v12492_v14  ;;  %v12557_v31 = vrot.slane %v22966_v30, %v27333_v7  ;;  %24611 = vmatmul.mubr.msk.f32.gmra.mrb[48].mxu1 %vm1767_vm2, %v5369_v38  ;;  %v22526_v34 = vld.sshfl [vmem:[%s27330_s25 + $0x11a] sm:$0x3 pattern:$0x76325410] }
 0x29d   : > { %25116 = vmatprep.mubr.msk.f32.mxu0 %vm27271_vm1, %v32793_v2  ;;  %v4687_v9 = vrot.slane %v4673_v23, %v27333_v7  ;;  %v13186_v50 = vcombine.low %v12500_v0, %v12499_v19  ;;  %v13202_v51 = vcombine.low %v12501_v15, %v22988_v6  ;;  %v12542_v43 = vcombine.high %v12540_v11, %v12540_v11  ;;  %v22967_v19 = vld [vmem:[%s27330_s25 + $0x1a0] sm:$0xff] }
 0x29e   : > { %24613 = vmatprep.mubr.msk.f32.mxu1 %vm27271_vm1, %v32793_v2  ;;  %v5385_v61 = vrot.slane %v5371_v42, %v27333_v7  ;;  %v12550_v57 = vcombine.high %v22966_v30, %v22966_v30  ;;  %v4697_v10 = vcombine.high %v4133_v24, %v4133_v24  ;;  %v13203_v48 = vcombine.low %v12516_v41, %v12524_v40 }
 0x29f   : > { %v4689_v4 = vcombine.high %v4687_v9, %v4687_v9  ;;  %v5387_v53 = vcombine.low %v4688_v37, %v4687_v9  ;;  %v13219_v46 = vcombine.low %v12523_v56, %v12525_v35  ;;  %v13220_v13 = vcombine.low %v12533_v33, %v12541_v27  ;;  %v22969_v35 = vld [vmem:[%s27330_s25 + $0x1b0] sm:$0xff] }
 0x2a0   : > { %25117 = vmatmul.mubr.msk.f32.gmra.mrb[56].mxu0 %vm1767_vm2, %v30252_v44  ;;  %v5386_v29 = vcombine.low %v5378_v8, %v5385_v61  ;;  %v13237_v59 = vcombine.low %v22989_v54, %v12557_v31  ;;  %v4704_v45 = vrot.slane %v4133_v24, %v27333_v7  ;;  %v13193_v52 = vrot.slane %v13185_v21, %v27333_v7 }
 0x2a1   : > { %25119 = vmatprep.mubr.msk.f32.mxu0 %vm27271_vm1, %v32793_v2  ;;  %v5388_v3 = vcombine.low %v4689_v4, %v22526_v34  ;;  %v5395_v47 = vrot.slane %v5387_v53, %v27333_v7  ;;  %v13200_v58 = vrot.slane %v13186_v50, %v27333_v7  ;;  %v12565_v44 = vcombine.high %v12557_v31, %v12557_v31 }
 0x2a2   : > { %24614 = vmatmul.mubr.msk.f32.gmra.mrb[50].mxu1 %vm1767_vm2, %v5386_v29  ;;  %v4711_v1 = vrot.slane %v4697_v10, %v27333_v7  ;;  %v13236_v14 = vcombine.low %v12540_v11, %v12542_v43  ;;  %v12564_v63 = vrot.slane %v12550_v57, %v27333_v7  ;;  %v4712_v49 = vcombine.high %v4704_v45, %v4704_v45  ;;  %v4137_v57 = vld [vmem:[%s27330_s25 + $0x142] sm:$0xff] }
 0x2a3   : > { %24616 = vmatprep.mubr.msk.f32.mxu1 %vm27271_vm1, %v32793_v2  ;;  %v5402_v22 = vrot.slane %v5388_v3, %v27333_v7  ;;  %v13210_v39 = vrot.slane %v13202_v51, %v27333_v7  ;;  %v13217_v55 = vrot.slane %v13203_v48, %v27333_v7  ;;  %v13234_v25 = vrot.slane %v13220_v13, %v27333_v7  ;;  %v22527_v51 = vld.sshfl [vmem:[%s27330_s25 + $0x132] sm:$0x3 pattern:$0x76325410] }
 0x2a4   : > { %25120 = vmatmul.mubr.msk.f32.gmra.mrb[58].mxu0 %vm1767_vm2, %v30254_v20  ;;  %v4713_v41 = vcombine.high %v4711_v1, %v4711_v1  ;;  %v13227_v33 = vrot.slane %v13219_v46, %v27333_v7  ;;  %v13251_v17 = vrot.slane %v13237_v59, %v27333_v7  ;;  %v5404_v56 = vcombine.low %v4704_v45, %v4712_v49 }
 0x2a5   : > { %25122 = vmatprep.mubr.msk.f32.mxu0 %vm27271_vm1, %v32793_v2  ;;  %v5403_v60 = vcombine.low %v5395_v47, %v5402_v22  ;;  %v30335_v12 = vrot.slane %v22967_v19, %v27333_v7  ;;  %v4714_v26 = vcombine.high %v4134_v18, %v4134_v18  ;;  %v4721_v0 = vrot.slane %v4134_v18, %v27333_v7 }
 0x2a6   : > { %v5405_v20 = vcombine.low %v4711_v1, %v4713_v41  ;;  %v13244_v62 = vrot.slane %v13236_v14, %v27333_v7  ;;  %v12566_v15 = vcombine.high %v12564_v63, %v12564_v63  ;;  %v30339_v30 = vcombine.low %v12565_v44, %v12564_v63  ;;  %v4139_v1 = vld [vmem:[%s27330_s25 + $0x152] sm:$0xff] }
 0x2a7   : > { %24617 = vmatmul.mubr.msk.f32.gmra.mrb[52].mxu1 %vm1767_vm2, %v5403_v60  ;;  %v5412_v11 = vrot.slane %v5404_v56, %v27333_v7  ;;  %v13201_v36 = vcombine.low %v13193_v52, %v13200_v58  ;;  %v4728_v40 = vrot.slane %v4714_v26, %v27333_v7  ;;  %v13218_v38 = vcombine.low %v13210_v39, %v13217_v55 }
 0x2a8   : > { %25123 = vmatmul.mubr.msk.f32.gmra.mrb[60].mxu0 %vm1767_vm2, %v30256_v28  ;;  %24619 = vmatprep.mubr.msk.f32.mxu1 %vm27271_vm1, %v32793_v2  ;;  %v5419_v6 = vrot.slane %v5405_v20, %v27333_v7  ;;  %v30352_v23 = vcombine.low %v13227_v33, %v13234_v25  ;;  %v12567_v37 = vcombine.high %v22967_v19, %v22967_v19  ;;  %v22970_v28 = vld [vmem:[%s27330_s25 + $0x1b8] sm:$0xff]  ;;  %v22528_v25 = vld.sshfl [vmem:[%s27330_s25 + $0x14a] sm:$0x3 pattern:$0x76325410] }
 0x2a9   : > { %25125 = vmatprep.mubr.msk.f32.mxu0 %vm27271_vm1, %v32793_v2  ;;  %v4729_v27 = vcombine.high %v4721_v0, %v4721_v0  ;;  %v4730_v8 = vcombine.high %v4728_v40, %v4728_v40  ;;  %v4738_v24 = vcombine.high %v4136_v16, %v4136_v16  ;;  %v4745_v21 = vrot.slane %v4136_v16, %v27333_v7  ;;  %v22972_v33 = vld [vmem:[%s27330_s25 + $0x1c8] sm:$0xff] }
 0x2aa   : > { %v5420_v42 = vcombine.low %v5412_v11, %v5419_v6  ;;  %v30357_v54 = vcombine.low %v13244_v62, %v13251_v17  ;;  %v30360_v31 = vcombine.low %v12566_v15, %v30335_v12  ;;  %v13261_v9 = vrot.slane %v30339_v30, %v27333_v7  ;;  %v30428_v30 = vpop.f32.mrb[4].mxu1 }
 0x2ab   : > { %v5421_v50 = vcombine.low %v4721_v0, %v4729_v27  ;;  %v12591_v43 = vcombine.high %v22969_v35, %v22969_v35  ;;  %v5422_v61 = vcombine.low %v4728_v40, %v4730_v8  ;;  %v4752_v34 = vrot.slane %v4738_v24, %v27333_v7 }
 0x2ac   : > { %25126 = vmatmul.mubr.msk.f32.gmra.mrb[62].mxu0 %vm1767_vm2, %v30288_v32  ;;  %24620 = vmatmul.mubr.msk.f32.gmra.mrb[54].mxu1 %vm1767_vm2, %v5420_v42  ;;  %v12608_v4 = vcombine.high %v22970_v28, %v22970_v28  ;;  %v4753_v10 = vcombine.high %v4745_v21, %v4745_v21  ;;  %v12581_v32 = vrot.slane %v12567_v37, %v27333_v7  ;;  %v4140_v37 = vld [vmem:[%s27330_s25 + $0x15a] sm:$0xff] }
 0x2ad   : > { %25128 = vmatprep.mubr.msk.f32.mxu0 %vm27271_vm1, %v32793_v2  ;;  %24622 = vmatprep.mubr.msk.f32.mxu1 %vm27271_vm1, %v32793_v2  ;;  %v5429_v53 = vrot.slane %v5421_v50, %v27333_v7  ;;  %v12582_v48 = vcombine.high %v30335_v12, %v30335_v12  ;;  %v5436_v46 = vrot.slane %v5422_v61, %v27333_v7  ;;  %v22990_v12 = vld.sshfl [vmem:[%s27330_s25 + $0x1a8] sm:$0x3 pattern:$0x76325410]  ;;  %v22973_v61 = vld [vmem:[%s27330_s25 + $0x1d0] sm:$0xff] }
 0x2ae   : > { %v5438_v13 = vcombine.low %v22527_v51, %v4745_v21  ;;  %v12598_v29 = vrot.slane %v22969_v35, %v27333_v7  ;;  %v5439_v59 = vcombine.low %v4753_v10, %v4752_v34  ;;  %v4754_v3 = vcombine.high %v4752_v34, %v4752_v34  ;;  %v4142_v10 = vld [vmem:[%s27330_s25 + $0x16a] sm:$0xff] }
 0x2af   : > { %v4755_v47 = vcombine.high %v4137_v57, %v4137_v57  ;;  %v12605_v45 = vrot.slane %v12591_v43, %v27333_v7  ;;  %v5437_v52 = vcombine.low %v5429_v53, %v5436_v46  ;;  %v4762_v44 = vrot.slane %v4137_v57, %v27333_v7 }
 0x2b0   : > { %25129 = vmatmul.mubr.msk.f32.gmra.mrb[64].mxu0 %vm1767_vm2, %v13201_v36  ;;  %v5446_v58 = vrot.slane %v5438_v13, %v27333_v7  ;;  %v12615_v14 = vrot.slane %v22970_v28, %v27333_v7  ;;  %v12622_v19 = vrot.slane %v12608_v4, %v27333_v7  ;;  %v5453_v63 = vrot.slane %v5439_v59, %v27333_v7  ;;  %v22991_v13 = vld.sshfl [vmem:[%s27330_s25 + $0x1c0] sm:$0x3 pattern:$0x76325410] }
 0x2b1   : > { %25131 = vmatprep.mubr.msk.f32.mxu0 %vm27271_vm1, %v32793_v2  ;;  %v4769_v22 = vrot.slane %v4755_v47, %v27333_v7  ;;  %v13268_v49 = vrot.slane %v30360_v31, %v27333_v7  ;;  %v12583_v18 = vcombine.high %v12581_v32, %v12581_v32  ;;  %24623 = vmatmul.mubr.msk.f32.gmra.mrb[56].mxu1 %vm1767_vm2, %v5437_v52 }
 0x2b2   : > { %v4770_v39 = vcombine.high %v4762_v44, %v4762_v44  ;;  %v5455_v55 = vcombine.low %v4754_v3, %v4762_v44  ;;  %v12606_v41 = vcombine.high %v12598_v29, %v12598_v29  ;;  %24625 = vmatprep.mubr.msk.f32.mxu1 %vm27271_vm1, %v32793_v2  ;;  %v5454_v17 = vcombine.low %v5446_v58, %v5453_v63  ;;  %v22529_v58 = vld.sshfl [vmem:[%s27330_s25 + $0x162] sm:$0x3 pattern:$0x76325410] }
 0x2b3   : > { %v4771_v60 = vcombine.high %v4769_v22, %v4769_v22  ;;  %v4786_v56 = vrot.slane %v4139_v1, %v27333_v7  ;;  %v30401_v20 = vcombine.low %v12582_v48, %v12581_v32  ;;  %v12607_v26 = vcombine.high %v12605_v45, %v12605_v45  ;;  %v24421_v32 = vpop.f32.mrb[5].mxu1 }
 0x2b4   : > { %25132 = vmatmul.mubr.msk.f32.gmra.mrb[66].mxu0 %vm1767_vm2, %v13218_v38  ;;  %v5456_v0 = vcombine.low %v4770_v39, %v4769_v22  ;;  %v5463_v62 = vrot.slane %v5455_v55, %v27333_v7  ;;  %v12623_v15 = vcombine.high %v12615_v14, %v12615_v14  ;;  %v12624_v11 = vcombine.high %v12622_v19, %v12622_v19  ;;  %v30449_v63 = vpop.f32.mrb[6].mxu1 }
 0x2b5   : > { %25134 = vmatprep.mubr.msk.f32.mxu0 %vm27271_vm1, %v32793_v2  ;;  %v4794_v16 = vcombine.high %v4786_v56, %v4786_v56  ;;  %v5472_v36 = vcombine.low %v4771_v60, %v22528_v25  ;;  %v12632_v6 = vcombine.high %v22972_v33, %v22972_v33  ;;  %v30407_v40 = vrot.slane %v22972_v33, %v27333_v7  ;;  %v24424_v39 = vpop.f32.mrb[7].mxu1  ;;  %v23036_v25 = vld [vmem:[%s27330_s25 + $0x31] sm:$0xff] }
 0x2b6   : > { %24626 = vmatmul.mubr.msk.f32.gmra.mrb[58].mxu1 %vm1767_vm2, %v5454_v17  ;;  %v5470_v38 = vrot.slane %v5456_v0, %v27333_v7  ;;  %v4779_v35 = vcombine.high %v4139_v1, %v4139_v1  ;;  %v13271_v27 = vcombine.low %v12583_v18, %v22990_v12  ;;  %v13287_v28 = vcombine.low %v12598_v29, %v12606_v41 }
 0x2b7   : > { %24628 = vmatprep.mubr.msk.f32.mxu1 %vm27271_vm1, %v32793_v2  ;;  %v5473_v42 = vcombine.low %v4786_v56, %v4794_v16  ;;  %v5480_v8 = vrot.slane %v5472_v36, %v27333_v7  ;;  %v13269_v24 = vcombine.low %v13261_v9, %v13268_v49  ;;  %v13288_v21 = vcombine.low %v12605_v45, %v12607_v26  ;;  %v30466_v36 = vpop.f32.mrb[8].mxu1 }
 0x2b8   : > { %25135 = vmatmul.mubr.msk.f32.gmra.mrb[68].mxu0 %vm1767_vm2, %v30352_v23  ;;  %v5471_v31 = vcombine.low %v5463_v62, %v5470_v38  ;;  %v4793_v50 = vrot.slane %v4779_v35, %v27333_v7  ;;  %v13278_v51 = vrot.slane %v30401_v20, %v27333_v7  ;;  %v13304_v43 = vcombine.low %v12615_v14, %v12623_v15  ;;  %v4143_v20 = vld [vmem:[%s27330_s25 + $0x172] sm:$0xff]  ;;  %v24427_v35 = vpop.f32.mrb[9].mxu1 }
 0x2b9   : > { %25137 = vmatprep.mubr.msk.f32.mxu0 %vm27271_vm1, %v32793_v2  ;;  %v5487_v23 = vrot.slane %v5473_v42, %v27333_v7  ;;  %v4803_v34 = vrot.slane %v4140_v37, %v27333_v7  ;;  %v13305_v9 = vcombine.low %v12622_v19, %v12624_v11  ;;  %v12646_v57 = vrot.slane %v12632_v6, %v27333_v7  ;;  %v23037_v62 = vld [vmem:[%s27330_s25 + $0x39] sm:$0xff] }
 0x2ba   : > { %v12647_v4 = vcombine.high %v30407_v40, %v30407_v40  ;;  %24629 = vmatmul.mubr.msk.f32.gmra.mrb[60].mxu1 %vm1767_vm2, %v5471_v31  ;;  %v4795_v53 = vcombine.high %v4793_v50, %v4793_v50  ;;  %v13285_v48 = vrot.slane %v13271_v27, %v27333_v7  ;;  %v13295_v46 = vrot.slane %v13287_v28, %v27333_v7 }
 0x2bb   : > { %24631 = vmatprep.mubr.msk.f32.mxu1 %vm27271_vm1, %v32793_v2  ;;  %v5488_v29 = vcombine.low %v5480_v8, %v5487_v23  ;;  %v4811_v59 = vcombine.high %v4803_v34, %v4803_v34  ;;  %v13302_v3 = vrot.slane %v13288_v21, %v27333_v7  ;;  %v12649_v47 = vcombine.high %v22973_v61, %v22973_v61  ;;  %v30481_v23 = vpop.f32.mrb[10].mxu1 }
 0x2bc   : > { %25138 = vmatmul.mubr.msk.f32.gmra.mrb[70].mxu0 %vm1767_vm2, %v30357_v54  ;;  %v12656_v45 = vrot.slane %v22973_v61, %v27333_v7  ;;  %v5489_v52 = vcombine.low %v4793_v50, %v4795_v53  ;;  %v13312_v44 = vrot.slane %v13304_v43, %v27333_v7  ;;  %v4796_v14 = vcombine.high %v4140_v37, %v4140_v37  ;;  %v24430_v53 = vpop.f32.mrb[11].mxu1 }
 0x2bd   : > { %25140 = vmatprep.mubr.msk.f32.mxu0 %vm27271_vm1, %v32793_v2  ;;  %v5490_v1 = vcombine.low %v4803_v34, %v4811_v59  ;;  %v4827_v19 = vrot.slane %v4142_v10, %v27333_v7  ;;  %v13319_v54 = vrot.slane %v13305_v9, %v27333_v7  ;;  %v13321_v22 = vcombine.low %v22991_v13, %v30407_v40 }
 0x2be   : > { %v13322_v49 = vcombine.low %v12647_v4, %v12646_v57  ;;  %24632 = vmatmul.mubr.msk.f32.gmra.mrb[62].mxu1 %vm1767_vm2, %v5488_v29  ;;  %v5497_v18 = vrot.slane %v5489_v52, %v27333_v7  ;;  %v13286_v55 = vcombine.low %v13278_v51, %v13285_v48  ;;  %v4810_v33 = vrot.slane %v4796_v14, %v27333_v7  ;;  %v4145_v29 = vld [vmem:[%s27330_s25 + $0x182] sm:$0xff]  ;;  %v30498_v14 = vpop.f32.mrb[12].mxu1 }
 0x2bf   : > { %24634 = vmatprep.mubr.msk.f32.mxu1 %vm27271_vm1, %v32793_v2  ;;  %v5504_v41 = vrot.slane %v5490_v1, %v27333_v7  ;;  %v5507_v17 = vcombine.low %v22529_v58, %v4827_v19  ;;  %v12648_v60 = vcombine.high %v12646_v57, %v12646_v57  ;;  %v12663_v56 = vrot.slane %v12649_v47, %v27333_v7  ;;  %v22530_v1 = vld.sshfl [vmem:[%s27330_s25 + $0x17a] sm:$0x3 pattern:$0x76325410] }
 0x2c0   : > { %25141 = vmatmul.mubr.msk.f32.gmra.mrb[72].mxu0 %vm1767_vm2, %v13269_v24  ;;  %v12664_v12 = vcombine.high %v12656_v45, %v12656_v45  ;;  %v4820_v26 = vcombine.high %v4142_v10, %v4142_v10  ;;  %v13303_v0 = vcombine.low %v13295_v46, %v13302_v3  ;;  %v4812_v11 = vcombine.high %v4810_v33, %v4810_v33  ;;  %v22992_v10 = vld.sshfl [vmem:[%s27330_s25 + $0x1d8] sm:$0x3 pattern:$0x76325410] }
 0x2c1   : > { %25143 = vmatprep.mubr.msk.f32.mxu0 %vm27271_vm1, %v32793_v2  ;;  %v5505_v15 = vcombine.low %v5497_v18, %v5504_v41  ;;  %v4835_v16 = vcombine.high %v4827_v19, %v4827_v19  ;;  %v13320_v6 = vcombine.low %v13312_v44, %v13319_v54  ;;  %v13329_v40 = vrot.slane %v13321_v22, %v27333_v7  ;;  %v24433_v18 = vpop.f32.mrb[13].mxu1 }
 0x2c2   : > { %v13336_v38 = vrot.slane %v13322_v49, %v27333_v7  ;;  %v13867_v37 = vcombine.high %v23036_v25, %v23036_v25  ;;  %v5506_v27 = vcombine.low %v4810_v33, %v4812_v11  ;;  %v5521_v28 = vrot.slane %v5507_v17, %v27333_v7 }
 0x2c3   : > { %24635 = vmatmul.mubr.msk.f32.gmra.mrb[64].mxu1 %vm1767_vm2, %v5505_v15  ;;  %v4834_v42 = vrot.slane %v4820_v26, %v27333_v7  ;;  %v4844_v8 = vrot.slane %v4143_v20, %v27333_v7  ;;  %v13338_v24 = vcombine.low %v12648_v60, %v12656_v45  ;;  %v13339_v21 = vcombine.low %v12664_v12, %v12663_v56  ;;  %v30515_v15 = vpop.f32.mrb[14].mxu1 }
 0x2c4   : > { %25144 = vmatmul.mubr.msk.f32.gmra.mrb[74].mxu0 %vm1767_vm2, %v13286_v55  ;;  %v13884_v31 = vcombine.high %v23037_v62, %v23037_v62  ;;  %24637 = vmatprep.mubr.msk.f32.mxu1 %vm27271_vm1, %v32793_v2  ;;  %v13874_v50 = vrot.slane %v23036_v25, %v27333_v7  ;;  %v5514_v51 = vrot.slane %v5506_v27, %v27333_v7  ;;  %v23039_v25 = vld [vmem:[%s27330_s25 + $0x49] sm:$0xff]  ;;  %v23040_v27 = vld [vmem:[%s27330_s25 + $0x51] sm:$0xff] }
 0x2c5   : > { %25146 = vmatprep.mubr.msk.f32.mxu0 %vm27271_vm1, %v32793_v2  ;;  %v4836_v43 = vcombine.high %v4834_v42, %v4834_v42  ;;  %v5523_v61 = vcombine.low %v4835_v16, %v4834_v42  ;;  %v12665_v34 = vcombine.high %v12663_v56, %v12663_v56  ;;  %v13881_v9 = vrot.slane %v13867_v37, %v27333_v7 }
 0x2c6   : > { %v4837_v57 = vcombine.high %v4143_v20, %v4143_v20  ;;  %v4852_v4 = vcombine.high %v4844_v8, %v4844_v8  ;;  %v13891_v32 = vrot.slane %v23037_v62, %v27333_v7  ;;  %v5522_v48 = vcombine.low %v5514_v51, %v5521_v28  ;;  %v4146_v20 = vld [vmem:[%s27330_s25 + $0x18a] sm:$0xff] }
 0x2c7   : > { %v5524_v46 = vcombine.low %v4836_v43, %v4844_v8  ;;  %v5531_v13 = vrot.slane %v5523_v61, %v27333_v7  ;;  %v13337_v59 = vcombine.low %v13329_v40, %v13336_v38  ;;  %v13346_v3 = vrot.slane %v13338_v24, %v27333_v7  ;;  %v24436_v38 = vpop.f32.mrb[15].mxu1 }
 0x2c8   : > { %25147 = vmatmul.mubr.msk.f32.gmra.mrb[76].mxu0 %vm1767_vm2, %v13303_v0  ;;  %v13898_v47 = vrot.slane %v13884_v31, %v27333_v7  ;;  %v4851_v45 = vrot.slane %v4837_v57, %v27333_v7  ;;  %v13353_v52 = vrot.slane %v13339_v21, %v27333_v7  ;;  %v13882_v58 = vcombine.high %v13874_v50, %v13874_v50  ;;  %v23090_v57 = vld.sshfl [vmem:[%s27330_s25 + $0x41] sm:$0x3 pattern:$0x76325410] }
 0x2c9   : > { %25149 = vmatprep.mubr.msk.f32.mxu0 %vm27271_vm1, %v32793_v2  ;;  %24638 = vmatmul.mubr.msk.f32.gmra.mrb[66].mxu1 %vm1767_vm2, %v5522_v48  ;;  %v5538_v44 = vrot.slane %v5524_v46, %v27333_v7  ;;  %v30500_v19 = vcombine.low %v12665_v34, %v22992_v10  ;;  %v4861_v49 = vcombine.high %v4145_v29, %v4145_v29  ;;  %v4148_v34 = vld [vmem:[%s27330_s25 + $0x19a] sm:$0xff] }
 0x2ca   : > { %24640 = vmatprep.mubr.msk.f32.mxu1 %vm27271_vm1, %v32793_v2  ;;  %v4853_v54 = vcombine.high %v4851_v45, %v4851_v45  ;;  %v5540_v22 = vcombine.low %v4852_v4, %v4851_v45  ;;  %v13883_v39 = vcombine.high %v13881_v9, %v13881_v9  ;;  %v13899_v55 = vcombine.high %v13891_v32, %v13891_v32 }
 0x2cb   : > { %v5539_v41 = vcombine.low %v5531_v13, %v5538_v44  ;;  %v4868_v33 = vrot.slane %v4145_v29, %v27333_v7  ;;  %v13900_v17 = vcombine.high %v13898_v47, %v13898_v47  ;;  %v4875_v12 = vrot.slane %v4861_v49, %v27333_v7  ;;  %v23042_v44 = vld [vmem:[%s27330_s25 + $0x61] sm:$0xff] }
 0x2cc   : > { %25150 = vmatmul.mubr.msk.f32.gmra.mrb[78].mxu0 %vm1767_vm2, %v13320_v6  ;;  %v5541_v60 = vcombine.low %v4853_v54, %v22530_v1  ;;  %v5548_v56 = vrot.slane %v5540_v22, %v27333_v7  ;;  %v13354_v26 = vcombine.low %v13346_v3, %v13353_v52  ;;  %v30512_v0 = vcombine.low %v13874_v50, %v13882_v58  ;;  %v22531_v54 = vld.sshfl [vmem:[%s27330_s25 + $0x192] sm:$0x3 pattern:$0x76325410] }
 0x2cd   : > { %25152 = vmatprep.mubr.msk.f32.mxu0 %vm27271_vm1, %v32793_v2  ;;  %24641 = vmatmul.mubr.msk.f32.gmra.mrb[68].mxu1 %vm1767_vm2, %v5539_v41  ;;  %v4876_v62 = vcombine.high %v4868_v33, %v4868_v33  ;;  %v13908_v11 = vcombine.high %v23039_v25, %v23039_v25  ;;  %v30518_v16 = vrot.slane %v23039_v25, %v27333_v7 }
 0x2ce   : > { %24643 = vmatprep.mubr.msk.f32.mxu1 %vm27271_vm1, %v32793_v2  ;;  %v5555_v6 = vrot.slane %v5541_v60, %v27333_v7  ;;  %v4877_v40 = vcombine.high %v4875_v12, %v4875_v12  ;;  %v13362_v37 = vrot.slane %v30500_v19, %v27333_v7  ;;  %v14608_v35 = vcombine.low %v13881_v9, %v13883_v39  ;;  %v30535_v9 = vpop.f32.mrb[16].mxu1 }
 0x2cf   : > { %v5557_v28 = vcombine.low %v4868_v33, %v4876_v62  ;;  %v4878_v42 = vcombine.high %v4146_v20, %v4146_v20  ;;  %v14624_v8 = vcombine.low %v13891_v32, %v13899_v55  ;;  %v14625_v24 = vcombine.low %v13898_v47, %v13900_v17  ;;  %v24439_v48 = vpop.f32.mrb[17].mxu1 }
 0x2d0   : > { %25153 = vmatmul.mubr.msk.f32.gmra.mrb[80].mxu0 %vm1767_vm2, %v13337_v59  ;;  %v5556_v21 = vcombine.low %v5548_v56, %v5555_v6  ;;  %v5558_v31 = vcombine.low %v4875_v12, %v4877_v40  ;;  %v14615_v50 = vrot.slane %v30512_v0, %v27333_v7  ;;  %v4885_v43 = vrot.slane %v4146_v20, %v27333_v7  ;;  %v30556_v49 = vpop.f32.mrb[18].mxu1 }
 0x2d1   : > { %25155 = vmatprep.mubr.msk.f32.mxu0 %vm27271_vm1, %v32793_v2  ;;  %v5565_v51 = vrot.slane %v5557_v28, %v27333_v7  ;;  %v4892_v61 = vrot.slane %v4878_v42, %v27333_v7  ;;  %v13922_v4 = vrot.slane %v13908_v11, %v27333_v7  ;;  %v13923_v53 = vcombine.high %v30518_v16, %v30518_v16  ;;  %v24442_v41 = vpop.f32.mrb[19].mxu1 }
 0x2d2   : > { %v13925_v10 = vcombine.high %v23040_v27, %v23040_v27  ;;  %24644 = vmatmul.mubr.msk.f32.gmra.mrb[70].mxu1 %vm1767_vm2, %v5556_v21  ;;  %v5572_v32 = vrot.slane %v5558_v31, %v27333_v7  ;;  %v14622_v46 = vrot.slane %v14608_v35, %v27333_v7  ;;  %v13932_v13 = vrot.slane %v23040_v27, %v27333_v7  ;;  %v30569_v62 = vpop.f32.mrb[20].mxu1  ;;  %v23045_v21 = vld [vmem:[%s27330_s25 + $0x79] sm:$0xff] }
 0x2d3   : > { %24646 = vmatprep.mubr.msk.f32.mxu1 %vm27271_vm1, %v32793_v2  ;;  %v4893_v29 = vcombine.high %v4885_v43, %v4885_v43  ;;  %v4894_v59 = vcombine.high %v4892_v61, %v4892_v61  ;;  %v14632_v3 = vrot.slane %v14624_v8, %v27333_v7  ;;  %v14639_v47 = vrot.slane %v14625_v24, %v27333_v7  ;;  %v24445_v38 = vpop.f32.mrb[21].mxu1 }
 0x2d4   : > { %25156 = vmatmul.mubr.msk.f32.gmra.mrb[106].mxu0 %vm1767_vm2, %v13354_v26  ;;  %v5573_v45 = vcombine.low %v5565_v51, %v5572_v32  ;;  %v4902_v52 = vcombine.high %v4148_v34, %v4148_v34  ;;  %v14641_v58 = vcombine.low %v23090_v57, %v30518_v16  ;;  %v4909_v22 = vrot.slane %v4148_v34, %v27333_v7  ;;  %v23043_v16 = vld [vmem:[%s27330_s25 + $0x69] sm:$0xff]  ;;  %v23091_v51 = vld.sshfl [vmem:[%s27330_s25 + $0x59] sm:$0x3 pattern:$0x76325410] }
 0x2d5   : > { %25158 = vmatprep.mubr.msk.f32.mxu0 %vm27271_vm1, %v32793_v2  ;;  %v5574_v1 = vcombine.low %v4885_v43, %v4893_v29  ;;  %v5575_v19 = vcombine.low %v4892_v61, %v4894_v59  ;;  %v14642_v18 = vcombine.low %v13923_v53, %v13922_v4  ;;  %v13924_v39 = vcombine.high %v13922_v4, %v13922_v4 }
 0x2d6   : > { %v13939_v55 = vrot.slane %v13925_v10, %v27333_v7  ;;  %24647 = vmatmul.mubr.msk.f32.gmra.mrb[72].mxu1 %vm1767_vm2, %v5573_v45  ;;  %v30561_v25 = vrot.slane %v4902_v52, %v27333_v7  ;;  %v13940_v33 = vcombine.high %v13932_v13, %v13932_v13  ;;  %v4917_v56 = vcombine.high %v4909_v22, %v4909_v22 }
 0x2d7   : > { %24649 = vmatprep.mubr.msk.f32.mxu1 %vm27271_vm1, %v32793_v2  ;;  %v5582_v17 = vrot.slane %v5574_v1, %v27333_v7  ;;  %v5589_v60 = vrot.slane %v5575_v19, %v27333_v7  ;;  %v14623_v12 = vcombine.low %v14615_v50, %v14622_v46  ;;  %v13956_v20 = vrot.slane %v23042_v44, %v27333_v7 }
 0x2d8   : > { %25159 = vmatmul.mubr.msk.f32.gmra.mrb[108].mxu0 %vm1767_vm2, %v13362_v37  ;;  %v13949_v26 = vcombine.high %v23042_v44, %v23042_v44  ;;  %v5591_v0 = vcombine.low %v22531_v54, %v4909_v22  ;;  %v14640_v11 = vcombine.low %v14632_v3, %v14639_v47  ;;  %v5592_v40 = vcombine.low %v4917_v56, %v30561_v25  ;;  %v23223_v37 = vld [vmem:[%s32788_s1 + $0x20] sm:$0x7]  ;;  %v23092_v22 = vld.sshfl [vmem:[%s27330_s25 + $0x71] sm:$0x3 pattern:$0x76325410] }
 0x2d9   : > { %25163 = vmatprep.mubr.msk.f32.mxu0 %vm27271_vm1, %v32793_v2  ;;  %v5590_v6 = vcombine.low %v5582_v17, %v5589_v60  ;;  %v14649_v35 = vrot.slane %v14641_v58, %v27333_v7  ;;  %v14656_v27 = vrot.slane %v14642_v18, %v27333_v7  ;;  %v14658_v28 = vcombine.low %v13924_v39, %v13932_v13  ;;  %v23046_v3 = vld [vmem:[%s27330_s25 + $0x81] sm:$0xff]  ;;  %v23048_v39 = vld [vmem:[%s27330_s25 + $0x91] sm:$0xff] }
 0x2da   : > { %v5599_v42 = vrot.slane %v5591_v0, %v27333_v7  ;;  %v14659_v8 = vcombine.low %v13940_v33, %v13939_v55  ;;  %v13941_v24 = vcombine.high %v13939_v55, %v13939_v55  ;;  %v13966_v31 = vcombine.high %v23043_v16, %v23043_v16 }
 0x2db   : > { %24650 = vmatmul.mubr.msk.f32.gmra.mrb[74].mxu1 %vm1767_vm2, %v5590_v6  ;;  %v5606_v50 = vrot.slane %v5592_v40, %v27333_v7  ;;  %v13964_v43 = vcombine.high %v13956_v20, %v13956_v20  ;;  %v13963_v61 = vrot.slane %v13949_v26, %v27333_v7  ;;  %v13973_v34 = vrot.slane %v23043_v16, %v27333_v7 }
 0x2dc   : > { %25164 = vmatmul.mubr.msk.f32.vlgmr.msra.gmra.mrb[110].mxu0 %vm1767_vm2, %v14623_v12  ;;  %24652 = vmatprep.mubr.msk.f32.mxu1 %vm27271_vm1, %v32793_v2  ;;  %v13990_v4 = vcombine.high %v23045_v21, %v23045_v21  ;;  %v14666_v53 = vrot.slane %v14658_v28, %v27333_v7  ;;  %v14673_v10 = vrot.slane %v14659_v8, %v27333_v7 }
 0x2dd   : > { %25287 = vmatpush3.msk.msra.mxu0 %vm1850_vm0, %v23223_v37  ;;  %25166 = vmatprep.mubr.msk.f32.mxu0 %vm27271_vm1, %v32793_v2  ;;  %v5607_v57 = vcombine.low %v5599_v42, %v5606_v50  ;;  %v14675_v32 = vcombine.low %v13941_v24, %v23091_v51  ;;  %v13980_v48 = vrot.slane %v13966_v31, %v27333_v7  ;;  %v23093_v24 = vld.sshfl [vmem:[%s27330_s25 + $0x89] sm:$0x3 pattern:$0x76325410] }
 0x2de   : > { %v14657_v46 = vcombine.low %v14649_v35, %v14656_v27  ;;  %v14676_v13 = vcombine.low %v13956_v20, %v13964_v43  ;;  %v13965_v29 = vcombine.high %v13963_v61, %v13963_v61  ;;  %v13981_v59 = vcombine.high %v13973_v34, %v13973_v34 }
 0x2df   : > { %24653 = vmatmul.mubr.msk.f32.gmra.mrb[76].mxu1 %vm1767_vm2, %v5607_v57  ;;  %v14004_v47 = vrot.slane %v13990_v4, %v27333_v7  ;;  %v14674_v45 = vcombine.low %v14666_v53, %v14673_v10  ;;  %v14683_v52 = vrot.slane %v14675_v32, %v27333_v7  ;;  %v13982_v58 = vcombine.high %v13980_v48, %v13980_v48  ;;  %v23051_v53 = vld [vmem:[%s27330_s25 + $0xa9] sm:$0xff] }
 0x2e0   : > { %25167 = vmatmul.mubr.msk.f32.gmra.mrb[112].mxu0 %vm1767_vm2, %v14640_v11  ;;  %24655 = vmatprep.mubr.msk.f32.mxu1 %vm27271_vm1, %v32793_v2  ;;  %v13997_v44 = vrot.slane %v23045_v21, %v27333_v7  ;;  %v14690_v1 = vrot.slane %v14676_v13, %v27333_v7  ;;  %v14692_v19 = vcombine.low %v13963_v61, %v13965_v29  ;;  %v23049_v11 = vld [vmem:[%s27330_s25 + $0x99] sm:$0xff]  ;;  %v23052_v29 = vld [vmem:[%s27330_s25 + $0xb1] sm:$0xff] }
 0x2e1   : > { %25169 = vmatprep.mubr.msk.f32.mxu0 %vm27271_vm1, %v32793_v2  ;;  %v14693_v54 = vcombine.low %v13973_v34, %v13981_v59  ;;  %v14007_v18 = vcombine.high %v23046_v3, %v23046_v3  ;;  %v14006_v41 = vcombine.high %v14004_v47, %v14004_v47  ;;  %v14014_v33 = vrot.slane %v23046_v3, %v27333_v7 }
 0x2e2   : > { %v14005_v55 = vcombine.high %v13997_v44, %v13997_v44  ;;  %v14709_v17 = vcombine.low %v13980_v48, %v13982_v58  ;;  %v14710_v60 = vcombine.low %v23092_v22, %v13997_v44  ;;  %v14031_v56 = vcombine.high %v23048_v39, %v23048_v39 }
 0x2e3   : > { %v14691_v12 = vcombine.low %v14683_v52, %v14690_v1  ;;  %v14700_v20 = vrot.slane %v14692_v19, %v27333_v7  ;;  %v14707_v26 = vrot.slane %v14693_v54, %v27333_v7  ;;  %v14021_v0 = vrot.slane %v14007_v18, %v27333_v7  ;;  %v23094_v1 = vld.sshfl [vmem:[%s27330_s25 + $0xa1] sm:$0x3 pattern:$0x76325410] }
 0x2e4   : > { %25170 = vmatmul.mubr.msk.f32.gmra.mrb[4].mxu0 %vm1767_vm2, %v14657_v46  ;;  %v14726_v16 = vcombine.low %v14005_v55, %v14004_v47  ;;  %v14727_v6 = vcombine.low %v14006_v41, %v14014_v33  ;;  %v14717_v40 = vrot.slane %v14709_v17, %v27333_v7  ;;  %v14724_v38 = vrot.slane %v14710_v60, %v27333_v7  ;;  %v23054_v41 = vld [vmem:[%s27330_s25 + $0xc1] sm:$0xff] }
 0x2e5   : > { %25172 = vmatprep.mubr.msk.f32.mxu0 %vm27271_vm1, %v32793_v2  ;;  %v14038_v37 = vrot.slane %v23048_v39, %v27333_v7  ;;  %v14045_v35 = vrot.slane %v14031_v56, %v27333_v7  ;;  %v14708_v27 = vcombine.low %v14700_v20, %v14707_v26  ;;  %v14022_v28 = vcombine.high %v14014_v33, %v14014_v33 }
 0x2e6   : > { %v14023_v42 = vcombine.high %v14021_v0, %v14021_v0  ;;  %v14048_v8 = vcombine.high %v23049_v11, %v23049_v11  ;;  %v14734_v21 = vrot.slane %v14726_v16, %v27333_v7  ;;  %v14741_v31 = vrot.slane %v14727_v6, %v27333_v7  ;;  %v23055_v6 = vld [vmem:[%s27330_s25 + $0xc9] sm:$0xff] }
 0x2e7   : > { %v14725_v50 = vcombine.low %v14717_v40, %v14724_v38  ;;  %v14046_v51 = vcombine.high %v14038_v37, %v14038_v37  ;;  %v14047_v43 = vcombine.high %v14045_v35, %v14045_v35  ;;  %v14743_v61 = vcombine.low %v14022_v28, %v14021_v0 }
 0x2e8   : > { %25173 = vmatmul.mubr.msk.f32.gmra.mrb[6].mxu0 %vm1767_vm2, %v14674_v45  ;;  %v14744_v34 = vcombine.low %v14023_v42, %v23093_v24  ;;  %v14055_v57 = vrot.slane %v23049_v11, %v27333_v7  ;;  %v14062_v4 = vrot.slane %v14048_v8, %v27333_v7  ;;  %v14742_v10 = vcombine.low %v14734_v21, %v14741_v31  ;;  %v23057_v31 = vld [vmem:[%s27330_s25 + $0xd9] sm:$0xff] }
 0x2e9   : > { %25175 = vmatprep.mubr.msk.f32.mxu0 %vm27271_vm1, %v32793_v2  ;;  %v14760_v32 = vcombine.low %v14038_v37, %v14046_v51  ;;  %v14761_v48 = vcombine.low %v14045_v35, %v14047_v43  ;;  %v14072_v46 = vcombine.high %v23051_v53, %v23051_v53  ;;  %v14079_v13 = vrot.slane %v23051_v53, %v27333_v7 }
 0x2ea   : > { %v14751_v59 = vrot.slane %v14743_v61, %v27333_v7  ;;  %v14758_v3 = vrot.slane %v14744_v34, %v27333_v7  ;;  %v14063_v47 = vcombine.high %v14055_v57, %v14055_v57  ;;  %v14064_v45 = vcombine.high %v14062_v4, %v14062_v4 }
 0x2eb   : > { %v14089_v52 = vcombine.high %v23052_v29, %v23052_v29  ;;  %v14768_v58 = vrot.slane %v14760_v32, %v27333_v7  ;;  %v14775_v44 = vrot.slane %v14761_v48, %v27333_v7  ;;  %v14086_v19 = vrot.slane %v14072_v46, %v27333_v7 }
 0x2ec   : > { %25176 = vmatmul.mubr.msk.f32.gmra.mrb[8].mxu0 %vm1767_vm2, %v14691_v12  ;;  %v14087_v54 = vcombine.high %v14079_v13, %v14079_v13  ;;  %v14759_v22 = vcombine.low %v14751_v59, %v14758_v3  ;;  %v14777_v18 = vcombine.low %v14055_v57, %v14063_v47  ;;  %v14778_v39 = vcombine.low %v14062_v4, %v14064_v45 }
 0x2ed   : > { %25178 = vmatprep.mubr.msk.f32.mxu0 %vm27271_vm1, %v32793_v2  ;;  %v14096_v55 = vrot.slane %v23052_v29, %v27333_v7  ;;  %v14794_v33 = vcombine.low %v23094_v1, %v14079_v13  ;;  %v14103_v17 = vrot.slane %v14089_v52, %v27333_v7  ;;  %v14776_v60 = vcombine.low %v14768_v58, %v14775_v44  ;;  %v23058_v13 = vld [vmem:[%s27330_s25 + $0xe1] sm:$0xff]  ;;  %v23096_v52 = vld.sshfl [vmem:[%s27330_s25 + $0xd1] sm:$0x3 pattern:$0x76325410] }
 0x2ee   : > { %v14795_v56 = vcombine.low %v14087_v54, %v14086_v19  ;;  %v14088_v12 = vcombine.high %v14086_v19, %v14086_v19  ;;  %v14113_v20 = vcombine.high %v23054_v41, %v23054_v41  ;;  %v14785_v26 = vrot.slane %v14777_v18, %v27333_v7  ;;  %v23060_v18 = vld [vmem:[%s27330_s25 + $0xf1] sm:$0xff] }
 0x2ef   : > { %v14792_v0 = vrot.slane %v14778_v39, %v27333_v7  ;;  %v14104_v11 = vcombine.high %v14096_v55, %v14096_v55  ;;  %v14120_v16 = vrot.slane %v23054_v41, %v27333_v7  ;;  %v14802_v40 = vrot.slane %v14794_v33, %v27333_v7 }
 0x2f0   : > { %25179 = vmatmul.mubr.msk.f32.gmra.mrb[10].mxu0 %vm1767_vm2, %v14708_v27  ;;  %v14105_v38 = vcombine.high %v14103_v17, %v14103_v17  ;;  %v14809_v37 = vrot.slane %v14795_v56, %v27333_v7  ;;  %v14811_v35 = vcombine.low %v14088_v12, %v14096_v55  ;;  %v23095_v27 = vld.sshfl [vmem:[%s27330_s25 + $0xb9] sm:$0x3 pattern:$0x76325410]  ;;  %v14127_v28 = vrot.slane %v14113_v20, %v27333_v7 }
 0x2f1   : > { %25181 = vmatprep.mubr.msk.f32.mxu0 %vm27271_vm1, %v32793_v2  ;;  %v14137_v42 = vrot.slane %v23055_v6, %v27333_v7  ;;  %v14793_v8 = vcombine.low %v14785_v26, %v14792_v0  ;;  %v14812_v24 = vcombine.low %v14104_v11, %v14103_v17  ;;  %v14128_v21 = vcombine.high %v14120_v16, %v14120_v16 }
 0x2f2   : > { %v14828_v51 = vcombine.low %v14105_v38, %v23095_v27  ;;  %v14810_v61 = vcombine.low %v14802_v40, %v14809_v37  ;;  %v14129_v34 = vcombine.high %v14127_v28, %v14127_v28  ;;  %v14154_v4 = vcombine.high %v23057_v31, %v23057_v31 }
 0x2f3   : > { %v14145_v57 = vcombine.high %v14137_v42, %v14137_v42  ;;  %v14826_v32 = vrot.slane %v14812_v24, %v27333_v7  ;;  %v14829_v48 = vcombine.low %v14120_v16, %v14128_v21  ;;  %v14161_v29 = vrot.slane %v23057_v31, %v27333_v7  ;;  %v23061_v16 = vld [vmem:[%s27330_s25 + $0xf9] sm:$0xff] }
 0x2f4   : > { %25182 = vmatmul.mubr.msk.f32.gmra.mrb[12].mxu0 %vm1767_vm2, %v14725_v50  ;;  %v14130_v50 = vcombine.high %v23055_v6, %v23055_v6  ;;  %v14836_v3 = vrot.slane %v14828_v51, %v27333_v7  ;;  %v14845_v47 = vcombine.low %v14127_v28, %v14129_v34  ;;  %v14168_v58 = vrot.slane %v14154_v4, %v27333_v7 }
 0x2f5   : > { %25184 = vmatprep.mubr.msk.f32.mxu0 %vm27271_vm1, %v32793_v2  ;;  %v14846_v45 = vcombine.low %v14137_v42, %v14145_v57  ;;  %v14843_v19 = vrot.slane %v14829_v48, %v27333_v7  ;;  %v14863_v39 = vcombine.low %v23096_v52, %v14161_v29  ;;  %v14169_v55 = vcombine.high %v14161_v29, %v14161_v29  ;;  %v23063_v48 = vld [vmem:[%s27330_s25 + $0x109] sm:$0xff] }
 0x2f6   : > { %v14144_v46 = vrot.slane %v14130_v50, %v27333_v7  ;;  %v14853_v33 = vrot.slane %v14845_v47, %v27333_v7  ;;  %v14178_v56 = vrot.slane %v23058_v13, %v27333_v7  ;;  %v14195_v11 = vcombine.high %v23060_v18, %v23060_v18  ;;  %v23097_v50 = vld.sshfl [vmem:[%s27330_s25 + $0xe9] sm:$0x3 pattern:$0x76325410] }
 0x2f7   : > { %v14860_v17 = vrot.slane %v14846_v45, %v27333_v7  ;;  %v14844_v20 = vcombine.low %v14836_v3, %v14843_v19  ;;  %v14877_v6 = vrot.slane %v14863_v39, %v27333_v7  ;;  %v14879_v40 = vcombine.low %v14169_v55, %v14168_v58  ;;  %v23098_v19 = vld.sshfl [vmem:[%s27330_s25 + $0x101] sm:$0x3 pattern:$0x76325410] }
 0x2f8   : > { %25185 = vmatmul.mubr.msk.f32.gmra.mrb[14].mxu0 %vm1767_vm2, %v14742_v10  ;;  %v14819_v10 = vrot.slane %v14811_v35, %v27333_v7  ;;  %v14146_v54 = vcombine.high %v14144_v46, %v14144_v46  ;;  %v14186_v27 = vcombine.high %v14178_v56, %v14178_v56  ;;  %v14202_v28 = vrot.slane %v23060_v18, %v27333_v7 }
 0x2f9   : > { %25187 = vmatprep.mubr.msk.f32.mxu0 %vm27271_vm1, %v32793_v2  ;;  %v14861_v37 = vcombine.low %v14853_v33, %v14860_v17  ;;  %v14209_v21 = vrot.slane %v14195_v11, %v27333_v7  ;;  %v14212_v31 = vcombine.high %v23061_v16, %v23061_v16  ;;  %v14219_v51 = vrot.slane %v23061_v16, %v27333_v7  ;;  %v23067_v16 = vld [vmem:[%s27330_s25 + $0x129] sm:$0xff] }
 0x2fa   : > { %v14827_v1 = vcombine.low %v14819_v10, %v14826_v32  ;;  %v14862_v26 = vcombine.low %v14144_v46, %v14146_v54  ;;  %v14210_v57 = vcombine.high %v14202_v28, %v14202_v28  ;;  %v14243_v3 = vrot.slane %v23063_v48, %v27333_v7 }
 0x2fb   : > { %v14211_v10 = vcombine.high %v14209_v21, %v14209_v21  ;;  %v14226_v32 = vrot.slane %v14212_v31, %v27333_v7  ;;  %v14227_v46 = vcombine.high %v14219_v51, %v14219_v51  ;;  %v23099_v31 = vld.sshfl [vmem:[%s27330_s25 + $0x119] sm:$0x3 pattern:$0x76325410] }
 0x2fc   : > { %25188 = vmatmul.mubr.msk.f32.gmra.mrb[16].mxu0 %vm1767_vm2, %v14759_v22  ;;  %v14171_v22 = vcombine.high %v23058_v13, %v23058_v13  ;;  %v14913_v45 = vcombine.low %v14202_v28, %v14210_v57 }
 0x2fd   : > { %25190 = vmatprep.mubr.msk.f32.mxu0 %vm27271_vm1, %v32793_v2  ;;  %v14914_v52 = vcombine.low %v14209_v21, %v14211_v10 }
 0x2fe   : > { %v14185_v0 = vrot.slane %v14171_v22, %v27333_v7  ;;  %v14251_v22 = vcombine.high %v14243_v3, %v14243_v3 }
 0x2ff   : > { %v14928_v33 = vrot.slane %v14914_v52, %v27333_v7 }
 0x300   : > { %25191 = vmatmul.mubr.msk.f32.gmra.mrb[18].mxu0 %vm1767_vm2, %v14776_v60  ;;  %v14170_v60 = vcombine.high %v14168_v58, %v14168_v58  ;;  %v14187_v24 = vcombine.high %v14185_v0, %v14185_v0  ;;  %v14896_v34 = vcombine.low %v14186_v27, %v14185_v0  ;;  %v14228_v58 = vcombine.high %v14226_v32, %v14226_v32 }
 0x301   : > { %25193 = vmatprep.mubr.msk.f32.mxu0 %vm27271_vm1, %v32793_v2  ;;  %v14301_v27 = vrot.slane %v23067_v16, %v27333_v7 }
 0x302   : > { %v14880_v35 = vcombine.low %v14170_v60, %v14178_v56  ;;  %v14904_v29 = vrot.slane %v14896_v34, %v27333_v7  ;;  %v14931_v17 = vcombine.low %v14226_v32, %v14228_v58  ;;  %v23066_v60 = vld [vmem:[%s27330_s25 + $0x121] sm:$0xff] }
 0x303   : > { %v11776_v43 = vpop.f32.mrb[98].mxu0  ;;  %v14309_v34 = vcombine.high %v14301_v27, %v14301_v27 }
 0x304   : > { %v25032_v53 = vpop.f32.mrb[99].mxu0  ;;  %25194 = vmatmul.mubr.msk.f32.gmra.mrb[20].mxu0 %vm1767_vm2, %v14793_v8  ;;  %v14870_v8 = vrot.slane %v14862_v26, %v27333_v7  ;;  %v14887_v43 = vrot.slane %v14879_v40, %v27333_v7  ;;  %v14945_v40 = vrot.slane %v14931_v17, %v27333_v7 }
 0x305   : > { %25196 = vmatprep.mubr.msk.f32.mxu0 %vm27271_vm1, %v32793_v2  ;;  %v14897_v53 = vcombine.low %v14187_v24, %v23097_v50 }
 0x306   : > { %v14878_v4 = vcombine.low %v14870_v8, %v14877_v6 }
 0x307   : > { %v11781_v59 = vpop.f32.mrb[100].mxu0  ;;  %v14911_v47 = vrot.slane %v14897_v53, %v27333_v7 }
 0x308   : > { %v25035_v44 = vpop.f32.mrb[101].mxu0  ;;  %25197 = vmatmul.mubr.msk.f32.gmra.mrb[26].mxu0 %vm1767_vm2, %v14810_v61  ;;  %v14894_v61 = vrot.slane %v14880_v35, %v27333_v7  ;;  %v14236_v59 = vcombine.high %v23063_v48, %v23063_v48 }
 0x309   : > { %25199 = vmatprep.mubr.msk.f32.mxu0 %vm27271_vm1, %v32793_v2  ;;  %v23064_v44 = vld [vmem:[%s27330_s25 + $0x111] sm:$0xff]  ;;  %v14912_v55 = vcombine.low %v14904_v29, %v14911_v47  ;;  %v23070_v29 = vld [vmem:[%s27330_s25 + $0x141] sm:$0xff]  ;;  %v14999_v47 = vcombine.low %v14301_v27, %v14309_v34 }
 0x30a   : > { %v14895_v13 = vcombine.low %v14887_v43, %v14894_v61  ;;  %v14250_v54 = vrot.slane %v14236_v59, %v27333_v7  ;;  %v14253_v18 = vcombine.high %v23064_v44, %v23064_v44  ;;  %v14260_v39 = vrot.slane %v23064_v44, %v27333_v7  ;;  %v23069_v61 = vld [vmem:[%s27330_s25 + $0x139] sm:$0xff]  ;;  %v23100_v44 = vld.sshfl [vmem:[%s27330_s25 + $0x131] sm:$0x3 pattern:$0x76325410] }
 0x30b   : > { %v13514_v41 = vpop.f32.mrb[102].mxu0  ;;  %v14294_v43 = vcombine.high %v23067_v16, %v23067_v16  ;;  %v14318_v59 = vcombine.high %v23069_v61, %v23069_v61 }
 0x30c   : > { %v25040_v12 = vpop.f32.mrb[103].mxu0  ;;  %25200 = vmatmul.mubr.msk.f32.gmra.mrb[28].mxu0 %vm1767_vm2, %v14827_v1  ;;  %v14930_v1 = vcombine.low %v14219_v51, %v14227_v46  ;;  %v14921_v41 = vrot.slane %v14913_v45, %v27333_v7  ;;  %v14252_v26 = vcombine.high %v14250_v54, %v14250_v54  ;;  %v14267_v0 = vrot.slane %v14253_v18, %v27333_v7 }
 0x30d   : > { %25202 = vmatprep.mubr.msk.f32.mxu0 %vm27271_vm1, %v32793_v2  ;;  %v14947_v12 = vcombine.low %v23098_v19, %v14243_v3  ;;  %v14268_v11 = vcombine.high %v14260_v39, %v14260_v39  ;;  %v14325_v45 = vrot.slane %v23069_v61, %v27333_v7 }
 0x30e   : > { %v14938_v56 = vrot.slane %v14930_v1, %v27333_v7  ;;  %v14929_v6 = vcombine.low %v14921_v41, %v14928_v33  ;;  %v14269_v24 = vcombine.high %v14267_v0, %v14267_v0  ;;  %v14335_v1 = vcombine.high %v23070_v29, %v23070_v29 }
 0x30f   : > { %v13519_v38 = vpop.f32.mrb[104].mxu0  ;;  %v14955_v35 = vrot.slane %v14947_v12, %v27333_v7  ;;  %v14965_v8 = vcombine.low %v14268_v11, %v14267_v0  ;;  %v15013_v33 = vrot.slane %v14999_v47, %v27333_v7  ;;  %v15016_v17 = vcombine.low %v23100_v44, %v14325_v45 }
 0x310   : > { %v25043_v42 = vpop.f32.mrb[105].mxu0  ;;  %25203 = vmatmul.mubr.msk.f32.gmra.mrb[30].mxu0 %vm1767_vm2, %v14844_v20  ;;  %v14948_v20 = vcombine.low %v14251_v22, %v14250_v54  ;;  %v14284_v38 = vrot.slane %v23066_v60, %v27333_v7  ;;  %v14946_v21 = vcombine.low %v14938_v56, %v14945_v40  ;;  %v14981_v10 = vcombine.low %v14269_v24, %v23099_v31 }
 0x311   : > { %25205 = vmatprep.mubr.msk.f32.mxu0 %vm27271_vm1, %v32793_v2  ;;  %v14964_v42 = vcombine.low %v14252_v26, %v14260_v39  ;;  %v14979_v53 = vrot.slane %v14965_v8, %v27333_v7  ;;  %v14332_v39 = vrot.slane %v14318_v59, %v27333_v7  ;;  %v14342_v56 = vrot.slane %v23070_v29, %v27333_v7  ;;  %v23075_v29 = vld [vmem:[%s27330_s25 + $0x169] sm:$0xff] }
 0x312   : > { %v14962_v28 = vrot.slane %v14948_v20, %v27333_v7  ;;  %v14292_v50 = vcombine.high %v14284_v38, %v14284_v38  ;;  %v14989_v58 = vrot.slane %v14981_v10, %v27333_v7  ;;  %v14349_v12 = vrot.slane %v14335_v1, %v27333_v7 }
 0x313   : > { %v15030_v27 = vrot.slane %v15016_v17, %v27333_v7  ;;  %v14400_v1 = vcombine.high %v23075_v29, %v23075_v29  ;;  %v23102_v17 = vld.sshfl [vmem:[%s27330_s25 + $0x161] sm:$0x3 pattern:$0x76325410] }
 0x314   : > { %25206 = vmatmul.mubr.msk.f32.gmra.mrb[32].mxu0 %vm1767_vm2, %v14861_v37  ;;  %v14277_v37 = vcombine.high %v23066_v60, %v23066_v60  ;;  %v14963_v57 = vcombine.low %v14955_v35, %v14962_v28  ;;  %v14982_v48 = vcombine.low %v14284_v38, %v14292_v50  ;;  %v14333_v60 = vcombine.high %v14325_v45, %v14325_v45  ;;  %v23073_v38 = vld [vmem:[%s27330_s25 + $0x159] sm:$0xff]  ;;  %v23101_v50 = vld.sshfl [vmem:[%s27330_s25 + $0x149] sm:$0x3 pattern:$0x76325410] }
 0x315   : > { %25208 = vmatprep.mubr.msk.f32.mxu0 %vm27271_vm1, %v32793_v2  ;;  %v14383_v10 = vrot.slane %v23073_v38, %v27333_v7 }
 0x316   : > { %v14291_v51 = vrot.slane %v14277_v37, %v27333_v7  ;;  %v14996_v54 = vrot.slane %v14982_v48, %v27333_v7  ;;  %v14350_v37 = vcombine.high %v14342_v56, %v14342_v56  ;;  %v15032_v28 = vcombine.low %v14333_v60, %v14332_v39 }
 0x317   : > { %v14391_v44 = vcombine.high %v14383_v10, %v14383_v10  ;;  %v14414_v60 = vrot.slane %v14400_v1, %v27333_v7 }
 0x318   : > { %25209 = vmatmul.mubr.msk.f32.gmra.mrb[34].mxu0 %vm1767_vm2, %v14878_v4  ;;  %v14972_v4 = vrot.slane %v14964_v42, %v27333_v7  ;;  %v14293_v46 = vcombine.high %v14291_v51, %v14291_v51  ;;  %v14997_v0 = vcombine.low %v14989_v58, %v14996_v54  ;;  %v14351_v42 = vcombine.high %v14349_v12, %v14349_v12 }
 0x319   : > { %25211 = vmatprep.mubr.msk.f32.mxu0 %vm27271_vm1, %v32793_v2  ;;  %v15049_v34 = vcombine.low %v14350_v37, %v14349_v12  ;;  %v15040_v48 = vrot.slane %v15032_v28, %v27333_v7 }
 0x31a   : > { %v14980_v52 = vcombine.low %v14972_v4, %v14979_v53  ;;  %v14998_v22 = vcombine.low %v14291_v51, %v14293_v46  ;;  %v14376_v51 = vcombine.high %v23073_v38, %v23073_v38  ;;  %v15050_v4 = vcombine.low %v14351_v42, %v23101_v50 }
 0x31b   : > { %v15057_v47 = vrot.slane %v15049_v34, %v27333_v7  ;;  %v14416_v38 = vcombine.high %v14414_v60, %v14414_v60 }
 0x31c   : > { %25212 = vmatmul.mubr.msk.f32.gmra.mrb[36].mxu0 %vm1767_vm2, %v14895_v13  ;;  %v14308_v13 = vrot.slane %v14294_v43, %v27333_v7  ;;  %v15006_v11 = vrot.slane %v14998_v22, %v27333_v7  ;;  %v14407_v22 = vrot.slane %v23075_v29, %v27333_v7 }
 0x31d   : > { %25214 = vmatprep.mubr.msk.f32.mxu0 %vm27271_vm1, %v32793_v2 }
 0x31e   : > { %v14310_v18 = vcombine.high %v14308_v13, %v14308_v13  ;;  %v15014_v24 = vcombine.low %v15006_v11, %v15013_v33  ;;  %v15083_v33 = vcombine.low %v14383_v10, %v14391_v44 }
 0x320   : > { %25215 = vmatmul.mubr.msk.f32.gmra.mrb[38].mxu0 %vm1767_vm2, %v14912_v55  ;;  %v23072_v55 = vld [vmem:[%s27330_s25 + $0x151] sm:$0xff]  ;;  %v15015_v16 = vcombine.low %v14308_v13, %v14310_v18  ;;  %v14390_v13 = vrot.slane %v14376_v51, %v27333_v7 }
 0x321   : > { %25217 = vmatprep.mubr.msk.f32.mxu0 %vm27271_vm1, %v32793_v2  ;;  %v14359_v20 = vcombine.high %v23072_v55, %v23072_v55  ;;  %v14366_v35 = vrot.slane %v23072_v55, %v27333_v7  ;;  %v23076_v18 = vld [vmem:[%s27330_s25 + $0x171] sm:$0xff] }
 0x322   : > { %v14392_v54 = vcombine.high %v14390_v13, %v14390_v13  ;;  %v14424_v11 = vrot.slane %v23076_v18, %v27333_v7 }
 0x323   : > { %v14373_v8 = vrot.slane %v14359_v20, %v27333_v7  ;;  %v14415_v20 = vcombine.high %v14407_v22, %v14407_v22 }
 0x324   : > { %25218 = vmatmul.mubr.msk.f32.gmra.mrb[40].mxu0 %vm1767_vm2, %v14929_v6  ;;  %v14334_v6 = vcombine.high %v14332_v39, %v14332_v39  ;;  %v15084_v12 = vcombine.low %v14390_v13, %v14392_v54  ;;  %v15117_v34 = vcombine.low %v14416_v38, %v14424_v11  ;;  %v23103_v13 = vld.sshfl [vmem:[%s27330_s25 + $0x179] sm:$0x3 pattern:$0x76325410] }
 0x325   : > { %25220 = vmatprep.mubr.msk.f32.mxu0 %vm27271_vm1, %v32793_v2  ;;  %v14375_v53 = vcombine.high %v14373_v8, %v14373_v8 }
 0x326   : > { %v15033_v31 = vcombine.low %v14334_v6, %v14342_v56  ;;  %v15098_v42 = vrot.slane %v15084_v12, %v27333_v7 }
 0x327   : > { %v4047_v32 = vpop.f32.mrb[86].mxu1  ;;  %v15067_v58 = vcombine.low %v14373_v8, %v14375_v53  ;;  %v15101_v8 = vcombine.low %v14415_v20, %v14414_v60 }
 0x328   : > { %25221 = vmatmul.mubr.msk.f32.gmra.mrb[42].mxu0 %vm1767_vm2, %v14946_v21  ;;  %v24532_v3 = vpop.f32.mrb[87].mxu1  ;;  %v15023_v21 = vrot.slane %v15015_v16, %v27333_v7  ;;  %v15047_v46 = vrot.slane %v15033_v31, %v27333_v7  ;;  %v23078_v16 = vld [vmem:[%s27330_s25 + $0x181] sm:$0xff]  ;;  %v23079_v31 = vld [vmem:[%s27330_s25 + $0x189] sm:$0xff] }
 0x329   : > { %25223 = vmatprep.mubr.msk.f32.mxu0 %vm27271_vm1, %v32793_v2  ;;  %v14441_v28 = vcombine.high %v23078_v16, %v23078_v16  ;;  %v14465_v10 = vrot.slane %v23079_v31, %v27333_v7  ;;  %v14458_v29 = vcombine.high %v23079_v31, %v23079_v31 }
 0x32a   : > { %v15031_v32 = vcombine.low %v15023_v21, %v15030_v27  ;;  %v14448_v27 = vrot.slane %v23078_v16, %v27333_v7  ;;  %v14432_v21 = vcombine.high %v14424_v11, %v14424_v11 }
 0x32b   : > { %v4052_v19 = vpop.f32.mrb[88].mxu1  ;;  %v14455_v53 = vrot.slane %v14441_v28, %v27333_v7 }
 0x32c   : > { %25224 = vmatmul.mubr.msk.f32.gmra.mrb[44].mxu0 %vm1767_vm2, %v14963_v57  ;;  %v24535_v41 = vpop.f32.mrb[89].mxu1  ;;  %v14374_v57 = vcombine.high %v14366_v35, %v14366_v35  ;;  %v15048_v19 = vcombine.low %v15040_v48, %v15047_v46  ;;  %v15115_v48 = vrot.slane %v15101_v8, %v27333_v7 }
 0x32d   : > { %25226 = vmatprep.mubr.msk.f32.mxu0 %vm27271_vm1, %v32793_v2  ;;  %v15081_v41 = vrot.slane %v15067_v58, %v27333_v7  ;;  %v14457_v1 = vcombine.high %v14455_v53, %v14455_v53 }
 0x32e   : > { %v15066_v45 = vcombine.low %v14366_v35, %v14374_v57  ;;  %v15091_v35 = vrot.slane %v15083_v33, %v27333_v7 }
 0x32f   : > { %v30761_v26 = vpop.f32.mrb[22].mxu1  ;;  %v15151_v12 = vcombine.low %v14455_v53, %v14457_v1  ;;  %v23105_v1 = vld.sshfl [vmem:[%s27330_s25 + $0x1a9] sm:$0x3 pattern:$0x76325410] }
 0x330   : > { %25227 = vmatmul.mubr.msk.f32.gmra.mrb[46].mxu0 %vm1767_vm2, %v14980_v52  ;;  %v24573_v40 = vpop.f32.mrb[23].mxu1  ;;  %v15064_v52 = vrot.slane %v15050_v4, %v27333_v7  ;;  %v15074_v39 = vrot.slane %v15066_v45, %v27333_v7  ;;  %v14456_v4 = vcombine.high %v14448_v27, %v14448_v27  ;;  %v15125_v45 = vrot.slane %v15117_v34, %v27333_v7 }
 0x331   : > { %25229 = vmatprep.mubr.msk.f32.mxu0 %vm27271_vm1, %v32793_v2  ;;  %v15100_v40 = vcombine.low %v23102_v17, %v14407_v22  ;;  %v15159_v8 = vrot.slane %v15151_v12, %v27333_v7  ;;  %v23087_v12 = vld [vmem:[%s27330_s25 + $0x1c9] sm:$0xff] }
 0x332   : > { %v15065_v55 = vcombine.low %v15057_v47, %v15064_v52  ;;  %v15082_v37 = vcombine.low %v15074_v39, %v15081_v41  ;;  %v15135_v44 = vcombine.low %v14448_v27, %v14456_v4  ;;  %v23085_v4 = vld [vmem:[%s27330_s25 + $0x1b9] sm:$0xff] }
 0x333   : > { %v30774_v43 = vpop.f32.mrb[24].mxu1 }
 0x334   : > { %25230 = vmatmul.mubr.msk.f32.gmra.mrb[48].mxu0 %vm1767_vm2, %v14997_v0  ;;  %v24576_v61 = vpop.f32.mrb[25].mxu1  ;;  %v14417_v0 = vcombine.high %v23076_v18, %v23076_v18  ;;  %v14472_v18 = vrot.slane %v14458_v29, %v27333_v7  ;;  %v15149_v60 = vrot.slane %v15135_v44, %v27333_v7 }
 0x335   : > { %25232 = vmatprep.mubr.msk.f32.mxu0 %vm27271_vm1, %v32793_v2  ;;  %v15108_v61 = vrot.slane %v15100_v40, %v27333_v7 }
 0x337   : > { %v15116_v54 = vcombine.low %v15108_v61, %v15115_v48 }
 0x338   : > { %25233 = vmatmul.mubr.msk.f32.gmra.mrb[50].mxu0 %vm1767_vm2, %v15014_v24  ;;  %v30784_v59 = vpop.f32.mrb[26].mxu1  ;;  %v14431_v24 = vrot.slane %v14417_v0, %v27333_v7  ;;  %v23104_v0 = vld.sshfl [vmem:[%s27330_s25 + $0x191] sm:$0x3 pattern:$0x76325410] }
 0x339   : > { %25235 = vmatprep.mubr.msk.f32.mxu0 %vm27271_vm1, %v32793_v2  ;;  %v24579_v3 = vpop.f32.mrb[27].mxu1 }
 0x33a   : > { %v14433_v57 = vcombine.high %v14431_v24, %v14431_v24  ;;  %v15118_v46 = vcombine.low %v14432_v21, %v14431_v24  ;;  %v23081_v3 = vld [vmem:[%s27330_s25 + $0x199] sm:$0xff] }
 0x33b   : > { %v14482_v39 = vcombine.high %v23081_v3, %v23081_v3  ;;  %v14489_v41 = vrot.slane %v23081_v3, %v27333_v7 }
 0x33c   : > { %25236 = vmatmul.mubr.msk.f32.gmra.mrb[52].mxu0 %vm1767_vm2, %v15031_v32  ;;  %v15099_v32 = vcombine.low %v15091_v35, %v15098_v42  ;;  %v15134_v58 = vcombine.low %v14433_v57, %v23103_v13  ;;  %v15132_v22 = vrot.slane %v15118_v46, %v27333_v7 }
 0x33d   : > { %25238 = vmatprep.mubr.msk.f32.mxu0 %vm27271_vm1, %v32793_v2  ;;  %v14496_v40 = vrot.slane %v14482_v39, %v27333_v7  ;;  %v15169_v35 = vcombine.low %v23104_v0, %v14489_v41  ;;  %v14497_v27 = vcombine.high %v14489_v41, %v14489_v41  ;;  %v14547_v39 = vrot.slane %v23085_v4, %v27333_v7 }
 0x33e   : > { %v15142_v17 = vrot.slane %v15134_v58, %v27333_v7  ;;  %v15133_v16 = vcombine.low %v15125_v45, %v15132_v22  ;;  %v14540_v58 = vcombine.high %v23085_v4, %v23085_v4 }
 0x33f   : > { %v30799_v56 = vpop.f32.mrb[28].mxu1  ;;  %v14498_v61 = vcombine.high %v14496_v40, %v14496_v40  ;;  %v15183_v53 = vrot.slane %v15169_v35, %v27333_v7  ;;  %v15185_v48 = vcombine.low %v14497_v27, %v14496_v40  ;;  %v14564_v40 = vcombine.high %v23087_v12, %v23087_v12 }
 0x340   : > { %25239 = vmatmul.mubr.msk.f32.gmra.mrb[54].mxu0 %vm1767_vm2, %v15048_v19  ;;  %v24582_v6 = vpop.f32.mrb[29].mxu1  ;;  %v14473_v19 = vcombine.high %v14465_v10, %v14465_v10  ;;  %v15150_v42 = vcombine.low %v15142_v17, %v15149_v60  ;;  %v14554_v60 = vrot.slane %v14540_v58, %v27333_v7 }
 0x341   : > { %25241 = vmatprep.mubr.msk.f32.mxu0 %vm27271_vm1, %v32793_v2  ;;  %v14474_v6 = vcombine.high %v14472_v18, %v14472_v18 }
 0x342   : > { %v15152_v20 = vcombine.low %v14465_v10, %v14473_v19 }
 0x343   : > { %v30812_v50 = vpop.f32.mrb[30].mxu1 }
 0x344   : > { %25242 = vmatmul.mubr.msk.f32.gmra.mrb[56].mxu0 %vm1767_vm2, %v15065_v55  ;;  %v24585_v51 = vpop.f32.mrb[31].mxu1  ;;  %v23082_v55 = vld [vmem:[%s27330_s25 + $0x1a1] sm:$0xff]  ;;  %v15166_v24 = vrot.slane %v15152_v20, %v27333_v7 }
 0x345   : > { %25244 = vmatprep.mubr.msk.f32.mxu0 %vm27271_vm1, %v32793_v2  ;;  %v14499_v38 = vcombine.high %v23082_v55, %v23082_v55  ;;  %v15168_v51 = vcombine.low %v14472_v18, %v14474_v6  ;;  %v14506_v34 = vrot.slane %v23082_v55, %v27333_v7  ;;  %v14555_v6 = vcombine.high %v14547_v39, %v14547_v39 }
 0x347   : > { %v14513_v57 = vrot.slane %v14499_v38, %v27333_v7  ;;  %v14514_v46 = vcombine.high %v14506_v34, %v14506_v34  ;;  %v15176_v3 = vrot.slane %v15168_v51, %v27333_v7  ;;  %v15186_v45 = vcombine.low %v14498_v61, %v14506_v34  ;;  %v23106_v34 = vld.sshfl [vmem:[%s27330_s25 + $0x1c1] sm:$0x3 pattern:$0x76325410] }
 0x348   : > { %25245 = vmatmul.mubr.msk.f32.gmra.mrb[58].mxu0 %vm1767_vm2, %v15082_v37  ;;  %v23084_v37 = vld [vmem:[%s27330_s25 + $0x1b1] sm:$0xff]  ;;  %v14571_v38 = vrot.slane %v23087_v12, %v27333_v7  ;;  %v15236_v61 = vcombine.low %v14547_v39, %v14555_v6  ;;  %v23152_v39 = vld [vmem:[%s27330_s25 + $0x3a] sm:$0xff] }
 0x349   : > { %25247 = vmatprep.mubr.msk.f32.mxu0 %vm27271_vm1, %v32793_v2  ;;  %v30825_v47 = vpop.f32.mrb[32].mxu1  ;;  %v14523_v21 = vcombine.high %v23084_v37, %v23084_v37  ;;  %v14530_v10 = vrot.slane %v23084_v37, %v27333_v7  ;;  %v15202_v22 = vcombine.low %v14514_v46, %v14513_v57  ;;  %v15184_v55 = vcombine.low %v15176_v3, %v15183_v53  ;;  %v23151_v46 = vld [vmem:[%s27330_s25 + $0x32] sm:$0xff] }
 0x34a   : > { %v24588_v52 = vpop.f32.mrb[33].mxu1  ;;  %v15200_v41 = vrot.slane %v15186_v45, %v27333_v7  ;;  %v14579_v4 = vcombine.high %v14571_v38, %v14571_v38  ;;  %v15253_v3 = vcombine.low %v23106_v34, %v14571_v38  ;;  %v15244_v58 = vrot.slane %v15236_v61, %v27333_v7 }
 0x34b   : > { %v14537_v13 = vrot.slane %v14523_v21, %v27333_v7  ;;  %v14515_v52 = vcombine.high %v14513_v57, %v14513_v57  ;;  %v14538_v19 = vcombine.high %v14530_v10, %v14530_v10  ;;  %v15210_v35 = vrot.slane %v15202_v22, %v27333_v7 }
 0x34c   : > { %25248 = vmatmul.mubr.msk.f32.gmra.mrb[60].mxu0 %vm1767_vm2, %v15099_v32  ;;  %v15167_v32 = vcombine.low %v15159_v8, %v15166_v24  ;;  %v23088_v8 = vld [vmem:[%s27330_s25 + $0x1d1] sm:$0xff]  ;;  %v14578_v57 = vrot.slane %v14564_v40, %v27333_v7  ;;  %v15816_v6 = vcombine.high %v23152_v39, %v23152_v39 }
 0x34d   : > { %25250 = vmatprep.mubr.msk.f32.mxu0 %vm27271_vm1, %v32793_v2  ;;  %v14539_v18 = vcombine.high %v14537_v13, %v14537_v13  ;;  %v15203_v17 = vcombine.low %v14515_v52, %v23105_v1 }
 0x34e   : > { %v30835_v33 = vpop.f32.mrb[34].mxu1  ;;  %v14580_v1 = vcombine.high %v14578_v57, %v14578_v57  ;;  %v15830_v61 = vrot.slane %v15816_v6, %v27333_v7 }
 0x34f   : > { %v24591_v11 = vpop.f32.mrb[35].mxu1  ;;  %v15217_v27 = vrot.slane %v15203_v17, %v27333_v7 }
 0x350   : > { %25251 = vmatmul.mubr.msk.f32.gmra.mrb[62].mxu0 %vm1767_vm2, %v15116_v54  ;;  %v15193_v54 = vrot.slane %v15185_v48, %v27333_v7  ;;  %v15219_v11 = vcombine.low %v14530_v10, %v14538_v19  ;;  %v14588_v48 = vrot.slane %v23088_v8, %v27333_v7 }
 0x351   : > { %25253 = vmatprep.mubr.msk.f32.mxu0 %vm27271_vm1, %v32793_v2  ;;  %v15218_v53 = vcombine.low %v15210_v35, %v15217_v27  ;;  %v15823_v27 = vrot.slane %v23152_v39, %v27333_v7  ;;  %v23205_v39 = vld.sshfl [vmem:[%s27330_s25 + $0x42] sm:$0x3 pattern:$0x76325410] }
 0x352   : > { %v30845_v28 = vpop.f32.mrb[36].mxu1  ;;  %v15201_v37 = vcombine.low %v15193_v54, %v15200_v41  ;;  %v15227_v21 = vrot.slane %v15219_v11, %v27333_v7  ;;  %v14596_v22 = vcombine.high %v14588_v48, %v14588_v48  ;;  %v15270_v17 = vcombine.low %v14580_v1, %v14588_v48 }
 0x353   : > { %v24594_v31 = vpop.f32.mrb[37].mxu1  ;;  %v15831_v48 = vcombine.high %v15823_v27, %v15823_v27 }
 0x354   : > { %25254 = vmatmul.mubr.msk.f32.gmra.mrb[64].mxu0 %vm1767_vm2, %v15133_v16  ;;  %v15220_v16 = vcombine.low %v14537_v13, %v14539_v18  ;;  %v15799_v18 = vcombine.high %v23151_v46, %v23151_v46  ;;  %v15278_v38 = vrot.slane %v15270_v17, %v27333_v7 }
 0x355   : > { %25256 = vmatprep.mubr.msk.f32.mxu0 %vm27271_vm1, %v32793_v2 }
 0x356   : > { %v30858_v29 = vpop.f32.mrb[38].mxu1  ;;  %v15234_v51 = vrot.slane %v15220_v16, %v27333_v7  ;;  %v15813_v16 = vrot.slane %v15799_v18, %v27333_v7  ;;  %v16556_v18 = vcombine.low %v15823_v27, %v15831_v48 }
 0x357   : > { %v24597_v44 = vpop.f32.mrb[39].mxu1 }
 0x358   : > { %25257 = vmatmul.mubr.msk.f32.gmra.mrb[66].mxu0 %vm1767_vm2, %v15150_v42  ;;  %v14556_v42 = vcombine.high %v14554_v60, %v14554_v60  ;;  %v15235_v52 = vcombine.low %v15227_v21, %v15234_v51  ;;  %v15254_v44 = vcombine.low %v14579_v4, %v14578_v57  ;;  %v15815_v51 = vcombine.high %v15813_v16, %v15813_v16 }
 0x359   : > { %25259 = vmatprep.mubr.msk.f32.mxu0 %vm27271_vm1, %v32793_v2 }
 0x35a   : > { %v15237_v10 = vcombine.low %v14554_v60, %v14556_v42  ;;  %v15268_v41 = vrot.slane %v15254_v44, %v27333_v7  ;;  %v15806_v60 = vrot.slane %v23151_v46, %v27333_v7  ;;  %v23154_v42 = vld [vmem:[%s27330_s25 + $0x4a] sm:$0xff] }
 0x35b   : > { %v30871_v20 = vpop.f32.mrb[40].mxu1  ;;  %v15840_v4 = vcombine.high %v23154_v42, %v23154_v42 }
 0x35c   : > { %25260 = vmatmul.mubr.msk.f32.gmra.mrb[68].mxu0 %vm1767_vm2, %v15167_v32  ;;  %v24600_v0 = vpop.f32.mrb[41].mxu1  ;;  %v14581_v32 = vcombine.high %v23088_v8, %v23088_v8  ;;  %v15251_v19 = vrot.slane %v15237_v10, %v27333_v7  ;;  %v15814_v35 = vcombine.high %v15806_v60, %v15806_v60 }
 0x35d   : > { %25262 = vmatprep.mubr.msk.f32.mxu0 %vm27271_vm1, %v32793_v2  ;;  %v15854_v44 = vrot.slane %v15840_v4, %v27333_v7 }
 0x35e   : > { %v14595_v54 = vrot.slane %v14581_v32, %v27333_v7  ;;  %v15252_v0 = vcombine.low %v15244_v58, %v15251_v19  ;;  %v16539_v32 = vcombine.low %v15806_v60, %v15814_v35 }
 0x360   : > { %25263 = vmatmul.mubr.msk.f32.gmra.mrb[70].mxu0 %vm1767_vm2, %v15184_v55  ;;  %v30882_v24 = vpop.f32.mrb[42].mxu1  ;;  %v15261_v55 = vrot.slane %v15253_v3, %v27333_v7  ;;  %v15271_v11 = vcombine.low %v14596_v22, %v14595_v54  ;;  %v16540_v3 = vcombine.low %v15813_v16, %v15815_v51  ;;  %v16547_v22 = vrot.slane %v16539_v32, %v27333_v7  ;;  %v23158_v51 = vld [vmem:[%s27330_s25 + $0x6a] sm:$0xff] }
 0x361   : > { %25265 = vmatprep.mubr.msk.f32.mxu0 %vm27271_vm1, %v32793_v2  ;;  %v24603_v31 = vpop.f32.mrb[43].mxu1  ;;  %v15905_v32 = vrot.slane %v23158_v51, %v27333_v7 }
 0x362   : > { %v15269_v8 = vcombine.low %v15261_v55, %v15268_v41  ;;  %v15285_v21 = vrot.slane %v15271_v11, %v27333_v7  ;;  %v23107_v31 = vld.sshfl [vmem:[%s27330_s25 + $0x1d9] sm:$0x3 pattern:$0x76325410]  ;;  %v16554_v55 = vrot.slane %v16540_v3, %v27333_v7 }
 0x364   : > { %25266 = vmatmul.mubr.msk.f32.gmra.mrb[72].mxu0 %vm1767_vm2, %v15201_v37  ;;  %v14597_v37 = vcombine.high %v14595_v54, %v14595_v54  ;;  %v15286_v46 = vcombine.low %v15278_v38, %v15285_v21  ;;  %v15856_v38 = vcombine.high %v15854_v44, %v15854_v44 }
 0x365   : > { %25268 = vmatprep.mubr.msk.f32.mxu0 %vm27271_vm1, %v32793_v2  ;;  %v30893_v13 = vpop.f32.mrb[44].mxu1 }
 0x366   : > { %v24606_v45 = vpop.f32.mrb[45].mxu1  ;;  %v15287_v10 = vcombine.low %v14597_v37, %v23107_v31 }
 0x367   : > { %v15832_v45 = vcombine.high %v15830_v61, %v15830_v61 }
 0x368   : > { %25269 = vmatmul.mubr.msk.f32.gmra.mrb[74].mxu0 %vm1767_vm2, %v15218_v53  ;;  %v15847_v53 = vrot.slane %v23154_v42, %v27333_v7  ;;  %v15294_v54 = vrot.slane %v15287_v10, %v27333_v7  ;;  %v16555_v42 = vcombine.low %v16547_v22, %v16554_v55  ;;  %v15913_v55 = vcombine.high %v15905_v32, %v15905_v32 }
 0x369   : > { %25271 = vmatprep.mubr.msk.f32.mxu0 %vm27271_vm1, %v32793_v2  ;;  %v16557_v41 = vcombine.low %v15830_v61, %v15832_v45 }
 0x36a   : > { %v15855_v1 = vcombine.high %v15847_v53, %v15847_v53  ;;  %v16573_v11 = vcombine.low %v23205_v39, %v15847_v53 }
 0x36b   : > { %v30905_v12 = vpop.f32.mrb[46].mxu1 }
 0x36c   : > { %25272 = vmatmul.mubr.msk.f32.gmra.mrb[76].mxu0 %vm1767_vm2, %v15235_v52  ;;  %v24609_v40 = vpop.f32.mrb[47].mxu1  ;;  %v23155_v52 = vld [vmem:[%s27330_s25 + $0x52] sm:$0xff]  ;;  %v16574_v16 = vcombine.low %v15855_v1, %v15854_v44  ;;  %v16581_v61 = vrot.slane %v16573_v11, %v27333_v7  ;;  %v15898_v44 = vcombine.high %v23158_v51, %v23158_v51  ;;  %v23161_v11 = vld [vmem:[%s27330_s25 + $0x82] sm:$0xff] }
 0x36d   : > { %25274 = vmatprep.mubr.msk.f32.mxu0 %vm27271_vm1, %v32793_v2  ;;  %v15857_v17 = vcombine.high %v23155_v52, %v23155_v52  ;;  %v15864_v60 = vrot.slane %v23155_v52, %v27333_v7  ;;  %v16564_v40 = vrot.slane %v16556_v18, %v27333_v7  ;;  %v23206_v52 = vld.sshfl [vmem:[%s27330_s25 + $0x5a] sm:$0x3 pattern:$0x76325410] }
 0x36f   : > { %v30918_v34 = vpop.f32.mrb[48].mxu1  ;;  %v15871_v21 = vrot.slane %v15857_v17, %v27333_v7  ;;  %v15872_v31 = vcombine.high %v15864_v60, %v15864_v60  ;;  %v16590_v3 = vcombine.low %v15856_v38, %v15864_v60  ;;  %v15912_v60 = vrot.slane %v15898_v44, %v27333_v7  ;;  %v23164_v44 = vld [vmem:[%s27330_s25 + $0x9a] sm:$0xff] }
 0x370   : > { %25275 = vmatmul.mubr.msk.f32.gmra.mrb[78].mxu0 %vm1767_vm2, %v15252_v0  ;;  %v24612_v57 = vpop.f32.mrb[49].mxu1  ;;  %v23157_v0 = vld [vmem:[%s27330_s25 + $0x62] sm:$0xff] }
 0x371   : > { %25277 = vmatprep.mubr.msk.f32.mxu0 %vm27271_vm1, %v32793_v2  ;;  %v15888_v37 = vrot.slane %v23157_v0, %v27333_v7  ;;  %v15881_v35 = vcombine.high %v23157_v0, %v23157_v0  ;;  %v16588_v57 = vrot.slane %v16574_v16, %v27333_v7  ;;  %v15873_v4 = vcombine.high %v15871_v21, %v15871_v21 }
 0x372   : > { %v16591_v45 = vcombine.low %v15872_v31, %v15871_v21  ;;  %v15914_v31 = vcombine.high %v15912_v60, %v15912_v60 }
 0x373   : > { %v15896_v53 = vcombine.high %v15888_v37, %v15888_v37  ;;  %v15895_v10 = vrot.slane %v15881_v35, %v27333_v7  ;;  %v16607_v22 = vcombine.low %v15873_v4, %v23206_v52 }
 0x374   : > { %25278 = vmatmul.mubr.msk.f32.gmra.mrb[80].mxu0 %vm1767_vm2, %v15269_v8  ;;  %v16571_v8 = vrot.slane %v16557_v41, %v27333_v7  ;;  %v16598_v41 = vrot.slane %v16590_v3, %v27333_v7  ;;  %v16605_v17 = vrot.slane %v16591_v45, %v27333_v7 }
 0x375   : > { %25280 = vmatprep.mubr.msk.f32.mxu0 %vm27271_vm1, %v32793_v2  ;;  %v30927_v58 = vpop.f32.mrb[50].mxu1  ;;  %v16608_v18 = vcombine.low %v15888_v37, %v15896_v53  ;;  %v15897_v39 = vcombine.high %v15895_v10, %v15895_v10  ;;  %v16615_v37 = vrot.slane %v16607_v22, %v27333_v7 }
 0x376   : > { %v24615_v19 = vpop.f32.mrb[51].mxu1  ;;  %v16606_v21 = vcombine.low %v16598_v41, %v16605_v17 }
 0x377   : > { %v23160_v19 = vld [vmem:[%s27330_s25 + $0x7a] sm:$0xff]  ;;  %v16622_v35 = vrot.slane %v16608_v18, %v27333_v7 }
 0x378   : > { %25281 = vmatmul.mubr.msk.f32.gmra.mrb[114].mxu0 %vm1767_vm2, %v15286_v46  ;;  %v16572_v46 = vcombine.low %v16564_v40, %v16571_v8  ;;  %v15922_v0 = vcombine.high %v23160_v19, %v23160_v19  ;;  %v15929_v40 = vrot.slane %v23160_v19, %v27333_v7  ;;  %v23207_v8 = vld.sshfl [vmem:[%s27330_s25 + $0x72] sm:$0x3 pattern:$0x76325410] }
 0x379   : > { %25283 = vmatprep.mubr.msk.f32.mxu0 %vm27271_vm1, %v32793_v2 }
 0x37a   : > { %v30939_v6 = vpop.f32.mrb[52].mxu1  ;;  %v15936_v51 = vrot.slane %v15922_v0, %v27333_v7  ;;  %v16642_v53 = vcombine.low %v23207_v8, %v15929_v40  ;;  %v15987_v8 = vrot.slane %v23164_v44, %v27333_v7 }
 0x37b   : > { %v24618_v27 = vpop.f32.mrb[53].mxu1 }
 0x37c   : > { %25284 = vmatmul.mubr.msk.f32.gmra.mrb[116].mxu0 %vm1767_vm2, %v15294_v54  ;;  %v16589_v54 = vcombine.low %v16581_v61, %v16588_v57  ;;  %v16624_v27 = vcombine.low %v15895_v10, %v15897_v39  ;;  %v15939_v61 = vcombine.high %v23161_v11, %v23161_v11  ;;  %v23163_v57 = vld [vmem:[%s27330_s25 + $0x92] sm:$0xff]  ;;  %v16623_v10 = vcombine.low %v16615_v37, %v16622_v35 }
 0x37d   : > { %25288 = vmatprep.mubr.msk.f32.mxu0 %vm27271_vm1, %v32793_v2  ;;  %v15963_v52 = vcombine.high %v23163_v57, %v23163_v57  ;;  %v15938_v19 = vcombine.high %v15936_v51, %v15936_v51  ;;  %v16656_v39 = vrot.slane %v16642_v53, %v27333_v7 }
 0x37e   : > { %v15953_v22 = vrot.slane %v15939_v61, %v27333_v7 }
 0x37f   : > { %v30953_v48 = vpop.f32.mrb[54].mxu1 }
 0x380   : > { %25289 = vmatmul.mubr.msk.f32.vlgmr.msra.gmra.mrb[118].mxu0 %vm1767_vm2, %v16555_v42  ;;  %v24621_v1 = vpop.f32.mrb[55].mxu1  ;;  %v16625_v42 = vcombine.low %v15905_v32, %v15913_v55  ;;  %v16632_v32 = vrot.slane %v16624_v27, %v27333_v7  ;;  %v15980_v55 = vcombine.high %v23164_v44, %v23164_v44  ;;  %v15955_v35 = vcombine.high %v15953_v22, %v15953_v22  ;;  %v23208_v27 = vld.sshfl [vmem:[%s27330_s25 + $0x8a] sm:$0x3 pattern:$0x76325410] }
 0x381   : > { %25291 = vmatprep.mubr.msk.f32.mxu0 %vm27271_vm1, %v32793_v2  ;;  %v16641_v1 = vcombine.low %v15912_v60, %v15914_v31  ;;  %v15977_v60 = vrot.slane %v15963_v52, %v27333_v7 }
 0x382   : > { %v16639_v45 = vrot.slane %v16625_v42, %v27333_v7 }
 0x384   : > { %25292 = vmatmul.mubr.msk.f32.gmra.mrb[120].mxu0 %vm1767_vm2, %v16572_v46  ;;  %v30967_v16 = vpop.f32.mrb[56].mxu1  ;;  %v15937_v46 = vcombine.high %v15929_v40, %v15929_v40  ;;  %v16640_v17 = vcombine.low %v16632_v32, %v16639_v45  ;;  %v15970_v40 = vrot.slane %v23163_v57, %v27333_v7  ;;  %v15979_v57 = vcombine.high %v15977_v60, %v15977_v60  ;;  %v23166_v32 = vld [vmem:[%s27330_s25 + $0xaa] sm:$0xff] }
 0x385   : > { %25294 = vmatprep.mubr.msk.f32.mxu0 %vm27271_vm1, %v32793_v2  ;;  %v24624_v38 = vpop.f32.mrb[57].mxu1  ;;  %v15995_v45 = vcombine.high %v15987_v8, %v15987_v8 }
 0x386   : > { %v16658_v0 = vcombine.low %v15937_v46, %v15936_v51  ;;  %v15978_v61 = vcombine.high %v15970_v40, %v15970_v40 }
 0x388   : > { %25295 = vmatmul.mubr.msk.f32.gmra.mrb[4].mxu0 %vm1767_vm2, %v16589_v54  ;;  %v15946_v54 = vrot.slane %v23161_v11, %v27333_v7  ;;  %v16649_v11 = vrot.slane %v16641_v1, %v27333_v7  ;;  %v16666_v51 = vrot.slane %v16658_v0, %v27333_v7  ;;  %v16692_v1 = vcombine.low %v15970_v40, %v15978_v61  ;;  %v23167_v0 = vld [vmem:[%s27330_s25 + $0xb2] sm:$0xff]  ;;  %v19281_v40 = vld [vmem:[%s32790_s3 + $0x8] sm:$0xff] }
 0x389   : > { %25297 = vmatprep.mubr.msk.f32.mxu0 %vm27271_vm1, %v32793_v2  ;;  %v30978_v4 = vpop.f32.mrb[58].mxu1 }
 0x38a   : > { %v24627_v3 = vpop.f32.mrb[59].mxu1  ;;  %v16659_v38 = vcombine.low %v15938_v19, %v15946_v54  ;;  %v15954_v37 = vcombine.high %v15946_v54, %v15946_v54  ;;  %v16657_v53 = vcombine.low %v16649_v11, %v16656_v39  ;;  %v16693_v19 = vcombine.low %v15977_v60, %v15979_v57  ;;  %v19280_v11 = vld [vmem:[%s32790_s3] sm:$0xff] }
 0x38b   : > { %v16004_v54 = vcombine.high %v23166_v32, %v23166_v32  ;;  %v25879_v60 = vpack.c.bf16 %v19281_v40, %v19280_v11 }
 0x38c   : > { %25298 = vmatmul.mubr.msk.f32.gmra.mrb[6].mxu0 %vm1767_vm2, %v16606_v21  ;;  %v15994_v21 = vrot.slane %v15980_v55, %v27333_v7  ;;  %v16673_v46 = vrot.slane %v16659_v38, %v27333_v7  ;;  %v16675_v3 = vcombine.low %v15954_v37, %v15953_v22  ;;  %v16709_v38 = vcombine.low %v15987_v8, %v15995_v45  ;;  %v23209_v8 = vld.sshfl [vmem:[%s27330_s25 + $0xa2] sm:$0x3 pattern:$0x76325410] }
 0x38d   : > { %25300 = vmatprep.mubr.msk.f32.mxu0 %vm27271_vm1, %v32793_v2  ;;  %v30988_v18 = vpop.f32.mrb[60].mxu1  ;;  %25880 = vmatprep.subr.bf16.mxu1 %v25879_v60 }
 0x38e   : > { %v24630_v41 = vpop.f32.mrb[61].mxu1  ;;  %v15996_v52 = vcombine.high %v15994_v21, %v15994_v21  ;;  %v16674_v39 = vcombine.low %v16666_v51, %v16673_v46  ;;  %v16021_v51 = vcombine.high %v23167_v0, %v23167_v0  ;;  %v23169_v46 = vld [vmem:[%s27330_s25 + $0xc2] sm:$0xff]  ;;  %25882 = vmatpush3.bf16.msra.mxu1 %v25879_v60 }
 0x38f   : > { %v16683_v41 = vrot.slane %v16675_v3, %v27333_v7 }
 0x390   : > { %25301 = vmatmul.mubr.msk.f32.gmra.mrb[8].mxu0 %vm1767_vm2, %v16623_v10  ;;  %v16676_v10 = vcombine.low %v15955_v35, %v23208_v27  ;;  %v16710_v37 = vcombine.low %v15994_v21, %v15996_v52  ;;  %v16700_v35 = vrot.slane %v16692_v1, %v27333_v7  ;;  %v16707_v27 = vrot.slane %v16693_v19, %v27333_v7 }
 0x391   : > { %25303 = vmatprep.mubr.msk.f32.mxu0 %vm27271_vm1, %v32793_v2  ;;  %v30998_v42 = vpop.f32.mrb[62].mxu1  ;;  %v16052_v1 = vrot.slane %v23169_v46, %v27333_v7  ;;  %v16045_v19 = vcombine.high %v23169_v46, %v23169_v46  ;;  %v23172_v46 = vld [vmem:[%s27330_s25 + $0xda] sm:$0xff] }
 0x392   : > { %v24633_v31 = vpop.f32.mrb[63].mxu1  ;;  %v16690_v22 = vrot.slane %v16676_v10, %v27333_v7  ;;  %v16717_v10 = vrot.slane %v16709_v38, %v27333_v7  ;;  %v16708_v52 = vcombine.low %v16700_v35, %v16707_v27 }
 0x393   : > { %v16018_v31 = vrot.slane %v16004_v54, %v27333_v7  ;;  %v16059_v35 = vrot.slane %v16045_v19, %v27333_v7 }
 0x394   : > { %25304 = vmatmul.mubr.msk.f32.gmra.mrb[10].mxu0 %vm1767_vm2, %v16640_v17  ;;  %v16011_v17 = vrot.slane %v23166_v32, %v27333_v7  ;;  %v16691_v61 = vcombine.low %v16683_v41, %v16690_v22  ;;  %v16724_v32 = vrot.slane %v16710_v37, %v27333_v7  ;;  %v23170_v22 = vld [vmem:[%s27330_s25 + $0xca] sm:$0xff]  ;;  %v16060_v37 = vcombine.high %v16052_v1, %v16052_v1 }
 0x395   : > { %25306 = vmatprep.mubr.msk.f32.mxu0 %vm27271_vm1, %v32793_v2  ;;  %v16020_v45 = vcombine.high %v16018_v31, %v16018_v31 }
 0x396   : > { %v31008_v44 = vpop.f32.mrb[64].mxu1  ;;  %v16019_v57 = vcombine.high %v16011_v17, %v16011_v17  ;;  %v16726_v54 = vcombine.low %v23209_v8, %v16011_v17  ;;  %v16725_v40 = vcombine.low %v16717_v10, %v16724_v32  ;;  %v16069_v17 = vrot.slane %v23170_v22, %v27333_v7 }
 0x397   : > { %v24636_v55 = vpop.f32.mrb[65].mxu1 }
 0x398   : > { %25307 = vmatmul.mubr.msk.f32.gmra.mrb[12].mxu0 %vm1767_vm2, %v16657_v53  ;;  %v16028_v53 = vrot.slane %v23167_v0, %v27333_v7  ;;  %v16727_v55 = vcombine.low %v16019_v57, %v16018_v31  ;;  %v16734_v27 = vrot.slane %v16726_v54, %v27333_v7  ;;  %v16062_v57 = vcombine.high %v23170_v22, %v23170_v22 }
 0x399   : > { %25309 = vmatprep.mubr.msk.f32.mxu0 %vm27271_vm1, %v32793_v2  ;;  %v16077_v19 = vcombine.high %v16069_v17, %v16069_v17  ;;  %v16086_v22 = vcombine.high %v23172_v46, %v23172_v46 }
 0x39a   : > { %v16036_v41 = vcombine.high %v16028_v53, %v16028_v53  ;;  %v16743_v60 = vcombine.low %v16020_v45, %v16028_v53  ;;  %v16741_v31 = vrot.slane %v16727_v55, %v27333_v7  ;;  %v16761_v45 = vcombine.low %v16052_v1, %v16060_v37 }
 0x39b   : > { %v16093_v1 = vrot.slane %v23172_v46, %v27333_v7 }
 0x39c   : > { %25310 = vmatmul.mubr.msk.f32.gmra.mrb[14].mxu0 %vm1767_vm2, %v16674_v39  ;;  %v31029_v3 = vpop.f32.mrb[66].mxu1  ;;  %v16035_v39 = vrot.slane %v16021_v51, %v27333_v7  ;;  %v16751_v8 = vrot.slane %v16743_v60, %v27333_v7  ;;  %v16742_v55 = vcombine.low %v16734_v27, %v16741_v31  ;;  %v16778_v31 = vcombine.low %v16069_v17, %v16077_v19 }
 0x39d   : > { %32895 = vst [vmem:[#allocation2_spill] sm:$0xff] %v31029_v3  ;;  %25312 = vmatprep.mubr.msk.f32.mxu0 %vm27271_vm1, %v32793_v2  ;;  %v24639_v21 = vpop.f32.mrb[67].mxu1 }
 0x39e   : > { %v16037_v38 = vcombine.high %v16035_v39, %v16035_v39  ;;  %v16744_v51 = vcombine.low %v16036_v41, %v16035_v39  ;;  %v16076_v41 = vrot.slane %v16062_v57, %v27333_v7 }
 0x3a0   : > { %25313 = vmatmul.mubr.msk.f32.gmra.mrb[16].mxu0 %vm1767_vm2, %v16691_v61  ;;  %v31040_v0 = vpop.f32.mrb[68].mxu1  ;;  %v23210_v61 = vld.sshfl [vmem:[%s27330_s25 + $0xba] sm:$0x3 pattern:$0x76325410]  ;;  %v16758_v39 = vrot.slane %v16744_v51, %v27333_v7 }
 0x3a1   : > { %32896 = vst [vmem:[#allocation3_spill] sm:$0xff] %v31040_v0  ;;  %25315 = vmatprep.mubr.msk.f32.mxu0 %vm27271_vm1, %v32793_v2  ;;  %v24642_v11 = vpop.f32.mrb[69].mxu1  ;;  %v16760_v32 = vcombine.low %v16037_v38, %v23210_v61  ;;  %v23211_v51 = vld.sshfl [vmem:[%s27330_s25 + $0xd2] sm:$0x3 pattern:$0x76325410] }
 0x3a2   : > { %v23173_v11 = vld [vmem:[%s27330_s25 + $0xe2] sm:$0xff]  ;;  %v16795_v46 = vcombine.low %v23211_v51, %v16093_v1 }
 0x3a3   : > { %v16768_v61 = vrot.slane %v16760_v32, %v27333_v7  ;;  %v16101_v32 = vcombine.high %v16093_v1, %v16093_v1  ;;  %v23176_v1 = vld [vmem:[%s27330_s25 + $0xfa] sm:$0xff] }
 0x3a4   : > { %25316 = vmatmul.mubr.msk.f32.gmra.mrb[18].mxu0 %vm1767_vm2, %v16708_v52  ;;  %v16061_v52 = vcombine.high %v16059_v35, %v16059_v35 }
 0x3a5   : > { %25318 = vmatprep.mubr.msk.f32.mxu0 %vm27271_vm1, %v32793_v2  ;;  %v31053_v53 = vpop.f32.mrb[70].mxu1 }
 0x3a6   : > { %32897 = vst [vmem:[#allocation4_spill] sm:$0xff] %v31053_v53  ;;  %v24645_v21 = vpop.f32.mrb[71].mxu1  ;;  %v16777_v27 = vcombine.low %v16059_v35, %v16061_v52  ;;  %v32899_v53 = vmov 0.0   ;;  %v16792_v52 = vrot.slane %v16778_v31, %v27333_v7 }
 0x3a7   : > { %v13709_v10 = vpop.f32.mrb[106].mxu0  ;;  %v16759_v21 = vcombine.low %v16751_v8, %v16758_v39 }
 0x3a8   : > { %v25157_v54 = vpop.f32.mrb[107].mxu0  ;;  %25319 = vmatmul.mubr.msk.f32.gmra.mrb[20].mxu0 %vm1767_vm2, %v16725_v40  ;;  %v16775_v40 = vrot.slane %v16761_v45, %v27333_v7  ;;  %v16078_v10 = vcombine.high %v16076_v41, %v16076_v41  ;;  %v16785_v45 = vrot.slane %v16777_v27, %v27333_v7 }
 0x3a9   : > { %25321 = vmatprep.mubr.msk.f32.mxu0 %vm27271_vm1, %v32793_v2  ;;  %v31062_v60 = vpop.f32.mrb[72].mxu1  ;;  %v16100_v54 = vrot.slane %v16086_v22, %v27333_v7  ;;  %v16103_v2 = vcombine.high %v23173_v11, %v23173_v11 }
 0x3aa   : > { %32898 = vst [vmem:[#allocation5_spill] sm:$0xff] %v31062_v60  ;;  %v24648_v38 = vpop.f32.mrb[73].mxu1  ;;  %v23175_v60 = vld [vmem:[%s27330_s25 + $0xf2] sm:$0xff]  ;;  %v16776_v17 = vcombine.low %v16768_v61, %v16775_v40  ;;  %v16794_v39 = vcombine.low %v16076_v41, %v16078_v10  ;;  %v16809_v61 = vrot.slane %v16795_v46, %v27333_v7  ;;  %v16144_v10 = vcombine.high %v23176_v1, %v23176_v1 }
 0x3ab   : > { %v13714_v37 = vpop.f32.mrb[108].mxu0  ;;  %v16127_v8 = vcombine.high %v23175_v60, %v23175_v60  ;;  %v16102_v22 = vcombine.high %v16100_v54, %v16100_v54  ;;  %v16117_v51 = vrot.slane %v16103_v2, %v27333_v7  ;;  %v16134_v40 = vrot.slane %v23175_v60, %v27333_v7  ;;  %v23212_v60 = vld.sshfl [vmem:[%s27330_s25 + $0xea] sm:$0x3 pattern:$0x76325410] }
 0x3ac   : > { %v25160_v57 = vpop.f32.mrb[109].mxu0  ;;  %25322 = vmatmul.mubr.msk.f32.gmra.mrb[26].mxu0 %vm1767_vm2, %v16742_v55  ;;  %v16110_v37 = vrot.slane %v23173_v11, %v27333_v7  ;;  %v16802_v2 = vrot.slane %v16794_v39, %v27333_v7 }
 0x3ad   : > { %25324 = vmatprep.mubr.msk.f32.mxu0 %vm27271_vm1, %v32899_v53  ;;  %v16793_v57 = vcombine.low %v16785_v45, %v16792_v52  ;;  %v16141_v41 = vrot.slane %v16127_v8, %v27333_v7  ;;  %v16158_v52 = vrot.slane %v16144_v10, %v27333_v7 }
 0x3ae   : > { %v31073_v38 = vpop.f32.mrb[74].mxu1  ;;  %v16118_v46 = vcombine.high %v16110_v37, %v16110_v37 }
 0x3af   : > { %32900 = vst [vmem:[#allocation6_spill] sm:$0xff] %v31073_v38  ;;  %v15446_v35 = vpop.f32.mrb[110].mxu0  ;;  %v24651_v19 = vpop.f32.mrb[75].mxu1  ;;  %v16143_v45 = vcombine.high %v16141_v41, %v16141_v41 }
 0x3b0   : > { %v25165_v55 = vpop.f32.mrb[111].mxu0  ;;  %25325 = vmatmul.mubr.msk.f32.gmra.mrb[28].mxu0 %vm1767_vm2, %v16759_v21  ;;  %v16811_v21 = vcombine.low %v16101_v32, %v16100_v54  ;;  %v16812_v19 = vcombine.low %v16102_v22, %v16110_v37  ;;  %v16151_v54 = vrot.slane %v23176_v1, %v27333_v7  ;;  %v16828_v39 = vcombine.low %v16118_v46, %v16117_v51  ;;  %v23178_v37 = vld [vmem:[%s27330_s25 + $0x10a] sm:$0xff] }
 0x3b1   : > { %25327 = vmatprep.mubr.msk.f32.mxu0 %vm27271_vm1, %v32899_v53  ;;  %v16119_v55 = vcombine.high %v16117_v51, %v16117_v51  ;;  %v16175_v10 = vrot.slane %v23178_v37, %v27333_v7 }
 0x3b2   : > { %v31085_v27 = vpop.f32.mrb[76].mxu1  ;;  %v16819_v32 = vrot.slane %v16811_v21, %v27333_v7  ;;  %v16826_v8 = vrot.slane %v16812_v19, %v27333_v7  ;;  %v16159_v1 = vcombine.high %v16151_v54, %v16151_v54  ;;  %v16160_v21 = vcombine.high %v16158_v52, %v16158_v52 }
 0x3b3   : > { %32901 = vst [vmem:[#allocation7_spill] sm:$0xff] %v31085_v27  ;;  %v15451_v31 = vpop.f32.mrb[112].mxu0  ;;  %v24654_v11 = vpop.f32.mrb[77].mxu1  ;;  %v16829_v22 = vcombine.low %v16119_v55, %v23212_v60  ;;  %v16168_v27 = vcombine.high %v23178_v37, %v23178_v37 }
 0x3b4   : > { %v25168_v35 = vpop.f32.mrb[113].mxu0  ;;  %25328 = vmatmul.mubr.msk.f32.gmra.mrb[30].mxu0 %vm1767_vm2, %v16776_v17  ;;  %v16142_v31 = vcombine.high %v16134_v40, %v16134_v40  ;;  %v16810_v17 = vcombine.low %v16802_v2, %v16809_v61  ;;  %v16827_v61 = vcombine.low %v16819_v32, %v16826_v8  ;;  %v23179_v2 = vld [vmem:[%s27330_s25 + $0x112] sm:$0xff]  ;;  %v16862_v19 = vcombine.low %v16151_v54, %v16159_v1  ;;  %v23213_v55 = vld.sshfl [vmem:[%s27330_s25 + $0x102] sm:$0x3 pattern:$0x76325410] }
 0x3b5   : > { %25330 = vmatprep.mubr.msk.f32.mxu0 %vm27271_vm1, %v32899_v53  ;;  %v16846_v35 = vcombine.low %v16141_v41, %v16143_v45  ;;  %v16843_v51 = vrot.slane %v16829_v22, %v27333_v7  ;;  %v16863_v46 = vcombine.low %v16158_v52, %v16160_v21  ;;  %v16182_v60 = vrot.slane %v16168_v27, %v27333_v7  ;;  %v23181_v8 = vld [vmem:[%s27330_s25 + $0x122] sm:$0xff]  ;;  %v23182_v21 = vld [vmem:[%s27330_s25 + $0x12a] sm:$0xff] }
 0x3b6   : > { %v16845_v11 = vcombine.low %v16134_v40, %v16142_v31  ;;  %v16183_v31 = vcombine.high %v16175_v10, %v16175_v10  ;;  %v16185_v45 = vcombine.high %v23179_v2, %v23179_v2  ;;  %v16870_v54 = vrot.slane %v16862_v19, %v27333_v7 }
 0x3b7   : > { %v16860_v41 = vrot.slane %v16846_v35, %v27333_v7  ;;  %v16877_v52 = vrot.slane %v16863_v46, %v27333_v7  ;;  %v16216_v27 = vrot.slane %v23181_v8, %v27333_v7  ;;  %v16233_v19 = vrot.slane %v23182_v21, %v27333_v7 }
 0x3b8   : > { %25331 = vmatmul.mubr.msk.f32.gmra.mrb[32].mxu0 %vm1767_vm2, %v16793_v57  ;;  %v16836_v57 = vrot.slane %v16828_v39, %v27333_v7  ;;  %v16853_v40 = vrot.slane %v16845_v11, %v27333_v7  ;;  %v16879_v39 = vcombine.low %v23213_v55, %v16175_v10  ;;  %v16880_v37 = vcombine.low %v16183_v31, %v16182_v60 }
 0x3b9   : > { %25333 = vmatprep.mubr.msk.f32.mxu0 %vm27271_vm1, %v32899_v53  ;;  %v16184_v11 = vcombine.high %v16182_v60, %v16182_v60  ;;  %v16199_v1 = vrot.slane %v16185_v45, %v27333_v7  ;;  %v23214_v60 = vld.sshfl [vmem:[%s27330_s25 + $0x11a] sm:$0x3 pattern:$0x76325410] }
 0x3ba   : > { %v16844_v32 = vcombine.low %v16836_v57, %v16843_v51  ;;  %v16861_v22 = vcombine.low %v16853_v40, %v16860_v41  ;;  %v16887_v10 = vrot.slane %v16879_v39, %v27333_v7  ;;  %v16226_v57 = vcombine.high %v23182_v21, %v23182_v21 }
 0x3bb   : > { %v16894_v51 = vrot.slane %v16880_v37, %v27333_v7  ;;  %v16224_v40 = vcombine.high %v16216_v27, %v16216_v27  ;;  %v16878_v41 = vcombine.low %v16870_v54, %v16877_v52  ;;  %v16241_v21 = vcombine.high %v16233_v19, %v16233_v19 }
 0x3bc   : > { %25334 = vmatmul.mubr.msk.f32.gmra.mrb[34].mxu0 %vm1767_vm2, %v16810_v17  ;;  %v16192_v17 = vrot.slane %v23179_v2, %v27333_v7  ;;  %v16201_v2 = vcombine.high %v16199_v1, %v16199_v1  ;;  %v16240_v45 = vrot.slane %v16226_v57, %v27333_v7  ;;  %v23215_v57 = vld.sshfl [vmem:[%s27330_s25 + $0x132] sm:$0x3 pattern:$0x76325410] }
 0x3bd   : > { %25336 = vmatprep.mubr.msk.f32.mxu0 %vm27271_vm1, %v32899_v53  ;;  %v16914_v37 = vcombine.low %v16216_v27, %v16224_v40 }
 0x3be   : > { %v16200_v35 = vcombine.high %v16192_v17, %v16192_v17  ;;  %v16896_v46 = vcombine.low %v16184_v11, %v16192_v17  ;;  %v16913_v39 = vcombine.low %v16201_v2, %v23214_v60  ;;  %v23185_v11 = vld [vmem:[%s27330_s25 + $0x142] sm:$0xff] }
 0x3bf   : > { %v16928_v27 = vrot.slane %v16914_v37, %v27333_v7  ;;  %v16274_v37 = vrot.slane %v23185_v11, %v27333_v7 }
 0x3c0   : > { %25337 = vmatmul.mubr.msk.f32.gmra.mrb[36].mxu0 %vm1767_vm2, %v16827_v61  ;;  %v16209_v61 = vcombine.high %v23181_v8, %v23181_v8  ;;  %v16897_v55 = vcombine.low %v16200_v35, %v16199_v1  ;;  %v16895_v8 = vcombine.low %v16887_v10, %v16894_v51  ;;  %v16904_v17 = vrot.slane %v16896_v46, %v27333_v7  ;;  %v23187_v46 = vld [vmem:[%s27330_s25 + $0x152] sm:$0xff] }
 0x3c1   : > { %25339 = vmatprep.mubr.msk.f32.mxu0 %vm27271_vm1, %v32899_v53  ;;  %v16242_v1 = vcombine.high %v16240_v45, %v16240_v45  ;;  %v16931_v10 = vcombine.low %v16233_v19, %v16241_v21 }
 0x3c2   : > { %v16223_v31 = vrot.slane %v16209_v61, %v27333_v7  ;;  %v16911_v54 = vrot.slane %v16897_v55, %v27333_v7  ;;  %v16921_v61 = vrot.slane %v16913_v39, %v27333_v7 }
 0x3c3   : > { %v16947_v55 = vcombine.low %v16240_v45, %v16242_v1  ;;  %v16945_v19 = vrot.slane %v16931_v10, %v27333_v7 }
 0x3c4   : > { %25340 = vmatmul.mubr.msk.f32.gmra.mrb[38].mxu0 %vm1767_vm2, %v16844_v32  ;;  %v23184_v32 = vld [vmem:[%s27330_s25 + $0x13a] sm:$0xff]  ;;  %v16912_v51 = vcombine.low %v16904_v17, %v16911_v54  ;;  %v16929_v39 = vcombine.low %v16921_v61, %v16928_v27  ;;  %v16291_v17 = vcombine.high %v23187_v46, %v23187_v46 }
 0x3c5   : > { %25342 = vmatprep.mubr.msk.f32.mxu0 %vm27271_vm1, %v32899_v53  ;;  %v16250_v52 = vcombine.high %v23184_v32, %v23184_v32  ;;  %v16257_v35 = vrot.slane %v23184_v32, %v27333_v7  ;;  %v23188_v54 = vld [vmem:[%s27330_s25 + $0x15a] sm:$0xff]  ;;  %v16955_v45 = vrot.slane %v16947_v55, %v27333_v7 }
 0x3c6   : > { %v16308_v61 = vcombine.high %v23188_v54, %v23188_v54 }
 0x3c7   : > { %v16264_v40 = vrot.slane %v16250_v52, %v27333_v7  ;;  %v16948_v60 = vcombine.low %v23215_v57, %v16257_v35  ;;  %v16265_v32 = vcombine.high %v16257_v35, %v16257_v35  ;;  %v16298_v35 = vrot.slane %v23187_v46, %v27333_v7 }
 0x3c8   : > { %25343 = vmatmul.mubr.msk.f32.gmra.mrb[40].mxu0 %vm1767_vm2, %v16861_v22  ;;  %v16225_v22 = vcombine.high %v16223_v31, %v16223_v31 }
 0x3c9   : > { %25345 = vmatprep.mubr.msk.f32.mxu0 %vm27271_vm1, %v32899_v53  ;;  %v16962_v52 = vrot.slane %v16948_v60, %v27333_v7  ;;  %v16964_v1 = vcombine.low %v16265_v32, %v16264_v40  ;;  %v16315_v60 = vrot.slane %v23188_v54, %v27333_v7  ;;  %v4918_v54 = vcombine.high %v30561_v25, %v30561_v25  ;;  %v23191_v25 = vld [vmem:[%s27330_s25 + $0x172] sm:$0xff] }
 0x3ca   : > { %v16930_v2 = vcombine.low %v16223_v31, %v16225_v22  ;;  %v23197_v22 = vld [vmem:[%s27330_s25 + $0x1a2] sm:$0xff]  ;;  %v16356_v3 = vrot.slane %v23191_v25, %v27333_v7 }
 0x3cb   : > { %v31163_v27 = vrot.slane %v23197_v22, %v27333_v7  ;;  %v16431_v10 = vcombine.high %v23197_v22, %v23197_v22  ;;  %v16972_v55 = vrot.slane %v16964_v1, %v27333_v7  ;;  %v16963_v32 = vcombine.low %v16955_v45, %v16962_v52 }
 0x3cc   : > { %25346 = vmatmul.mubr.msk.f32.gmra.mrb[42].mxu0 %vm1767_vm2, %v16878_v41  ;;  %v16267_v41 = vcombine.high %v23185_v11, %v23185_v11  ;;  %v16938_v31 = vrot.slane %v16930_v2, %v27333_v7  ;;  %v16282_v11 = vcombine.high %v16274_v37, %v16274_v37  ;;  %v16306_v22 = vcombine.high %v16298_v35, %v16298_v35 }
 0x3cd   : > { %25348 = vmatprep.mubr.msk.f32.mxu0 %vm27271_vm1, %v32899_v53  ;;  %v16446_v46 = vcombine.high %v31163_v27, %v31163_v27  ;;  %v16323_v45 = vcombine.high %v16315_v60, %v16315_v60 }
 0x3ce   : > { %v16281_v21 = vrot.slane %v16267_v41, %v27333_v7  ;;  %v16946_v57 = vcombine.low %v16938_v31, %v16945_v19  ;;  %v16305_v41 = vrot.slane %v16291_v17, %v27333_v7  ;;  %v23190_v19 = vld [vmem:[%s27330_s25 + $0x16a] sm:$0xff] }
 0x3cf   : > { %v16332_v52 = vcombine.high %v23190_v19, %v23190_v19 }
 0x3d0   : > { %25349 = vmatmul.mubr.msk.f32.gmra.mrb[44].mxu0 %vm1767_vm2, %v16895_v8  ;;  %v16266_v8 = vcombine.high %v16264_v40, %v16264_v40  ;;  %v16283_v2 = vcombine.high %v16281_v21, %v16281_v21  ;;  %v23216_v40 = vld.sshfl [vmem:[%s27330_s25 + $0x14a] sm:$0x3 pattern:$0x76325410]  ;;  %v16307_v38 = vcombine.high %v16305_v41, %v16305_v41 }
 0x3d1   : > { %25351 = vmatprep.mubr.msk.f32.mxu0 %vm27271_vm1, %v32899_v53 }
 0x3d2   : > { %v16982_v17 = vcombine.low %v16283_v2, %v23216_v40  ;;  %v16999_v40 = vcombine.low %v16305_v41, %v16307_v38 }
 0x3d4   : > { %25352 = vmatmul.mubr.msk.f32.gmra.mrb[46].mxu0 %vm1767_vm2, %v16912_v51  ;;  %v16965_v51 = vcombine.low %v16266_v8, %v16274_v37  ;;  %v16445_v37 = vrot.slane %v16431_v10, %v27333_v7  ;;  %v16981_v8 = vcombine.low %v16282_v11, %v16281_v21  ;;  %v16998_v10 = vcombine.low %v16298_v35, %v16306_v22 }
 0x3d5   : > { %25354 = vmatprep.mubr.msk.f32.mxu0 %vm27271_vm1, %v32899_v53  ;;  %v5608_v21 = vcombine.low %v4918_v54, %v31163_v27  ;;  %v16996_v2 = vrot.slane %v16982_v17, %v27333_v7  ;;  %v17013_v54 = vrot.slane %v16999_v40, %v27333_v7  ;;  %v23194_v40 = vld [vmem:[%s27330_s25 + $0x18a] sm:$0xff] }
 0x3d6   : > { %v16979_v31 = vrot.slane %v16965_v51, %v27333_v7  ;;  %v17134_v1 = vcombine.low %v16446_v46, %v16445_v37  ;;  %v16447_v0 = vcombine.high %v16445_v37, %v16445_v37  ;;  %v16989_v51 = vrot.slane %v16981_v8, %v27333_v7  ;;  %v23220_v46 = vld.sshfl [vmem:[%s27330_s25 + $0x1aa] sm:$0x3 pattern:$0x76325410] }
 0x3d7   : > { %v5616_v22 = vrot.slane %v5608_v21, %v27333_v7  ;;  %v17006_v37 = vrot.slane %v16998_v10, %v27333_v7  ;;  %v23217_v8 = vld.sshfl [vmem:[%s27330_s25 + $0x162] sm:$0x3 pattern:$0x76325410] }
 0x3d8   : > { %25355 = vmatmul.mubr.msk.f32.gmra.mrb[48].mxu0 %vm1767_vm2, %v16929_v39  ;;  %v16322_v39 = vrot.slane %v16308_v61, %v27333_v7  ;;  %v16339_v61 = vrot.slane %v23190_v19, %v27333_v7  ;;  %v16980_v11 = vcombine.low %v16972_v55, %v16979_v31  ;;  %v31193_v35 = vrot.slane %v17134_v1, %v27333_v7  ;;  %v23193_v21 = vld [vmem:[%s27330_s25 + $0x182] sm:$0xff] }
 0x3d9   : > { %25357 = vmatprep.mubr.msk.f32.mxu0 %vm27271_vm1, %v32899_v53  ;;  %v17015_v19 = vcombine.low %v16315_v60, %v16323_v45  ;;  %v17135_v38 = vcombine.low %v16447_v0, %v23220_v46  ;;  %v16997_v17 = vcombine.low %v16989_v51, %v16996_v2  ;;  %v16349_v1 = vcombine.high %v23191_v25, %v23191_v25 }
 0x3da   : > { %v16347_v55 = vcombine.high %v16339_v61, %v16339_v61  ;;  %v5624_v41 = vcombine.low %v5616_v22, %v31193_v35  ;;  %v17032_v0 = vcombine.low %v23217_v8, %v16339_v61  ;;  %v16373_v10 = vcombine.high %v23193_v21, %v23193_v21  ;;  %v23218_v8 = vld.sshfl [vmem:[%s27330_s25 + $0x17a] sm:$0x3 pattern:$0x76325410] }
 0x3db   : > { %v17023_v60 = vrot.slane %v17015_v19, %v27333_v7  ;;  %v16363_v2 = vrot.slane %v16349_v1, %v27333_v7  ;;  %v16364_v61 = vcombine.high %v16356_v3, %v16356_v3 }
 0x3dc   : > { %25358 = vmatmul.mubr.msk.f32.gmra.mrb[50].mxu0 %vm1767_vm2, %v16946_v57  ;;  %v16324_v57 = vcombine.high %v16322_v39, %v16322_v39  ;;  %24656 = vmatmul.mubr.msk.f32.gmra.mrb[90].mxu1 %vm1767_vm2, %v5624_v41  ;;  %v17040_v46 = vrot.slane %v17032_v0, %v27333_v7  ;;  %v23196_v41 = vld [vmem:[%s27330_s25 + $0x19a] sm:$0xff] }
 0x3dd   : > { %25360 = vmatprep.mubr.msk.f32.mxu0 %vm27271_vm1, %v32899_v53  ;;  %24658 = vmatprep.mubr.msk.f32.mxu1 %vm27271_vm1, %v32899_v53  ;;  %v16365_v19 = vcombine.high %v16363_v2, %v16363_v2  ;;  %v16414_v0 = vcombine.high %v23196_v41, %v23196_v41 }
 0x3de   : > { %v17016_v31 = vcombine.low %v16322_v39, %v16324_v57  ;;  %v31213_v57 = vrot.slane %v17135_v38, %v27333_v7  ;;  %v16397_v38 = vrot.slane %v23194_v40, %v27333_v7 }
 0x3df   : > { %v17066_v1 = vcombine.low %v16365_v19, %v23218_v8  ;;  %v23219_v19 = vld.sshfl [vmem:[%s27330_s25 + $0x192] sm:$0x3 pattern:$0x76325410] }
 0x3e0   : > { %25361 = vmatmul.mubr.msk.f32.gmra.mrb[52].mxu0 %vm1767_vm2, %v16963_v32  ;;  %v16346_v32 = vrot.slane %v16332_v52, %v27333_v7  ;;  %v17030_v45 = vrot.slane %v17016_v31, %v27333_v7  ;;  %v16380_v52 = vrot.slane %v23193_v21, %v27333_v7  ;;  %24659 = vmatmul.mubr.msk.f32.gmra.mrb[92].mxu1 %vm1767_vm2, %v31213_v57 }
 0x3e1   : > { %25363 = vmatprep.mubr.msk.f32.mxu0 %vm27271_vm1, %v32899_v53  ;;  %25415 = vmatprep.mubr.f32.mxu1 %v32899_v53  ;;  %v17050_v31 = vcombine.low %v16364_v61, %v16363_v2  ;;  %v16428_v2 = vrot.slane %v16414_v0, %v27333_v7 }
 0x3e2   : > { %v17033_v39 = vcombine.low %v16347_v55, %v16346_v32  ;;  %v16348_v51 = vcombine.high %v16346_v32, %v16346_v32  ;;  %v17031_v22 = vcombine.low %v17023_v60, %v17030_v45  ;;  %v16388_v32 = vcombine.high %v16380_v52, %v16380_v52 }
 0x3e3   : > { %v16387_v55 = vrot.slane %v16373_v10, %v27333_v7  ;;  %v16405_v45 = vcombine.high %v16397_v38, %v16397_v38 }
 0x3e4   : > { %25364 = vmatmul.mubr.msk.f32.gmra.mrb[54].mxu0 %vm1767_vm2, %v16980_v11  ;;  %v17014_v11 = vcombine.low %v17006_v37, %v17013_v54  ;;  %v17047_v25 = vrot.slane %v17033_v39, %v27333_v7  ;;  %v17049_v37 = vcombine.low %v16348_v51, %v16356_v3  ;;  %25416 = vmatmul.mubr.f32.vlgmr.msra.gmra.mrb[94].mxu1 %v32899_v53 }
 0x3e5   : > { %25366 = vmatprep.mubr.msk.f32.mxu0 %vm27271_vm1, %v32899_v53  ;;  %v17067_v21 = vcombine.low %v16380_v52, %v16388_v32  ;;  %v16389_v60 = vcombine.high %v16387_v55, %v16387_v55  ;;  %v17064_v39 = vrot.slane %v17050_v31, %v27333_v7  ;;  %v16430_v31 = vcombine.high %v16428_v2, %v16428_v2 }
 0x3e6   : > { %v17048_v54 = vcombine.low %v17040_v46, %v17047_v25  ;;  %v17057_v3 = vrot.slane %v17049_v37, %v27333_v7  ;;  %v16421_v25 = vrot.slane %v23196_v41, %v27333_v7  ;;  %v23200_v41 = vld [vmem:[%s27330_s25 + $0x1ba] sm:$0xff] }
 0x3e7   : > { %v17081_v52 = vrot.slane %v17067_v21, %v27333_v7  ;;  %v17083_v51 = vcombine.low %v16387_v55, %v16389_v60  ;;  %v17118_v21 = vcombine.low %v16430_v31, %v31163_v27 }
 0x3e8   : > { %25367 = vmatmul.mubr.msk.f32.gmra.mrb[56].mxu0 %vm1767_vm2, %v16997_v17  ;;  %v16390_v17 = vcombine.high %v23194_v40, %v23194_v40  ;;  %v17065_v61 = vcombine.low %v17057_v3, %v17064_v39  ;;  %v17084_v40 = vcombine.low %v16397_v38, %v16405_v45  ;;  %v16429_v37 = vcombine.high %v16421_v25, %v16421_v25 }
 0x3e9   : > { %25369 = vmatprep.mubr.msk.f32.mxu0 %vm27271_vm1, %v32899_v53  ;;  %v17091_v55 = vrot.slane %v17083_v51, %v27333_v7  ;;  %v17132_v27 = vrot.slane %v17118_v21, %v27333_v7 }
 0x3ea   : > { %v16404_v10 = vrot.slane %v16390_v17, %v27333_v7  ;;  %v17098_v17 = vrot.slane %v17084_v40, %v27333_v7 }
 0x3ec   : > { %25370 = vmatmul.mubr.msk.f32.gmra.mrb[58].mxu0 %vm1767_vm2, %v17014_v11  ;;  %v17074_v11 = vrot.slane %v17066_v1, %v27333_v7  ;;  %v16406_v46 = vcombine.high %v16404_v10, %v16404_v10  ;;  %v17117_v1 = vcombine.low %v16429_v37, %v16428_v2  ;;  %v17099_v3 = vcombine.low %v17091_v55, %v17098_v17 }
 0x3ed   : > { %25372 = vmatprep.mubr.msk.f32.mxu0 %vm27271_vm1, %v32899_v53  ;;  %v17150_v55 = vcombine.low %v31193_v35, %v31213_v57 }
 0x3ee   : > { %v17082_v32 = vcombine.low %v17074_v11, %v17081_v52  ;;  %v17100_v38 = vcombine.low %v16404_v10, %v16406_v46  ;;  %v16472_v10 = vcombine.high %v23200_v41, %v23200_v41  ;;  %v17125_v11 = vrot.slane %v17117_v1, %v27333_v7  ;;  %v23202_v46 = vld [vmem:[%s27330_s25 + $0x1ca] sm:$0xff] }
 0x3ef   : > { %v16496_v31 = vcombine.high %v23202_v46, %v23202_v46 }
 0x3f0   : > { %25373 = vmatmul.mubr.msk.f32.gmra.mrb[60].mxu0 %vm1767_vm2, %v17031_v22  ;;  %v23199_v22 = vld [vmem:[%s27330_s25 + $0x1b2] sm:$0xff]  ;;  %v17108_v39 = vrot.slane %v17100_v38, %v27333_v7  ;;  %v16486_v40 = vrot.slane %v16472_v10, %v27333_v7 }
 0x3f1   : > { %25375 = vmatprep.mubr.msk.f32.mxu0 %vm27271_vm1, %v32899_v53  ;;  %v16455_v8 = vcombine.high %v23199_v22, %v23199_v22  ;;  %v16462_v60 = vrot.slane %v23199_v22, %v27333_v7  ;;  %v31280_v1 = vrot.slane %v16496_v31, %v27333_v7 }
 0x3f2   : > { %v16488_v37 = vcombine.high %v16486_v40, %v16486_v40 }
 0x3f3   : > { %v16469_v0 = vrot.slane %v16455_v8, %v27333_v7  ;;  %v16470_v52 = vcombine.high %v16462_v60, %v16462_v60  ;;  %v16503_v8 = vrot.slane %v23202_v46, %v27333_v7  ;;  %32902 = vst [vmem:[#allocation8_spill] sm:$0xff] %v31280_v1 }
 0x3f4   : > { %25376 = vmatmul.mubr.msk.f32.gmra.mrb[62].mxu0 %vm1767_vm2, %v17048_v54  ;;  %v17101_v54 = vcombine.low %v23219_v19, %v16421_v25  ;;  %v17133_v25 = vcombine.low %v17125_v11, %v17132_v27 }
 0x3f5   : > { %25378 = vmatprep.mubr.msk.f32.mxu0 %vm27271_vm1, %v32899_v53  ;;  %v16471_v51 = vcombine.high %v16469_v0, %v16469_v0  ;;  %v17151_v22 = vcombine.low %v16462_v60, %v16470_v52  ;;  %v16511_v21 = vcombine.high %v16503_v8, %v16503_v8  ;;  %v23221_v60 = vld.sshfl [vmem:[%s27330_s25 + $0x1c2] sm:$0x3 pattern:$0x76325410]  ;;  %v23297_v52 = vld [vmem:[%s32790_s3 + $0x10] sm:$0xff] }
 0x3f6   : > { %v17115_v45 = vrot.slane %v17101_v54, %v27333_v7 }
 0x3f7   : > { %v17152_v19 = vcombine.low %v16469_v0, %v16471_v51  ;;  %v17159_v17 = vrot.slane %v17151_v22, %v27333_v7  ;;  %v23298_v51 = vld [vmem:[%s32790_s3 + $0x18] sm:$0xff] }
 0x3f8   : > { %25379 = vmatmul.mubr.msk.f32.gmra.mrb[64].mxu0 %vm1767_vm2, %v17065_v61  ;;  %v17116_v2 = vcombine.low %v17108_v39, %v17115_v45  ;;  %v16479_v61 = vrot.slane %v23200_v41, %v27333_v7  ;;  %v17169_v41 = vcombine.low %v16486_v40, %v16488_v37  ;;  %v17186_v39 = vcombine.low %v16511_v21, %v31280_v1 }
 0x3f9   : > { %25381 = vmatprep.mubr.msk.f32.mxu0 %vm27271_vm1, %v32899_v53  ;;  %v17166_v38 = vrot.slane %v17152_v19, %v27333_v7 }
 0x3fa   : > { %v17183_v57 = vrot.slane %v17169_v41, %v27333_v7  ;;  %v17200_v11 = vrot.slane %v17186_v39, %v27333_v7 }
 0x3fb   : > { %v17167_v0 = vcombine.low %v17159_v17, %v17166_v38 }
 0x3fc   : > { %25382 = vmatmul.mubr.msk.f32.gmra.mrb[66].mxu0 %vm1767_vm2, %v17082_v32  ;;  %v16487_v32 = vcombine.high %v16479_v61, %v16479_v61 }
 0x3fd   : > { %25384 = vmatprep.mubr.msk.f32.mxu0 %vm27271_vm1, %v32899_v53 }
 0x3fe   : > { %v17168_v54 = vcombine.low %v16479_v61, %v16487_v32  ;;  %v31311_v32 = vld [vmem:[%s32789_s2] ss:$0 sm:$0xff] }
 0x400   : > { %25385 = vmatmul.mubr.msk.f32.gmra.mrb[68].mxu0 %vm1767_vm2, %v17099_v3  ;;  %v17176_v35 = vrot.slane %v17168_v54, %v27333_v7  ;;  %v17185_v3 = vcombine.low %v23221_v60, %v16503_v8  ;;  %v25917_v8 = vadd.f32 %v31311_v32, %v30428_v30  ;;  %v25919_v54 = vadd.f32 %v31311_v32, %v30449_v63 }
 0x401   : > { %25387 = vmatprep.mubr.msk.f32.mxu0 %vm27271_vm1, %v32899_v53  ;;  %v25921_v30 = vadd.f32 %v31311_v32, %v30466_v36 }
 0x402   : > { %v17184_v45 = vcombine.low %v17176_v35, %v17183_v57  ;;  %v17193_v10 = vrot.slane %v17185_v3, %v27333_v7 }
 0x404   : > { %25388 = vmatmul.mubr.msk.f32.gmra.mrb[70].mxu0 %vm1767_vm2, %v17116_v2  ;;  %v17201_v27 = vcombine.low %v17193_v10, %v17200_v11  ;;  %v25883_v2 = vpack.c.bf16 %v23298_v51, %v23297_v52 }
 0x405   : > { %25390 = vmatprep.mubr.msk.f32.mxu0 %vm27271_vm1, %v32899_v53 }
 0x406   : > { %25884 = vmatprep.subr.bf16.mxu1 %v25883_v2 }
 0x407   : > { %25886 = vmatpush3.bf16.msra.mxu1 %v25883_v2 }
 0x408   : > { %25391 = vmatmul.mubr.msk.f32.gmra.mrb[72].mxu0 %vm1767_vm2, %v17133_v25 }
 0x409   : > { %25393 = vmatprep.mubr.msk.f32.mxu0 %vm27271_vm1, %v32899_v53 }
 0x40c   : > { %25394 = vmatmul.mubr.msk.f32.gmra.mrb[74].mxu0 %vm1767_vm2, %v17150_v55 }
 0x40d   : > { %25396 = vmatprep.mubr.msk.f32.mxu0 %vm27271_vm1, %v32899_v53 }
 0x410   : > { %25397 = vmatmul.mubr.msk.f32.gmra.mrb[76].mxu0 %vm1767_vm2, %v17167_v0 }
 0x411   : > { %25399 = vmatprep.mubr.msk.f32.mxu0 %vm27271_vm1, %v32899_v53 }
 0x414   : > { %25400 = vmatmul.mubr.msk.f32.gmra.mrb[78].mxu0 %vm1767_vm2, %v17184_v45 }
 0x415   : > { %25402 = vmatprep.mubr.msk.f32.mxu0 %vm27271_vm1, %v32899_v53 }
 0x418   : > { %25403 = vmatmul.mubr.msk.f32.gmra.mrb[80].mxu0 %vm1767_vm2, %v17201_v27 }
 0x419   : > { %25405 = vmatprep.mubr.msk.f32.mxu0 %vm27271_vm1, %v32899_v53 }
 0x44b   : > { %v15641_v61 = vpop.f32.mrb[114].mxu0 }
 0x44c   : > { %v25282_v40 = vpop.f32.mrb[115].mxu0  ;;  %v25923_v61 = vadd.f32 %v31311_v32, %v30481_v23  ;;  %v25925_v23 = vadd.f32 %v31311_v32, %v30498_v14 }
 0x44f   : > { %v15646_v46 = vpop.f32.mrb[116].mxu0 }
 0x450   : > { %v25285_v25 = vpop.f32.mrb[117].mxu0 }
 0x453   : > { %v17378_v22 = vpop.f32.mrb[118].mxu0 }
 0x454   : > { %v25290_v19 = vpop.f32.mrb[119].mxu0 }
 0x457   : > { %v17383_v37 = vpop.f32.mrb[120].mxu0 }
 0x458   : > { %v25293_v31 = vpop.f32.mrb[121].mxu0 }
 0x45b   : > { %v17388_v55 = vpop.f32.mrb[4].mxu0 }
 0x45c   : > { %v25918_v17 = vadd.f32 %v25917_v8, %v17388_v55  ;;  %v25296_v38 = vpop.f32.mrb[5].mxu0 }
 0x45e   : > { %v17625_v41 = vmax.f32 %v25918_v17, 0.0 }
 0x45f   : > { %v17393_v21 = vpop.f32.mrb[6].mxu0 }
 0x460   : > { %v17739_v60 = vcombine.high %v17625_v41, %v17625_v41  ;;  %v17746_v0 = vrot.slane %v17625_v41, %v27333_v7  ;;  %v25920_v35 = vadd.f32 %v25919_v54, %v17393_v21  ;;  %v25299_v57 = vpop.f32.mrb[7].mxu0 }
 0x462   : > { %v17753_v3 = vrot.slane %v17739_v60, %v27333_v7  ;;  %v17754_v39 = vcombine.high %v17746_v0, %v17746_v0  ;;  %v17626_v45 = vmax.f32 %v25920_v35, 0.0 }
 0x463   : > { %v17398_v10 = vpop.f32.mrb[8].mxu0 }
 0x464   : > { %v18468_v11 = vcombine.low %v17754_v39, %v17753_v3  ;;  %v17755_v27 = vcombine.high %v17753_v3, %v17753_v3  ;;  %v17756_v52 = vcombine.high %v17626_v45, %v17626_v45  ;;  %v17763_v63 = vrot.slane %v17626_v45, %v27333_v7  ;;  %v25302_v51 = vpop.f32.mrb[9].mxu0 }
 0x465   : > { %v25922_v2 = vadd.f32 %v25921_v30, %v17398_v10  ;;  %v25927_v51 = vadd.f32 %v31311_v32, %v30515_v15 }
 0x466   : > { %v17770_v40 = vrot.slane %v17756_v52, %v27333_v7  ;;  %v17771_v46 = vcombine.high %v17763_v63, %v17763_v63  ;;  %v18469_v25 = vcombine.low %v17755_v27, %v17763_v63  ;;  %v18476_v55 = vrot.slane %v18468_v11, %v27333_v7 }
 0x467   : > { %v17627_v22 = vmax.f32 %v25922_v2, 0.0  ;;  %v17403_v19 = vpop.f32.mrb[10].mxu0 }
 0x468   : > { %v18483_v37 = vrot.slane %v18469_v25, %v27333_v7  ;;  %v17772_v36 = vcombine.high %v17770_v40, %v17770_v40  ;;  %v25924_v31 = vadd.f32 %v25923_v61, %v17403_v19  ;;  %v25305_v8 = vpop.f32.mrb[11].mxu0  ;;  %v18485_v17 = vcombine.low %v17771_v46, %v17770_v40 }
 0x469   : > { %v17773_v38 = vcombine.high %v17627_v22, %v17627_v22  ;;  %v31328_v54 = vrot.slane %v17627_v22, %v27333_v7 }
 0x46a   : > { %v17628_v41 = vmax.f32 %v25924_v31, 0.0  ;;  %v18484_v21 = vcombine.low %v18476_v55, %v18483_v37  ;;  %v18493_v10 = vrot.slane %v18485_v17, %v27333_v7  ;;  %v25929_v17 = vadd.f32 %v31311_v32, %v30535_v9  ;;  %v23332_v9 = vld [vmem:[%s32790_s3 + $0x28] sm:$0xff] }
 0x46b   : > { %v17787_v60 = vrot.slane %v17773_v38, %v27333_v7  ;;  %v18486_v0 = vcombine.low %v17772_v36, %v31328_v54  ;;  %v17408_v35 = vpop.f32.mrb[12].mxu0 }
 0x46c   : > { %v17790_v57 = vcombine.high %v17628_v41, %v17628_v41  ;;  %v17797_v3 = vrot.slane %v17628_v41, %v27333_v7  ;;  %v25926_v39 = vadd.f32 %v25925_v23, %v17408_v35  ;;  %v25308_v45 = vpop.f32.mrb[13].mxu0  ;;  %v31338_v30 = vsel %vm18397_vm3, %v18484_v21, 0.0 }
 0x46d   : > { %v17789_v14 = vcombine.high %v17787_v60, %v17787_v60  ;;  %v18500_v11 = vrot.slane %v18486_v0, %v27333_v7  ;;  %25418 = vmatprep.mubr.msk.f32.mxu1 %vm19282_vm4, %v31338_v30  ;;  %v23331_v45 = vld [vmem:[%s32790_s3 + $0x20] sm:$0xff] }
 0x46e   : > { %v17804_v27 = vrot.slane %v17790_v57, %v27333_v7  ;;  %v17805_v52 = vcombine.high %v17797_v3, %v17797_v3  ;;  %v17629_v63 = vmax.f32 %v25926_v39, 0.0 }
 0x46f   : > { %v18509_v2 = vcombine.low %v17787_v60, %v17789_v14  ;;  %v17413_v61 = vpop.f32.mrb[14].mxu0  ;;  %v31347_v40 = vcombine.low %v18493_v10, %v18500_v11  ;;  %v25931_v10 = vadd.f32 %v31311_v32, %v30556_v49 }
 0x470   : > { %v17806_v46 = vcombine.high %v17804_v27, %v17804_v27  ;;  %v18510_v25 = vcombine.low %v17797_v3, %v17805_v52  ;;  %v17807_v22 = vcombine.high %v17629_v63, %v17629_v63  ;;  %v17814_v19 = vrot.slane %v17629_v63, %v27333_v7  ;;  %v25311_v37 = vpop.f32.mrb[15].mxu0 }
 0x471   : > { %v25928_v36 = vadd.f32 %v25927_v51, %v17413_v61  ;;  %25419 = vmatmul.mubr.msk.f32.gmra.mrb[96].mxu1 %vm19282_vm4, %v31347_v40  ;;  %v18517_v38 = vrot.slane %v18509_v2, %v27333_v7 }
 0x472   : > { %v18524_v31 = vrot.slane %v18510_v25, %v27333_v7  ;;  %v18526_v8 = vcombine.low %v17804_v27, %v17806_v46  ;;  %v31354_v55 = vrot.slane %v17807_v22, %v27333_v7  ;;  %v17822_v15 = vcombine.high %v17814_v19, %v17814_v19 }
 0x473   : > { %v17630_v23 = vmax.f32 %v25928_v36, 0.0  ;;  %v17418_v41 = vpop.f32.mrb[16].mxu0  ;;  %v31372_v27 = vpack.c.bf16 %v23332_v9, %v23331_v45  ;;  %v25935_v45 = vadd.f32 %v31311_v32, %v30761_v26 }
 0x474   : > { %v18527_v21 = vcombine.low %v17814_v19, %v17822_v15  ;;  %v17823_v60 = vcombine.high %v31354_v55, %v31354_v55  ;;  %v25314_v0 = vpop.f32.mrb[17].mxu0  ;;  %v25930_v3 = vadd.f32 %v25929_v17, %v17418_v41  ;;  %v18525_v39 = vcombine.low %v18517_v38, %v18524_v31 }
 0x475   : > { %v17824_v35 = vcombine.high %v17630_v23, %v17630_v23  ;;  %v17831_v57 = vrot.slane %v17630_v23, %v27333_v7  ;;  %v18534_v14 = vrot.slane %v18526_v8, %v27333_v7  ;;  %25888 = vmatprep.subr.bf16.mxu1 %v31372_v27  ;;  %v25933_v15 = vadd.f32 %v31311_v32, %v30569_v62 }
 0x476   : > { %v18541_v11 = vrot.slane %v18527_v21, %v27333_v7  ;;  %v17631_v2 = vmax.f32 %v25930_v3, 0.0  ;;  %v31379_v22 = vsel %vm18397_vm3, %v18525_v39, 0.0 }
 0x477   : > { %v17838_v52 = vrot.slane %v17824_v35, %v27333_v7  ;;  %v17839_v63 = vcombine.high %v17831_v57, %v17831_v57  ;;  %v18550_v51 = vcombine.low %v17823_v60, %v17831_v57  ;;  %v17423_v61 = vpop.f32.mrb[18].mxu0  ;;  %25421 = vmatprep.mubr.msk.f32.mxu1 %vm19282_vm4, %v31379_v22 }
 0x478   : > { %v31375_v46 = vcombine.low %v18534_v14, %v18541_v11  ;;  %v25932_v25 = vadd.f32 %v25931_v10, %v17423_v61  ;;  %v25317_v49 = vpop.f32.mrb[19].mxu0  ;;  %v17841_v36 = vcombine.high %v17631_v2, %v17631_v2  ;;  %v17848_v31 = vrot.slane %v17631_v2, %v27333_v7 }
 0x479   : > { %v18551_v19 = vcombine.low %v17839_v63, %v17838_v52  ;;  %v17840_v37 = vcombine.high %v17838_v52, %v17838_v52  ;;  %v18558_v17 = vrot.slane %v18550_v51, %v27333_v7 }
 0x47a   : > { %v17632_v8 = vmax.f32 %v25932_v25, 0.0  ;;  %25422 = vmatmul.mubr.msk.f32.gmra.mrb[98].mxu1 %vm19282_vm4, %v31375_v46  ;;  %v31392_v23 = vrot.slane %v17841_v36, %v27333_v7  ;;  %v17856_v21 = vcombine.high %v17848_v31, %v17848_v31 }
 0x47b   : > { %v18565_v38 = vrot.slane %v18551_v19, %v27333_v7  ;;  %v17428_v41 = vpop.f32.mrb[20].mxu0  ;;  %v18567_v60 = vcombine.low %v17840_v37, %v17848_v31  ;;  %v25937_v37 = vadd.f32 %v31311_v32, %v30774_v43 }
 0x47c   : > { %v17858_v0 = vcombine.high %v17632_v8, %v17632_v8  ;;  %v17865_v35 = vrot.slane %v17632_v8, %v27333_v7  ;;  %v25320_v57 = vpop.f32.mrb[21].mxu0  ;;  %v25934_v3 = vadd.f32 %v25933_v15, %v17428_v41  ;;  %v18568_v62 = vcombine.low %v17856_v21, %v31392_v23 }
 0x47d   : > { %v18566_v39 = vcombine.low %v18558_v17, %v18565_v38  ;;  %v18575_v63 = vrot.slane %v18567_v60, %v27333_v7 }
 0x47e   : > { %v17872_v9 = vrot.slane %v17858_v0, %v27333_v7  ;;  %v17873_v10 = vcombine.high %v17865_v35, %v17865_v35  ;;  %v17633_v14 = vmax.f32 %v25934_v3, 0.0  ;;  %v18582_v51 = vrot.slane %v18568_v62, %v27333_v7 }
 0x47f   : > { %v17433_v11 = vpop.f32.mrb[26].mxu0  ;;  %v31401_v52 = vsel %vm18397_vm3, %v18566_v39, 0.0 }
 0x480   : > { %v17874_v2 = vcombine.high %v17872_v9, %v17872_v9  ;;  %v25936_v61 = vadd.f32 %v25935_v45, %v17433_v11  ;;  %25424 = vmatprep.mubr.msk.f32.mxu1 %vm19282_vm4, %v31401_v52  ;;  %v25323_v26 = vpop.f32.mrb[27].mxu0  ;;  %v18591_v25 = vcombine.low %v17865_v35, %v17873_v10  ;;  %v17875_v49 = vcombine.high %v17633_v14, %v17633_v14 }
 0x481   : > { %v17882_v19 = vrot.slane %v17633_v14, %v27333_v7  ;;  %v31410_v36 = vcombine.low %v18575_v63, %v18582_v51 }
 0x482   : > { %v18592_v31 = vcombine.low %v17872_v9, %v17874_v2  ;;  %v17634_v8 = vmax.f32 %v25936_v61, 0.0  ;;  %v17889_v15 = vrot.slane %v17875_v49, %v27333_v7  ;;  %v18599_v43 = vrot.slane %v18591_v25, %v27333_v7 }
 0x483   : > { %v17890_v17 = vcombine.high %v17882_v19, %v17882_v19  ;;  %v17438_v38 = vpop.f32.mrb[28].mxu0  ;;  %25425 = vmatmul.mubr.msk.f32.gmra.mrb[100].mxu1 %vm19282_vm4, %v31410_v36  ;;  %v25939_v9 = vadd.f32 %v31311_v32, %v30784_v59  ;;  %v25941_v59 = vadd.f32 %v31311_v32, %v30799_v56 }
 0x484   : > { %v18606_v41 = vrot.slane %v18592_v31, %v27333_v7  ;;  %v17892_v21 = vcombine.high %v17634_v8, %v17634_v8  ;;  %v31415_v60 = vrot.slane %v17634_v8, %v27333_v7  ;;  %v25938_v0 = vadd.f32 %v25937_v37, %v17438_v38  ;;  %v25326_v35 = vpop.f32.mrb[29].mxu0 }
 0x485   : > { %v17891_v57 = vcombine.high %v17889_v15, %v17889_v15  ;;  %v18608_v3 = vcombine.low %v17882_v19, %v17890_v17 }
 0x486   : > { %v17906_v39 = vrot.slane %v17892_v21, %v27333_v7  ;;  %v17907_v45 = vcombine.high %v31415_v60, %v31415_v60  ;;  %v17635_v62 = vmax.f32 %v25938_v0, 0.0  ;;  %v18607_v11 = vcombine.low %v18599_v43, %v18606_v41 }
 0x487   : > { %v18609_v10 = vcombine.low %v17889_v15, %v17891_v57  ;;  %v17443_v14 = vpop.f32.mrb[30].mxu0  ;;  %v18616_v63 = vrot.slane %v18608_v3, %v27333_v7 }
 0x488   : > { %v17908_v51 = vcombine.high %v17906_v39, %v17906_v39  ;;  %v17909_v2 = vcombine.high %v17635_v62, %v17635_v62  ;;  %v25329_v61 = vpop.f32.mrb[31].mxu0  ;;  %v17916_v25 = vrot.slane %v17635_v62, %v27333_v7  ;;  %v25940_v49 = vadd.f32 %v25939_v9, %v17443_v14 }
 0x489   : > { %v18623_v26 = vrot.slane %v18609_v10, %v27333_v7  ;;  %v31430_v19 = vsel %vm18397_vm3, %v18607_v11, 0.0  ;;  %v18632_v37 = vcombine.low %v17907_v45, %v17906_v39  ;;  %v25943_v39 = vadd.f32 %v31311_v32, %v30812_v50 }
 0x48a   : > { %v17923_v31 = vrot.slane %v17909_v2, %v27333_v7  ;;  %25427 = vmatprep.mubr.msk.f32.mxu1 %vm19282_vm4, %v31430_v19  ;;  %v17924_v15 = vcombine.high %v17916_v25, %v17916_v25  ;;  %v18633_v17 = vcombine.low %v17908_v51, %v17916_v25  ;;  %v17636_v38 = vmax.f32 %v25940_v49, 0.0 }
 0x48b   : > { %v31437_v8 = vcombine.low %v18616_v63, %v18623_v26  ;;  %v17448_v41 = vpop.f32.mrb[32].mxu0  ;;  %v18640_v45 = vrot.slane %v18632_v37, %v27333_v7 }
 0x48c   : > { %v17925_v21 = vcombine.high %v17923_v31, %v17923_v31  ;;  %v25942_v0 = vadd.f32 %v25941_v59, %v17448_v41  ;;  %v25332_v35 = vpop.f32.mrb[33].mxu0  ;;  %v18647_v43 = vrot.slane %v18633_v17, %v27333_v7  ;;  %v18649_v57 = vcombine.low %v17924_v15, %v17923_v31 }
 0x48d   : > { %v17926_v3 = vcombine.high %v17636_v38, %v17636_v38  ;;  %v31441_v56 = vrot.slane %v17636_v38, %v27333_v7  ;;  %25428 = vmatmul.mubr.msk.f32.gmra.mrb[102].mxu1 %vm19282_vm4, %v31437_v8  ;;  %v25945_v15 = vadd.f32 %v31311_v32, %v30825_v47 }
 0x48e   : > { %v17637_v62 = vmax.f32 %v25942_v0, 0.0  ;;  %v18648_v61 = vcombine.low %v18640_v45, %v18647_v43  ;;  %v18657_v26 = vrot.slane %v18649_v57, %v27333_v7 }
 0x48f   : > { %v17940_v9 = vrot.slane %v17926_v3, %v27333_v7  ;;  %v18650_v10 = vcombine.low %v17925_v21, %v31441_v56  ;;  %v17453_v14 = vpop.f32.mrb[34].mxu0 }
 0x490   : > { %v17943_v11 = vcombine.high %v17637_v62, %v17637_v62  ;;  %v17950_v63 = vrot.slane %v17637_v62, %v27333_v7  ;;  %v25944_v51 = vadd.f32 %v25943_v39, %v17453_v14  ;;  %v25335_v2 = vpop.f32.mrb[35].mxu0  ;;  %v31456_v31 = vsel %vm18397_vm3, %v18648_v61, 0.0 }
 0x491   : > { %v17942_v25 = vcombine.high %v17940_v9, %v17940_v9  ;;  %v18664_v49 = vrot.slane %v18650_v10, %v27333_v7  ;;  %25430 = vmatprep.mubr.msk.f32.mxu1 %vm19282_vm4, %v31456_v31 }
 0x492   : > { %v17957_v50 = vrot.slane %v17943_v11, %v27333_v7  ;;  %v17958_v59 = vcombine.high %v17950_v63, %v17950_v63  ;;  %v17638_v37 = vmax.f32 %v25944_v51, 0.0 }
 0x493   : > { %v31460_v17 = vcombine.low %v18657_v26, %v18664_v49  ;;  %v18673_v38 = vcombine.low %v17940_v9, %v17942_v25  ;;  %v17458_v41 = vpop.f32.mrb[36].mxu0  ;;  %v25947_v9 = vadd.f32 %v31311_v32, %v30835_v33 }
 0x494   : > { %v17959_v21 = vcombine.high %v17957_v50, %v17957_v50  ;;  %v18674_v0 = vcombine.low %v17950_v63, %v17958_v59  ;;  %v17960_v35 = vcombine.high %v17638_v37, %v17638_v37  ;;  %v17967_v43 = vrot.slane %v17638_v37, %v27333_v7  ;;  %v25338_v57 = vpop.f32.mrb[37].mxu0 }
 0x495   : > { %v25946_v3 = vadd.f32 %v25945_v15, %v17458_v41  ;;  %25431 = vmatmul.mubr.msk.f32.gmra.mrb[104].mxu1 %vm19282_vm4, %v31460_v17  ;;  %v18681_v10 = vrot.slane %v18673_v38, %v27333_v7 }
 0x496   : > { %v18688_v39 = vrot.slane %v18674_v0, %v27333_v7  ;;  %v18690_v47 = vcombine.low %v17957_v50, %v17959_v21  ;;  %v31469_v45 = vrot.slane %v17960_v35, %v27333_v7  ;;  %v17975_v62 = vcombine.high %v17967_v43, %v17967_v43 }
 0x497   : > { %v17639_v14 = vmax.f32 %v25946_v3, 0.0  ;;  %v17463_v11 = vpop.f32.mrb[38].mxu0  ;;  %v25949_v50 = vadd.f32 %v31311_v32, %v30845_v28 }
 0x498   : > { %v18691_v63 = vcombine.low %v17967_v43, %v17975_v62  ;;  %v17976_v51 = vcombine.high %v31469_v45, %v31469_v45  ;;  %v25341_v2 = vpop.f32.mrb[39].mxu0  ;;  %v25948_v25 = vadd.f32 %v25947_v9, %v17463_v11  ;;  %v18689_v49 = vcombine.low %v18681_v10, %v18688_v39 }
 0x499   : > { %v17977_v61 = vcombine.high %v17639_v14, %v17639_v14  ;;  %v17984_v26 = vrot.slane %v17639_v14, %v27333_v7  ;;  %v18698_v59 = vrot.slane %v18690_v47, %v27333_v7  ;;  %v25951_v9 = vadd.f32 %v31311_v32, %v30858_v29 }
 0x49a   : > { %v18705_v33 = vrot.slane %v18691_v63, %v27333_v7  ;;  %v17640_v41 = vmax.f32 %v25948_v25, 0.0  ;;  %v31486_v43 = vsel %vm18397_vm3, %v18689_v49, 0.0 }
 0x49b   : > { %v17991_v37 = vrot.slane %v17977_v61, %v27333_v7  ;;  %v17992_v15 = vcombine.high %v17984_v26, %v17984_v26  ;;  %v18714_v38 = vcombine.low %v17976_v51, %v17984_v26  ;;  %v17468_v21 = vpop.f32.mrb[40].mxu0  ;;  %25433 = vmatprep.mubr.msk.f32.mxu1 %vm19282_vm4, %v31486_v43 }
 0x49c   : > { %v31482_v0 = vcombine.low %v18698_v59, %v18705_v33  ;;  %v25950_v35 = vadd.f32 %v25949_v50, %v17468_v21  ;;  %v25344_v57 = vpop.f32.mrb[41].mxu0  ;;  %v17994_v39 = vcombine.high %v17640_v41, %v17640_v41  ;;  %v18001_v47 = vrot.slane %v17640_v41, %v27333_v7 }
 0x49d   : > { %v18715_v3 = vcombine.low %v17992_v15, %v17991_v37  ;;  %v17993_v28 = vcombine.high %v17991_v37, %v17991_v37  ;;  %v18722_v10 = vrot.slane %v18714_v38, %v27333_v7  ;;  %v25953_v59 = vadd.f32 %v31311_v32, %v30871_v20 }
 0x49e   : > { %v17641_v62 = vmax.f32 %v25950_v35, 0.0  ;;  %25434 = vmatmul.mubr.msk.f32.gmra.mrb[106].mxu1 %vm19282_vm4, %v31482_v0  ;;  %v31498_v11 = vrot.slane %v17994_v39, %v27333_v7  ;;  %v18009_v51 = vcombine.high %v18001_v47, %v18001_v47 }
 0x49f   : > { %v18729_v14 = vrot.slane %v18715_v3, %v27333_v7  ;;  %v17473_v63 = vpop.f32.mrb[42].mxu0  ;;  %v18731_v2 = vcombine.low %v17993_v28, %v18001_v47 }
 0x4a0   : > { %v18011_v61 = vcombine.high %v17641_v62, %v17641_v62  ;;  %v18018_v26 = vrot.slane %v17641_v62, %v27333_v7  ;;  %v25347_v25 = vpop.f32.mrb[43].mxu0  ;;  %v25952_v49 = vadd.f32 %v25951_v9, %v17473_v63  ;;  %v18732_v29 = vcombine.low %v18009_v51, %v31498_v11 }
 0x4a1   : > { %v18730_v50 = vcombine.low %v18722_v10, %v18729_v14  ;;  %v18739_v21 = vrot.slane %v18731_v2, %v27333_v7  ;;  %v25955_v62 = vadd.f32 %v31311_v32, %v30882_v24 }
 0x4a2   : > { %v18025_v33 = vrot.slane %v18011_v61, %v27333_v7  ;;  %v18026_v37 = vcombine.high %v18018_v26, %v18018_v26  ;;  %v17642_v15 = vmax.f32 %v25952_v49, 0.0  ;;  %v18746_v35 = vrot.slane %v18732_v29, %v27333_v7 }
 0x4a3   : > { %v17478_v38 = vpop.f32.mrb[44].mxu0  ;;  %v31507_v41 = vsel %vm18397_vm3, %v18730_v50, 0.0 }
 0x4a4   : > { %v18027_v57 = vcombine.high %v18025_v33, %v18025_v33  ;;  %v25954_v3 = vadd.f32 %v25953_v59, %v17478_v38  ;;  %25436 = vmatprep.mubr.msk.f32.mxu1 %vm19282_vm4, %v31507_v41  ;;  %v25350_v20 = vpop.f32.mrb[45].mxu0  ;;  %v18755_v28 = vcombine.low %v18018_v26, %v18026_v37  ;;  %v18028_v39 = vcombine.high %v17642_v15, %v17642_v15 }
 0x4a5   : > { %v18035_v47 = vrot.slane %v17642_v15, %v27333_v7  ;;  %v31516_v9 = vcombine.low %v18739_v21, %v18746_v35  ;;  %v25957_v38 = vadd.f32 %v31311_v32, %v30893_v13  ;;  %v25959_v13 = vadd.f32 %v31311_v32, %v30905_v12 }
 0x4a6   : > { %v18756_v10 = vcombine.low %v18025_v33, %v18027_v57  ;;  %v17643_v14 = vmax.f32 %v25954_v3, 0.0  ;;  %v18042_v63 = vrot.slane %v18028_v39, %v27333_v7  ;;  %v18763_v24 = vrot.slane %v18755_v28, %v27333_v7 }
 0x4a7   : > { %v18043_v51 = vcombine.high %v18035_v47, %v18035_v47  ;;  %v17483_v2 = vpop.f32.mrb[46].mxu0  ;;  %25437 = vmatmul.mubr.msk.f32.gmra.mrb[108].mxu1 %vm19282_vm4, %v31516_v9 }
 0x4a8   : > { %v18770_v61 = vrot.slane %v18756_v10, %v27333_v7  ;;  %v18045_v25 = vcombine.high %v17643_v14, %v17643_v14  ;;  %v31521_v49 = vrot.slane %v17643_v14, %v27333_v7  ;;  %v25956_v26 = vadd.f32 %v25955_v62, %v17483_v2  ;;  %v25353_v50 = vpop.f32.mrb[47].mxu0 }
 0x4a9   : > { %v18044_v59 = vcombine.high %v18042_v63, %v18042_v63  ;;  %v18772_v29 = vcombine.low %v18035_v47, %v18043_v51 }
 0x4aa   : > { %v18059_v33 = vrot.slane %v18045_v25, %v27333_v7  ;;  %v18060_v37 = vcombine.high %v31521_v49, %v31521_v49  ;;  %v17644_v15 = vmax.f32 %v25956_v26, 0.0  ;;  %v18771_v57 = vcombine.low %v18763_v24, %v18770_v61 }
 0x4ab   : > { %v18773_v21 = vcombine.low %v18042_v63, %v18044_v59  ;;  %v17488_v35 = vpop.f32.mrb[48].mxu0  ;;  %v18780_v3 = vrot.slane %v18772_v29, %v27333_v7 }
 0x4ac   : > { %v18061_v20 = vcombine.high %v18059_v33, %v18059_v33  ;;  %v18062_v39 = vcombine.high %v17644_v15, %v17644_v15  ;;  %v25356_v62 = vpop.f32.mrb[49].mxu0  ;;  %v18069_v47 = vrot.slane %v17644_v15, %v27333_v7  ;;  %v25958_v10 = vadd.f32 %v25957_v38, %v17488_v35 }
 0x4ad   : > { %v18787_v28 = vrot.slane %v18773_v21, %v27333_v7  ;;  %v31536_v14 = vsel %vm18397_vm3, %v18771_v57, 0.0  ;;  %v18796_v63 = vcombine.low %v18060_v37, %v18059_v33  ;;  %v25961_v33 = vadd.f32 %v31311_v32, %v30918_v34 }
 0x4ae   : > { %v18076_v51 = vrot.slane %v18062_v39, %v27333_v7  ;;  %25439 = vmatprep.mubr.msk.f32.mxu1 %vm19282_vm4, %v31536_v14  ;;  %v18077_v61 = vcombine.high %v18069_v47, %v18069_v47  ;;  %v18797_v25 = vcombine.low %v18061_v20, %v18069_v47  ;;  %v17645_v26 = vmax.f32 %v25958_v10, 0.0 }
 0x4af   : > { %v31543_v2 = vcombine.low %v18780_v3, %v18787_v28  ;;  %v17493_v50 = vpop.f32.mrb[50].mxu0  ;;  %v18804_v37 = vrot.slane %v18796_v63, %v27333_v7 }
 0x4b0   : > { %v18078_v24 = vcombine.high %v18076_v51, %v18076_v51  ;;  %v25960_v59 = vadd.f32 %v25959_v13, %v17493_v50  ;;  %v25359_v29 = vpop.f32.mrb[51].mxu0  ;;  %v18811_v15 = vrot.slane %v18797_v25, %v27333_v7  ;;  %v18813_v38 = vcombine.low %v18077_v61, %v18076_v51 }
 0x4b1   : > { %v18079_v21 = vcombine.high %v17645_v26, %v17645_v26  ;;  %v31547_v12 = vrot.slane %v17645_v26, %v27333_v7  ;;  %25440 = vmatmul.mubr.msk.f32.gmra.mrb[110].mxu1 %vm19282_vm4, %v31543_v2  ;;  %v25963_v50 = vadd.f32 %v31311_v32, %v30927_v58 }
 0x4b2   : > { %v17646_v35 = vmax.f32 %v25960_v59, 0.0  ;;  %v18812_v10 = vcombine.low %v18804_v37, %v18811_v15  ;;  %v18821_v13 = vrot.slane %v18813_v38, %v27333_v7 }
 0x4b3   : > { %v18093_v57 = vrot.slane %v18079_v21, %v27333_v7  ;;  %v18814_v3 = vcombine.low %v18078_v24, %v31547_v12  ;;  %v17498_v20 = vpop.f32.mrb[52].mxu0 }
 0x4b4   : > { %v18096_v39 = vcombine.high %v17646_v35, %v17646_v35  ;;  %v18103_v62 = vrot.slane %v17646_v35, %v27333_v7  ;;  %v25962_v28 = vadd.f32 %v25961_v33, %v17498_v20  ;;  %v25362_v47 = vpop.f32.mrb[53].mxu0  ;;  %v31562_v26 = vsel %vm18397_vm3, %v18812_v10, 0.0  ;;  %v5979_v35 = vpop.f32.mrb[90].mxu1 }
 0x4b5   : > { %v18095_v51 = vcombine.high %v18093_v57, %v18093_v57  ;;  %v18828_v61 = vrot.slane %v18814_v3, %v27333_v7  ;;  %25442 = vmatprep.mubr.msk.f32.mxu1 %vm19282_vm4, %v31562_v26  ;;  %v24657_v20 = vpop.f32.mrb[91].mxu1 }
 0x4b6   : > { %v18110_v34 = vrot.slane %v18096_v39, %v27333_v7  ;;  %v18111_v63 = vcombine.high %v18103_v62, %v18103_v62  ;;  %v17647_v25 = vmax.f32 %v25962_v28, 0.0 }
 0x4b7   : > { %v31566_v24 = vcombine.low %v18821_v13, %v18828_v61  ;;  %v18837_v59 = vcombine.low %v18093_v57, %v18095_v51  ;;  %v17503_v29 = vpop.f32.mrb[54].mxu0 }
 0x4b8   : > { %v18112_v15 = vcombine.high %v18110_v34, %v18110_v34  ;;  %v18838_v38 = vcombine.low %v18103_v62, %v18111_v63  ;;  %v18113_v21 = vcombine.high %v17647_v25, %v17647_v25  ;;  %v18120_v33 = vrot.slane %v17647_v25, %v27333_v7  ;;  %v25365_v37 = vpop.f32.mrb[55].mxu0  ;;  %v5984_v25 = vpop.f32.mrb[92].mxu1 }
 0x4b9   : > { %v25964_v3 = vadd.f32 %v25963_v50, %v17503_v29  ;;  %25443 = vmatmul.mubr.msk.f32.gmra.mrb[112].mxu1 %vm19282_vm4, %v31566_v24  ;;  %v25965_v62 = vadd.f32 %v31311_v32, %v30939_v6  ;;  %v18845_v47 = vrot.slane %v18837_v59, %v27333_v7 }
 0x4ba   : > { %v18852_v58 = vrot.slane %v18838_v38, %v27333_v7  ;;  %v18854_v39 = vcombine.low %v18110_v34, %v18112_v15  ;;  %v31575_v57 = vrot.slane %v18113_v21, %v27333_v7  ;;  %v18128_v28 = vcombine.high %v18120_v33, %v18120_v33  ;;  %v24660_v38 = vpop.f32.mrb[93].mxu1 }
 0x4bb   : > { %v17648_v10 = vmax.f32 %v25964_v3, 0.0  ;;  %v17508_v13 = vpop.f32.mrb[56].mxu0  ;;  %v25967_v21 = vadd.f32 %v31311_v32, %v30953_v48 }
 0x4bc   : > { %v18855_v51 = vcombine.low %v18120_v33, %v18128_v28  ;;  %v18129_v61 = vcombine.high %v31575_v57, %v31575_v57  ;;  %v25368_v63 = vpop.f32.mrb[57].mxu0  ;;  %v25966_v29 = vadd.f32 %v25965_v62, %v17508_v13  ;;  %v18853_v15 = vcombine.low %v18845_v47, %v18852_v58 }
 0x4bd   : > { %v18130_v50 = vcombine.high %v17648_v10, %v17648_v10  ;;  %v18137_v34 = vrot.slane %v17648_v10, %v27333_v7  ;;  %v18862_v6 = vrot.slane %v18854_v39, %v27333_v7 }
 0x4be   : > { %v18869_v59 = vrot.slane %v18855_v51, %v27333_v7  ;;  %v17649_v3 = vmax.f32 %v25966_v29, 0.0  ;;  %v31592_v58 = vsel %vm18397_vm3, %v18853_v15, 0.0  ;;  %v25969_v51 = vadd.f32 %v31311_v32, %v30967_v16 }
 0x4bf   : > { %v18144_v33 = vrot.slane %v18130_v50, %v27333_v7  ;;  %v18145_v37 = vcombine.high %v18137_v34, %v18137_v34  ;;  %v18878_v35 = vcombine.low %v18129_v61, %v18137_v34  ;;  %v17513_v20 = vpop.f32.mrb[58].mxu0  ;;  %25445 = vmatprep.mubr.msk.f32.mxu1 %vm19282_vm4, %v31592_v58 }
 0x4c0   : > { %v31588_v28 = vcombine.low %v18862_v6, %v18869_v59  ;;  %v25968_v63 = vadd.f32 %v25967_v21, %v17513_v20  ;;  %v25371_v62 = vpop.f32.mrb[59].mxu0  ;;  %v18147_v10 = vcombine.high %v17649_v3, %v17649_v3  ;;  %v18154_v39 = vrot.slane %v17649_v3, %v27333_v7 }
 0x4c1   : > { %v18879_v47 = vcombine.low %v18145_v37, %v18144_v33  ;;  %v18146_v48 = vcombine.high %v18144_v33, %v18144_v33  ;;  %v18886_v61 = vrot.slane %v18878_v35, %v27333_v7  ;;  %v25971_v37 = vadd.f32 %v31311_v32, %v30978_v4 }
 0x4c2   : > { %v17650_v13 = vmax.f32 %v25968_v63, 0.0  ;;  %25446 = vmatmul.mubr.msk.f32.gmra.mrb[114].mxu1 %vm19282_vm4, %v31588_v28  ;;  %v31604_v50 = vrot.slane %v18147_v10, %v27333_v7  ;;  %v18162_v29 = vcombine.high %v18154_v39, %v18154_v39 }
 0x4c3   : > { %v18893_v25 = vrot.slane %v18879_v47, %v27333_v7  ;;  %v17518_v34 = vpop.f32.mrb[60].mxu0  ;;  %v18895_v15 = vcombine.low %v18146_v48, %v18154_v39 }
 0x4c4   : > { %v18164_v38 = vcombine.high %v17650_v13, %v17650_v13  ;;  %v18171_v21 = vrot.slane %v17650_v13, %v27333_v7  ;;  %v25374_v6 = vpop.f32.mrb[61].mxu0  ;;  %v25970_v59 = vadd.f32 %v25969_v51, %v17518_v34  ;;  %v18896_v16 = vcombine.low %v18162_v29, %v31604_v50 }
 0x4c5   : > { %v18894_v33 = vcombine.low %v18886_v61, %v18893_v25  ;;  %v18903_v47 = vrot.slane %v18895_v15, %v27333_v7  ;;  %v25973_v25 = vadd.f32 %v31311_v32, %v30988_v18 }
 0x4c6   : > { %v18178_v35 = vrot.slane %v18164_v38, %v27333_v7  ;;  %v18179_v3 = vcombine.high %v18171_v21, %v18171_v21  ;;  %v17651_v20 = vmax.f32 %v25970_v59, 0.0  ;;  %v18910_v48 = vrot.slane %v18896_v16, %v27333_v7 }
 0x4c7   : > { %v17523_v63 = vpop.f32.mrb[62].mxu0  ;;  %v31613_v62 = vsel %vm18397_vm3, %v18894_v33, 0.0 }
 0x4c8   : > { %32903 = vst [vmem:[#allocation9_spill] sm:$0xff] %v31613_v62  ;;  %v18180_v10 = vcombine.high %v18178_v35, %v18178_v35  ;;  %v25972_v39 = vadd.f32 %v25971_v37, %v17523_v63  ;;  %25448 = vmatprep.mubr.msk.f32.mxu1 %vm19282_vm4, %v31613_v62  ;;  %v25377_v4 = vpop.f32.mrb[63].mxu0  ;;  %v18919_v13 = vcombine.low %v18171_v21, %v18179_v3 }
 0x4c9   : > { %v18181_v51 = vcombine.high %v17651_v20, %v17651_v20  ;;  %v18188_v61 = vrot.slane %v17651_v20, %v27333_v7  ;;  %v31622_v34 = vcombine.low %v18903_v47, %v18910_v48 }
 0x4ca   : > { %v18920_v29 = vcombine.low %v18178_v35, %v18180_v10  ;;  %v17652_v38 = vmax.f32 %v25972_v39, 0.0  ;;  %v18927_v18 = vrot.slane %v18919_v13, %v27333_v7  ;;  %v25975_v10 = vadd.f32 %v31311_v32, %v30998_v42 }
 0x4cb   : > { %v18195_v15 = vrot.slane %v18181_v51, %v27333_v7  ;;  %v18196_v6 = vcombine.high %v18188_v61, %v18188_v61  ;;  %v17528_v59 = vpop.f32.mrb[64].mxu0  ;;  %25449 = vmatmul.mubr.msk.f32.gmra.mrb[116].mxu1 %vm19282_vm4, %v31622_v34  ;;  %v25977_v42 = vadd.f32 %v31311_v32, %v31008_v44 }
 0x4cc   : > { %v18934_v33 = vrot.slane %v18920_v29, %v27333_v7  ;;  %v18198_v37 = vcombine.high %v17652_v38, %v17652_v38  ;;  %v31627_v16 = vrot.slane %v17652_v38, %v27333_v7  ;;  %v25974_v21 = vadd.f32 %v25973_v25, %v17528_v59  ;;  %v25380_v3 = vpop.f32.mrb[65].mxu0 }
 0x4cd   : > { %v18197_v20 = vcombine.high %v18195_v15, %v18195_v15  ;;  %v18936_v35 = vcombine.low %v18188_v61, %v18196_v6 }
 0x4ce   : > { %v18212_v63 = vrot.slane %v18198_v37, %v27333_v7  ;;  %v18213_v47 = vcombine.high %v31627_v16, %v31627_v16  ;;  %v17653_v48 = vmax.f32 %v25974_v21, 0.0  ;;  %v18935_v51 = vcombine.low %v18927_v18, %v18934_v33 }
 0x4cf   : > { %v18937_v39 = vcombine.low %v18195_v15, %v18197_v20  ;;  %v17533_v4 = vpop.f32.mrb[66].mxu0  ;;  %v18944_v29 = vrot.slane %v18936_v35, %v27333_v7 }
 0x4d0   : > { %v18214_v25 = vcombine.high %v18212_v63, %v18212_v63  ;;  %v18215_v38 = vcombine.high %v17653_v48, %v17653_v48  ;;  %v25383_v59 = vpop.f32.mrb[67].mxu0  ;;  %v18222_v61 = vrot.slane %v17653_v48, %v27333_v7  ;;  %v25976_v6 = vadd.f32 %v25975_v10, %v17533_v4 }
 0x4d1   : > { %v18951_v13 = vrot.slane %v18937_v39, %v27333_v7  ;;  %v31642_v37 = vsel %vm18397_vm3, %v18935_v51, 0.0  ;;  %v18960_v15 = vcombine.low %v18213_v47, %v18212_v63  ;;  %v32905_v63 = vld [vmem:[#allocation2_spill] sm:$0xff] }
 0x4d2   : > { %32904 = vst [vmem:[#allocation10_spill] sm:$0xff] %v31642_v37  ;;  %v18229_v33 = vrot.slane %v18215_v38, %v27333_v7  ;;  %25451 = vmatprep.mubr.msk.f32.mxu1 %vm19282_vm4, %v31642_v37  ;;  %v18230_v3 = vcombine.high %v18222_v61, %v18222_v61  ;;  %v18961_v18 = vcombine.low %v18214_v25, %v18222_v61  ;;  %v17654_v20 = vmax.f32 %v25976_v6, 0.0 }
 0x4d3   : > { %v31649_v21 = vcombine.low %v18944_v29, %v18951_v13  ;;  %v17538_v35 = vpop.f32.mrb[68].mxu0  ;;  %v25979_v47 = vadd.f32 %v31311_v32, %v32905_v63  ;;  %v18968_v29 = vrot.slane %v18960_v15, %v27333_v7 }
 0x4d4   : > { %v18231_v48 = vcombine.high %v18229_v33, %v18229_v33  ;;  %v25978_v10 = vadd.f32 %v25977_v42, %v17538_v35  ;;  %v25386_v39 = vpop.f32.mrb[69].mxu0  ;;  %v18975_v4 = vrot.slane %v18961_v18, %v27333_v7  ;;  %v18977_v51 = vcombine.low %v18230_v3, %v18229_v33 }
 0x4d5   : > { %v18232_v59 = vcombine.high %v17654_v20, %v17654_v20  ;;  %v31653_v44 = vrot.slane %v17654_v20, %v27333_v7  ;;  %25452 = vmatmul.mubr.msk.f32.gmra.mrb[118].mxu1 %vm19282_vm4, %v31649_v21 }
 0x4d6   : > { %v17655_v25 = vmax.f32 %v25978_v10, 0.0  ;;  %v18976_v18 = vcombine.low %v18968_v29, %v18975_v4  ;;  %v18985_v20 = vrot.slane %v18977_v51, %v27333_v7 }
 0x4d7   : > { %v18246_v38 = vrot.slane %v18232_v59, %v27333_v7  ;;  %v18978_v13 = vcombine.low %v18231_v48, %v31653_v44  ;;  %v17543_v61 = vpop.f32.mrb[70].mxu0  ;;  %v32907_v48 = vld [vmem:[#allocation3_spill] sm:$0xff] }
 0x4d8   : > { %v18249_v6 = vcombine.high %v17655_v25, %v17655_v25  ;;  %v18256_v42 = vrot.slane %v17655_v25, %v27333_v7  ;;  %v25980_v33 = vadd.f32 %v25979_v47, %v17543_v61  ;;  %v25389_v3 = vpop.f32.mrb[71].mxu0  ;;  %v31668_v59 = vsel %vm18397_vm3, %v18976_v18, 0.0 }
 0x4d9   : > { %v18248_v35 = vcombine.high %v18246_v38, %v18246_v38  ;;  %v18992_v39 = vrot.slane %v18978_v13, %v27333_v7  ;;  %32906 = vst [vmem:[#allocation2_spill] sm:$0xff] %v31668_v59  ;;  %v25981_v1 = vadd.f32 %v31311_v32, %v32907_v48  ;;  %25454 = vmatprep.mubr.msk.f32.mxu1 %vm19282_vm4, %v31668_v59  ;;  %v32911_v59 = vld [vmem:[#allocation5_spill] sm:$0xff] }
 0x4da   : > { %v18263_v63 = vrot.slane %v18249_v6, %v27333_v7  ;;  %v18264_v15 = vcombine.high %v18256_v42, %v18256_v42  ;;  %v17656_v10 = vmax.f32 %v25980_v33, 0.0 }
 0x4db   : > { %v31672_v25 = vcombine.low %v18985_v20, %v18992_v39  ;;  %v19001_v47 = vcombine.low %v18246_v38, %v18248_v35  ;;  %v17548_v4 = vpop.f32.mrb[72].mxu0  ;;  %v32910_v35 = vld [vmem:[#allocation4_spill] sm:$0xff] }
 0x4dc   : > { %v18265_v51 = vcombine.high %v18263_v63, %v18263_v63  ;;  %v19002_v29 = vcombine.low %v18256_v42, %v18264_v15  ;;  %v18266_v13 = vcombine.high %v17656_v10, %v17656_v10  ;;  %v18273_v61 = vrot.slane %v17656_v10, %v27333_v7  ;;  %v25392_v6 = vpop.f32.mrb[73].mxu0 }
 0x4dd   : > { %32908 = vst [vmem:[#allocation3_spill] sm:$0xff] %v31672_v25  ;;  %v25982_v33 = vadd.f32 %v25981_v1, %v17548_v4  ;;  %25455 = vmatmul.mubr.msk.f32.gmra.mrb[120].mxu1 %vm19282_vm4, %v31672_v25  ;;  %v25983_v39 = vadd.f32 %v31311_v32, %v32910_v35  ;;  %v19009_v42 = vrot.slane %v19001_v47, %v27333_v7 }
 0x4de   : > { %v19016_v3 = vrot.slane %v19002_v29, %v27333_v7  ;;  %v19018_v18 = vcombine.low %v18263_v63, %v18265_v51  ;;  %v31681_v20 = vrot.slane %v18266_v13, %v27333_v7  ;;  %v18281_v38 = vcombine.high %v18273_v61, %v18273_v61  ;;  %v27261_v13 = vld [vmem:[%s32789_s2] ss:$0 sm:$0xff] }
 0x4df   : > { %v17657_v15 = vmax.f32 %v25982_v33, 0.0  ;;  %v17553_v48 = vpop.f32.mrb[74].mxu0  ;;  %v25985_v32 = vadd.f32 %v27261_v13, %v32911_v59 }
 0x4e0   : > { %32909 = vst [vmem:[#allocation11_spill] sm:$0xff] %v31681_v20  ;;  %v19019_v10 = vcombine.low %v18273_v61, %v18281_v38  ;;  %v18282_v1 = vcombine.high %v31681_v20, %v31681_v20  ;;  %v25395_v4 = vpop.f32.mrb[75].mxu0  ;;  %v25984_v63 = vadd.f32 %v25983_v39, %v17553_v48  ;;  %v19017_v51 = vcombine.low %v19009_v42, %v19016_v3 }
 0x4e1   : > { %v18283_v6 = vcombine.high %v17657_v15, %v17657_v15  ;;  %v18290_v29 = vrot.slane %v17657_v15, %v27333_v7  ;;  %v19026_v47 = vrot.slane %v19018_v18, %v27333_v7 }
 0x4e2   : > { %v19033_v33 = vrot.slane %v19019_v10, %v27333_v7  ;;  %v17658_v4 = vmax.f32 %v25984_v63, 0.0  ;;  %v31702_v3 = vsel %vm18397_vm3, %v19017_v51, 0.0  ;;  %v32912_v10 = vld [vmem:[#allocation6_spill] sm:$0xff]  ;;  %v17788_v51 = vcombine.high %v31328_v54, %v31328_v54 }
 0x4e3   : > { %v18297_v61 = vrot.slane %v18283_v6, %v27333_v7  ;;  %v18298_v38 = vcombine.high %v18290_v29, %v18290_v29  ;;  %v19042_v35 = vcombine.low %v18282_v1, %v18290_v29  ;;  %v17558_v20 = vpop.f32.mrb[76].mxu0  ;;  %25457 = vmatprep.mubr.msk.f32.mxu1 %vm19282_vm4, %v31702_v3  ;;  %v25987_v1 = vadd.f32 %v27261_v13, %v32912_v10 }
 0x4e4   : > { %v31696_v25 = vcombine.low %v19026_v47, %v19033_v33  ;;  %v31698_v39 = vadd.f32 %v25985_v32, %v17558_v20  ;;  %v25398_v42 = vpop.f32.mrb[77].mxu0  ;;  %v18300_v18 = vcombine.high %v17658_v4, %v17658_v4  ;;  %v18307_v48 = vrot.slane %v17658_v4, %v27333_v7 }
 0x4e5   : > { %v19043_v59 = vcombine.low %v18298_v38, %v18297_v61  ;;  %v18299_v15 = vcombine.high %v18297_v61, %v18297_v61  ;;  %v19050_v20 = vrot.slane %v19042_v35, %v27333_v7  ;;  %v31718_v61 = vadd.s32 16, %v27320_v5  ;;  %v32914_v42 = vld [vmem:[#allocation7_spill] sm:$0xff] }
 0x4e6   : > { %25458 = vmatmul.mubr.msk.f32.gmra.mrb[122].mxu1 %vm19282_vm4, %v31696_v25  ;;  %v31713_v29 = vrot.slane %v18300_v18, %v27333_v7  ;;  %v18315_v32 = vcombine.high %v18307_v48, %v18307_v48  ;;  %v25989_v35 = vadd.f32 %v27261_v13, %v32914_v42  ;;  %v18508_v54 = vrot.slane %v17788_v51, %v27333_v7 }
 0x4e7   : > { %v19057_v6 = vrot.slane %v19043_v59, %v27333_v7  ;;  %v17563_v63 = vpop.f32.mrb[78].mxu0  ;;  %v19059_v47 = vcombine.low %v18299_v15, %v18307_v48  ;;  %32913 = vst [vmem:[#allocation4_spill] sm:$0xff] %v31718_v61  ;;  %vm18408_vm5 = vcmp.le.s32.totalorder %v31718_v61, 16  ;;  %v31737_v13 = vrot.slane %v32899_v53, 1 }
 0x4e8   : > { %v25401_v33 = vpop.f32.mrb[79].mxu0  ;;  %v31720_v38 = vadd.f32 %v25987_v1, %v17563_v63  ;;  %v19060_v59 = vcombine.low %v18315_v32, %v31713_v29  ;;  %v23366_v63 = vld [vmem:[%s32790_s3 + $0x38] sm:$0xff]  ;;  %v17857_v51 = vcombine.high %v31392_v23, %v31392_v23  ;;  %v19659_v32 = vrot.slane %v31347_v40, 1 }
 0x4e9   : > { %v19058_v4 = vcombine.low %v19050_v20, %v19057_v6  ;;  %v19067_v15 = vrot.slane %v19059_v47, %v27333_v7  ;;  %32916 = vst [vmem:[#allocation6_spill] sm:$0xff] %v31737_v13  ;;  %v23365_v6 = vld [vmem:[%s32790_s3 + $0x30] sm:$0xff]  ;;  %v31754_v47 = vsel %vm18408_vm5, %v18508_v54, 0.0  ;;  %v19658_v42 = vrot.slane %v31338_v30, 1 }
 0x4ea   : > { %v19074_v48 = vrot.slane %v19060_v59, %v27333_v7  ;;  %v19661_v23 = vrot.slane %v31754_v47, 1  ;;  %v18590_v59 = vrot.slane %v17857_v51, %v27333_v7  ;;  %v19664_v54 = vrot.slane %v31375_v46, 1 }
 0x4eb   : > { %v17568_v10 = vpop.f32.mrb[80].mxu0  ;;  %v31726_v18 = vsel %vm18397_vm3, %v19058_v4, 0.0  ;;  %v18549_v4 = vrot.slane %v31354_v55, %v27333_v7  ;;  %v19663_v55 = vrot.slane %v31379_v22, 1 }
 0x4ec   : > { %v31731_v33 = vadd.f32 %v25989_v35, %v17568_v10  ;;  %25460 = vmatprep.mubr.msk.f32.mxu1 %vm19282_vm4, %v31726_v18  ;;  %v25404_v1 = vpop.f32.mrb[81].mxu0  ;;  %v31739_v20 = vcombine.low %v19067_v15, %v19074_v48  ;;  %v31761_v35 = vpack.c.bf16 %v23366_v63, %v23365_v6  ;;  %v31768_v10 = vsel %vm19652_vm6, %v19658_v42, %v19659_v32 }
 0x4ed   : > { %v31777_v15 = vsel %vm18408_vm5, %v18549_v4, 0.0  ;;  %v31781_v48 = vsel %vm19652_vm6, %v19659_v32, %v19661_v23  ;;  %v17941_v1 = vcombine.high %v31441_v56, %v31441_v56  ;;  %v19669_v6 = vrot.slane %v31410_v36, 1 }
 0x4ee   : > { %32915 = vst [vmem:[#allocation5_spill] sm:$0xff] %v31731_v33  ;;  %25461 = vmatmul.mubr.msk.f32.gmra.mrb[124].mxu1 %vm19282_vm4, %v31739_v20  ;;  %v31793_v63 = vsel %vm18408_vm5, %v18590_v59, 0.0  ;;  %v19666_v51 = vrot.slane %v31777_v15, 1  ;;  %v18631_v56 = vrot.slane %v31415_v60, %v27333_v7  ;;  %v19668_v32 = vrot.slane %v31401_v52, 1 }
 0x4ef   : > { %25467 = vmatprep.mubr.msk.f32.mxu1 %vm19282_vm4, %v31737_v13  ;;  %v19671_v42 = vrot.slane %v31793_v63, 1  ;;  %v18672_v23 = vrot.slane %v17941_v1, %v27333_v7  ;;  %v18010_v1 = vcombine.high %v31498_v11, %v31498_v11  ;;  %v18713_v11 = vrot.slane %v31469_v45, %v27333_v7 }
 0x4f0   : > { %v31802_v4 = vsel %vm19652_vm6, %v19664_v54, %v19666_v51  ;;  %v31809_v59 = vsel %vm19652_vm6, %v19668_v32, %v19669_v6  ;;  %v31816_v60 = vsel %vm18408_vm5, %v18631_v56, 0.0  ;;  %v19683_v45 = vrot.slane %v31486_v43, 1 }
 0x4f1   : > { %32918 = vst [vmem:[#allocation12_spill] sm:$0xff] %v31802_v4  ;;  %32919 = vst [vmem:[#allocation13_spill] sm:$0xff] %v31809_v59  ;;  %v31820_v51 = vsel %vm19652_vm6, %v19669_v6, %v19671_v42  ;;  %v31832_v56 = vsel %vm18408_vm5, %v18672_v23, 0.0  ;;  %v19676_v6 = vrot.slane %v31816_v60, 1  ;;  %v19678_v42 = vrot.slane %v31456_v31, 1 }
 0x4f2   : > { %25468 = vmatmul.mubr.msk.f32.vlgmr.msra.gmra.mrb[94].mxu1 %vm19282_vm4, %v31737_v13  ;;  %32920 = vst [vmem:[#allocation14_spill] sm:$0xff] %v31820_v51  ;;  %v19679_v13 = vrot.slane %v31460_v17, 1 }
 0x4f3   : > { %25890 = vmatpush3.bf16.msra.mxu1 %v31372_v27  ;;  %25470 = vmatprep.mubr.msk.f32.mxu1 %vm19282_vm4, %v31768_v10  ;;  %v31788_v27 = vsel %vm19652_vm6, %v19663_v55, %v19664_v54  ;;  %v19674_v55 = vrot.slane %v31437_v8, 1  ;;  %v19673_v54 = vrot.slane %v31430_v19, 1 }
 0x4f4   : > { %25892 = vmatprep.subr.bf16.mxu1 %v31761_v35  ;;  %32917 = vst [vmem:[#allocation7_spill] sm:$0xff] %v31788_v27  ;;  %v31848_v23 = vsel %vm19652_vm6, %v19678_v42, %v19679_v13 }
 0x4f5   : > { %v31827_v32 = vsel %vm19652_vm6, %v19673_v54, %v19674_v55  ;;  %v31841_v33 = vsel %vm19652_vm6, %v19674_v55, %v19676_v6  ;;  %v19681_v54 = vrot.slane %v31832_v56, 1  ;;  %32923 = vst [vmem:[#allocation17_spill] sm:$0xff] %v31848_v23  ;;  %v31856_v55 = vsel %vm18408_vm5, %v18713_v11, 0.0 }
 0x4f6   : > { %25471 = vmatmul.mubr.msk.f32.gmra.mrb[96].mxu1 %vm19282_vm4, %v31781_v48  ;;  %32921 = vst [vmem:[#allocation15_spill] sm:$0xff] %v31827_v32  ;;  %32922 = vst [vmem:[#allocation16_spill] sm:$0xff] %v31841_v33  ;;  %v19688_v11 = vrot.slane %v31507_v41, 1 }
 0x4f7   : > { %25473 = vmatprep.mubr.msk.f32.mxu1 %vm19282_vm4, %v31788_v27  ;;  %v31859_v6 = vsel %vm19652_vm6, %v19679_v13, %v19681_v54  ;;  %v19686_v13 = vrot.slane %v31856_v55, 1 }
 0x4f8   : > { %32924 = vst [vmem:[#allocation18_spill] sm:$0xff] %v31859_v6 }
 0x4fa   : > { %25474 = vmatmul.mubr.msk.f32.gmra.mrb[98].mxu1 %vm19282_vm4, %v31802_v4 }
 0x4fb   : > { %25476 = vmatprep.mubr.msk.f32.mxu1 %vm19282_vm4, %v31809_v59  ;;  %v32940_v59 = vld [vmem:[#allocation2_spill] sm:$0xff] }
 0x4fc   : > { %v19718_v4 = vrot.slane %v32940_v59, 1 }
 0x4fe   : > { %25477 = vmatmul.mubr.msk.f32.gmra.mrb[100].mxu1 %vm19282_vm4, %v31820_v51  ;;  %v18754_v51 = vrot.slane %v18010_v1, %v27333_v7  ;;  %v18094_v1 = vcombine.high %v31547_v12, %v31547_v12  ;;  %v18795_v12 = vrot.slane %v31521_v49, %v27333_v7 }
 0x4ff   : > { %25479 = vmatprep.mubr.msk.f32.mxu1 %vm19282_vm4, %v31827_v32  ;;  %v19684_v32 = vrot.slane %v31482_v0, 1 }
 0x500   : > { %v31894_v49 = vsel %vm18408_vm5, %v18795_v12, 0.0 }
 0x501   : > { %v31866_v42 = vsel %vm19652_vm6, %v19683_v45, %v19684_v32  ;;  %v31880_v54 = vsel %vm19652_vm6, %v19684_v32, %v19686_v13  ;;  %v19693_v32 = vrot.slane %v31536_v14, 1 }
 0x502   : > { %25480 = vmatmul.mubr.msk.f32.gmra.mrb[102].mxu1 %vm19282_vm4, %v31841_v33  ;;  %32925 = vst [vmem:[#allocation19_spill] sm:$0xff] %v31866_v42  ;;  %v31871_v33 = vsel %vm18408_vm5, %v18754_v51, 0.0  ;;  %32926 = vst [vmem:[#allocation20_spill] sm:$0xff] %v31880_v54 }
 0x503   : > { %25482 = vmatprep.mubr.msk.f32.mxu1 %vm19282_vm4, %v31848_v23  ;;  %v19689_v23 = vrot.slane %v31516_v9, 1  ;;  %v19691_v45 = vrot.slane %v31871_v33, 1 }
 0x505   : > { %v31887_v51 = vsel %vm19652_vm6, %v19688_v11, %v19689_v23  ;;  %v31898_v13 = vsel %vm19652_vm6, %v19689_v23, %v19691_v45  ;;  %v19696_v23 = vrot.slane %v31894_v49, 1  ;;  %v19698_v45 = vrot.slane %v31562_v26, 1 }
 0x506   : > { %25483 = vmatmul.mubr.msk.f32.gmra.mrb[104].mxu1 %vm19282_vm4, %v31859_v6  ;;  %v18836_v6 = vrot.slane %v18094_v1, %v27333_v7  ;;  %32927 = vst [vmem:[#allocation21_spill] sm:$0xff] %v31887_v51  ;;  %32928 = vst [vmem:[#allocation22_spill] sm:$0xff] %v31898_v13  ;;  %v18163_v1 = vcombine.high %v31604_v50, %v31604_v50  ;;  %v18877_v50 = vrot.slane %v31575_v57, %v27333_v7 }
 0x507   : > { %25485 = vmatprep.mubr.msk.f32.mxu1 %vm19282_vm4, %v31866_v42  ;;  %v19694_v42 = vrot.slane %v31543_v2, 1  ;;  %v19703_v57 = vrot.slane %v31592_v58, 1 }
 0x508   : > { %v31910_v12 = vsel %vm18408_vm5, %v18836_v6, 0.0 }
 0x509   : > { %v31905_v11 = vsel %vm19652_vm6, %v19693_v32, %v19694_v42  ;;  %v19701_v32 = vrot.slane %v31910_v12, 1 }
 0x50a   : > { %25486 = vmatmul.mubr.msk.f32.gmra.mrb[106].mxu1 %vm19282_vm4, %v31880_v54  ;;  %32929 = vst [vmem:[#allocation23_spill] sm:$0xff] %v31905_v11  ;;  %v18918_v54 = vrot.slane %v18163_v1, %v27333_v7  ;;  %v18247_v1 = vcombine.high %v31653_v44, %v31653_v44  ;;  %v18959_v44 = vrot.slane %v31627_v16, %v27333_v7 }
 0x50b   : > { %25488 = vmatprep.mubr.msk.f32.mxu1 %vm19282_vm4, %v31887_v51  ;;  %v19699_v51 = vrot.slane %v31566_v24, 1 }
 0x50c   : > { %v31972_v16 = vsel %vm18408_vm5, %v18959_v44, 0.0 }
 0x50d   : > { %v31926_v6 = vsel %vm19652_vm6, %v19698_v45, %v19699_v51 }
 0x50e   : > { %25489 = vmatmul.mubr.msk.f32.gmra.mrb[108].mxu1 %vm19282_vm4, %v31898_v13  ;;  %v31919_v13 = vsel %vm19652_vm6, %v19694_v42, %v19696_v23  ;;  %32931 = vst [vmem:[#allocation25_spill] sm:$0xff] %v31926_v6  ;;  %v31934_v42 = vsel %vm18408_vm5, %v18877_v50, 0.0  ;;  %v31937_v23 = vsel %vm19652_vm6, %v19699_v51, %v19701_v32  ;;  %v19708_v50 = vrot.slane %v31613_v62, 1 }
 0x50f   : > { %25491 = vmatprep.mubr.msk.f32.mxu1 %vm19282_vm4, %v31905_v11  ;;  %32930 = vst [vmem:[#allocation24_spill] sm:$0xff] %v31919_v13  ;;  %v19704_v11 = vrot.slane %v31588_v28, 1  ;;  %32932 = vst [vmem:[#allocation26_spill] sm:$0xff] %v31937_v23  ;;  %v19706_v51 = vrot.slane %v31934_v42, 1 }
 0x511   : > { %v31944_v45 = vsel %vm19652_vm6, %v19703_v57, %v19704_v11  ;;  %v31958_v32 = vsel %vm19652_vm6, %v19704_v11, %v19706_v51  ;;  %v19713_v11 = vrot.slane %v31642_v37, 1 }
 0x512   : > { %25492 = vmatmul.mubr.msk.f32.gmra.mrb[110].mxu1 %vm19282_vm4, %v31919_v13  ;;  %32933 = vst [vmem:[#allocation27_spill] sm:$0xff] %v31944_v45  ;;  %v31949_v13 = vsel %vm18408_vm5, %v18918_v54, 0.0  ;;  %32934 = vst [vmem:[#allocation28_spill] sm:$0xff] %v31958_v32 }
 0x513   : > { %25494 = vmatprep.mubr.msk.f32.mxu1 %vm19282_vm4, %v31926_v6  ;;  %v19709_v6 = vrot.slane %v31622_v34, 1  ;;  %v19711_v57 = vrot.slane %v31949_v13, 1 }
 0x515   : > { %v31965_v54 = vsel %vm19652_vm6, %v19708_v50, %v19709_v6  ;;  %v31976_v51 = vsel %vm19652_vm6, %v19709_v6, %v19711_v57  ;;  %v19716_v6 = vrot.slane %v31972_v16, 1  ;;  %v32939_v57 = vld [vmem:[#allocation11_spill] sm:$0xff] }
 0x516   : > { %25495 = vmatmul.mubr.msk.f32.gmra.mrb[112].mxu1 %vm19282_vm4, %v31937_v23  ;;  %v19000_v23 = vrot.slane %v18247_v1, %v27333_v7  ;;  %32935 = vst [vmem:[#allocation29_spill] sm:$0xff] %v31965_v54  ;;  %32936 = vst [vmem:[#allocation30_spill] sm:$0xff] %v31976_v51  ;;  %v18316_v1 = vcombine.high %v31713_v29, %v31713_v29  ;;  %v19041_v29 = vrot.slane %v32939_v57, %v27333_v7 }
 0x517   : > { %25497 = vmatprep.mubr.msk.f32.mxu1 %vm19282_vm4, %v31944_v45  ;;  %v19714_v45 = vrot.slane %v31649_v21, 1  ;;  %v19723_v57 = vrot.slane %v31702_v3, 1 }
 0x518   : > { %v31988_v44 = vsel %vm18408_vm5, %v19000_v23, 0.0  ;;  %v19082_v27 = vrot.slane %v18316_v1, %v27333_v7  ;;  %v19729_v1 = vrot.slane %v31739_v20, 1 }
 0x519   : > { %v31983_v50 = vsel %vm19652_vm6, %v19713_v11, %v19714_v45  ;;  %v19721_v11 = vrot.slane %v31988_v44, 1 }
 0x51a   : > { %25498 = vmatmul.mubr.msk.f32.gmra.mrb[114].mxu1 %vm19282_vm4, %v31958_v32  ;;  %32937 = vst [vmem:[#allocation31_spill] sm:$0xff] %v31983_v50  ;;  %v32938_v32 = vld [vmem:[#allocation3_spill] sm:$0xff] }
 0x51b   : > { %25500 = vmatprep.mubr.msk.f32.mxu1 %vm19282_vm4, %v31965_v54  ;;  %v19719_v54 = vrot.slane %v32938_v32, 1 }
 0x51d   : > { %v32004_v23 = vsel %vm19652_vm6, %v19718_v4, %v19719_v54 }
 0x51e   : > { %25501 = vmatmul.mubr.msk.f32.gmra.mrb[116].mxu1 %vm19282_vm4, %v31976_v51  ;;  %v31997_v51 = vsel %vm19652_vm6, %v19714_v45, %v19716_v6  ;;  %32942 = vst [vmem:[#allocation11_spill] sm:$0xff] %v32004_v23  ;;  %v32012_v45 = vsel %vm18408_vm5, %v19041_v29, 0.0  ;;  %v32015_v6 = vsel %vm19652_vm6, %v19719_v54, %v19721_v11  ;;  %v19728_v54 = vrot.slane %v31726_v18, 1 }
 0x51f   : > { %25503 = vmatprep.mubr.msk.f32.mxu1 %vm19282_vm4, %v31983_v50  ;;  %32941 = vst [vmem:[#allocation3_spill] sm:$0xff] %v31997_v51  ;;  %v19724_v50 = vrot.slane %v31696_v25, 1  ;;  %32943 = vst [vmem:[#allocation2_spill] sm:$0xff] %v32015_v6  ;;  %v19726_v29 = vrot.slane %v32012_v45, 1 }
 0x521   : > { %v32020_v4 = vsel %vm19652_vm6, %v19723_v57, %v19724_v50  ;;  %v32032_v11 = vsel %vm19652_vm6, %v19724_v50, %v19726_v29  ;;  %v32038_v57 = vsel %vm19652_vm6, %v19728_v54, %v19729_v1  ;;  %v23399_v50 = vld [vmem:[%s32790_s3 + $0x40] sm:$0xff]  ;;  %v23400_v29 = vld [vmem:[%s32790_s3 + $0x48] sm:$0xff]  ;;  %v20064_v54 = vrot.slane %v31347_v40, 2 }
 0x522   : > { %25504 = vmatmul.mubr.msk.f32.gmra.mrb[118].mxu1 %vm19282_vm4, %v31997_v51  ;;  %32944 = vst [vmem:[#allocation32_spill] sm:$0xff] %v32020_v4  ;;  %32945 = vst [vmem:[#allocation33_spill] sm:$0xff] %v32032_v11 }
 0x523   : > { %25506 = vmatprep.mubr.msk.f32.mxu1 %vm19282_vm4, %v32004_v23  ;;  %v32025_v23 = vsel %vm18408_vm5, %v19082_v27, 0.0  ;;  %32946 = vst [vmem:[#allocation34_spill] sm:$0xff] %v32038_v57  ;;  %v32043_v27 = vrot.slane %v32899_v53, 2  ;;  %v20066_v53 = vrot.slane %v31754_v47, 2 }
 0x525   : > { %32947 = vst [vmem:[#allocation35_spill] sm:$0xff] %v32043_v27 }
 0x526   : > { %25507 = vmatmul.mubr.msk.f32.gmra.mrb[120].mxu1 %vm19282_vm4, %v32015_v6  ;;  %v19731_v6 = vrot.slane %v32025_v23, 1 }
 0x527   : > { %25509 = vmatprep.mubr.msk.f32.mxu1 %vm19282_vm4, %v32020_v4 }
 0x528   : > { %v32046_v61 = vsel %vm19652_vm6, %v19729_v1, %v19731_v6  ;;  %v20063_v6 = vrot.slane %v31338_v30, 2  ;;  %v32060_v1 = vpack.c.bf16 %v23400_v29, %v23399_v50  ;;  %v32075_v50 = vsel %vm20057_vm7, %v20064_v54, %v20066_v53 }
 0x529   : > { %32948 = vst [vmem:[#allocation36_spill] sm:$0xff] %v32046_v61  ;;  %v20074_v29 = vrot.slane %v31410_v36, 2  ;;  %v20076_v53 = vrot.slane %v31793_v63, 2  ;;  %v20084_v63 = vrot.slane %v31460_v17, 2 }
 0x52a   : > { %25510 = vmatmul.mubr.msk.f32.gmra.mrb[122].mxu1 %vm19282_vm4, %v32032_v11  ;;  %v20068_v11 = vrot.slane %v31379_v22, 2 }
 0x52b   : > { %25512 = vmatprep.mubr.msk.f32.mxu1 %vm19282_vm4, %v32038_v57  ;;  %v32066_v57 = vsel %vm20057_vm7, %v20063_v6, %v20064_v54  ;;  %v20073_v6 = vrot.slane %v31401_v52, 2  ;;  %v20079_v54 = vrot.slane %v31437_v8, 2 }
 0x52e   : > { %25513 = vmatmul.mubr.msk.f32.gmra.mrb[124].mxu1 %vm19282_vm4, %v32046_v61  ;;  %v20069_v61 = vrot.slane %v31375_v46, 2 }
 0x52f   : > { %25519 = vmatprep.mubr.msk.f32.mxu1 %vm19282_vm4, %v32043_v27 }
 0x530   : > { %v32080_v47 = vsel %vm20057_vm7, %v20068_v11, %v20069_v61  ;;  %v32094_v11 = vsel %vm20057_vm7, %v20073_v6, %v20074_v29  ;;  %v20083_v6 = vrot.slane %v31456_v31, 2 }
 0x531   : > { %32949 = vst [vmem:[#allocation37_spill] sm:$0xff] %v32080_v47  ;;  %32950 = vst [vmem:[#allocation38_spill] sm:$0xff] %v32094_v11 }
 0x532   : > { %25520 = vmatmul.mubr.msk.f32.vlgmr.msra.gmra.mrb[94].mxu1 %vm19282_vm4, %v32043_v27 }
 0x533   : > { %25894 = vmatpush3.bf16.msra.mxu1 %v31761_v35  ;;  %25522 = vmatprep.mubr.msk.f32.mxu1 %vm19282_vm4, %v32066_v57  ;;  %v20071_v35 = vrot.slane %v31777_v15, 2  ;;  %v20078_v15 = vrot.slane %v31430_v19, 2 }
 0x534   : > { %25896 = vmatprep.subr.bf16.mxu1 %v32060_v1 }
 0x535   : > { %v32088_v27 = vsel %vm20057_vm7, %v20069_v61, %v20071_v35  ;;  %v32106_v61 = vsel %vm20057_vm7, %v20078_v15, %v20079_v54  ;;  %v20081_v35 = vrot.slane %v31816_v60, 2  ;;  %v20089_v15 = vrot.slane %v31482_v0, 2 }
 0x536   : > { %25523 = vmatmul.mubr.msk.f32.gmra.mrb[96].mxu1 %vm19282_vm4, %v32075_v50  ;;  %32951 = vst [vmem:[#allocation39_spill] sm:$0xff] %v32106_v61  ;;  %v20088_v60 = vrot.slane %v31486_v43, 2 }
 0x537   : > { %25525 = vmatprep.mubr.msk.f32.mxu1 %vm19282_vm4, %v32080_v47  ;;  %v32101_v47 = vsel %vm20057_vm7, %v20074_v29, %v20076_v53  ;;  %v20086_v29 = vrot.slane %v31832_v56, 2  ;;  %v32120_v53 = vsel %vm20057_vm7, %v20083_v6, %v20084_v63  ;;  %v20093_v6 = vrot.slane %v31507_v41, 2 }
 0x538   : > { %32952 = vst [vmem:[#allocation40_spill] sm:$0xff] %v32120_v53  ;;  %v32132_v56 = vsel %vm20057_vm7, %v20088_v60, %v20089_v15  ;;  %v20099_v60 = vrot.slane %v31543_v2, 2 }
 0x539   : > { %32953 = vst [vmem:[#allocation41_spill] sm:$0xff] %v32132_v56 }
 0x53a   : > { %25526 = vmatmul.mubr.msk.f32.gmra.mrb[98].mxu1 %vm19282_vm4, %v32088_v27 }
 0x53b   : > { %25528 = vmatprep.mubr.msk.f32.mxu1 %vm19282_vm4, %v32094_v11  ;;  %v32114_v11 = vsel %vm20057_vm7, %v20079_v54, %v20081_v35  ;;  %v20094_v54 = vrot.slane %v31516_v9, 2  ;;  %v20091_v35 = vrot.slane %v31856_v55, 2  ;;  %v20098_v55 = vrot.slane %v31536_v14, 2 }
 0x53e   : > { %25529 = vmatmul.mubr.msk.f32.gmra.mrb[100].mxu1 %vm19282_vm4, %v32101_v47 }
 0x53f   : > { %25531 = vmatprep.mubr.msk.f32.mxu1 %vm19282_vm4, %v32106_v61  ;;  %v32127_v61 = vsel %vm20057_vm7, %v20084_v63, %v20086_v29  ;;  %v20096_v63 = vrot.slane %v31871_v33, 2  ;;  %v32146_v29 = vsel %vm20057_vm7, %v20093_v6, %v20094_v54  ;;  %v32158_v33 = vsel %vm20057_vm7, %v20098_v55, %v20099_v60 }
 0x540   : > { %32954 = vst [vmem:[#allocation42_spill] sm:$0xff] %v32146_v29  ;;  %32955 = vst [vmem:[#allocation43_spill] sm:$0xff] %v32158_v33  ;;  %v20103_v6 = vrot.slane %v31562_v26, 2  ;;  %v20109_v55 = vrot.slane %v31588_v28, 2 }
 0x542   : > { %25532 = vmatmul.mubr.msk.f32.gmra.mrb[102].mxu1 %vm19282_vm4, %v32114_v11 }
 0x543   : > { %25534 = vmatprep.mubr.msk.f32.mxu1 %vm19282_vm4, %v32120_v53  ;;  %v32140_v53 = vsel %vm20057_vm7, %v20089_v15, %v20091_v35  ;;  %v20104_v15 = vrot.slane %v31566_v24, 2  ;;  %v20101_v35 = vrot.slane %v31894_v49, 2  ;;  %v20108_v49 = vrot.slane %v31592_v58, 2 }
 0x546   : > { %25535 = vmatmul.mubr.msk.f32.gmra.mrb[104].mxu1 %vm19282_vm4, %v32127_v61 }
 0x547   : > { %25537 = vmatprep.mubr.msk.f32.mxu1 %vm19282_vm4, %v32132_v56  ;;  %v32153_v56 = vsel %vm20057_vm7, %v20094_v54, %v20096_v63  ;;  %v20106_v54 = vrot.slane %v31910_v12, 2  ;;  %v32172_v63 = vsel %vm20057_vm7, %v20103_v6, %v20104_v15  ;;  %v32184_v12 = vsel %vm20057_vm7, %v20108_v49, %v20109_v55 }
 0x548   : > { %32956 = vst [vmem:[#allocation44_spill] sm:$0xff] %v32172_v63  ;;  %32957 = vst [vmem:[#allocation45_spill] sm:$0xff] %v32184_v12  ;;  %v20113_v6 = vrot.slane %v31613_v62, 2  ;;  %v20119_v49 = vrot.slane %v31649_v21, 2 }
 0x54a   : > { %25538 = vmatmul.mubr.msk.f32.gmra.mrb[106].mxu1 %vm19282_vm4, %v32140_v53 }
 0x54b   : > { %25540 = vmatprep.mubr.msk.f32.mxu1 %vm19282_vm4, %v32146_v29  ;;  %v32166_v29 = vsel %vm20057_vm7, %v20099_v60, %v20101_v35  ;;  %v20114_v60 = vrot.slane %v31622_v34, 2  ;;  %v20111_v35 = vrot.slane %v31934_v42, 2  ;;  %v20118_v42 = vrot.slane %v31642_v37, 2 }
 0x54e   : > { %25541 = vmatmul.mubr.msk.f32.gmra.mrb[108].mxu1 %vm19282_vm4, %v32153_v56 }
 0x54f   : > { %25543 = vmatprep.mubr.msk.f32.mxu1 %vm19282_vm4, %v32158_v33  ;;  %v32179_v33 = vsel %vm20057_vm7, %v20104_v15, %v20106_v54  ;;  %v20116_v15 = vrot.slane %v31949_v13, 2  ;;  %v32198_v54 = vsel %vm20057_vm7, %v20113_v6, %v20114_v60  ;;  %v32210_v13 = vsel %vm20057_vm7, %v20118_v42, %v20119_v49 }
 0x550   : > { %32958 = vst [vmem:[#allocation46_spill] sm:$0xff] %v32198_v54  ;;  %32960 = vst [vmem:[#allocation48_spill] sm:$0xff] %v32210_v13  ;;  %v20123_v6 = vrot.slane %v32940_v59, 2  ;;  %v20129_v42 = vrot.slane %v31696_v25, 2 }
 0x552   : > { %25544 = vmatmul.mubr.msk.f32.gmra.mrb[110].mxu1 %vm19282_vm4, %v32166_v29 }
 0x553   : > { %25546 = vmatprep.mubr.msk.f32.mxu1 %vm19282_vm4, %v32172_v63  ;;  %v32192_v63 = vsel %vm20057_vm7, %v20109_v55, %v20111_v35  ;;  %v20124_v55 = vrot.slane %v32938_v32, 2  ;;  %v20121_v35 = vrot.slane %v31972_v16, 2  ;;  %v20128_v16 = vrot.slane %v31702_v3, 2 }
 0x556   : > { %25547 = vmatmul.mubr.msk.f32.gmra.mrb[112].mxu1 %vm19282_vm4, %v32179_v33 }
 0x557   : > { %25549 = vmatprep.mubr.msk.f32.mxu1 %vm19282_vm4, %v32184_v12  ;;  %v32205_v12 = vsel %vm20057_vm7, %v20114_v60, %v20116_v15  ;;  %v20126_v60 = vrot.slane %v31988_v44, 2  ;;  %v32224_v15 = vsel %vm20057_vm7, %v20123_v6, %v20124_v55  ;;  %v32236_v44 = vsel %vm20057_vm7, %v20128_v16, %v20129_v42 }
 0x558   : > { %32959 = vst [vmem:[#allocation47_spill] sm:$0xff] %v32205_v12  ;;  %32961 = vst [vmem:[#allocation49_spill] sm:$0xff] %v32224_v15  ;;  %v20133_v6 = vrot.slane %v31726_v18, 2 }
 0x559   : > { %32963 = vst [vmem:[#allocation51_spill] sm:$0xff] %v32236_v44 }
 0x55a   : > { %25550 = vmatmul.mubr.msk.f32.gmra.mrb[114].mxu1 %vm19282_vm4, %v32192_v63 }
 0x55b   : > { %25552 = vmatprep.mubr.msk.f32.mxu1 %vm19282_vm4, %v32198_v54  ;;  %v32218_v54 = vsel %vm20057_vm7, %v20119_v49, %v20121_v35  ;;  %v20134_v49 = vrot.slane %v31739_v20, 2  ;;  %v20131_v35 = vrot.slane %v32012_v45, 2  ;;  %v23433_v45 = vld [vmem:[%s32790_s3 + $0x50] sm:$0xff] }
 0x55e   : > { %25553 = vmatmul.mubr.msk.f32.gmra.mrb[116].mxu1 %vm19282_vm4, %v32205_v12 }
 0x55f   : > { %25555 = vmatprep.mubr.msk.f32.mxu1 %vm19282_vm4, %v32210_v13  ;;  %v32231_v13 = vsel %vm20057_vm7, %v20124_v55, %v20126_v60  ;;  %v20136_v55 = vrot.slane %v32025_v23, 2  ;;  %v32250_v60 = vsel %vm20057_vm7, %v20133_v6, %v20134_v49  ;;  %v23434_v23 = vld [vmem:[%s32790_s3 + $0x58] sm:$0xff] }
 0x560   : > { %32962 = vst [vmem:[#allocation50_spill] sm:$0xff] %v32231_v13  ;;  %32965 = vst [vmem:[#allocation53_spill] sm:$0xff] %v32250_v60 }
 0x561   : > { %v32255_v16 = vsel %vm20057_vm7, %v20134_v49, %v20136_v55 }
 0x562   : > { %25556 = vmatmul.mubr.msk.f32.gmra.mrb[118].mxu1 %vm19282_vm4, %v32218_v54 }
 0x563   : > { %25558 = vmatprep.mubr.msk.f32.mxu1 %vm19282_vm4, %v32224_v15  ;;  %v32244_v15 = vsel %vm20057_vm7, %v20129_v42, %v20131_v35  ;;  %v25899_v42 = vpack.c.bf16 %v23434_v23, %v23433_v45 }
 0x564   : > { %32964 = vst [vmem:[#allocation52_spill] sm:$0xff] %v32244_v15 }
 0x566   : > { %25559 = vmatmul.mubr.msk.f32.gmra.mrb[120].mxu1 %vm19282_vm4, %v32231_v13 }
 0x567   : > { %25561 = vmatprep.mubr.msk.f32.mxu1 %vm19282_vm4, %v32236_v44 }
 0x56a   : > { %25562 = vmatmul.mubr.msk.f32.gmra.mrb[122].mxu1 %vm19282_vm4, %v32244_v15 }
 0x56b   : > { %25564 = vmatprep.mubr.msk.f32.mxu1 %vm19282_vm4, %v32250_v60 }
 0x56e   : > { %25565 = vmatmul.mubr.msk.f32.gmra.mrb[124].mxu1 %vm19282_vm4, %v32255_v16 }
 0x56f   : > { %25571 = vmatprep.mubr.msk.f32.mxu1 %vm19282_vm4, %v31338_v30  ;;  %v17659_v30 = vmax.f32 %v31698_v39, 0.0 }
 0x571   : > { %v18324_v39 = vrot.slane %v17659_v30, %v27333_v7 }
 0x572   : > { %25572 = vmatmul.mubr.msk.f32.vlgmr.msra.gmra.mrb[94].mxu1 %vm19282_vm4, %v31347_v40  ;;  %v18317_v40 = vcombine.high %v17659_v30, %v17659_v30 }
 0x573   : > { %25898 = vmatpush3.bf16.msra.mxu1 %v32060_v1  ;;  %25574 = vmatprep.mubr.msk.f32.mxu1 %vm19282_vm4, %v31379_v22  ;;  %v17660_v1 = vmax.f32 %v31720_v38, 0.0  ;;  %v18332_v55 = vcombine.high %v18324_v39, %v18324_v39 }
 0x574   : > { %25900 = vmatprep.subr.bf16.mxu1 %v25899_v42  ;;  %v18331_v49 = vrot.slane %v18317_v40, %v27333_v7 }
 0x575   : > { %v18334_v35 = vcombine.high %v17660_v1, %v17660_v1  ;;  %v18341_v23 = vrot.slane %v17660_v1, %v27333_v7  ;;  %v19083_v30 = vcombine.low %v18324_v39, %v18332_v55 }
 0x576   : > { %25575 = vmatmul.mubr.msk.f32.gmra.mrb[96].mxu1 %vm19282_vm4, %v31375_v46  ;;  %v18333_v6 = vcombine.high %v18331_v49, %v18331_v49 }
 0x577   : > { %25577 = vmatprep.mubr.msk.f32.mxu1 %vm19282_vm4, %v31401_v52  ;;  %v18348_v38 = vrot.slane %v18334_v35, %v27333_v7 }
 0x578   : > { %v19084_v45 = vcombine.low %v18331_v49, %v18333_v6  ;;  %v19091_v49 = vrot.slane %v19083_v30, %v27333_v7  ;;  %v32967_v30 = vld [vmem:[#allocation12_spill] sm:$0xff] }
 0x579   : > { %v18350_v40 = vcombine.high %v18348_v38, %v18348_v38 }
 0x57a   : > { %25578 = vmatmul.mubr.msk.f32.gmra.mrb[98].mxu1 %vm19282_vm4, %v31410_v36 }
 0x57b   : > { %25580 = vmatprep.mubr.msk.f32.mxu1 %vm19282_vm4, %v31430_v19  ;;  %v19101_v1 = vcombine.low %v18348_v38, %v18350_v40  ;;  %v23468_v38 = vld [vmem:[%s32790_s3 + $0x68] sm:$0xff]  ;;  %v32968_v40 = vld [vmem:[#allocation13_spill] sm:$0xff] }
 0x57d   : > { %v19115_v39 = vrot.slane %v19101_v1, %v27333_v7  ;;  %v32970_v1 = vld [vmem:[#allocation15_spill] sm:$0xff] }
 0x57e   : > { %25581 = vmatmul.mubr.msk.f32.gmra.mrb[100].mxu1 %vm19282_vm4, %v31437_v8 }
 0x57f   : > { %25583 = vmatprep.mubr.msk.f32.mxu1 %vm19282_vm4, %v31456_v31 }
 0x582   : > { %25584 = vmatmul.mubr.msk.f32.gmra.mrb[102].mxu1 %vm19282_vm4, %v31460_v17 }
 0x583   : > { %25586 = vmatprep.mubr.msk.f32.mxu1 %vm19282_vm4, %v31486_v43 }
 0x586   : > { %25587 = vmatmul.mubr.msk.f32.gmra.mrb[104].mxu1 %vm19282_vm4, %v31482_v0 }
 0x587   : > { %25589 = vmatprep.mubr.msk.f32.mxu1 %vm19282_vm4, %v31507_v41 }
 0x58a   : > { %25590 = vmatmul.mubr.msk.f32.gmra.mrb[106].mxu1 %vm19282_vm4, %v31516_v9 }
 0x58b   : > { %25592 = vmatprep.mubr.msk.f32.mxu1 %vm19282_vm4, %v31536_v14 }
 0x58e   : > { %25593 = vmatmul.mubr.msk.f32.gmra.mrb[108].mxu1 %vm19282_vm4, %v31543_v2 }
 0x58f   : > { %25595 = vmatprep.mubr.msk.f32.mxu1 %vm19282_vm4, %v31562_v26 }
 0x592   : > { %25596 = vmatmul.mubr.msk.f32.gmra.mrb[110].mxu1 %vm19282_vm4, %v31566_v24 }
 0x593   : > { %25598 = vmatprep.mubr.msk.f32.mxu1 %vm19282_vm4, %v31592_v58 }
 0x596   : > { %25599 = vmatmul.mubr.msk.f32.gmra.mrb[112].mxu1 %vm19282_vm4, %v31588_v28 }
 0x597   : > { %25601 = vmatprep.mubr.msk.f32.mxu1 %vm19282_vm4, %v31613_v62  ;;  %v18349_v62 = vcombine.high %v18341_v23, %v18341_v23 }
 0x599   : > { %v19100_v35 = vcombine.low %v18341_v23, %v18349_v62  ;;  %v32966_v23 = vld [vmem:[#allocation7_spill] sm:$0xff] }
 0x59a   : > { %25602 = vmatmul.mubr.msk.f32.gmra.mrb[114].mxu1 %vm19282_vm4, %v31622_v34 }
 0x59b   : > { %25604 = vmatprep.mubr.msk.f32.mxu1 %vm19282_vm4, %v31642_v37  ;;  %v19098_v37 = vrot.slane %v19084_v45, %v27333_v7  ;;  %v19108_v55 = vrot.slane %v19100_v35, %v27333_v7  ;;  %v32974_v35 = vld [vmem:[#allocation19_spill] sm:$0xff] }
 0x59d   : > { %v19099_v6 = vcombine.low %v19091_v49, %v19098_v37  ;;  %v32342_v62 = vcombine.low %v19108_v55, %v19115_v39  ;;  %v23467_v37 = vld [vmem:[%s32790_s3 + $0x60] sm:$0xff]  ;;  %v32976_v39 = vld [vmem:[#allocation21_spill] sm:$0xff] }
 0x59e   : > { %25605 = vmatmul.mubr.msk.f32.gmra.mrb[116].mxu1 %vm19282_vm4, %v31649_v21  ;;  %v25903_v5 = vpack.c.bf16 %v23468_v38, %v23467_v37  ;;  %v32969_v49 = vld [vmem:[#allocation14_spill] sm:$0xff]  ;;  %v32978_v37 = vld [vmem:[#allocation23_spill] sm:$0xff]  ;;  %v32979_v38 = vld [vmem:[#allocation24_spill] sm:$0xff] }
 0x59f   : > { %25607 = vmatprep.mubr.msk.f32.mxu1 %vm19282_vm4, %v32940_v59  ;;  %v32338_v45 = vsel %vm18397_vm3, %v19099_v6, 0.0  ;;  %v32975_v6 = vld [vmem:[#allocation20_spill] sm:$0xff]  ;;  %v32977_v55 = vld [vmem:[#allocation22_spill] sm:$0xff] }
 0x5a2   : > { %25608 = vmatmul.mubr.msk.f32.gmra.mrb[118].mxu1 %vm19282_vm4, %v32938_v32 }
 0x5a3   : > { %25610 = vmatprep.mubr.msk.f32.mxu1 %vm19282_vm4, %v31702_v3 }
 0x5a6   : > { %25611 = vmatmul.mubr.msk.f32.gmra.mrb[120].mxu1 %vm19282_vm4, %v31696_v25 }
 0x5a7   : > { %25613 = vmatprep.mubr.msk.f32.mxu1 %vm19282_vm4, %v31726_v18 }
 0x5aa   : > { %25614 = vmatmul.mubr.msk.f32.gmra.mrb[122].mxu1 %vm19282_vm4, %v31739_v20 }
 0x5ab   : > { %25616 = vmatprep.mubr.msk.f32.mxu1 %vm19282_vm4, %v32338_v45 }
 0x5ae   : > { %25617 = vmatmul.mubr.msk.f32.gmra.mrb[124].mxu1 %vm19282_vm4, %v32342_v62 }
 0x5af   : > { %25623 = vmatprep.mubr.msk.f32.mxu1 %vm19282_vm4, %v31768_v10  ;;  %v32971_v10 = vld [vmem:[#allocation16_spill] sm:$0xff] }
 0x5b2   : > { %25624 = vmatmul.mubr.msk.f32.vlgmr.msra.gmra.mrb[94].mxu1 %vm19282_vm4, %v31781_v48  ;;  %v32972_v48 = vld [vmem:[#allocation17_spill] sm:$0xff] }
 0x5b3   : > { %25902 = vmatpush3.bf16.msra.mxu1 %v25899_v42  ;;  %25626 = vmatprep.mubr.msk.f32.mxu1 %vm19282_vm4, %v32966_v23  ;;  %v32973_v42 = vld [vmem:[#allocation18_spill] sm:$0xff] }
 0x5b4   : > { %25904 = vmatprep.subr.bf16.mxu1 %v25903_v5 }
 0x5b6   : > { %25627 = vmatmul.mubr.msk.f32.gmra.mrb[96].mxu1 %vm19282_vm4, %v32967_v30 }
 0x5b7   : > { %25629 = vmatprep.mubr.msk.f32.mxu1 %vm19282_vm4, %v32968_v40 }
 0x5ba   : > { %25630 = vmatmul.mubr.msk.f32.gmra.mrb[98].mxu1 %vm19282_vm4, %v32969_v49 }
 0x5bb   : > { %25632 = vmatprep.mubr.msk.f32.mxu1 %vm19282_vm4, %v32970_v1 }
 0x5be   : > { %25633 = vmatmul.mubr.msk.f32.gmra.mrb[100].mxu1 %vm19282_vm4, %v32971_v10  ;;  %v32993_v10 = vld [vmem:[#allocation36_spill] sm:$0xff] }
 0x5bf   : > { %25635 = vmatprep.mubr.msk.f32.mxu1 %vm19282_vm4, %v32972_v48  ;;  %v32980_v48 = vld [vmem:[#allocation25_spill] sm:$0xff] }
 0x5c2   : > { %25636 = vmatmul.mubr.msk.f32.gmra.mrb[102].mxu1 %vm19282_vm4, %v32973_v42  ;;  %v32981_v42 = vld [vmem:[#allocation26_spill] sm:$0xff] }
 0x5c3   : > { %25638 = vmatprep.mubr.msk.f32.mxu1 %vm19282_vm4, %v32974_v35  ;;  %v32982_v35 = vld [vmem:[#allocation27_spill] sm:$0xff] }
 0x5c6   : > { %25639 = vmatmul.mubr.msk.f32.gmra.mrb[104].mxu1 %vm19282_vm4, %v32975_v6  ;;  %v32983_v6 = vld [vmem:[#allocation28_spill] sm:$0xff] }
 0x5c7   : > { %25641 = vmatprep.mubr.msk.f32.mxu1 %vm19282_vm4, %v32976_v39  ;;  %v32984_v39 = vld [vmem:[#allocation29_spill] sm:$0xff] }
 0x5ca   : > { %25642 = vmatmul.mubr.msk.f32.gmra.mrb[106].mxu1 %vm19282_vm4, %v32977_v55  ;;  %v32985_v55 = vld [vmem:[#allocation30_spill] sm:$0xff] }
 0x5cb   : > { %25644 = vmatprep.mubr.msk.f32.mxu1 %vm19282_vm4, %v32978_v37  ;;  %v32986_v37 = vld [vmem:[#allocation31_spill] sm:$0xff] }
 0x5ce   : > { %25645 = vmatmul.mubr.msk.f32.gmra.mrb[108].mxu1 %vm19282_vm4, %v32979_v38  ;;  %v32987_v38 = vld [vmem:[#allocation5_spill] sm:$0xff] }
 0x5cf   : > { %25647 = vmatprep.mubr.msk.f32.mxu1 %vm19282_vm4, %v32980_v48  ;;  %v17661_v48 = vmax.f32 %v32987_v38, 0.0  ;;  %v20730_v38 = vrot.slane %v32342_v62, 1 }
 0x5d2   : > { %25648 = vmatmul.mubr.msk.f32.gmra.mrb[110].mxu1 %vm19282_vm4, %v32981_v42  ;;  %v32988_v42 = vld [vmem:[#allocation11_spill] sm:$0xff] }
 0x5d3   : > { %25650 = vmatprep.mubr.msk.f32.mxu1 %vm19282_vm4, %v32982_v35  ;;  %v18358_v35 = vrot.slane %v17661_v48, %v27333_v7  ;;  %v20729_v48 = vrot.slane %v32338_v45, 1 }
 0x5d6   : > { %25651 = vmatmul.mubr.msk.f32.gmra.mrb[112].mxu1 %vm19282_vm4, %v32983_v6  ;;  %v32989_v6 = vld [vmem:[#allocation2_spill] sm:$0xff] }
 0x5d7   : > { %25653 = vmatprep.mubr.msk.f32.mxu1 %vm19282_vm4, %v32984_v39  ;;  %v32990_v39 = vld [vmem:[#allocation33_spill] sm:$0xff] }
 0x5da   : > { %25654 = vmatmul.mubr.msk.f32.gmra.mrb[114].mxu1 %vm19282_vm4, %v32985_v55  ;;  %v19123_v55 = vrot.slane %v18358_v35, %v27333_v7 }
 0x5db   : > { %25656 = vmatprep.mubr.msk.f32.mxu1 %vm19282_vm4, %v32986_v37  ;;  %v32991_v37 = vld [vmem:[#allocation34_spill] sm:$0xff] }
 0x5de   : > { %25657 = vmatmul.mubr.msk.f32.gmra.mrb[116].mxu1 %vm19282_vm4, %v31997_v51  ;;  %v23499_v51 = vld [vmem:[%s32790_s3 + $0x70] sm:$0xff] }
 0x5df   : > { %25659 = vmatprep.mubr.msk.f32.mxu1 %vm19282_vm4, %v32988_v42  ;;  %v19269_v42 = vsel %vm18408_vm5, %v19123_v55, 0.0  ;;  %v23500_v55 = vld [vmem:[%s32790_s3 + $0x78] sm:$0xff] }
 0x5e0   : > { %v20732_v35 = vrot.slane %v19269_v42, 1 }
 0x5e2   : > { %25660 = vmatmul.mubr.msk.f32.gmra.mrb[118].mxu1 %vm19282_vm4, %v32989_v6 }
 0x5e3   : > { %25662 = vmatprep.mubr.msk.f32.mxu1 %vm19282_vm4, %v32020_v4  ;;  %v32420_v4 = vsel %vm19652_vm6, %v20729_v48, %v20730_v38  ;;  %v25907_v48 = vpack.c.bf16 %v23500_v55, %v23499_v51  ;;  %v33001_v51 = vld [vmem:[#allocation43_spill] sm:$0xff]  ;;  %v33002_v55 = vld [vmem:[#allocation44_spill] sm:$0xff] }
 0x5e6   : > { %25663 = vmatmul.mubr.msk.f32.gmra.mrb[120].mxu1 %vm19282_vm4, %v32990_v39  ;;  %v32425_v39 = vsel %vm19652_vm6, %v20730_v38, %v20732_v35  ;;  %v32995_v38 = vld [vmem:[#allocation37_spill] sm:$0xff]  ;;  %v32996_v35 = vld [vmem:[#allocation38_spill] sm:$0xff] }
 0x5e7   : > { %25665 = vmatprep.mubr.msk.f32.mxu1 %vm19282_vm4, %v32991_v37  ;;  %32994 = vst [vmem:[#allocation7_spill] sm:$0xff] %v32425_v39 }
 0x5ea   : > { %25666 = vmatmul.mubr.msk.f32.gmra.mrb[122].mxu1 %vm19282_vm4, %v32993_v10 }
 0x5eb   : > { %25668 = vmatprep.mubr.msk.f32.mxu1 %vm19282_vm4, %v32420_v4 }
 0x5ee   : > { %25669 = vmatmul.mubr.msk.f32.gmra.mrb[124].mxu1 %vm19282_vm4, %v32425_v39  ;;  %v32997_v39 = vld [vmem:[#allocation39_spill] sm:$0xff] }
 0x5ef   : > { %25675 = vmatprep.mubr.msk.f32.mxu1 %vm19282_vm4, %v32066_v57  ;;  %v32998_v57 = vld [vmem:[#allocation40_spill] sm:$0xff] }
 0x5f2   : > { %25676 = vmatmul.mubr.msk.f32.vlgmr.msra.gmra.mrb[94].mxu1 %vm19282_vm4, %v32075_v50  ;;  %v32999_v50 = vld [vmem:[#allocation41_spill] sm:$0xff] }
 0x5f3   : > { %25906 = vmatpush3.bf16.msra.mxu1 %v25903_v5  ;;  %25678 = vmatprep.mubr.msk.f32.mxu1 %vm19282_vm4, %v32995_v38  ;;  %v33000_v5 = vld [vmem:[#allocation42_spill] sm:$0xff] }
 0x5f4   : > { %25908 = vmatprep.subr.bf16.mxu1 %v25907_v48 }
 0x5f6   : > { %25679 = vmatmul.mubr.msk.f32.gmra.mrb[96].mxu1 %vm19282_vm4, %v32088_v27 }
 0x5f7   : > { %25681 = vmatprep.mubr.msk.f32.mxu1 %vm19282_vm4, %v32996_v35 }
 0x5fa   : > { %25682 = vmatmul.mubr.msk.f32.gmra.mrb[98].mxu1 %vm19282_vm4, %v32101_v47 }
 0x5fb   : > { %25684 = vmatprep.mubr.msk.f32.mxu1 %vm19282_vm4, %v32997_v39 }
 0x5fe   : > { %25685 = vmatmul.mubr.msk.f32.gmra.mrb[100].mxu1 %vm19282_vm4, %v32114_v11 }
 0x5ff   : > { %25687 = vmatprep.mubr.msk.f32.mxu1 %vm19282_vm4, %v32998_v57 }
 0x602   : > { %25688 = vmatmul.mubr.msk.f32.gmra.mrb[102].mxu1 %vm19282_vm4, %v32127_v61 }
 0x603   : > { %25690 = vmatprep.mubr.msk.f32.mxu1 %vm19282_vm4, %v32999_v50  ;;  %v33003_v50 = vld [vmem:[#allocation45_spill] sm:$0xff] }
 0x606   : > { %25691 = vmatmul.mubr.msk.f32.gmra.mrb[104].mxu1 %vm19282_vm4, %v32140_v53 }
 0x607   : > { %25693 = vmatprep.mubr.msk.f32.mxu1 %vm19282_vm4, %v33000_v5  ;;  %v33004_v5 = vld [vmem:[#allocation46_spill] sm:$0xff] }
 0x60a   : > { %25694 = vmatmul.mubr.msk.f32.gmra.mrb[106].mxu1 %vm19282_vm4, %v32153_v56 }
 0x60b   : > { %25696 = vmatprep.mubr.msk.f32.mxu1 %vm19282_vm4, %v33001_v51  ;;  %v33005_v51 = vld [vmem:[#allocation48_spill] sm:$0xff] }
 0x60e   : > { %25697 = vmatmul.mubr.msk.f32.gmra.mrb[108].mxu1 %vm19282_vm4, %v32166_v29 }
 0x60f   : > { %25699 = vmatprep.mubr.msk.f32.mxu1 %vm19282_vm4, %v33002_v55  ;;  %v33006_v55 = vld [vmem:[#allocation49_spill] sm:$0xff] }
 0x612   : > { %25700 = vmatmul.mubr.msk.f32.gmra.mrb[110].mxu1 %vm19282_vm4, %v32179_v33 }
 0x613   : > { %25702 = vmatprep.mubr.msk.f32.mxu1 %vm19282_vm4, %v33003_v50 }
 0x616   : > { %25703 = vmatmul.mubr.msk.f32.gmra.mrb[112].mxu1 %vm19282_vm4, %v32192_v63 }
 0x617   : > { %25705 = vmatprep.mubr.msk.f32.mxu1 %vm19282_vm4, %v33004_v5 }
 0x61a   : > { %25706 = vmatmul.mubr.msk.f32.gmra.mrb[114].mxu1 %vm19282_vm4, %v32205_v12  ;;  %v20999_v12 = vrot.slane %v32342_v62, 2 }
 0x61b   : > { %25708 = vmatprep.mubr.msk.f32.mxu1 %vm19282_vm4, %v33005_v51  ;;  %v20998_v51 = vrot.slane %v32338_v45, 2 }
 0x61e   : > { %25709 = vmatmul.mubr.msk.f32.gmra.mrb[116].mxu1 %vm19282_vm4, %v32218_v54 }
 0x61f   : > { %25711 = vmatprep.mubr.msk.f32.mxu1 %vm19282_vm4, %v33006_v55  ;;  %v32498_v55 = vsel %vm20057_vm7, %v20998_v51, %v20999_v12 }
 0x622   : > { %25712 = vmatmul.mubr.msk.f32.gmra.mrb[118].mxu1 %vm19282_vm4, %v32231_v13 }
 0x623   : > { %25714 = vmatprep.mubr.msk.f32.mxu1 %vm19282_vm4, %v32236_v44  ;;  %v21001_v44 = vrot.slane %v19269_v42, 2  ;;  %v33030_v42 = vld [vmem:[#allocation33_spill] sm:$0xff] }
 0x625   : > { %v32503_v13 = vsel %vm20057_vm7, %v20999_v12, %v21001_v44  ;;  %v33019_v12 = vld [vmem:[#allocation24_spill] sm:$0xff]  ;;  %v33021_v44 = vld [vmem:[#allocation26_spill] sm:$0xff] }
 0x626   : > { %25715 = vmatmul.mubr.msk.f32.gmra.mrb[120].mxu1 %vm19282_vm4, %v32244_v15  ;;  %v23533_v15 = vld [vmem:[%s32790_s3 + $0x80] sm:$0xff] }
 0x627   : > { %25717 = vmatprep.mubr.msk.f32.mxu1 %vm19282_vm4, %v32250_v60  ;;  %v23534_v60 = vld [vmem:[%s32790_s3 + $0x88] sm:$0xff] }
 0x628   : > { %v25911_v51 = vpack.c.bf16 %v23534_v60, %v23533_v15  ;;  %v33020_v15 = vld [vmem:[#allocation25_spill] sm:$0xff]  ;;  %v33022_v60 = vld [vmem:[#allocation27_spill] sm:$0xff] }
 0x62a   : > { %25718 = vmatmul.mubr.msk.f32.gmra.mrb[122].mxu1 %vm19282_vm4, %v32255_v16 }
 0x62b   : > { %25720 = vmatprep.mubr.msk.f32.mxu1 %vm19282_vm4, %v32498_v55 }
 0x62e   : > { %25721 = vmatmul.mubr.msk.f32.gmra.mrb[124].mxu1 %vm19282_vm4, %v32503_v13 }
 0x62f   : > { %25727 = vmatprep.mubr.msk.f32.mxu1 %vm19282_vm4, %v31379_v22  ;;  %v33008_v22 = vld [vmem:[#allocation10_spill] sm:$0xff] }
 0x632   : > { %25728 = vmatmul.mubr.msk.f32.vlgmr.msra.gmra.mrb[94].mxu1 %vm19282_vm4, %v31375_v46  ;;  %v33007_v46 = vld [vmem:[#allocation9_spill] sm:$0xff] }
 0x633   : > { %25910 = vmatpush3.bf16.msra.mxu1 %v25907_v48  ;;  %25730 = vmatprep.mubr.msk.f32.mxu1 %vm19282_vm4, %v31401_v52  ;;  %v33009_v52 = vmov 0.0   ;;  %v33031_v48 = vld [vmem:[#allocation7_spill] sm:$0xff] }
 0x634   : > { %25912 = vmatprep.subr.bf16.mxu1 %v25911_v51 }
 0x636   : > { %25731 = vmatmul.mubr.msk.f32.gmra.mrb[96].mxu1 %vm19282_vm4, %v31410_v36  ;;  %v23203_v36 = vld [vmem:[%s27330_s25 + $0x1d2] sm:$0xff] }
 0x637   : > { %25733 = vmatprep.mubr.msk.f32.mxu1 %vm19282_vm4, %v31430_v19  ;;  %v33010_v19 = vld [vmem:[#allocation8_spill] sm:$0xff] }
 0x63a   : > { %25734 = vmatmul.mubr.msk.f32.gmra.mrb[98].mxu1 %vm19282_vm4, %v31437_v8  ;;  %v16512_v8 = vcombine.high %v33010_v19, %v33010_v19 }
 0x63b   : > { %25736 = vmatprep.mubr.msk.f32.mxu1 %vm19282_vm4, %v31456_v31  ;;  %v16513_v31 = vcombine.high %v23203_v36, %v23203_v36 }
 0x63e   : > { %25737 = vmatmul.mubr.msk.f32.gmra.mrb[100].mxu1 %vm19282_vm4, %v31460_v17  ;;  %v16520_v17 = vrot.slane %v23203_v36, %v27333_v7 }
 0x63f   : > { %25739 = vmatprep.mubr.msk.f32.mxu1 %vm19282_vm4, %v31486_v43 }
 0x640   : > { %v16528_v43 = vcombine.high %v16520_v17, %v16520_v17 }
 0x642   : > { %25740 = vmatmul.mubr.msk.f32.gmra.mrb[102].mxu1 %vm19282_vm4, %v31482_v0  ;;  %v16527_v0 = vrot.slane %v16513_v31, %v27333_v7 }
 0x643   : > { %25742 = vmatprep.mubr.msk.f32.mxu1 %vm19282_vm4, %v31507_v41  ;;  %v17202_v41 = vcombine.low %v16512_v8, %v16520_v17 }
 0x646   : > { %25743 = vmatmul.mubr.msk.f32.gmra.mrb[104].mxu1 %vm19282_vm4, %v31516_v9  ;;  %v23222_v9 = vld.sshfl [vmem:[%s27330_s25 + $0x1da] sm:$0x3 pattern:$0x76325410] }
 0x647   : > { %25745 = vmatprep.mubr.msk.f32.mxu1 %vm19282_vm4, %v31536_v14  ;;  %v17203_v14 = vcombine.low %v16528_v43, %v16527_v0 }
 0x64a   : > { %25746 = vmatmul.mubr.msk.f32.gmra.mrb[106].mxu1 %vm19282_vm4, %v31543_v2  ;;  %v17210_v2 = vrot.slane %v17202_v41, %v27333_v7 }
 0x64b   : > { %25748 = vmatprep.mubr.msk.f32.mxu1 %vm19282_vm4, %v31562_v26  ;;  %v16529_v26 = vcombine.high %v16527_v0, %v16527_v0 }
 0x64e   : > { %25749 = vmatmul.mubr.msk.f32.gmra.mrb[108].mxu1 %vm19282_vm4, %v31566_v24  ;;  %v17217_v24 = vrot.slane %v17203_v14, %v27333_v7 }
 0x64f   : > { %25751 = vmatprep.mubr.msk.f32.mxu1 %vm19282_vm4, %v31592_v58 }
 0x650   : > { %v17218_v58 = vcombine.low %v17210_v2, %v17217_v24 }
 0x652   : > { %25752 = vmatmul.mubr.msk.f32.gmra.mrb[110].mxu1 %vm19282_vm4, %v31588_v28  ;;  %v17219_v28 = vcombine.low %v16529_v26, %v23222_v9  ;;  %25406 = vmatmul.mubr.msk.f32.gmra.mrb[122].mxu0 %vm1767_vm2, %v17218_v58 }
 0x653   : > { %25754 = vmatprep.mubr.msk.f32.mxu1 %vm19282_vm4, %v33007_v46  ;;  %25408 = vmatprep.mubr.msk.f32.mxu0 %vm27271_vm1, %v33009_v52 }
 0x656   : > { %25755 = vmatmul.mubr.msk.f32.gmra.mrb[112].mxu1 %vm19282_vm4, %v31622_v34  ;;  %v17226_v34 = vrot.slane %v17219_v28, %v27333_v7  ;;  %v33016_v7 = vld [vmem:[#allocation21_spill] sm:$0xff] }
 0x657   : > { %25757 = vmatprep.mubr.msk.f32.mxu1 %vm19282_vm4, %v33008_v22 }
 0x658   : > { %25409 = vmatmul.mubr.msk.f32.gmra.mrb[124].mxu0 %vm1767_vm2, %v17226_v34 }
 0x65a   : > { %25758 = vmatmul.mubr.msk.f32.gmra.mrb[114].mxu1 %vm19282_vm4, %v31649_v21  ;;  %v33011_v21 = vld [vmem:[#allocation16_spill] sm:$0xff] }
 0x65b   : > { %25760 = vmatprep.mubr.msk.f32.mxu1 %vm19282_vm4, %v32940_v59  ;;  %v33017_v59 = vld [vmem:[#allocation22_spill] sm:$0xff] }
 0x65e   : > { %25761 = vmatmul.mubr.msk.f32.gmra.mrb[116].mxu1 %vm19282_vm4, %v32938_v32  ;;  %v33018_v32 = vld [vmem:[#allocation23_spill] sm:$0xff] }
 0x65f   : > { %25763 = vmatprep.mubr.msk.f32.mxu1 %vm19282_vm4, %v31702_v3  ;;  %v33013_v3 = vld [vmem:[#allocation18_spill] sm:$0xff] }
 0x662   : > { %25764 = vmatmul.mubr.msk.f32.gmra.mrb[118].mxu1 %vm19282_vm4, %v31696_v25  ;;  %v33012_v25 = vld [vmem:[#allocation17_spill] sm:$0xff] }
 0x663   : > { %25766 = vmatprep.mubr.msk.f32.mxu1 %vm19282_vm4, %v31726_v18  ;;  %v33014_v18 = vld [vmem:[#allocation19_spill] sm:$0xff] }
 0x666   : > { %25767 = vmatmul.mubr.msk.f32.gmra.mrb[120].mxu1 %vm19282_vm4, %v31739_v20  ;;  %v33015_v20 = vld [vmem:[#allocation20_spill] sm:$0xff] }
 0x667   : > { %25769 = vmatprep.mubr.msk.f32.mxu1 %vm19282_vm4, %v32338_v45  ;;  %v33023_v45 = vld [vmem:[#allocation28_spill] sm:$0xff] }
 0x66a   : > { %25770 = vmatmul.mubr.msk.f32.gmra.mrb[122].mxu1 %vm19282_vm4, %v32342_v62  ;;  %v33024_v62 = vld [vmem:[#allocation29_spill] sm:$0xff] }
 0x66b   : > { %25772 = vmatprep.mubr.f32.mxu1 %v33009_v52 }
 0x66e   : > { %25773 = vmatmul.mubr.f32.gmra.mrb[124].mxu1 %v33009_v52 }
 0x66f   : > { %25779 = vmatprep.mubr.msk.f32.mxu1 %vm19282_vm4, %v32966_v23  ;;  %v33025_v23 = vld [vmem:[#allocation30_spill] sm:$0xff] }
 0x672   : > { %25780 = vmatmul.mubr.msk.f32.vlgmr.msra.gmra.mrb[94].mxu1 %vm19282_vm4, %v32967_v30  ;;  %v33026_v30 = vld [vmem:[#allocation31_spill] sm:$0xff] }
 0x673   : > { %25914 = vmatpush3.bf16.msra.mxu1 %v25911_v51  ;;  %25782 = vmatprep.mubr.msk.f32.mxu1 %vm19282_vm4, %v32968_v40  ;;  %v33027_v40 = vld [vmem:[#allocation3_spill] sm:$0xff]  ;;  %v33032_v51 = vld [vmem:[#allocation6_spill] sm:$0xff] }
 0x676   : > { %25783 = vmatmul.mubr.msk.f32.gmra.mrb[96].mxu1 %vm19282_vm4, %v32969_v49  ;;  %v33028_v49 = vld [vmem:[#allocation11_spill] sm:$0xff] }
 0x677   : > { %25785 = vmatprep.mubr.msk.f32.mxu1 %vm19282_vm4, %v32970_v1  ;;  %v33029_v1 = vld [vmem:[#allocation32_spill] sm:$0xff] }
 0x67a   : > { %25786 = vmatmul.mubr.msk.f32.gmra.mrb[98].mxu1 %vm19282_vm4, %v33011_v21 }
 0x67b   : > { %25788 = vmatprep.mubr.msk.f32.mxu1 %vm19282_vm4, %v33012_v25 }
 0x67e   : > { %25789 = vmatmul.mubr.msk.f32.gmra.mrb[100].mxu1 %vm19282_vm4, %v33013_v3 }
 0x67f   : > { %25791 = vmatprep.mubr.msk.f32.mxu1 %vm19282_vm4, %v33014_v18 }
 0x682   : > { %25792 = vmatmul.mubr.msk.f32.gmra.mrb[102].mxu1 %vm19282_vm4, %v33015_v20 }
 0x683   : > { %25794 = vmatprep.mubr.msk.f32.mxu1 %vm19282_vm4, %v33016_v7 }
 0x686   : > { %25795 = vmatmul.mubr.msk.f32.gmra.mrb[104].mxu1 %vm19282_vm4, %v33017_v59 }
 0x687   : > { %25797 = vmatprep.mubr.msk.f32.mxu1 %vm19282_vm4, %v33018_v32 }
 0x68a   : > { %25798 = vmatmul.mubr.msk.f32.gmra.mrb[106].mxu1 %vm19282_vm4, %v33019_v12 }
 0x68b   : > { %25800 = vmatprep.mubr.msk.f32.mxu1 %vm19282_vm4, %v33020_v15 }
 0x68e   : > { %25801 = vmatmul.mubr.msk.f32.gmra.mrb[108].mxu1 %vm19282_vm4, %v33021_v44 }
 0x68f   : > { %25803 = vmatprep.mubr.msk.f32.mxu1 %vm19282_vm4, %v33022_v60 }
 0x692   : > { %25804 = vmatmul.mubr.msk.f32.gmra.mrb[110].mxu1 %vm19282_vm4, %v33023_v45 }
 0x693   : > { %25806 = vmatprep.mubr.msk.f32.mxu1 %vm19282_vm4, %v33024_v62 }
 0x696   : > { %25807 = vmatmul.mubr.msk.f32.gmra.mrb[112].mxu1 %vm19282_vm4, %v33025_v23 }
 0x697   : > { %25809 = vmatprep.mubr.msk.f32.mxu1 %vm19282_vm4, %v33026_v30 }
 0x69a   : > { %25810 = vmatmul.mubr.msk.f32.gmra.mrb[114].mxu1 %vm19282_vm4, %v33027_v40 }
 0x69b   : > { %25812 = vmatprep.mubr.msk.f32.mxu1 %vm19282_vm4, %v33028_v49 }
 0x69e   : > { %25813 = vmatmul.mubr.msk.f32.gmra.mrb[116].mxu1 %vm19282_vm4, %v32989_v6 }
 0x69f   : > { %25815 = vmatprep.mubr.msk.f32.mxu1 %vm19282_vm4, %v33029_v1 }
 0x6a2   : > { %25816 = vmatmul.mubr.msk.f32.gmra.mrb[118].mxu1 %vm19282_vm4, %v33030_v42 }
 0x6a3   : > { %25818 = vmatprep.mubr.msk.f32.mxu1 %vm19282_vm4, %v32991_v37 }
 0x6a6   : > { %25819 = vmatmul.mubr.msk.f32.gmra.mrb[120].mxu1 %vm19282_vm4, %v32993_v10  ;;  %v33043_v10 = vld [vmem:[#allocation53_spill] sm:$0xff] }
 0x6a7   : > { %25821 = vmatprep.mubr.msk.f32.mxu1 %vm19282_vm4, %v32420_v4  ;;  %v33033_v4 = vld [vmem:[#allocation41_spill] sm:$0xff] }
 0x6aa   : > { %25822 = vmatmul.mubr.msk.f32.gmra.mrb[122].mxu1 %vm19282_vm4, %v33031_v48 }
 0x6ab   : > { %25824 = vmatprep.mubr.msk.f32.mxu1 %vm19282_vm4, %v33032_v51 }
 0x6ae   : > { %25825 = vmatmul.mubr.msk.f32.gmra.mrb[124].mxu1 %vm19282_vm4, %v33032_v51 }
 0x6af   : > { %25831 = vmatprep.mubr.msk.f32.mxu1 %vm19282_vm4, %v32995_v38 }
 0x6b2   : > { %25832 = vmatmul.mubr.msk.f32.vlgmr.msra.gmra.mrb[94].mxu1 %vm19282_vm4, %v32088_v27  ;;  %v33034_v27 = vld [vmem:[#allocation42_spill] sm:$0xff] }
 0x6b3   : > { %25834 = vmatprep.mubr.msk.f32.mxu1 %vm19282_vm4, %v32996_v35 }
 0x6b6   : > { %25835 = vmatmul.mubr.msk.f32.gmra.mrb[96].mxu1 %vm19282_vm4, %v32101_v47  ;;  %v33035_v47 = vld [vmem:[#allocation43_spill] sm:$0xff] }
 0x6b7   : > { %25837 = vmatprep.mubr.msk.f32.mxu1 %vm19282_vm4, %v32997_v39 }
 0x6ba   : > { %25838 = vmatmul.mubr.msk.f32.gmra.mrb[98].mxu1 %vm19282_vm4, %v32114_v11  ;;  %v33036_v11 = vld [vmem:[#allocation44_spill] sm:$0xff] }
 0x6bb   : > { %25840 = vmatprep.mubr.msk.f32.mxu1 %vm19282_vm4, %v32998_v57 }
 0x6be   : > { %25841 = vmatmul.mubr.msk.f32.gmra.mrb[100].mxu1 %vm19282_vm4, %v32127_v61  ;;  %v33037_v61 = vld [vmem:[#allocation47_spill] sm:$0xff] }
 0x6bf   : > { %25843 = vmatprep.mubr.msk.f32.mxu1 %vm19282_vm4, %v33033_v4 }
 0x6c2   : > { %25844 = vmatmul.mubr.msk.f32.gmra.mrb[102].mxu1 %vm19282_vm4, %v32140_v53  ;;  %v33038_v53 = vld [vmem:[#allocation48_spill] sm:$0xff] }
 0x6c3   : > { %25846 = vmatprep.mubr.msk.f32.mxu1 %vm19282_vm4, %v33034_v27 }
 0x6c6   : > { %25847 = vmatmul.mubr.msk.f32.gmra.mrb[104].mxu1 %vm19282_vm4, %v32153_v56  ;;  %v33039_v56 = vld [vmem:[#allocation49_spill] sm:$0xff] }
 0x6c7   : > { %25849 = vmatprep.mubr.msk.f32.mxu1 %vm19282_vm4, %v33035_v47 }
 0x6ca   : > { %25850 = vmatmul.mubr.msk.f32.gmra.mrb[106].mxu1 %vm19282_vm4, %v32166_v29  ;;  %v33040_v29 = vld [vmem:[#allocation50_spill] sm:$0xff] }
 0x6cb   : > { %25852 = vmatprep.mubr.msk.f32.mxu1 %vm19282_vm4, %v33036_v11 }
 0x6ce   : > { %25853 = vmatmul.mubr.msk.f32.gmra.mrb[108].mxu1 %vm19282_vm4, %v32179_v33  ;;  %v33041_v33 = vld [vmem:[#allocation51_spill] sm:$0xff] }
 0x6cf   : > { %25855 = vmatprep.mubr.msk.f32.mxu1 %vm19282_vm4, %v33003_v50 }
 0x6d2   : > { %25856 = vmatmul.mubr.msk.f32.gmra.mrb[110].mxu1 %vm19282_vm4, %v32192_v63  ;;  %v33042_v63 = vld [vmem:[#allocation52_spill] sm:$0xff] }
 0x6d3   : > { %25858 = vmatprep.mubr.msk.f32.mxu1 %vm19282_vm4, %v33004_v5 }
 0x6d6   : > { %25859 = vmatmul.mubr.msk.f32.gmra.mrb[112].mxu1 %vm19282_vm4, %v33037_v61 }
 0x6d7   : > { %25861 = vmatprep.mubr.msk.f32.mxu1 %vm19282_vm4, %v33038_v53 }
 0x6da   : > { %25862 = vmatmul.mubr.msk.f32.gmra.mrb[114].mxu1 %vm19282_vm4, %v32218_v54  ;;  %v33044_v54 = vld [vmem:[#allocation35_spill] sm:$0xff] }
 0x6db   : > { %25864 = vmatprep.mubr.msk.f32.mxu1 %vm19282_vm4, %v33039_v56 }
 0x6de   : > { %25865 = vmatmul.mubr.msk.f32.gmra.mrb[116].mxu1 %vm19282_vm4, %v33040_v29 }
 0x6df   : > { %25867 = vmatprep.mubr.msk.f32.mxu1 %vm19282_vm4, %v33041_v33 }
 0x6e2   : > { %25868 = vmatmul.mubr.msk.f32.gmra.mrb[118].mxu1 %vm19282_vm4, %v33042_v63 }
 0x6e3   : > { %25870 = vmatprep.mubr.msk.f32.mxu1 %vm19282_vm4, %v33043_v10 }
 0x6e6   : > { %25871 = vmatmul.mubr.msk.f32.gmra.mrb[120].mxu1 %vm19282_vm4, %v32255_v16  ;;  %v32719_v16 = vld [vmem:[%s32791_s4] ss:$0 sm:$0xff] }
 0x6e7   : > { %25873 = vmatprep.mubr.msk.f32.mxu1 %vm19282_vm4, %v32498_v55 }
 0x6ea   : > { %25874 = vmatmul.mubr.msk.f32.gmra.mrb[122].mxu1 %vm19282_vm4, %v32503_v13 }
 0x6eb   : > { %25876 = vmatprep.mubr.msk.f32.mxu1 %vm19282_vm4, %v33044_v54 }
 0x6ee   : > { %25877 = vmatmul.mubr.msk.f32.gmra.mrb[124].mxu1 %vm19282_vm4, %v33044_v54 }
 0x725   : > { %v17573_v6 = vpop.f32.mrb[122].mxu0 }
 0x726   : > { %v25407_v39 = vpop.f32.mrb[123].mxu0 }
 0x72b   : > { %v17578_v37 = vpop.f32.mrb[124].mxu0 }
 0x72c   : > { %v25410_v38 = vpop.f32.mrb[125].mxu0 }
 0x785   : > { %v25833_v35 = vpop.f32.mrb[94].mxu1 }
 0x786   : > { %v25991_v57 = vadd.f32 %v25833_v35, %v32719_v16  ;;  %v21881_v50 = vpop.f32.mrb[95].mxu1 }
 0x787   : > { %v25992_v13 = vadd.f32 %v32719_v16, %v21881_v50 }
 0x788   : > { %v23568_v5 = vmul.f32 -1.442695, %v25991_v57 }
 0x789   : > { %v23567_v55 = vmul.f32 -1.442695, %v25992_v13  ;;  %v25836_v46 = vpop.f32.mrb[96].mxu1 }
 0x78a   : > { %v21891_v22 = vpop.f32.mrb[97].mxu1  ;;  %v25993_v36 = vadd.f32 %v25836_v46, %v32719_v16 }
 0x78b   : > { %27132 = vpow2.f32 %v23567_v55  ;;  %v25994_v52 = vadd.f32 %v32719_v16, %v21891_v22 }
 0x78c   : > { %27134 = vpow2.f32 %v23568_v5  ;;  %v23570_v17 = vmul.f32 -1.442695, %v25993_v36 }
 0x78d   : > { %v23569_v19 = vmul.f32 -1.442695, %v25994_v52  ;;  %v25839_v8 = vpop.f32.mrb[98].mxu1 }
 0x78e   : > { %v21901_v31 = vpop.f32.mrb[99].mxu1  ;;  %v25995_v9 = vadd.f32 %v25839_v8, %v32719_v16 }
 0x78f   : > { %27136 = vpow2.f32 %v23569_v19  ;;  %v25996_v0 = vadd.f32 %v32719_v16, %v21901_v31 }
 0x790   : > { %27138 = vpow2.f32 %v23570_v17  ;;  %v23572_v34 = vmul.f32 -1.442695, %v25995_v9 }
 0x791   : > { %v25842_v43 = vpop.f32.mrb[100].mxu1  ;;  %v23571_v14 = vmul.f32 -1.442695, %v25996_v0 }
 0x792   : > { %v21911_v41 = vpop.f32.mrb[101].mxu1  ;;  %v25997_v7 = vadd.f32 %v25842_v43, %v32719_v16 }
 0x793   : > { %27140 = vpow2.f32 %v23571_v14  ;;  %v25998_v21 = vadd.f32 %v32719_v16, %v21911_v41 }
 0x794   : > { %v23574_v60 = vmul.f32 -1.442695, %v25997_v7 }
 0x795   : > { %v27133_v2 = vpop.eup %27132  ;;  %v25845_v26 = vpop.f32.mrb[102].mxu1  ;;  %v23573_v59 = vmul.f32 -1.442695, %v25998_v21 }
 0x796   : > { %v27135_v24 = vpop.eup %27134  ;;  %v21921_v28 = vpop.f32.mrb[103].mxu1  ;;  %v22168_v58 = vadd.f32 1.0, %v27133_v2  ;;  %v25999_v1 = vadd.f32 %v25845_v26, %v32719_v16 }
 0x797   : > { %v22169_v25 = vadd.f32 1.0, %v27135_v24  ;;  %v26000_v45 = vadd.f32 %v32719_v16, %v21921_v28 }
 0x798   : > { %27142 = vrcp.f32 %v22168_v58  ;;  %v23576_v11 = vmul.f32 -1.442695, %v25999_v1 }
 0x799   : > { %v25848_v3 = vpop.f32.mrb[104].mxu1  ;;  %v27137_v18 = vpop.eup %27136  ;;  %27144 = vpow2.f32 %v23572_v34  ;;  %v23575_v42 = vmul.f32 -1.442695, %v26000_v45 }
 0x79a   : > { %v21931_v20 = vpop.f32.mrb[105].mxu1  ;;  %27146 = vrcp.f32 %v22169_v25  ;;  %v22170_v32 = vadd.f32 1.0, %v27137_v18  ;;  %v27139_v15 = vpop.eup %27138  ;;  %v26001_v38 = vadd.f32 %v25848_v3, %v32719_v16 }
 0x79b   : > { %27148 = vpow2.f32 %v23573_v59  ;;  %v22171_v62 = vadd.f32 1.0, %v27139_v15  ;;  %v26002_v29 = vadd.f32 %v32719_v16, %v21931_v20 }
 0x79c   : > { %27150 = vrcp.f32 %v22170_v32  ;;  %v23578_v52 = vmul.f32 -1.442695, %v26001_v38 }
 0x79d   : > { %v25851_v12 = vpop.f32.mrb[106].mxu1  ;;  %v27141_v30 = vpop.eup %27140  ;;  %27152 = vpow2.f32 %v23574_v60  ;;  %v23577_v35 = vmul.f32 -1.442695, %v26002_v29 }
 0x79e   : > { %v21941_v44 = vpop.f32.mrb[107].mxu1  ;;  %27154 = vrcp.f32 %v22171_v62  ;;  %v22172_v51 = vadd.f32 1.0, %v27141_v30  ;;  %v26003_v17 = vadd.f32 %v25851_v12, %v32719_v16 }
 0x79f   : > { %27156 = vpow2.f32 %v23575_v42  ;;  %v26004_v36 = vadd.f32 %v32719_v16, %v21941_v44 }
 0x7a0   : > { %27158 = vrcp.f32 %v22172_v51  ;;  %v23580_v58 = vmul.f32 -1.442695, %v26003_v17 }
 0x7a1   : > { %v32730_v23 = vpop.f32.mrb[108].mxu1  ;;  %27160 = vpow2.f32 %v23576_v11  ;;  %v23579_v14 = vmul.f32 -1.442695, %v26004_v36 }
 0x7a2   : > { %v32732_v40 = vpop.f32.mrb[109].mxu1  ;;  %v27143_v49 = vpop.eup %27142  ;;  %v26005_v60 = vadd.f32 %v32730_v23, %v32719_v16 }
 0x7a3   : > { %22264 = vxpose.xlu0.b32.start [1/16] (narrow) %v27143_v49, 8  ;;  %v27145_v48 = vpop.eup %27144  ;;  %v26006_v34 = vadd.f32 %v32719_v16, %v32732_v40 }
 0x7a4   : > { %v27147_v47 = vpop.eup %27146  ;;  %v22173_v56 = vadd.f32 1.0, %v27145_v48 }
 0x7a5   : > { %v25857_v4 = vpop.f32.mrb[110].mxu1  ;;  %v27149_v10 = vpop.eup %27148  ;;  %v23581_v45 = vmul.f32 -1.442695, %v26006_v34 }
 0x7a6   : > { %v21961_v27 = vpop.f32.mrb[111].mxu1  ;;  %v26007_v61 = vadd.f32 %v25857_v4, %v32719_v16  ;;  %v27151_v6 = vpop.eup %27150  ;;  %27162 = vrcp.f32 %v22173_v56  ;;  %v22174_v57 = vadd.f32 1.0, %v27149_v10 }
 0x7a7   : > { %v26008_v53 = vadd.f32 %v32719_v16, %v21961_v27  ;;  %22265 = vxpose.xlu0.b32.cont [2/16] (narrow) %v27147_v47, 8  ;;  %v27153_v13 = vpop.eup %27152  ;;  %v23582_v47 = vmul.f32 -1.442695, %v26005_v60 }
 0x7a8   : > { %v23584_v39 = vmul.f32 -1.442695, %v26007_v61  ;;  %v27155_v55 = vpop.eup %27154  ;;  %v22175_v19 = vadd.f32 1.0, %v27153_v13 }
 0x7a9   : > { %v23583_v33 = vmul.f32 -1.442695, %v26008_v53  ;;  %v25860_v63 = vpop.f32.mrb[112].mxu1  ;;  %v27157_v31 = vpop.eup %27156 }
 0x7aa   : > { %v21971_v54 = vpop.f32.mrb[113].mxu1  ;;  %v26009_v46 = vadd.f32 %v25860_v63, %v32719_v16  ;;  %v27159_v43 = vpop.eup %27158  ;;  %v22176_v26 = vadd.f32 1.0, %v27157_v31 }
 0x7ab   : > { %v26010_v37 = vadd.f32 %v32719_v16, %v21971_v54  ;;  %22266 = vxpose.xlu0.b32.cont [3/16] (narrow) %v27151_v6, 8  ;;  %27164 = vpow2.f32 %v23583_v33  ;;  %v27161_v2 = vpop.eup %27160 }
 0x7ac   : > { %27166 = vpow2.f32 %v23584_v39  ;;  %v23586_v41 = vmul.f32 -1.442695, %v26009_v46  ;;  %v22177_v12 = vadd.f32 1.0, %v27161_v2 }
 0x7ad   : > { %v25863_v50 = vpop.f32.mrb[114].mxu1  ;;  %v23585_v22 = vmul.f32 -1.442695, %v26010_v37  ;;  %27168 = vpow2.f32 %v23577_v35 }
 0x7ae   : > { %v21981_v5 = vpop.f32.mrb[115].mxu1  ;;  %27170 = vrcp.f32 %v22174_v57  ;;  %v26011_v18 = vadd.f32 %v25863_v50, %v32719_v16 }
 0x7af   : > { %22267 = vxpose.xlu0.b32.cont [4/16] (narrow) %v27155_v55, 8  ;;  %27172 = vpow2.f32 %v23585_v22  ;;  %v26012_v9 = vadd.f32 %v32719_v16, %v21981_v5 }
 0x7b0   : > { %27174 = vpow2.f32 %v23578_v52  ;;  %v27163_v28 = vpop.eup %27162  ;;  %v23588_v49 = vmul.f32 -1.442695, %v26011_v18 }
 0x7b1   : > { %v25866_v8 = vpop.f32.mrb[116].mxu1  ;;  %27176 = vrcp.f32 %v22175_v19  ;;  %v23587_v20 = vmul.f32 -1.442695, %v26012_v9 }
 0x7b2   : > { %v21991_v0 = vpop.f32.mrb[117].mxu1  ;;  %27178 = vpow2.f32 %v23586_v41  ;;  %v26013_v56 = vadd.f32 %v25866_v8, %v32719_v16 }
 0x7b3   : > { %22268 = vxpose.xlu0.b32.cont [5/16] (narrow) %v27159_v43, 8  ;;  %27180 = vpow2.f32 %v23579_v14  ;;  %v26014_v1 = vadd.f32 %v32719_v16, %v21991_v0 }
 0x7b4   : > { %27182 = vrcp.f32 %v22176_v26  ;;  %v23590_v57 = vmul.f32 -1.442695, %v26013_v56 }
 0x7b5   : > { %v25869_v24 = vpop.f32.mrb[118].mxu1  ;;  %v27165_v3 = vpop.eup %27164  ;;  %27184 = vpow2.f32 %v23580_v58  ;;  %v23589_v29 = vmul.f32 -1.442695, %v26014_v1 }
 0x7b6   : > { %v32747_v21 = vadd.f32 %v25869_v24, %v32719_v16  ;;  %v22001_v25 = vpop.f32.mrb[119].mxu1  ;;  %v22184_v59 = vadd.f32 1.0, %v27165_v3  ;;  %v27167_v32 = vpop.eup %27166  ;;  %27186 = vpow2.f32 %v23587_v20 }
 0x7b7   : > { %v26016_v7 = vadd.f32 %v32719_v16, %v22001_v25  ;;  %22269 = vxpose.xlu0.b32.cont [6/16] (narrow) %v27163_v28, 8  ;;  %v27169_v44 = vpop.eup %27168  ;;  %v22185_v48 = vadd.f32 1.0, %v27167_v32 }
 0x7b8   : > { %v27171_v40 = vpop.eup %27170  ;;  %27188 = vrcp.f32 %v22184_v59  ;;  %v22178_v4 = vadd.f32 1.0, %v27169_v44  ;;  %v23592_v43 = vmul.f32 -1.442695, %v32747_v21 }
 0x7b9   : > { %v25872_v15 = vpop.f32.mrb[120].mxu1  ;;  %v27173_v51 = vpop.eup %27172  ;;  %27190 = vrcp.f32 %v22177_v12  ;;  %v23591_v36 = vmul.f32 -1.442695, %v26016_v7 }
 0x7ba   : > { %v32754_v62 = vadd.f32 %v25872_v15, %v32719_v16  ;;  %v22011_v30 = vpop.f32.mrb[121].mxu1  ;;  %v27175_v27 = vpop.eup %27174  ;;  %27192 = vpow2.f32 %v23581_v45  ;;  %v22186_v63 = vadd.f32 1.0, %v27173_v51 }
 0x7bb   : > { %v32758_v42 = vadd.f32 %v32719_v16, %v22011_v30  ;;  %22270 = vxpose.xlu0.b32.cont [7/16] (narrow) %v27171_v40, 8  ;;  %v27177_v53 = vpop.eup %27176  ;;  %27194 = vpow2.f32 %v23588_v49  ;;  %v22179_v54 = vadd.f32 1.0, %v27175_v27 }
 0x7bc   : > { %27196 = vrcp.f32 %v22185_v48  ;;  %v27179_v10 = vpop.eup %27178  ;;  %v23594_v18 = vmul.f32 -1.442695, %v32754_v62 }
 0x7bd   : > { %v25875_v23 = vpop.f32.mrb[122].mxu1  ;;  %27198 = vrcp.f32 %v22178_v4  ;;  %v27181_v39 = vpop.eup %27180  ;;  %v22187_v5 = vadd.f32 1.0, %v27179_v10  ;;  %v23593_v28 = vmul.f32 -1.442695, %v32758_v42 }
 0x7be   : > { %v32761_v11 = vadd.f32 %v25875_v23, %v32719_v16  ;;  %v22021_v61 = vpop.f32.mrb[123].mxu1  ;;  %27200 = vpow2.f32 %v23582_v47  ;;  %v27183_v35 = vpop.eup %27182  ;;  %v22180_v46 = vadd.f32 1.0, %v27181_v39 }
 0x7bf   : > { %v32765_v33 = vadd.f32 %v32719_v16, %v22021_v61  ;;  %22271 = vxpose.xlu0.b32.cont [8/16] (narrow) %v27177_v53, 8  ;;  %27202 = vpow2.f32 %v23589_v29  ;;  %v27185_v13 = vpop.eup %27184 }
 0x7c0   : > { %27204 = vrcp.f32 %v22186_v63  ;;  %v27187_v55 = vpop.eup %27186  ;;  %v22181_v17 = vadd.f32 1.0, %v27185_v13  ;;  %v23596_v62 = vmul.f32 -1.442695, %v32761_v11 }
 0x7c1   : > { %v25878_v6 = vpop.f32.mrb[124].mxu1  ;;  %27206 = vrcp.f32 %v22179_v54  ;;  %v22188_v8 = vadd.f32 1.0, %v27187_v55  ;;  %v23595_v12 = vmul.f32 -1.442695, %v32765_v33 }
 0x7c2   : > { %v32768_v37 = vadd.f32 %v25878_v6, %v32719_v16  ;;  %v22031_v38 = vpop.f32.mrb[125].mxu1  ;;  %v27189_v22 = vpop.eup %27188  ;;  %27208 = vpow2.f32 %v23590_v57 }
 0x7c3   : > { %v32771_v50 = vadd.f32 %v32719_v16, %v22031_v38  ;;  %22272 = vxpose.xlu0.b32.cont [9/16] (narrow) %v27183_v35, 8  ;;  %v27191_v52 = vpop.eup %27190  ;;  %22296 = vxpose.xlu1.b32.start [1/16] (narrow) %v27189_v22, 8  ;;  %27210 = vrcp.f32 %v22187_v5 }
 0x7c4   : > { %v27193_v19 = vpop.eup %27192  ;;  %27212 = vrcp.f32 %v22180_v46  ;;  %v23598_v23 = vmul.f32 -1.442695, %v32768_v37 }
 0x7c5   : > { %v27195_v31 = vpop.eup %27194  ;;  %27214 = vpow2.f32 %v23591_v36  ;;  %v22182_v2 = vadd.f32 1.0, %v27193_v19  ;;  %v23597_v42 = vmul.f32 -1.442695, %v32771_v50 }
 0x7c6   : > { %v27197_v16 = vpop.eup %27196  ;;  %v22189_v9 = vadd.f32 1.0, %v27195_v31  ;;  %27216 = vrcp.f32 %v22188_v8 }
 0x7c7   : > { %22273 = vxpose.xlu0.b32.cont [10/16] (narrow) %v27191_v52, 8  ;;  %v27199_v0 = vpop.eup %27198  ;;  %22297 = vxpose.xlu1.b32.cont [2/16] (narrow) %v27197_v16, 8  ;;  %27218 = vrcp.f32 %v22181_v17 }
 0x7c8   : > { %v27201_v41 = vpop.eup %27200  ;;  %27220 = vpow2.f32 %v23592_v43 }
 0x7c9   : > { %v27203_v14 = vpop.eup %27202  ;;  %27222 = vrcp.f32 %v22189_v9  ;;  %v22183_v21 = vadd.f32 1.0, %v27201_v41 }
 0x7ca   : > { %v27205_v26 = vpop.eup %27204  ;;  %v22190_v58 = vadd.f32 1.0, %v27203_v14  ;;  %27224 = vrcp.f32 %v22182_v2 }
 0x7cb   : > { %22274 = vxpose.xlu0.b32.cont [11/16] (narrow) %v27199_v0, 8  ;;  %v27207_v24 = vpop.eup %27206  ;;  %22298 = vxpose.xlu1.b32.cont [3/16] (narrow) %v27205_v26, 8  ;;  %27226 = vpow2.f32 %v23593_v28 }
 0x7cc   : > { %v27209_v34 = vpop.eup %27208  ;;  %27228 = vrcp.f32 %v22190_v58 }
 0x7cd   : > { %v27211_v25 = vpop.eup %27210  ;;  %v22191_v20 = vadd.f32 1.0, %v27209_v34  ;;  %27230 = vrcp.f32 %v22183_v21 }
 0x7ce   : > { %v27213_v3 = vpop.eup %27212  ;;  %27232 = vpow2.f32 %v23594_v18 }
 0x7cf   : > { %22275 = vxpose.xlu0.b32.cont [12/16] (narrow) %v27207_v24, 8  ;;  %22299 = vxpose.xlu1.b32.cont [4/16] (narrow) %v27211_v25, 8  ;;  %v27215_v7 = vpop.eup %27214  ;;  %27234 = vrcp.f32 %v22191_v20 }
 0x7d0   : > { %v27217_v59 = vpop.eup %27216  ;;  %v22192_v15 = vadd.f32 1.0, %v27215_v7  ;;  %27236 = vpow2.f32 %v23595_v12 }
 0x7d1   : > { %v27219_v32 = vpop.eup %27218 }
 0x7d2   : > { %v27221_v44 = vpop.eup %27220  ;;  %27238 = vrcp.f32 %v22192_v15 }
 0x7d3   : > { %22276 = vxpose.xlu0.b32.cont [13/16] (narrow) %v27213_v3, 8  ;;  %22300 = vxpose.xlu1.b32.cont [5/16] (narrow) %v27217_v59, 8  ;;  %v27223_v60 = vpop.eup %27222  ;;  %v22193_v30 = vadd.f32 1.0, %v27221_v44  ;;  %27240 = vpow2.f32 %v23596_v62 }
 0x7d4   : > { %v27225_v45 = vpop.eup %27224 }
 0x7d5   : > { %v27227_v40 = vpop.eup %27226  ;;  %27242 = vrcp.f32 %v22193_v30 }
 0x7d6   : > { %v27229_v49 = vpop.eup %27228  ;;  %v22194_v48 = vadd.f32 1.0, %v27227_v40  ;;  %27244 = vpow2.f32 %v23597_v42 }
 0x7d7   : > { %22277 = vxpose.xlu0.b32.cont [14/16] (narrow) %v27219_v32, 8  ;;  %22301 = vxpose.xlu1.b32.cont [6/16] (narrow) %v27223_v60, 8  ;;  %v27231_v1 = vpop.eup %27230 }
 0x7d8   : > { %v27233_v51 = vpop.eup %27232  ;;  %27246 = vrcp.f32 %v22194_v48 }
 0x7d9   : > { %v27235_v4 = vpop.eup %27234  ;;  %v22195_v27 = vadd.f32 1.0, %v27233_v51  ;;  %27248 = vpow2.f32 %v23598_v23 }
 0x7da   : > { %v27237_v47 = vpop.eup %27236 }
 0x7db   : > { %22278 = vxpose.xlu0.b32.cont [15/16] (narrow) %v27225_v45, 8  ;;  %22302 = vxpose.xlu1.b32.cont [7/16] (narrow) %v27229_v49, 8  ;;  %27250 = vrcp.f32 %v22195_v27  ;;  %v22196_v61 = vadd.f32 1.0, %v27237_v47 }
 0x7dc   : > { %v27239_v11 = vpop.eup %27238 }
 0x7dd   : > { %v27241_v53 = vpop.eup %27240  ;;  %27252 = vrcp.f32 %v22196_v61 }
 0x7de   : > { %v22197_v29 = vadd.f32 1.0, %v27241_v53 }
 0x7df   : > { %22279 = vxpose.xlu0.b32.end [16/16] (narrow) %v27231_v1, 8  ;;  %22303 = vxpose.xlu1.b32.cont [8/16] (narrow) %v27235_v4, 8  ;;  %v27243_v56 = vpop.eup %27242 }
 0x7e0   : > { %v27245_v33 = vpop.eup %27244  ;;  %27254 = vrcp.f32 %v22197_v29 }
 0x7e1   : > { %v22198_v10 = vadd.f32 1.0, %v27245_v33 }
 0x7e2   : > { %v27247_v63 = vpop.eup %27246 }
 0x7e3   : > { %22304 = vxpose.xlu1.b32.cont [9/16] (narrow) %v27239_v11, 8  ;;  %v27249_v54 = vpop.eup %27248  ;;  %27256 = vrcp.f32 %v22198_v10 }
 0x7e4   : > { %v22199_v39 = vadd.f32 1.0, %v27249_v54 }
 0x7e5   : > { %v27251_v6 = vpop.eup %27250 }
 0x7e6   : > { %27258 = vrcp.f32 %v22199_v39 }
 0x7e7   : > { %22305 = vxpose.xlu1.b32.cont [10/16] (narrow) %v27243_v56, 8  ;;  %v27253_v37 = vpop.eup %27252 }
 0x7ea   : > { %v27255_v38 = vpop.eup %27254 }
 0x7eb   : > { %22306 = vxpose.xlu1.b32.cont [11/16] (narrow) %v27247_v63, 8 }
 0x7ed   : > { %v27257_v35 = vpop.eup %27256 }
 0x7ef   : > { %22307 = vxpose.xlu1.b32.cont [12/16] (narrow) %v27251_v6, 8 }
 0x7f0   : > { %v27259_v57 = vpop.eup %27258 }
 0x7f3   : > { %22308 = vxpose.xlu1.b32.cont [13/16] (narrow) %v27253_v37, 8 }
 0x7f7   : > { %22309 = vxpose.xlu1.b32.cont [14/16] (narrow) %v27255_v38, 8 }
 0x7fb   : > { %22310 = vxpose.xlu1.b32.cont [15/16] (narrow) %v27257_v35, 8 }
 0x7ff   : > { %22311 = vxpose.xlu1.b32.end [16/16] (narrow) %v27259_v57, 8 }
 0x823   : > { %v22280_v50 = vpop.trf.xlu0 }
 0x824   : > { %22328 = vst [vmem:[%s224_s21] sm:$0xff] %v22280_v50 }
 0x843   : > { %v22312_v13 = vpop.trf.xlu1 }
 0x844   : > { %22329 = vst [vmem:[%s224_s21 + $0x8] sm:$0xff] %v22312_v13 }
 0x845 PF: > { %s15_s18 = sadd.s32 1, %s27268_s18  }
 0x846   : > { %p12_p4 = scmp.ge.s32.totalorder %s15_s18, 4  }
 0x848   :  { %14 = sbr.rel (!%p12_p4) target bundleno = 1 (0x1), region = 88 }

</bundles_post_ra>
